<compile_context>
chip_gen: v6e
topology: v6e:2x2x1
jax: 0.10.0
libtpu: 0.0.40
codegen_flags: <defaults>
</compile_context>

<pallas_src>
import jax
import jax.numpy as jnp
from jax import lax
from jax.experimental import pallas as pl
from jax.experimental.pallas import tpu as pltpu

LANE = 128


def _vmem_limit_bytes():
    try:
        info = pltpu.get_tpu_info()
        cap = int(getattr(info, "vmem_capacity_bytes", 128 * 1024 * 1024))
    except Exception:
        cap = 128 * 1024 * 1024
    return min(96 * 1024 * 1024, (cap * 3) // 4)


_VMEM_LIMIT = _vmem_limit_bytes()


def _pick_block(dim, candidates, align):
    for c in candidates:
        if c <= dim and dim % c == 0 and c % align == 0:
            return c
    return dim


def _ceil_to(x, m):
    return ((x + m - 1) // m) * m


# --------------------------------------------------------------------------------------
# GCN aggregation:  relu(A @ Y + b), K-tiled over A_hat columns (Y = X @ W done beforehand)
# --------------------------------------------------------------------------------------
def _gcn_ay_kernel(a_ref, y_ref, b_ref, o_ref, acc_ref):
    k = pl.program_id(1)

    @pl.when(k == 0)
    def _():
        acc_ref[...] = jnp.zeros_like(acc_ref)

    acc_ref[...] += jnp.dot(a_ref[...], y_ref[...],
                            preferred_element_type=jnp.float32)

    @pl.when(k == pl.num_programs(1) - 1)
    def _():
        o_ref[...] = jnp.maximum(acc_ref[...] + b_ref[...], 0.0)


def gcn_ay(a_bf, y_bf, b):
    n = a_bf.shape[0]
    d_out = y_bf.shape[1]
    bm = _pick_block(n, (512, 256, 128, 64, 32, 16, 8), 8)
    bk = _pick_block(n, (1024, 512, 256, 128), 128)
    return pl.pallas_call(
        _gcn_ay_kernel,
        out_shape=jax.ShapeDtypeStruct((n, d_out), jnp.float32),
        grid_spec=pltpu.PrefetchScalarGridSpec(
            num_scalar_prefetch=0,
            grid=(n // bm, n // bk),
            in_specs=[
                pl.BlockSpec((bm, bk), lambda i, k: (i, k)),
                pl.BlockSpec((bk, d_out), lambda i, k: (k, 0)),
                pl.BlockSpec((1, d_out), lambda i, k: (0, 0)),
            ],
            out_specs=pl.BlockSpec((bm, d_out), lambda i, k: (i, 0)),
            scratch_shapes=[pltpu.VMEM((bm, d_out), jnp.float32)],
        ),
        compiler_params=pltpu.CompilerParams(
            dimension_semantics=("parallel", "arbitrary"),
            vmem_limit_bytes=_VMEM_LIMIT),
    )(a_bf, y_bf, b.reshape(1, -1))


# --------------------------------------------------------------------------------------
# Row-tiled linear kernels (bf16 operands, f32 accumulation).
# `linear`  : X @ W + b
# `linear2` : Xa @ Wa + Xb @ Wb + b   (used to consume [h_fwd | h_bwd] without concatenating)
# --------------------------------------------------------------------------------------
def _linear_kernel(x_ref, w_ref, b_ref, o_ref):
    o_ref[...] = (jnp.dot(x_ref[...], w_ref[...],
                          preferred_element_type=jnp.float32) + b_ref[...])


def linear(x, w, b):
    m, k = x.shape
    n = w.shape[1]
    bm = _pick_block(m, (512, 256, 128, 64, 32, 16, 8), 8)
    return pl.pallas_call(
        _linear_kernel,
        out_shape=jax.ShapeDtypeStruct((m, n), jnp.float32),
        grid_spec=pltpu.PrefetchScalarGridSpec(
            num_scalar_prefetch=0,
            grid=(m // bm,),
            in_specs=[
                pl.BlockSpec((bm, k), lambda i: (i, 0)),
                pl.BlockSpec((k, n), lambda i: (0, 0)),
                pl.BlockSpec((1, n), lambda i: (0, 0)),
            ],
            out_specs=pl.BlockSpec((bm, n), lambda i: (i, 0)),
        ),
        compiler_params=pltpu.CompilerParams(
            dimension_semantics=("parallel",),
            vmem_limit_bytes=_VMEM_LIMIT),
    )(x, w, b.reshape(1, -1))


def _linear2_kernel(xa_ref, xb_ref, wa_ref, wb_ref, b_ref, o_ref):
    o_ref[...] = (jnp.dot(xa_ref[...], wa_ref[...], preferred_element_type=jnp.float32)
                  + jnp.dot(xb_ref[...], wb_ref[...], preferred_element_type=jnp.float32)
                  + b_ref[...])


def linear2(xa, xb, wa, wb, b):
    m, ka = xa.shape
    kb = xb.shape[1]
    n = wa.shape[1]
    bm = _pick_block(m, (512, 256, 128, 64, 32, 16, 8), 8)
    return pl.pallas_call(
        _linear2_kernel,
        out_shape=jax.ShapeDtypeStruct((m, n), jnp.float32),
        grid_spec=pltpu.PrefetchScalarGridSpec(
            num_scalar_prefetch=0,
            grid=(m // bm,),
            in_specs=[
                pl.BlockSpec((bm, ka), lambda i: (i, 0)),
                pl.BlockSpec((bm, kb), lambda i: (i, 0)),
                pl.BlockSpec((ka, n), lambda i: (0, 0)),
                pl.BlockSpec((kb, n), lambda i: (0, 0)),
                pl.BlockSpec((1, n), lambda i: (0, 0)),
            ],
            out_specs=pl.BlockSpec((bm, n), lambda i: (i, 0)),
        ),
        compiler_params=pltpu.CompilerParams(
            dimension_semantics=("parallel",),
            vmem_limit_bytes=_VMEM_LIMIT),
    )(xa, xb, wa, wb, b.reshape(1, -1))


# --------------------------------------------------------------------------------------
# Fused, chunked bidirectional LSTM recurrence.
# Input projections (x @ W_ih + b_ih + b_hh for both directions) are hoisted into one
# (din -> 8H) matmul beforehand; gx lanes [0:4H] = fwd gates, [4H:8H] = bwd gates.
# The per-step hidden matmul is a single block-diagonal (B,2H)@(2H,8H) MXU issue.
# Backward direction is handled with reversed time-block index_maps (no jnp.flip).
# TODO(synk): on v7x the two directions could be sharded across the 2 TensorCores via a
#             leading "parallel" direction axis; kept fused single-core here.
# --------------------------------------------------------------------------------------
def _bilstm_kernel(gxf_ref, gxb_ref, whh_ref, hf_out_ref, hb_out_ref, h_s, c_s):
    tb = pl.program_id(0)

    @pl.when(tb == 0)
    def _():
        h_s[...] = jnp.zeros_like(h_s)
        c_s[...] = jnp.zeros_like(c_s)

    Ts = gxf_ref.shape[0]
    H = hf_out_ref.shape[-1]
    G = 4 * H

    def step(s, carry):
        h_prev = h_s[...]                         # (B, 2H) f32
        c_prev = c_s[...]
        gates_h = jnp.dot(h_prev.astype(whh_ref.dtype), whh_ref[...],
                          preferred_element_type=jnp.float32)      # (B, 8H)
        gates_f = gxf_ref[s] + gates_h[:, :G]
        gates_b = gxb_ref[Ts - 1 - s] + gates_h[:, G:]

        def cell(gates, c_prev_d):
            i = jax.nn.sigmoid(gates[:, 0 * H:1 * H])
            f = jax.nn.sigmoid(gates[:, 1 * H:2 * H])
            g = jnp.tanh(gates[:, 2 * H:3 * H])
            o = jax.nn.sigmoid(gates[:, 3 * H:4 * H])
            c = f * c_prev_d + i * g
            h = o * jnp.tanh(c)
            return h, c

        hf_new, cf_new = cell(gates_f, c_prev[:, :H])
        hb_new, cb_new = cell(gates_b, c_prev[:, H:])
        h_s[...] = jnp.concatenate([hf_new, hb_new], axis=-1)
        c_s[...] = jnp.concatenate([cf_new, cb_new], axis=-1)
        hf_out_ref[s] = hf_new
        hb_out_ref[Ts - 1 - s] = hb_new
        return carry

    lax.fori_loop(0, Ts, step, 0, unroll=True)


def bilstm(gx, whh_bd):
    S, B, G2 = gx.shape               # G2 = 8H
    H = whh_bd.shape[0] // 2
    G = 4 * H
    Ts = _pick_block(S, (32, 16, 8, 4, 2, 1), 1)
    nb = S // Ts
    return pl.pallas_call(
        _bilstm_kernel,
        out_shape=(jax.ShapeDtypeStruct((S, B, H), jnp.float32),
                   jax.ShapeDtypeStruct((S, B, H), jnp.float32)),
        grid_spec=pltpu.PrefetchScalarGridSpec(
            num_scalar_prefetch=0,
            grid=(nb,),
            in_specs=[
                pl.BlockSpec((Ts, B, G), lambda t: (t, 0, 0)),            # fwd gate half
                pl.BlockSpec((Ts, B, G), lambda t: (nb - 1 - t, 0, 1)),   # bwd gate half, reversed
                pl.BlockSpec((2 * H, G2), lambda t: (0, 0)),
            ],
            out_specs=(
                pl.BlockSpec((Ts, B, H), lambda t: (t, 0, 0)),
                pl.BlockSpec((Ts, B, H), lambda t: (nb - 1 - t, 0, 0)),   # write back in order
            ),
            scratch_shapes=[pltpu.VMEM((B, 2 * H), jnp.float32),
                            pltpu.VMEM((B, 2 * H), jnp.float32)],
        ),
        compiler_params=pltpu.CompilerParams(
            dimension_semantics=("arbitrary",),
            vmem_limit_bytes=_VMEM_LIMIT),
    )(gx, gx, whh_bd)


# --------------------------------------------------------------------------------------
# Decoder + masked MSE loss + imputation, row-tiled with SMEM scalar accumulators.
# Takes the fwd/bwd LSTM halves separately (no concatenate); output is lane-padded.
# --------------------------------------------------------------------------------------
def _decoder_kernel(hf_ref, hb_ref, wt_ref, wb_ref, b_ref, ori_ref, m_ref,
                    final_ref, loss_ref, acc_smem):
    i = pl.program_id(0)

    @pl.when(i == 0)
    def _():
        acc_smem[0] = jnp.float32(0.0)
        acc_smem[1] = jnp.float32(0.0)

    imputed = (jnp.dot(hf_ref[...], wt_ref[...], preferred_element_type=jnp.float32)
               + jnp.dot(hb_ref[...], wb_ref[...], preferred_element_type=jnp.float32)
               + b_ref[...])
    ori = ori_ref[...]
    m = m_ref[...]
    diff = imputed - ori
    acc_smem[0] += jnp.sum(m * diff * diff)
    acc_smem[1] += jnp.sum(m)
    final_ref[...] = jnp.where(m != 0.0, ori, imputed)

    @pl.when(i == pl.num_programs(0) - 1)
    def _():
        loss_ref[...] = (acc_smem[0] / (acc_smem[1] + 1e-8)).reshape(1, 1)


def decoder_impute(hf, hb, w_top, w_bot, b, ori, mask):
    m_rows, f_p = ori.shape
    h_dim = hf.shape[1]
    bm = _pick_block(m_rows, (512, 256, 128, 64, 32, 16, 8), 8)
    return pl.pallas_call(
        _decoder_kernel,
        out_shape=(jax.ShapeDtypeStruct((m_rows, f_p), jnp.float32),
                   jax.ShapeDtypeStruct((1, 1), jnp.float32)),
        grid_spec=pltpu.PrefetchScalarGridSpec(
            num_scalar_prefetch=0,
            grid=(m_rows // bm,),
            in_specs=[
                pl.BlockSpec((bm, h_dim), lambda i: (i, 0)),
                pl.BlockSpec((bm, h_dim), lambda i: (i, 0)),
                pl.BlockSpec((h_dim, f_p), lambda i: (0, 0)),
                pl.BlockSpec((h_dim, f_p), lambda i: (0, 0)),
                pl.BlockSpec((1, f_p), lambda i: (0, 0)),
                pl.BlockSpec((bm, f_p), lambda i: (i, 0)),
                pl.BlockSpec((bm, f_p), lambda i: (i, 0)),
            ],
            out_specs=(
                pl.BlockSpec((bm, f_p), lambda i: (i, 0)),
                pl.BlockSpec((1, 1), lambda i: (0, 0)),
            ),
            scratch_shapes=[pltpu.SMEM((2,), jnp.float32)],
        ),
        compiler_params=pltpu.CompilerParams(
            dimension_semantics=("arbitrary",),
            vmem_limit_bytes=_VMEM_LIMIT),
    )(hf, hb, w_top, w_bot, b.reshape(1, -1), ori, mask)


# --------------------------------------------------------------------------------------
# plain-JAX glue
# --------------------------------------------------------------------------------------
# TODO(synk): A_hat construction from edge_index is a data-dependent scatter; kept in plain
# JAX glue (normalization in f32, the bf16 cast fuses into the same XLA pass).  For very
# large graphs, gather A row/column blocks via scalar-prefetched indices instead.
def gcn_norm_dense(edge_index, num_nodes):
    src, dst = edge_index[0], edge_index[1]
    a = jnp.zeros((num_nodes, num_nodes), jnp.float32)
    a = a.at[dst, src].add(1.0)                     # A_ij = 1 if edge j -> i
    a = a + jnp.eye(num_nodes, dtype=jnp.float32)   # add_self_loops=True
    deg = jnp.sum(a, axis=1)
    dinv = jax.lax.rsqrt(deg)
    return dinv[:, None] * a * dinv[None, :]


def init_params(key, in_dim, hidden_dim, out_dim, lstm_hidden, num_layers):
    """Logical (unpadded) parameters mirroring the PyTorch module layout."""
    keys = iter(jax.random.split(key, 256))

    def nrm(shape, scale=0.1):
        return scale * jax.random.normal(next(keys), shape, jnp.float32)

    params = {
        "gcn1_w": nrm((in_dim, hidden_dim)), "gcn1_b": nrm((hidden_dim,)),
        "gcn2_w": nrm((hidden_dim, out_dim)), "gcn2_b": nrm((out_dim,)),
        "dec_w": nrm((in_dim, 2 * lstm_hidden)),   # torch Linear weight (out, in)
        "dec_b": nrm((in_dim,)),
    }
    lstm = []
    din = out_dim
    for _ in range(num_layers):
        layer = {}
        for d in ("fwd", "bwd"):
            layer[d] = dict(
                w_ih=nrm((4 * lstm_hidden, din)),          # gate order i, f, g, o
                w_hh=nrm((4 * lstm_hidden, lstm_hidden)),
                b_ih=nrm((4 * lstm_hidden,)),
                b_hh=nrm((4 * lstm_hidden,)),
            )
        lstm.append(layer)
        din = 2 * lstm_hidden
    params["lstm"] = lstm
    return params


def pack_params(p, in_dim, hidden_dim, out_dim, H):
    """Lane-pad feature dims to 128, fuse fwd/bwd LSTM weights, cast weights to bf16."""
    hid_p = _ceil_to(hidden_dim, LANE)
    out_p = _ceil_to(out_dim, LANE)
    f_p = _ceil_to(in_dim, LANE)
    G = 4 * H

    packed = {}
    w1 = jnp.zeros((in_dim, hid_p), jnp.float32).at[:, :hidden_dim].set(p["gcn1_w"])
    packed["gcn1_w"] = w1.astype(jnp.bfloat16)
    packed["gcn1_b"] = jnp.zeros((hid_p,), jnp.float32).at[:hidden_dim].set(p["gcn1_b"])

    w2 = jnp.zeros((hid_p, out_p), jnp.float32).at[:hidden_dim, :out_dim].set(p["gcn2_w"])
    packed["gcn2_w"] = w2.astype(jnp.bfloat16)
    packed["gcn2_b"] = jnp.zeros((out_p,), jnp.float32).at[:out_dim].set(p["gcn2_b"])

    lstm_packed = []
    din = out_dim
    for li, layer in enumerate(p["lstm"]):
        fd, bd = layer["fwd"], layer["bwd"]
        b_fused = jnp.concatenate([fd["b_ih"] + fd["b_hh"], bd["b_ih"] + bd["b_hh"]])  # (8H,)
        whh_bd = jnp.zeros((2 * H, 2 * G), jnp.float32)
        whh_bd = whh_bd.at[:H, :G].set(fd["w_hh"].T).at[H:, G:].set(bd["w_hh"].T)
        entry = {"b": b_fused, "w_hh": whh_bd.astype(jnp.bfloat16)}
        if li == 0:
            w_ih = jnp.zeros((out_p, 2 * G), jnp.float32)
            w_ih = w_ih.at[:din, :G].set(fd["w_ih"].T).at[:din, G:].set(bd["w_ih"].T)
            entry["w_ih"] = w_ih.astype(jnp.bfloat16)
        else:
            # layer input is [h_fwd | h_bwd] of the previous layer (each H wide)
            w_top = jnp.concatenate([fd["w_ih"].T[:H], bd["w_ih"].T[:H]], axis=1)  # (H, 8H)
            w_bot = jnp.concatenate([fd["w_ih"].T[H:], bd["w_ih"].T[H:]], axis=1)
            entry["w_ih_top"] = w_top.astype(jnp.bfloat16)
            entry["w_ih_bot"] = w_bot.astype(jnp.bfloat16)
        lstm_packed.append(entry)
        din = 2 * H
    packed["lstm"] = lstm_packed

    wd = p["dec_w"].T   # (2H, in_dim)
    wd_top = jnp.zeros((H, f_p), jnp.float32).at[:, :in_dim].set(wd[:H])
    wd_bot = jnp.zeros((H, f_p), jnp.float32).at[:, :in_dim].set(wd[H:])
    packed["dec_w_top"] = wd_top.astype(jnp.bfloat16)
    packed["dec_w_bot"] = wd_bot.astype(jnp.bfloat16)
    packed["dec_b"] = jnp.zeros((f_p,), jnp.float32).at[:in_dim].set(p["dec_b"])
    return packed


def stgi_forward(params, x, edge_index, mask):
    T, N, F = x.shape
    n_total = T * N
    H = params["dec_w_top"].shape[0]
    f_p = params["dec_w_top"].shape[1]
    hid_p = params["gcn1_w"].shape[1]
    out_p = params["gcn2_w"].shape[1]

    a_bf = gcn_norm_dense(edge_index, n_total).astype(jnp.bfloat16)

    ori = x.reshape(n_total, F).astype(jnp.float32)
    mask_f = mask.reshape(n_total, F).astype(jnp.float32)
    ori_pad = jnp.pad(ori, ((0, 0), (0, f_p - F)))
    mask_pad = jnp.pad(mask_f, ((0, 0), (0, f_p - F)))

    # GCN layers, project-first: relu(A @ (X @ W) + b)
    zero_hid = jnp.zeros((hid_p,), jnp.float32)
    zero_out = jnp.zeros((out_p,), jnp.float32)
    y1 = linear(ori.astype(jnp.bfloat16), params["gcn1_w"], zero_hid)
    h1 = gcn_ay(a_bf, y1.astype(jnp.bfloat16), params["gcn1_b"])
    y2 = linear(h1.astype(jnp.bfloat16), params["gcn2_w"], zero_out)
    h2 = gcn_ay(a_bf, y2.astype(jnp.bfloat16), params["gcn2_b"])      # (n_total, out_p)

    # bidirectional multi-layer LSTM: batch = time steps, sequence = nodes (batch_first)
    h_seq = h2.reshape(T, N, out_p).transpose(1, 0, 2)                # (S=N, B=T, out_p)
    S, B = N, T
    hf = hb = None
    for li, layer in enumerate(params["lstm"]):
        if li == 0:
            gx = linear(h_seq.reshape(S * B, out_p).astype(jnp.bfloat16),
                        layer["w_ih"], layer["b"])
        else:
            gx = linear2(hf.reshape(S * B, H).astype(jnp.bfloat16),
                         hb.reshape(S * B, H).astype(jnp.bfloat16),
                         layer["w_ih_top"], layer["w_ih_bot"], layer["b"])
        gx = gx.reshape(S, B, 8 * H)
        hf, hb = bilstm(gx, layer["w_hh"])                            # (S, B, H) each

    hf_t = hf.transpose(1, 0, 2).reshape(n_total, H)
    hb_t = hb.transpose(1, 0, 2).reshape(n_total, H)

    final_pad, loss = decoder_impute(hf_t.astype(jnp.bfloat16),
                                     hb_t.astype(jnp.bfloat16),
                                     params["dec_w_top"], params["dec_w_bot"],
                                     params["dec_b"], ori_pad, mask_pad)
    x_final = final_pad[:, :F].reshape(T, N, F)
    return x_final, loss[0, 0]


if __name__ == "__main__":
    # small shapes consistent with forward(): x is (time_steps, nodes, features)
    T, N, F = 8, 16, 4
    hidden_dim, out_dim, lstm_hidden, num_layers = 32, 16, 32, 2

    key = jax.random.PRNGKey(0)
    k_x, k_m, k_p = jax.random.split(key, 3)
    x = jax.random.normal(k_x, (T, N, F), jnp.float32)
    mask = (jax.random.uniform(k_m, (T, N, F)) > 0.3).astype(jnp.float32)

    # symmetric ring graph (indices into the flattened node set, exactly as the
    # PyTorch module receives edge_index)
    src = jnp.arange(N, dtype=jnp.int32)
    dst = (src + 1) % N
    edge_index = jnp.stack([jnp.concatenate([src, dst]),
                            jnp.concatenate([dst, src])], axis=0)

    logical = init_params(k_p, F, hidden_dim, out_dim, lstm_hidden, num_layers)
    params = pack_params(logical, F, hidden_dim, out_dim, lstm_hidden)

    fwd = jax.jit(stgi_forward)
    x_final, x_loss = fwd(params, x, edge_index, mask)
    jax.block_until_ready((x_final, x_loss))
    assert x_final.shape == (T, N, F) and x_loss.shape == ()
    print("KERNEL_OK")
</pallas_src>

<mosaic_0001>
module attributes {stable_mosaic.version = 11 : i64} {
  func.func private @main(%arg0: i32) attributes {dimension_semantics = [#tpu.dimension_semantics<core_parallel>], iteration_bounds = array<i64: 2>, tpu.core_type = #tpu.core_type<sc_scalar_subcore>, window_params = []} {
    return
  }
}

module attributes {stable_mosaic.version = 11 : i64} {
  func.func private @main(%arg0: i32) attributes {dimension_semantics = [#tpu.dimension_semantics<core_parallel>], iteration_bounds = array<i64: 2>, tpu.core_type = #tpu.core_type<sc_scalar_subcore>, window_params = []} {
    return
  }
}

module attributes {stable_mosaic.version = 11 : i64} {
  func.func @_linear_kernel(%arg0: i32, %arg1: memref<128x4xbf16, #tpu.memory_space<vmem>>, %arg2: memref<4x128xbf16, #tpu.memory_space<vmem>>, %arg3: memref<1x128xf32, #tpu.memory_space<vmem>>, %arg4: memref<128x128xf32, #tpu.memory_space<vmem>>) attributes {dimension_semantics = [#tpu.dimension_semantics<parallel>], iteration_bounds = array<i64: 1>, scalar_prefetch = 0 : i64, scratch_operands = 0 : i64, tpu.core_type = #tpu.core_type<tc>, window_params = [{transform_indices = @transform_0, window_bounds = array<i64: 128, 4>}, {pipeline_mode = #tpu.pipeline_mode<synchronous>, transform_indices = @transform_1, window_bounds = array<i64: 4, 128>}, {pipeline_mode = #tpu.pipeline_mode<synchronous>, transform_indices = @transform_2, window_bounds = array<i64: 1, 128>}, {transform_indices = @transform_3, window_bounds = array<i64: 128, 128>}]} {
    %c0 = arith.constant 0 : index
    %c0_0 = arith.constant 0 : index
    %0 = vector.load %arg1[%c0, %c0_0] : memref<128x4xbf16, #tpu.memory_space<vmem>>, vector<128x4xbf16>
    %c0_1 = arith.constant 0 : index
    %c0_2 = arith.constant 0 : index
    %1 = vector.load %arg2[%c0_1, %c0_2] : memref<4x128xbf16, #tpu.memory_space<vmem>>, vector<4x128xbf16>
    %cst = arith.constant dense<0.000000e+00> : vector<128x128xf32>
    %2 = tpu.matmul %0, %1, %cst {dimension_numbers = #tpu.dot_dimension_numbers<[1], [0], [0], [1], [0, 0, 1, 1], [], []>} : vector<128x4xbf16>, vector<4x128xbf16>, vector<128x128xf32> -> vector<128x128xf32>
    %c0_3 = arith.constant 0 : index
    %c0_4 = arith.constant 0 : index
    %3 = vector.load %arg3[%c0_3, %c0_4] : memref<1x128xf32, #tpu.memory_space<vmem>>, vector<1x128xf32>
    %4 = vector.broadcast %3 : vector<1x128xf32> to vector<128x128xf32>
    %5 = arith.addf %2, %4 : vector<128x128xf32>
    %c0_5 = arith.constant 0 : index
    %c0_6 = arith.constant 0 : index
    %6 = vector.load %arg4[%c0_5, %c0_6] : memref<128x128xf32, #tpu.memory_space<vmem>>, vector<128x128xf32>
    tpu.vector_store %arg4[%c0_5, %c0_6], %5 {strides = array<i32>} : memref<128x128xf32, #tpu.memory_space<vmem>>, vector<128x128xf32>,
    return
  }
  func.func @transform_0(%arg0: i32) -> (i32, i32) {
    %c0_i32 = arith.constant 0 : i32
    %c0_i32_0 = arith.constant 0 : i32
    return %arg0, %c0_i32 : i32, i32
  }
  func.func @transform_1(%arg0: i32) -> (i32, i32) {
    %c0_i32 = arith.constant 0 : i32
    %c0_i32_0 = arith.constant 0 : i32
    %c0_i32_1 = arith.constant 0 : i32
    return %c0_i32, %c0_i32_0 : i32, i32
  }
  func.func @transform_2(%arg0: i32) -> (i32, i32) {
    %c0_i32 = arith.constant 0 : i32
    %c0_i32_0 = arith.constant 0 : i32
    %c0_i32_1 = arith.constant 0 : i32
    return %c0_i32, %c0_i32_0 : i32, i32
  }
  func.func @transform_3(%arg0: i32) -> (i32, i32) {
    %c0_i32 = arith.constant 0 : i32
    %c0_i32_0 = arith.constant 0 : i32
    return %arg0, %c0_i32 : i32, i32
  }
}

module attributes {stable_mosaic.version = 11 : i64} {
  func.func @_gcn_ay_kernel(%arg0: i32, %arg1: i32, %arg2: memref<128x128xbf16, #tpu.memory_space<vmem>>, %arg3: memref<128x128xbf16, #tpu.memory_space<vmem>>, %arg4: memref<1x128xf32, #tpu.memory_space<vmem>>, %arg5: memref<128x128xf32, #tpu.memory_space<vmem>>, %arg6: memref<128x128xf32, #tpu.memory_space<vmem>>) attributes {dimension_semantics = [#tpu.dimension_semantics<parallel>, #tpu.dimension_semantics<arbitrary>], iteration_bounds = array<i64: 1, 1>, scalar_prefetch = 0 : i64, scratch_operands = 1 : i64, tpu.core_type = #tpu.core_type<tc>, window_params = [{transform_indices = @transform_0, window_bounds = array<i64: 128, 128>}, {transform_indices = @transform_1, window_bounds = array<i64: 128, 128>}, {pipeline_mode = #tpu.pipeline_mode<synchronous>, transform_indices = @transform_2, window_bounds = array<i64: 1, 128>}, {transform_indices = @transform_3, window_bounds = array<i64: 128, 128>}]} {
    %c0_i32 = arith.constant 0 : i32
    %0 = arith.cmpi eq, %arg1, %c0_i32 : i32
    %1 = arith.extui %0 : i1 to i32
    %c0_i32_0 = arith.constant 0 : i32
    %2 = arith.cmpi ne, %1, %c0_i32_0 : i32
    scf.if %2 {
      %cst_10 = arith.constant 0.000000e+00 : f32
      %12 = vector.broadcast %cst_10 : f32 to vector<128x128xf32>
      %c0_11 = arith.constant 0 : index
      %c0_12 = arith.constant 0 : index
      %13 = vector.load %arg6[%c0_11, %c0_12] : memref<128x128xf32, #tpu.memory_space<vmem>>, vector<128x128xf32>
      tpu.vector_store %arg6[%c0_11, %c0_12], %12 {strides = array<i32>} : memref<128x128xf32, #tpu.memory_space<vmem>>, vector<128x128xf32>,
    } else {
    }
    %c0 = arith.constant 0 : index
    %c0_1 = arith.constant 0 : index
    %3 = vector.load %arg6[%c0, %c0_1] : memref<128x128xf32, #tpu.memory_space<vmem>>, vector<128x128xf32>
    %c0_2 = arith.constant 0 : index
    %c0_3 = arith.constant 0 : index
    %4 = vector.load %arg2[%c0_2, %c0_3] : memref<128x128xbf16, #tpu.memory_space<vmem>>, vector<128x128xbf16>
    %c0_4 = arith.constant 0 : index
    %c0_5 = arith.constant 0 : index
    %5 = vector.load %arg3[%c0_4, %c0_5] : memref<128x128xbf16, #tpu.memory_space<vmem>>, vector<128x128xbf16>
    %cst = arith.constant dense<0.000000e+00> : vector<128x128xf32>
    %6 = tpu.matmul %4, %5, %cst {dimension_numbers = #tpu.dot_dimension_numbers<[1], [0], [0], [1], [0, 0, 1, 1], [], []>} : vector<128x128xbf16>, vector<128x128xbf16>, vector<128x128xf32> -> vector<128x128xf32>
    %7 = arith.addf %3, %6 : vector<128x128xf32>
    %c0_6 = arith.constant 0 : index
    %c0_7 = arith.constant 0 : index
    %8 = vector.load %arg6[%c0_6, %c0_7] : memref<128x128xf32, #tpu.memory_space<vmem>>, vector<128x128xf32>
    tpu.vector_store %arg6[%c0_6, %c0_7], %7 {strides = array<i32>} : memref<128x128xf32, #tpu.memory_space<vmem>>, vector<128x128xf32>,
    %c0_i32_8 = arith.constant 0 : i32
    %9 = arith.cmpi eq, %arg1, %c0_i32_8 : i32
    %10 = arith.extui %9 : i1 to i32
    %c0_i32_9 = arith.constant 0 : i32
    %11 = arith.cmpi ne, %10, %c0_i32_9 : i32
    scf.if %11 {
      %c0_10 = arith.constant 0 : index
      %c0_11 = arith.constant 0 : index
      %12 = vector.load %arg6[%c0_10, %c0_11] : memref<128x128xf32, #tpu.memory_space<vmem>>, vector<128x128xf32>
      %c0_12 = arith.constant 0 : index
      %c0_13 = arith.constant 0 : index
      %13 = vector.load %arg4[%c0_12, %c0_13] : memref<1x128xf32, #tpu.memory_space<vmem>>, vector<1x128xf32>
      %14 = vector.broadcast %13 : vector<1x128xf32> to vector<128x128xf32>
      %15 = arith.addf %12, %14 : vector<128x128xf32>
      %cst_14 = arith.constant 0.000000e+00 : f32
      %16 = vector.broadcast %cst_14 : f32 to vector<128x128xf32>
      %17 = arith.maximumf %15, %16 : vector<128x128xf32>
      %c0_15 = arith.constant 0 : index
      %c0_16 = arith.constant 0 : index
      %18 = vector.load %arg5[%c0_15, %c0_16] : memref<128x128xf32, #tpu.memory_space<vmem>>, vector<128x128xf32>
      tpu.vector_store %arg5[%c0_15, %c0_16], %17 {strides = array<i32>} : memref<128x128xf32, #tpu.memory_space<vmem>>, vector<128x128xf32>,
    } else {
    }
    return
  }
  func.func @transform_0(%arg0: i32, %arg1: i32) -> (i32, i32) {
    %c0_i32 = arith.constant 0 : i32
    return %arg0, %arg1 : i32, i32
  }
  func.func @transform_1(%arg0: i32, %arg1: i32) -> (i32, i32) {
    %c0_i32 = arith.constant 0 : i32
    %c0_i32_0 = arith.constant 0 : i32
    return %arg1, %c0_i32 : i32, i32
  }
  func.func @transform_2(%arg0: i32, %arg1: i32) -> (i32, i32) {
    %c0_i32 = arith.constant 0 : i32
    %c0_i32_0 = arith.constant 0 : i32
    %c0_i32_1 = arith.constant 0 : i32
    return %c0_i32, %c0_i32_0 : i32, i32
  }
  func.func @transform_3(%arg0: i32, %arg1: i32) -> (i32, i32) {
    %c0_i32 = arith.constant 0 : i32
    %c0_i32_0 = arith.constant 0 : i32
    return %arg0, %c0_i32 : i32, i32
  }
}

module attributes {stable_mosaic.version = 11 : i64} {
  func.func @_linear_kernel(%arg0: i32, %arg1: memref<128x128xbf16, #tpu.memory_space<vmem>>, %arg2: memref<128x128xbf16, #tpu.memory_space<vmem>>, %arg3: memref<1x128xf32, #tpu.memory_space<vmem>>, %arg4: memref<128x128xf32, #tpu.memory_space<vmem>>) attributes {dimension_semantics = [#tpu.dimension_semantics<parallel>], iteration_bounds = array<i64: 1>, scalar_prefetch = 0 : i64, scratch_operands = 0 : i64, tpu.core_type = #tpu.core_type<tc>, window_params = [{transform_indices = @transform_0, window_bounds = array<i64: 128, 128>}, {pipeline_mode = #tpu.pipeline_mode<synchronous>, transform_indices = @transform_1, window_bounds = array<i64: 128, 128>}, {pipeline_mode = #tpu.pipeline_mode<synchronous>, transform_indices = @transform_2, window_bounds = array<i64: 1, 128>}, {transform_indices = @transform_3, window_bounds = array<i64: 128, 128>}]} {
    %c0 = arith.constant 0 : index
    %c0_0 = arith.constant 0 : index
    %0 = vector.load %arg1[%c0, %c0_0] : memref<128x128xbf16, #tpu.memory_space<vmem>>, vector<128x128xbf16>
    %c0_1 = arith.constant 0 : index
    %c0_2 = arith.constant 0 : index
    %1 = vector.load %arg2[%c0_1, %c0_2] : memref<128x128xbf16, #tpu.memory_space<vmem>>, vector<128x128xbf16>
    %cst = arith.constant dense<0.000000e+00> : vector<128x128xf32>
    %2 = tpu.matmul %0, %1, %cst {dimension_numbers = #tpu.dot_dimension_numbers<[1], [0], [0], [1], [0, 0, 1, 1], [], []>} : vector<128x128xbf16>, vector<128x128xbf16>, vector<128x128xf32> -> vector<128x128xf32>
    %c0_3 = arith.constant 0 : index
    %c0_4 = arith.constant 0 : index
    %3 = vector.load %arg3[%c0_3, %c0_4] : memref<1x128xf32, #tpu.memory_space<vmem>>, vector<1x128xf32>
    %4 = vector.broadcast %3 : vector<1x128xf32> to vector<128x128xf32>
    %5 = arith.addf %2, %4 : vector<128x128xf32>
    %c0_5 = arith.constant 0 : index
    %c0_6 = arith.constant 0 : index
    %6 = vector.load %arg4[%c0_5, %c0_6] : memref<128x128xf32, #tpu.memory_space<vmem>>, vector<128x128xf32>
    tpu.vector_store %arg4[%c0_5, %c0_6], %5 {strides = array<i32>} : memref<128x128xf32, #tpu.memory_space<vmem>>, vector<128x128xf32>,
    return
  }
  func.func @transform_0(%arg0: i32) -> (i32, i32) {
    %c0_i32 = arith.constant 0 : i32
    %c0_i32_0 = arith.constant 0 : i32
    return %arg0, %c0_i32 : i32, i32
  }
  func.func @transform_1(%arg0: i32) -> (i32, i32) {
    %c0_i32 = arith.constant 0 : i32
    %c0_i32_0 = arith.constant 0 : i32
    %c0_i32_1 = arith.constant 0 : i32
    return %c0_i32, %c0_i32_0 : i32, i32
  }
  func.func @transform_2(%arg0: i32) -> (i32, i32) {
    %c0_i32 = arith.constant 0 : i32
    %c0_i32_0 = arith.constant 0 : i32
    %c0_i32_1 = arith.constant 0 : i32
    return %c0_i32, %c0_i32_0 : i32, i32
  }
  func.func @transform_3(%arg0: i32) -> (i32, i32) {
    %c0_i32 = arith.constant 0 : i32
    %c0_i32_0 = arith.constant 0 : i32
    return %arg0, %c0_i32 : i32, i32
  }
}

module attributes {stable_mosaic.version = 11 : i64} {
  func.func @_linear_kernel(%arg0: i32, %arg1: memref<128x128xbf16, #tpu.memory_space<vmem>>, %arg2: memref<128x256xbf16, #tpu.memory_space<vmem>>, %arg3: memref<1x256xf32, #tpu.memory_space<vmem>>, %arg4: memref<128x256xf32, #tpu.memory_space<vmem>>) attributes {dimension_semantics = [#tpu.dimension_semantics<parallel>], iteration_bounds = array<i64: 1>, scalar_prefetch = 0 : i64, scratch_operands = 0 : i64, tpu.core_type = #tpu.core_type<tc>, window_params = [{transform_indices = @transform_0, window_bounds = array<i64: 128, 128>}, {pipeline_mode = #tpu.pipeline_mode<synchronous>, transform_indices = @transform_1, window_bounds = array<i64: 128, 256>}, {pipeline_mode = #tpu.pipeline_mode<synchronous>, transform_indices = @transform_2, window_bounds = array<i64: 1, 256>}, {transform_indices = @transform_3, window_bounds = array<i64: 128, 256>}]} {
    %c0 = arith.constant 0 : index
    %c0_0 = arith.constant 0 : index
    %0 = vector.load %arg1[%c0, %c0_0] : memref<128x128xbf16, #tpu.memory_space<vmem>>, vector<128x128xbf16>
    %c0_1 = arith.constant 0 : index
    %c0_2 = arith.constant 0 : index
    %1 = vector.load %arg2[%c0_1, %c0_2] : memref<128x256xbf16, #tpu.memory_space<vmem>>, vector<128x256xbf16>
    %cst = arith.constant dense<0.000000e+00> : vector<128x256xf32>
    %2 = tpu.matmul %0, %1, %cst {dimension_numbers = #tpu.dot_dimension_numbers<[1], [0], [0], [1], [0, 0, 1, 1], [], []>} : vector<128x128xbf16>, vector<128x256xbf16>, vector<128x256xf32> -> vector<128x256xf32>
    %c0_3 = arith.constant 0 : index
    %c0_4 = arith.constant 0 : index
    %3 = vector.load %arg3[%c0_3, %c0_4] : memref<1x256xf32, #tpu.memory_space<vmem>>, vector<1x256xf32>
    %4 = vector.broadcast %3 : vector<1x256xf32> to vector<128x256xf32>
    %5 = arith.addf %2, %4 : vector<128x256xf32>
    %c0_5 = arith.constant 0 : index
    %c0_6 = arith.constant 0 : index
    %6 = vector.load %arg4[%c0_5, %c0_6] : memref<128x256xf32, #tpu.memory_space<vmem>>, vector<128x256xf32>
    tpu.vector_store %arg4[%c0_5, %c0_6], %5 {strides = array<i32>} : memref<128x256xf32, #tpu.memory_space<vmem>>, vector<128x256xf32>,
    return
  }
  func.func @transform_0(%arg0: i32) -> (i32, i32) {
    %c0_i32 = arith.constant 0 : i32
    %c0_i32_0 = arith.constant 0 : i32
    return %arg0, %c0_i32 : i32, i32
  }
  func.func @transform_1(%arg0: i32) -> (i32, i32) {
    %c0_i32 = arith.constant 0 : i32
    %c0_i32_0 = arith.constant 0 : i32
    %c0_i32_1 = arith.constant 0 : i32
    return %c0_i32, %c0_i32_0 : i32, i32
  }
  func.func @transform_2(%arg0: i32) -> (i32, i32) {
    %c0_i32 = arith.constant 0 : i32
    %c0_i32_0 = arith.constant 0 : i32
    %c0_i32_1 = arith.constant 0 : i32
    return %c0_i32, %c0_i32_0 : i32, i32
  }
  func.func @transform_3(%arg0: i32) -> (i32, i32) {
    %c0_i32 = arith.constant 0 : i32
    %c0_i32_0 = arith.constant 0 : i32
    return %arg0, %c0_i32 : i32, i32
  }
}

module attributes {stable_mosaic.version = 11 : i64} {
  func.func @_bilstm_kernel(%arg0: i32, %arg1: memref<16x8x128xf32, #tpu.memory_space<vmem>>, %arg2: memref<16x8x128xf32, #tpu.memory_space<vmem>>, %arg3: memref<64x256xbf16, #tpu.memory_space<vmem>>, %arg4: memref<16x8x32xf32, #tpu.memory_space<vmem>>, %arg5: memref<16x8x32xf32, #tpu.memory_space<vmem>>, %arg6: memref<8x64xf32, #tpu.memory_space<vmem>>, %arg7: memref<8x64xf32, #tpu.memory_space<vmem>>) attributes {dimension_semantics = [#tpu.dimension_semantics<arbitrary>], iteration_bounds = array<i64: 1>, scalar_prefetch = 0 : i64, scratch_operands = 2 : i64, tpu.core_type = #tpu.core_type<tc>, window_params = [{transform_indices = @transform_0, window_bounds = array<i64: 16, 8, 128>}, {transform_indices = @transform_1, window_bounds = array<i64: 16, 8, 128>}, {pipeline_mode = #tpu.pipeline_mode<synchronous>, transform_indices = @transform_2, window_bounds = array<i64: 64, 256>}, {transform_indices = @transform_3, window_bounds = array<i64: 16, 8, 32>}, {transform_indices = @transform_4, window_bounds = array<i64: 16, 8, 32>}]} {
    %c0_i32 = arith.constant 0 : i32
    %0 = arith.cmpi eq, %arg0, %c0_i32 : i32
    %1 = arith.extui %0 : i1 to i32
    %c0_i32_0 = arith.constant 0 : i32
    %2 = arith.cmpi ne, %1, %c0_i32_0 : i32
    scf.if %2 {
      %cst_432 = arith.constant 0.000000e+00 : f32
      %1299 = vector.broadcast %cst_432 : f32 to vector<8x64xf32>
      %c0_433 = arith.constant 0 : index
      %c0_434 = arith.constant 0 : index
      %1300 = vector.load %arg6[%c0_433, %c0_434] : memref<8x64xf32, #tpu.memory_space<vmem>>, vector<8x64xf32>
      tpu.vector_store %arg6[%c0_433, %c0_434], %1299 {strides = array<i32>} : memref<8x64xf32, #tpu.memory_space<vmem>>, vector<8x64xf32>,
      %cst_435 = arith.constant 0.000000e+00 : f32
      %1301 = vector.broadcast %cst_435 : f32 to vector<8x64xf32>
      %c0_436 = arith.constant 0 : index
      %c0_437 = arith.constant 0 : index
      %1302 = vector.load %arg7[%c0_436, %c0_437] : memref<8x64xf32, #tpu.memory_space<vmem>>, vector<8x64xf32>
      tpu.vector_store %arg7[%c0_436, %c0_437], %1301 {strides = array<i32>} : memref<8x64xf32, #tpu.memory_space<vmem>>, vector<8x64xf32>,
    } else {
    }
    %c0_i32_1 = arith.constant 0 : i32
    %c0 = arith.constant 0 : index
    %c0_2 = arith.constant 0 : index
    %3 = vector.load %arg6[%c0, %c0_2] : memref<8x64xf32, #tpu.memory_space<vmem>>, vector<8x64xf32>
    %c0_3 = arith.constant 0 : index
    %c0_4 = arith.constant 0 : index
    %4 = vector.load %arg7[%c0_3, %c0_4] : memref<8x64xf32, #tpu.memory_space<vmem>>, vector<8x64xf32>
    %5 = arith.truncf %3 : vector<8x64xf32> to vector<8x64xbf16>
    %c0_5 = arith.constant 0 : index
    %c0_6 = arith.constant 0 : index
    %6 = vector.load %arg3[%c0_5, %c0_6] : memref<64x256xbf16, #tpu.memory_space<vmem>>, vector<64x256xbf16>
    %cst = arith.constant dense<0.000000e+00> : vector<8x256xf32>
    %7 = tpu.matmul %5, %6, %cst {dimension_numbers = #tpu.dot_dimension_numbers<[1], [0], [0], [1], [0, 0, 1, 1], [], []>} : vector<8x64xbf16>, vector<64x256xbf16>, vector<8x256xf32> -> vector<8x256xf32>
    %8 = arith.index_cast %c0_i32_1 : i32 to index
    %c0_7 = arith.constant 0 : index
    %c0_8 = arith.constant 0 : index
    %9 = vector.load %arg1[%8, %c0_7, %c0_8] : memref<16x8x128xf32, #tpu.memory_space<vmem>>, vector<1x8x128xf32>
    %10 = vector.shape_cast %9 : vector<1x8x128xf32> to vector<8x128xf32>
    %11 = vector.extract_strided_slice %7 {offsets = [0, 0], sizes = [8, 128], strides = [1, 1]} : vector<8x256xf32> to vector<8x128xf32>
    %12 = arith.addf %10, %11 : vector<8x128xf32>
    %c15_i32 = arith.constant 15 : i32
    %13 = arith.subi %c15_i32, %c0_i32_1 : i32
    %14 = arith.index_cast %13 : i32 to index
    %c0_9 = arith.constant 0 : index
    %c0_10 = arith.constant 0 : index
    %15 = vector.load %arg2[%14, %c0_9, %c0_10] : memref<16x8x128xf32, #tpu.memory_space<vmem>>, vector<1x8x128xf32>
    %16 = vector.shape_cast %15 : vector<1x8x128xf32> to vector<8x128xf32>
    %17 = vector.extract_strided_slice %7 {offsets = [0, 128], sizes = [8, 128], strides = [1, 1]} : vector<8x256xf32> to vector<8x128xf32>
    %18 = arith.addf %16, %17 : vector<8x128xf32>
    %19 = vector.extract_strided_slice %4 {offsets = [0, 0], sizes = [8, 32], strides = [1, 1]} : vector<8x64xf32> to vector<8x32xf32>
    %20 = vector.extract_strided_slice %12 {offsets = [0, 0], sizes = [8, 32], strides = [1, 1]} : vector<8x128xf32> to vector<8x32xf32>
    %21 = arith.negf %20 : vector<8x32xf32>
    %22 = math.exp %21 : vector<8x32xf32>
    %cst_11 = arith.constant 1.000000e+00 : f32
    %23 = vector.broadcast %cst_11 : f32 to vector<8x32xf32>
    %24 = arith.addf %23, %22 : vector<8x32xf32>
    %25 = arith.divf %23, %24 : vector<8x32xf32>
    %26 = vector.extract_strided_slice %12 {offsets = [0, 32], sizes = [8, 32], strides = [1, 1]} : vector<8x128xf32> to vector<8x32xf32>
    %27 = arith.negf %26 : vector<8x32xf32>
    %28 = math.exp %27 : vector<8x32xf32>
    %cst_12 = arith.constant 1.000000e+00 : f32
    %29 = vector.broadcast %cst_12 : f32 to vector<8x32xf32>
    %30 = arith.addf %29, %28 : vector<8x32xf32>
    %31 = arith.divf %29, %30 : vector<8x32xf32>
    %32 = vector.extract_strided_slice %12 {offsets = [0, 64], sizes = [8, 32], strides = [1, 1]} : vector<8x128xf32> to vector<8x32xf32>
    %33 = math.tanh %32 : vector<8x32xf32>
    %34 = vector.extract_strided_slice %12 {offsets = [0, 96], sizes = [8, 32], strides = [1, 1]} : vector<8x128xf32> to vector<8x32xf32>
    %35 = arith.negf %34 : vector<8x32xf32>
    %36 = math.exp %35 : vector<8x32xf32>
    %cst_13 = arith.constant 1.000000e+00 : f32
    %37 = vector.broadcast %cst_13 : f32 to vector<8x32xf32>
    %38 = arith.addf %37, %36 : vector<8x32xf32>
    %39 = arith.divf %37, %38 : vector<8x32xf32>
    %40 = arith.mulf %31, %19 : vector<8x32xf32>
    %41 = arith.mulf %25, %33 : vector<8x32xf32>
    %42 = arith.addf %40, %41 : vector<8x32xf32>
    %43 = math.tanh %42 : vector<8x32xf32>
    %44 = arith.mulf %39, %43 : vector<8x32xf32>
    %45 = vector.extract_strided_slice %4 {offsets = [0, 32], sizes = [8, 32], strides = [1, 1]} : vector<8x64xf32> to vector<8x32xf32>
    %46 = vector.extract_strided_slice %18 {offsets = [0, 0], sizes = [8, 32], strides = [1, 1]} : vector<8x128xf32> to vector<8x32xf32>
    %47 = arith.negf %46 : vector<8x32xf32>
    %48 = math.exp %47 : vector<8x32xf32>
    %cst_14 = arith.constant 1.000000e+00 : f32
    %49 = vector.broadcast %cst_14 : f32 to vector<8x32xf32>
    %50 = arith.addf %49, %48 : vector<8x32xf32>
    %51 = arith.divf %49, %50 : vector<8x32xf32>
    %52 = vector.extract_strided_slice %18 {offsets = [0, 32], sizes = [8, 32], strides = [1, 1]} : vector<8x128xf32> to vector<8x32xf32>
    %53 = arith.negf %52 : vector<8x32xf32>
    %54 = math.exp %53 : vector<8x32xf32>
    %cst_15 = arith.constant 1.000000e+00 : f32
    %55 = vector.broadcast %cst_15 : f32 to vector<8x32xf32>
    %56 = arith.addf %55, %54 : vector<8x32xf32>
    %57 = arith.divf %55, %56 : vector<8x32xf32>
    %58 = vector.extract_strided_slice %18 {offsets = [0, 64], sizes = [8, 32], strides = [1, 1]} : vector<8x128xf32> to vector<8x32xf32>
    %59 = math.tanh %58 : vector<8x32xf32>
    %60 = vector.extract_strided_slice %18 {offsets = [0, 96], sizes = [8, 32], strides = [1, 1]} : vector<8x128xf32> to vector<8x32xf32>
    %61 = arith.negf %60 : vector<8x32xf32>
    %62 = math.exp %61 : vector<8x32xf32>
    %cst_16 = arith.constant 1.000000e+00 : f32
    %63 = vector.broadcast %cst_16 : f32 to vector<8x32xf32>
    %64 = arith.addf %63, %62 : vector<8x32xf32>
    %65 = arith.divf %63, %64 : vector<8x32xf32>
    %66 = arith.mulf %57, %45 : vector<8x32xf32>
    %67 = arith.mulf %51, %59 : vector<8x32xf32>
    %68 = arith.addf %66, %67 : vector<8x32xf32>
    %69 = math.tanh %68 : vector<8x32xf32>
    %70 = arith.mulf %65, %69 : vector<8x32xf32>
    %71 = tpu.concatenate %44, %70 in 1 : vector<8x32xf32>, vector<8x32xf32> -> vector<8x64xf32>
    %c0_17 = arith.constant 0 : index
    %c0_18 = arith.constant 0 : index
    %72 = vector.load %arg6[%c0_17, %c0_18] : memref<8x64xf32, #tpu.memory_space<vmem>>, vector<8x64xf32>
    tpu.vector_store %arg6[%c0_17, %c0_18], %71 {strides = array<i32>} : memref<8x64xf32, #tpu.memory_space<vmem>>, vector<8x64xf32>,
    %73 = tpu.concatenate %42, %68 in 1 : vector<8x32xf32>, vector<8x32xf32> -> vector<8x64xf32>
    %c0_19 = arith.constant 0 : index
    %c0_20 = arith.constant 0 : index
    %74 = vector.load %arg7[%c0_19, %c0_20] : memref<8x64xf32, #tpu.memory_space<vmem>>, vector<8x64xf32>
    tpu.vector_store %arg7[%c0_19, %c0_20], %73 {strides = array<i32>} : memref<8x64xf32, #tpu.memory_space<vmem>>, vector<8x64xf32>,
    %75 = arith.index_cast %c0_i32_1 : i32 to index
    %c0_21 = arith.constant 0 : index
    %c0_22 = arith.constant 0 : index
    %76 = vector.load %arg4[%75, %c0_21, %c0_22] : memref<16x8x32xf32, #tpu.memory_space<vmem>>, vector<1x8x32xf32>
    %77 = vector.shape_cast %76 : vector<1x8x32xf32> to vector<8x32xf32>
    %78 = vector.shape_cast %44 : vector<8x32xf32> to vector<1x8x32xf32>
    tpu.vector_store %arg4[%75, %c0_21, %c0_22], %78 {strides = array<i32>} : memref<16x8x32xf32, #tpu.memory_space<vmem>>, vector<1x8x32xf32>,
    %c15_i32_23 = arith.constant 15 : i32
    %79 = arith.subi %c15_i32_23, %c0_i32_1 : i32
    %80 = arith.index_cast %79 : i32 to index
    %c0_24 = arith.constant 0 : index
    %c0_25 = arith.constant 0 : index
    %81 = vector.load %arg5[%80, %c0_24, %c0_25] : memref<16x8x32xf32, #tpu.memory_space<vmem>>, vector<1x8x32xf32>
    %82 = vector.shape_cast %81 : vector<1x8x32xf32> to vector<8x32xf32>
    %83 = vector.shape_cast %70 : vector<8x32xf32> to vector<1x8x32xf32>
    tpu.vector_store %arg5[%80, %c0_24, %c0_25], %83 {strides = array<i32>} : memref<16x8x32xf32, #tpu.memory_space<vmem>>, vector<1x8x32xf32>,
    %c1_i32 = arith.constant 1 : i32
    %c0_26 = arith.constant 0 : index
    %c0_27 = arith.constant 0 : index
    %84 = vector.load %arg6[%c0_26, %c0_27] : memref<8x64xf32, #tpu.memory_space<vmem>>, vector<8x64xf32>
    %c0_28 = arith.constant 0 : index
    %c0_29 = arith.constant 0 : index
    %85 = vector.load %arg7[%c0_28, %c0_29] : memref<8x64xf32, #tpu.memory_space<vmem>>, vector<8x64xf32>
    %86 = arith.truncf %84 : vector<8x64xf32> to vector<8x64xbf16>
    %c0_30 = arith.constant 0 : index
    %c0_31 = arith.constant 0 : index
    %87 = vector.load %arg3[%c0_30, %c0_31] : memref<64x256xbf16, #tpu.memory_space<vmem>>, vector<64x256xbf16>
    %cst_32 = arith.constant dense<0.000000e+00> : vector<8x256xf32>
    %88 = tpu.matmul %86, %87, %cst_32 {dimension_numbers = #tpu.dot_dimension_numbers<[1], [0], [0], [1], [0, 0, 1, 1], [], []>} : vector<8x64xbf16>, vector<64x256xbf16>, vector<8x256xf32> -> vector<8x256xf32>
    %89 = arith.index_cast %c1_i32 : i32 to index
    %c0_33 = arith.constant 0 : index
    %c0_34 = arith.constant 0 : index
    %90 = vector.load %arg1[%89, %c0_33, %c0_34] : memref<16x8x128xf32, #tpu.memory_space<vmem>>, vector<1x8x128xf32>
    %91 = vector.shape_cast %90 : vector<1x8x128xf32> to vector<8x128xf32>
    %92 = vector.extract_strided_slice %88 {offsets = [0, 0], sizes = [8, 128], strides = [1, 1]} : vector<8x256xf32> to vector<8x128xf32>
    %93 = arith.addf %91, %92 : vector<8x128xf32>
    %c15_i32_35 = arith.constant 15 : i32
    %94 = arith.subi %c15_i32_35, %c1_i32 : i32
    %95 = arith.index_cast %94 : i32 to index
    %c0_36 = arith.constant 0 : index
    %c0_37 = arith.constant 0 : index
    %96 = vector.load %arg2[%95, %c0_36, %c0_37] : memref<16x8x128xf32, #tpu.memory_space<vmem>>, vector<1x8x128xf32>
    %97 = vector.shape_cast %96 : vector<1x8x128xf32> to vector<8x128xf32>
    %98 = vector.extract_strided_slice %88 {offsets = [0, 128], sizes = [8, 128], strides = [1, 1]} : vector<8x256xf32> to vector<8x128xf32>
    %99 = arith.addf %97, %98 : vector<8x128xf32>
    %100 = vector.extract_strided_slice %85 {offsets = [0, 0], sizes = [8, 32], strides = [1, 1]} : vector<8x64xf32> to vector<8x32xf32>
    %101 = vector.extract_strided_slice %93 {offsets = [0, 0], sizes = [8, 32], strides = [1, 1]} : vector<8x128xf32> to vector<8x32xf32>
    %102 = arith.negf %101 : vector<8x32xf32>
    %103 = math.exp %102 : vector<8x32xf32>
    %cst_38 = arith.constant 1.000000e+00 : f32
    %104 = vector.broadcast %cst_38 : f32 to vector<8x32xf32>
    %105 = arith.addf %104, %103 : vector<8x32xf32>
    %106 = arith.divf %104, %105 : vector<8x32xf32>
    %107 = vector.extract_strided_slice %93 {offsets = [0, 32], sizes = [8, 32], strides = [1, 1]} : vector<8x128xf32> to vector<8x32xf32>
    %108 = arith.negf %107 : vector<8x32xf32>
    %109 = math.exp %108 : vector<8x32xf32>
    %cst_39 = arith.constant 1.000000e+00 : f32
    %110 = vector.broadcast %cst_39 : f32 to vector<8x32xf32>
    %111 = arith.addf %110, %109 : vector<8x32xf32>
    %112 = arith.divf %110, %111 : vector<8x32xf32>
    %113 = vector.extract_strided_slice %93 {offsets = [0, 64], sizes = [8, 32], strides = [1, 1]} : vector<8x128xf32> to vector<8x32xf32>
    %114 = math.tanh %113 : vector<8x32xf32>
    %115 = vector.extract_strided_slice %93 {offsets = [0, 96], sizes = [8, 32], strides = [1, 1]} : vector<8x128xf32> to vector<8x32xf32>
    %116 = arith.negf %115 : vector<8x32xf32>
    %117 = math.exp %116 : vector<8x32xf32>
    %cst_40 = arith.constant 1.000000e+00 : f32
    %118 = vector.broadcast %cst_40 : f32 to vector<8x32xf32>
    %119 = arith.addf %118, %117 : vector<8x32xf32>
    %120 = arith.divf %118, %119 : vector<8x32xf32>
    %121 = arith.mulf %112, %100 : vector<8x32xf32>
    %122 = arith.mulf %106, %114 : vector<8x32xf32>
    %123 = arith.addf %121, %122 : vector<8x32xf32>
    %124 = math.tanh %123 : vector<8x32xf32>
    %125 = arith.mulf %120, %124 : vector<8x32xf32>
    %126 = vector.extract_strided_slice %85 {offsets = [0, 32], sizes = [8, 32], strides = [1, 1]} : vector<8x64xf32> to vector<8x32xf32>
    %127 = vector.extract_strided_slice %99 {offsets = [0, 0], sizes = [8, 32], strides = [1, 1]} : vector<8x128xf32> to vector<8x32xf32>
    %128 = arith.negf %127 : vector<8x32xf32>
    %129 = math.exp %128 : vector<8x32xf32>
    %cst_41 = arith.constant 1.000000e+00 : f32
    %130 = vector.broadcast %cst_41 : f32 to vector<8x32xf32>
    %131 = arith.addf %130, %129 : vector<8x32xf32>
    %132 = arith.divf %130, %131 : vector<8x32xf32>
    %133 = vector.extract_strided_slice %99 {offsets = [0, 32], sizes = [8, 32], strides = [1, 1]} : vector<8x128xf32> to vector<8x32xf32>
    %134 = arith.negf %133 : vector<8x32xf32>
    %135 = math.exp %134 : vector<8x32xf32>
    %cst_42 = arith.constant 1.000000e+00 : f32
    %136 = vector.broadcast %cst_42 : f32 to vector<8x32xf32>
    %137 = arith.addf %136, %135 : vector<8x32xf32>
    %138 = arith.divf %136, %137 : vector<8x32xf32>
    %139 = vector.extract_strided_slice %99 {offsets = [0, 64], sizes = [8, 32], strides = [1, 1]} : vector<8x128xf32> to vector<8x32xf32>
    %140 = math.tanh %139 : vector<8x32xf32>
    %141 = vector.extract_strided_slice %99 {offsets = [0, 96], sizes = [8, 32], strides = [1, 1]} : vector<8x128xf32> to vector<8x32xf32>
    %142 = arith.negf %141 : vector<8x32xf32>
    %143 = math.exp %142 : vector<8x32xf32>
    %cst_43 = arith.constant 1.000000e+00 : f32
    %144 = vector.broadcast %cst_43 : f32 to vector<8x32xf32>
    %145 = arith.addf %144, %143 : vector<8x32xf32>
    %146 = arith.divf %144, %145 : vector<8x32xf32>
    %147 = arith.mulf %138, %126 : vector<8x32xf32>
    %148 = arith.mulf %132, %140 : vector<8x32xf32>
    %149 = arith.addf %147, %148 : vector<8x32xf32>
    %150 = math.tanh %149 : vector<8x32xf32>
    %151 = arith.mulf %146, %150 : vector<8x32xf32>
    %152 = tpu.concatenate %125, %151 in 1 : vector<8x32xf32>, vector<8x32xf32> -> vector<8x64xf32>
    %c0_44 = arith.constant 0 : index
    %c0_45 = arith.constant 0 : index
    %153 = vector.load %arg6[%c0_44, %c0_45] : memref<8x64xf32, #tpu.memory_space<vmem>>, vector<8x64xf32>
    tpu.vector_store %arg6[%c0_44, %c0_45], %152 {strides = array<i32>} : memref<8x64xf32, #tpu.memory_space<vmem>>, vector<8x64xf32>,
    %154 = tpu.concatenate %123, %149 in 1 : vector<8x32xf32>, vector<8x32xf32> -> vector<8x64xf32>
    %c0_46 = arith.constant 0 : index
    %c0_47 = arith.constant 0 : index
    %155 = vector.load %arg7[%c0_46, %c0_47] : memref<8x64xf32, #tpu.memory_space<vmem>>, vector<8x64xf32>
    tpu.vector_store %arg7[%c0_46, %c0_47], %154 {strides = array<i32>} : memref<8x64xf32, #tpu.memory_space<vmem>>, vector<8x64xf32>,
    %156 = arith.index_cast %c1_i32 : i32 to index
    %c0_48 = arith.constant 0 : index
    %c0_49 = arith.constant 0 : index
    %157 = vector.load %arg4[%156, %c0_48, %c0_49] : memref<16x8x32xf32, #tpu.memory_space<vmem>>, vector<1x8x32xf32>
    %158 = vector.shape_cast %157 : vector<1x8x32xf32> to vector<8x32xf32>
    %159 = vector.shape_cast %125 : vector<8x32xf32> to vector<1x8x32xf32>
    tpu.vector_store %arg4[%156, %c0_48, %c0_49], %159 {strides = array<i32>} : memref<16x8x32xf32, #tpu.memory_space<vmem>>, vector<1x8x32xf32>,
    %c15_i32_50 = arith.constant 15 : i32
    %160 = arith.subi %c15_i32_50, %c1_i32 : i32
    %161 = arith.index_cast %160 : i32 to index
    %c0_51 = arith.constant 0 : index
    %c0_52 = arith.constant 0 : index
    %162 = vector.load %arg5[%161, %c0_51, %c0_52] : memref<16x8x32xf32, #tpu.memory_space<vmem>>, vector<1x8x32xf32>
    %163 = vector.shape_cast %162 : vector<1x8x32xf32> to vector<8x32xf32>
    %164 = vector.shape_cast %151 : vector<8x32xf32> to vector<1x8x32xf32>
    tpu.vector_store %arg5[%161, %c0_51, %c0_52], %164 {strides = array<i32>} : memref<16x8x32xf32, #tpu.memory_space<vmem>>, vector<1x8x32xf32>,
    %c2_i32 = arith.constant 2 : i32
    %c0_53 = arith.constant 0 : index
    %c0_54 = arith.constant 0 : index
    %165 = vector.load %arg6[%c0_53, %c0_54] : memref<8x64xf32, #tpu.memory_space<vmem>>, vector<8x64xf32>
    %c0_55 = arith.constant 0 : index
    %c0_56 = arith.constant 0 : index
    %166 = vector.load %arg7[%c0_55, %c0_56] : memref<8x64xf32, #tpu.memory_space<vmem>>, vector<8x64xf32>
    %167 = arith.truncf %165 : vector<8x64xf32> to vector<8x64xbf16>
    %c0_57 = arith.constant 0 : index
    %c0_58 = arith.constant 0 : index
    %168 = vector.load %arg3[%c0_57, %c0_58] : memref<64x256xbf16, #tpu.memory_space<vmem>>, vector<64x256xbf16>
    %cst_59 = arith.constant dense<0.000000e+00> : vector<8x256xf32>
    %169 = tpu.matmul %167, %168, %cst_59 {dimension_numbers = #tpu.dot_dimension_numbers<[1], [0], [0], [1], [0, 0, 1, 1], [], []>} : vector<8x64xbf16>, vector<64x256xbf16>, vector<8x256xf32> -> vector<8x256xf32>
    %170 = arith.index_cast %c2_i32 : i32 to index
    %c0_60 = arith.constant 0 : index
    %c0_61 = arith.constant 0 : index
    %171 = vector.load %arg1[%170, %c0_60, %c0_61] : memref<16x8x128xf32, #tpu.memory_space<vmem>>, vector<1x8x128xf32>
    %172 = vector.shape_cast %171 : vector<1x8x128xf32> to vector<8x128xf32>
    %173 = vector.extract_strided_slice %169 {offsets = [0, 0], sizes = [8, 128], strides = [1, 1]} : vector<8x256xf32> to vector<8x128xf32>
    %174 = arith.addf %172, %173 : vector<8x128xf32>
    %c15_i32_62 = arith.constant 15 : i32
    %175 = arith.subi %c15_i32_62, %c2_i32 : i32
    %176 = arith.index_cast %175 : i32 to index
    %c0_63 = arith.constant 0 : index
    %c0_64 = arith.constant 0 : index
    %177 = vector.load %arg2[%176, %c0_63, %c0_64] : memref<16x8x128xf32, #tpu.memory_space<vmem>>, vector<1x8x128xf32>
    %178 = vector.shape_cast %177 : vector<1x8x128xf32> to vector<8x128xf32>
    %179 = vector.extract_strided_slice %169 {offsets = [0, 128], sizes = [8, 128], strides = [1, 1]} : vector<8x256xf32> to vector<8x128xf32>
    %180 = arith.addf %178, %179 : vector<8x128xf32>
    %181 = vector.extract_strided_slice %166 {offsets = [0, 0], sizes = [8, 32], strides = [1, 1]} : vector<8x64xf32> to vector<8x32xf32>
    %182 = vector.extract_strided_slice %174 {offsets = [0, 0], sizes = [8, 32], strides = [1, 1]} : vector<8x128xf32> to vector<8x32xf32>
    %183 = arith.negf %182 : vector<8x32xf32>
    %184 = math.exp %183 : vector<8x32xf32>
    %cst_65 = arith.constant 1.000000e+00 : f32
    %185 = vector.broadcast %cst_65 : f32 to vector<8x32xf32>
    %186 = arith.addf %185, %184 : vector<8x32xf32>
    %187 = arith.divf %185, %186 : vector<8x32xf32>
    %188 = vector.extract_strided_slice %174 {offsets = [0, 32], sizes = [8, 32], strides = [1, 1]} : vector<8x128xf32> to vector<8x32xf32>
    %189 = arith.negf %188 : vector<8x32xf32>
    %190 = math.exp %189 : vector<8x32xf32>
    %cst_66 = arith.constant 1.000000e+00 : f32
    %191 = vector.broadcast %cst_66 : f32 to vector<8x32xf32>
    %192 = arith.addf %191, %190 : vector<8x32xf32>
    %193 = arith.divf %191, %192 : vector<8x32xf32>
    %194 = vector.extract_strided_slice %174 {offsets = [0, 64], sizes = [8, 32], strides = [1, 1]} : vector<8x128xf32> to vector<8x32xf32>
    %195 = math.tanh %194 : vector<8x32xf32>
    %196 = vector.extract_strided_slice %174 {offsets = [0, 96], sizes = [8, 32], strides = [1, 1]} : vector<8x128xf32> to vector<8x32xf32>
    %197 = arith.negf %196 : vector<8x32xf32>
    %198 = math.exp %197 : vector<8x32xf32>
    %cst_67 = arith.constant 1.000000e+00 : f32
    %199 = vector.broadcast %cst_67 : f32 to vector<8x32xf32>
    %200 = arith.addf %199, %198 : vector<8x32xf32>
    %201 = arith.divf %199, %200 : vector<8x32xf32>
    %202 = arith.mulf %193, %181 : vector<8x32xf32>
    %203 = arith.mulf %187, %195 : vector<8x32xf32>
    %204 = arith.addf %202, %203 : vector<8x32xf32>
    %205 = math.tanh %204 : vector<8x32xf32>
    %206 = arith.mulf %201, %205 : vector<8x32xf32>
    %207 = vector.extract_strided_slice %166 {offsets = [0, 32], sizes = [8, 32], strides = [1, 1]} : vector<8x64xf32> to vector<8x32xf32>
    %208 = vector.extract_strided_slice %180 {offsets = [0, 0], sizes = [8, 32], strides = [1, 1]} : vector<8x128xf32> to vector<8x32xf32>
    %209 = arith.negf %208 : vector<8x32xf32>
    %210 = math.exp %209 : vector<8x32xf32>
    %cst_68 = arith.constant 1.000000e+00 : f32
    %211 = vector.broadcast %cst_68 : f32 to vector<8x32xf32>
    %212 = arith.addf %211, %210 : vector<8x32xf32>
    %213 = arith.divf %211, %212 : vector<8x32xf32>
    %214 = vector.extract_strided_slice %180 {offsets = [0, 32], sizes = [8, 32], strides = [1, 1]} : vector<8x128xf32> to vector<8x32xf32>
    %215 = arith.negf %214 : vector<8x32xf32>
    %216 = math.exp %215 : vector<8x32xf32>
    %cst_69 = arith.constant 1.000000e+00 : f32
    %217 = vector.broadcast %cst_69 : f32 to vector<8x32xf32>
    %218 = arith.addf %217, %216 : vector<8x32xf32>
    %219 = arith.divf %217, %218 : vector<8x32xf32>
    %220 = vector.extract_strided_slice %180 {offsets = [0, 64], sizes = [8, 32], strides = [1, 1]} : vector<8x128xf32> to vector<8x32xf32>
    %221 = math.tanh %220 : vector<8x32xf32>
    %222 = vector.extract_strided_slice %180 {offsets = [0, 96], sizes = [8, 32], strides = [1, 1]} : vector<8x128xf32> to vector<8x32xf32>
    %223 = arith.negf %222 : vector<8x32xf32>
    %224 = math.exp %223 : vector<8x32xf32>
    %cst_70 = arith.constant 1.000000e+00 : f32
    %225 = vector.broadcast %cst_70 : f32 to vector<8x32xf32>
    %226 = arith.addf %225, %224 : vector<8x32xf32>
    %227 = arith.divf %225, %226 : vector<8x32xf32>
    %228 = arith.mulf %219, %207 : vector<8x32xf32>
    %229 = arith.mulf %213, %221 : vector<8x32xf32>
    %230 = arith.addf %228, %229 : vector<8x32xf32>
    %231 = math.tanh %230 : vector<8x32xf32>
    %232 = arith.mulf %227, %231 : vector<8x32xf32>
    %233 = tpu.concatenate %206, %232 in 1 : vector<8x32xf32>, vector<8x32xf32> -> vector<8x64xf32>
    %c0_71 = arith.constant 0 : index
    %c0_72 = arith.constant 0 : index
    %234 = vector.load %arg6[%c0_71, %c0_72] : memref<8x64xf32, #tpu.memory_space<vmem>>, vector<8x64xf32>
    tpu.vector_store %arg6[%c0_71, %c0_72], %233 {strides = array<i32>} : memref<8x64xf32, #tpu.memory_space<vmem>>, vector<8x64xf32>,
    %235 = tpu.concatenate %204, %230 in 1 : vector<8x32xf32>, vector<8x32xf32> -> vector<8x64xf32>
    %c0_73 = arith.constant 0 : index
    %c0_74 = arith.constant 0 : index
    %236 = vector.load %arg7[%c0_73, %c0_74] : memref<8x64xf32, #tpu.memory_space<vmem>>, vector<8x64xf32>
    tpu.vector_store %arg7[%c0_73, %c0_74], %235 {strides = array<i32>} : memref<8x64xf32, #tpu.memory_space<vmem>>, vector<8x64xf32>,
    %237 = arith.index_cast %c2_i32 : i32 to index
    %c0_75 = arith.constant 0 : index
    %c0_76 = arith.constant 0 : index
    %238 = vector.load %arg4[%237, %c0_75, %c0_76] : memref<16x8x32xf32, #tpu.memory_space<vmem>>, vector<1x8x32xf32>
    %239 = vector.shape_cast %238 : vector<1x8x32xf32> to vector<8x32xf32>
    %240 = vector.shape_cast %206 : vector<8x32xf32> to vector<1x8x32xf32>
    tpu.vector_store %arg4[%237, %c0_75, %c0_76], %240 {strides = array<i32>} : memref<16x8x32xf32, #tpu.memory_space<vmem>>, vector<1x8x32xf32>,
    %c15_i32_77 = arith.constant 15 : i32
    %241 = arith.subi %c15_i32_77, %c2_i32 : i32
    %242 = arith.index_cast %241 : i32 to index
    %c0_78 = arith.constant 0 : index
    %c0_79 = arith.constant 0 : index
    %243 = vector.load %arg5[%242, %c0_78, %c0_79] : memref<16x8x32xf32, #tpu.memory_space<vmem>>, vector<1x8x32xf32>
    %244 = vector.shape_cast %243 : vector<1x8x32xf32> to vector<8x32xf32>
    %245 = vector.shape_cast %232 : vector<8x32xf32> to vector<1x8x32xf32>
    tpu.vector_store %arg5[%242, %c0_78, %c0_79], %245 {strides = array<i32>} : memref<16x8x32xf32, #tpu.memory_space<vmem>>, vector<1x8x32xf32>,
    %c3_i32 = arith.constant 3 : i32
    %c0_80 = arith.constant 0 : index
    %c0_81 = arith.constant 0 : index
    %246 = vector.load %arg6[%c0_80, %c0_81] : memref<8x64xf32, #tpu.memory_space<vmem>>, vector<8x64xf32>
    %c0_82 = arith.constant 0 : index
    %c0_83 = arith.constant 0 : index
    %247 = vector.load %arg7[%c0_82, %c0_83] : memref<8x64xf32, #tpu.memory_space<vmem>>, vector<8x64xf32>
    %248 = arith.truncf %246 : vector<8x64xf32> to vector<8x64xbf16>
    %c0_84 = arith.constant 0 : index
    %c0_85 = arith.constant 0 : index
    %249 = vector.load %arg3[%c0_84, %c0_85] : memref<64x256xbf16, #tpu.memory_space<vmem>>, vector<64x256xbf16>
    %cst_86 = arith.constant dense<0.000000e+00> : vector<8x256xf32>
    %250 = tpu.matmul %248, %249, %cst_86 {dimension_numbers = #tpu.dot_dimension_numbers<[1], [0], [0], [1], [0, 0, 1, 1], [], []>} : vector<8x64xbf16>, vector<64x256xbf16>, vector<8x256xf32> -> vector<8x256xf32>
    %251 = arith.index_cast %c3_i32 : i32 to index
    %c0_87 = arith.constant 0 : index
    %c0_88 = arith.constant 0 : index
    %252 = vector.load %arg1[%251, %c0_87, %c0_88] : memref<16x8x128xf32, #tpu.memory_space<vmem>>, vector<1x8x128xf32>
    %253 = vector.shape_cast %252 : vector<1x8x128xf32> to vector<8x128xf32>
    %254 = vector.extract_strided_slice %250 {offsets = [0, 0], sizes = [8, 128], strides = [1, 1]} : vector<8x256xf32> to vector<8x128xf32>
    %255 = arith.addf %253, %254 : vector<8x128xf32>
    %c15_i32_89 = arith.constant 15 : i32
    %256 = arith.subi %c15_i32_89, %c3_i32 : i32
    %257 = arith.index_cast %256 : i32 to index
    %c0_90 = arith.constant 0 : index
    %c0_91 = arith.constant 0 : index
    %258 = vector.load %arg2[%257, %c0_90, %c0_91] : memref<16x8x128xf32, #tpu.memory_space<vmem>>, vector<1x8x128xf32>
    %259 = vector.shape_cast %258 : vector<1x8x128xf32> to vector<8x128xf32>
    %260 = vector.extract_strided_slice %250 {offsets = [0, 128], sizes = [8, 128], strides = [1, 1]} : vector<8x256xf32> to vector<8x128xf32>
    %261 = arith.addf %259, %260 : vector<8x128xf32>
    %262 = vector.extract_strided_slice %247 {offsets = [0, 0], sizes = [8, 32], strides = [1, 1]} : vector<8x64xf32> to vector<8x32xf32>
    %263 = vector.extract_strided_slice %255 {offsets = [0, 0], sizes = [8, 32], strides = [1, 1]} : vector<8x128xf32> to vector<8x32xf32>
    %264 = arith.negf %263 : vector<8x32xf32>
    %265 = math.exp %264 : vector<8x32xf32>
    %cst_92 = arith.constant 1.000000e+00 : f32
    %266 = vector.broadcast %cst_92 : f32 to vector<8x32xf32>
    %267 = arith.addf %266, %265 : vector<8x32xf32>
    %268 = arith.divf %266, %267 : vector<8x32xf32>
    %269 = vector.extract_strided_slice %255 {offsets = [0, 32], sizes = [8, 32], strides = [1, 1]} : vector<8x128xf32> to vector<8x32xf32>
    %270 = arith.negf %269 : vector<8x32xf32>
    %271 = math.exp %270 : vector<8x32xf32>
    %cst_93 = arith.constant 1.000000e+00 : f32
    %272 = vector.broadcast %cst_93 : f32 to vector<8x32xf32>
    %273 = arith.addf %272, %271 : vector<8x32xf32>
    %274 = arith.divf %272, %273 : vector<8x32xf32>
    %275 = vector.extract_strided_slice %255 {offsets = [0, 64], sizes = [8, 32], strides = [1, 1]} : vector<8x128xf32> to vector<8x32xf32>
    %276 = math.tanh %275 : vector<8x32xf32>
    %277 = vector.extract_strided_slice %255 {offsets = [0, 96], sizes = [8, 32], strides = [1, 1]} : vector<8x128xf32> to vector<8x32xf32>
    %278 = arith.negf %277 : vector<8x32xf32>
    %279 = math.exp %278 : vector<8x32xf32>
    %cst_94 = arith.constant 1.000000e+00 : f32
    %280 = vector.broadcast %cst_94 : f32 to vector<8x32xf32>
    %281 = arith.addf %280, %279 : vector<8x32xf32>
    %282 = arith.divf %280, %281 : vector<8x32xf32>
    %283 = arith.mulf %274, %262 : vector<8x32xf32>
    %284 = arith.mulf %268, %276 : vector<8x32xf32>
    %285 = arith.addf %283, %284 : vector<8x32xf32>
    %286 = math.tanh %285 : vector<8x32xf32>
    %287 = arith.mulf %282, %286 : vector<8x32xf32>
    %288 = vector.extract_strided_slice %247 {offsets = [0, 32], sizes = [8, 32], strides = [1, 1]} : vector<8x64xf32> to vector<8x32xf32>
    %289 = vector.extract_strided_slice %261 {offsets = [0, 0], sizes = [8, 32], strides = [1, 1]} : vector<8x128xf32> to vector<8x32xf32>
    %290 = arith.negf %289 : vector<8x32xf32>
    %291 = math.exp %290 : vector<8x32xf32>
    %cst_95 = arith.constant 1.000000e+00 : f32
    %292 = vector.broadcast %cst_95 : f32 to vector<8x32xf32>
    %293 = arith.addf %292, %291 : vector<8x32xf32>
    %294 = arith.divf %292, %293 : vector<8x32xf32>
    %295 = vector.extract_strided_slice %261 {offsets = [0, 32], sizes = [8, 32], strides = [1, 1]} : vector<8x128xf32> to vector<8x32xf32>
    %296 = arith.negf %295 : vector<8x32xf32>
    %297 = math.exp %296 : vector<8x32xf32>
    %cst_96 = arith.constant 1.000000e+00 : f32
    %298 = vector.broadcast %cst_96 : f32 to vector<8x32xf32>
    %299 = arith.addf %298, %297 : vector<8x32xf32>
    %300 = arith.divf %298, %299 : vector<8x32xf32>
    %301 = vector.extract_strided_slice %261 {offsets = [0, 64], sizes = [8, 32], strides = [1, 1]} : vector<8x128xf32> to vector<8x32xf32>
    %302 = math.tanh %301 : vector<8x32xf32>
    %303 = vector.extract_strided_slice %261 {offsets = [0, 96], sizes = [8, 32], strides = [1, 1]} : vector<8x128xf32> to vector<8x32xf32>
    %304 = arith.negf %303 : vector<8x32xf32>
    %305 = math.exp %304 : vector<8x32xf32>
    %cst_97 = arith.constant 1.000000e+00 : f32
    %306 = vector.broadcast %cst_97 : f32 to vector<8x32xf32>
    %307 = arith.addf %306, %305 : vector<8x32xf32>
    %308 = arith.divf %306, %307 : vector<8x32xf32>
    %309 = arith.mulf %300, %288 : vector<8x32xf32>
    %310 = arith.mulf %294, %302 : vector<8x32xf32>
    %311 = arith.addf %309, %310 : vector<8x32xf32>
    %312 = math.tanh %311 : vector<8x32xf32>
    %313 = arith.mulf %308, %312 : vector<8x32xf32>
    %314 = tpu.concatenate %287, %313 in 1 : vector<8x32xf32>, vector<8x32xf32> -> vector<8x64xf32>
    %c0_98 = arith.constant 0 : index
    %c0_99 = arith.constant 0 : index
    %315 = vector.load %arg6[%c0_98, %c0_99] : memref<8x64xf32, #tpu.memory_space<vmem>>, vector<8x64xf32>
    tpu.vector_store %arg6[%c0_98, %c0_99], %314 {strides = array<i32>} : memref<8x64xf32, #tpu.memory_space<vmem>>, vector<8x64xf32>,
    %316 = tpu.concatenate %285, %311 in 1 : vector<8x32xf32>, vector<8x32xf32> -> vector<8x64xf32>
    %c0_100 = arith.constant 0 : index
    %c0_101 = arith.constant 0 : index
    %317 = vector.load %arg7[%c0_100, %c0_101] : memref<8x64xf32, #tpu.memory_space<vmem>>, vector<8x64xf32>
    tpu.vector_store %arg7[%c0_100, %c0_101], %316 {strides = array<i32>} : memref<8x64xf32, #tpu.memory_space<vmem>>, vector<8x64xf32>,
    %318 = arith.index_cast %c3_i32 : i32 to index
    %c0_102 = arith.constant 0 : index
    %c0_103 = arith.constant 0 : index
    %319 = vector.load %arg4[%318, %c0_102, %c0_103] : memref<16x8x32xf32, #tpu.memory_space<vmem>>, vector<1x8x32xf32>
    %320 = vector.shape_cast %319 : vector<1x8x32xf32> to vector<8x32xf32>
    %321 = vector.shape_cast %287 : vector<8x32xf32> to vector<1x8x32xf32>
    tpu.vector_store %arg4[%318, %c0_102, %c0_103], %321 {strides = array<i32>} : memref<16x8x32xf32, #tpu.memory_space<vmem>>, vector<1x8x32xf32>,
    %c15_i32_104 = arith.constant 15 : i32
    %322 = arith.subi %c15_i32_104, %c3_i32 : i32
    %323 = arith.index_cast %322 : i32 to index
    %c0_105 = arith.constant 0 : index
    %c0_106 = arith.constant 0 : index
    %324 = vector.load %arg5[%323, %c0_105, %c0_106] : memref<16x8x32xf32, #tpu.memory_space<vmem>>, vector<1x8x32xf32>
    %325 = vector.shape_cast %324 : vector<1x8x32xf32> to vector<8x32xf32>
    %326 = vector.shape_cast %313 : vector<8x32xf32> to vector<1x8x32xf32>
    tpu.vector_store %arg5[%323, %c0_105, %c0_106], %326 {strides = array<i32>} : memref<16x8x32xf32, #tpu.memory_space<vmem>>, vector<1x8x32xf32>,
    %c4_i32 = arith.constant 4 : i32
    %c0_107 = arith.constant 0 : index
    %c0_108 = arith.constant 0 : index
    %327 = vector.load %arg6[%c0_107, %c0_108] : memref<8x64xf32, #tpu.memory_space<vmem>>, vector<8x64xf32>
    %c0_109 = arith.constant 0 : index
    %c0_110 = arith.constant 0 : index
    %328 = vector.load %arg7[%c0_109, %c0_110] : memref<8x64xf32, #tpu.memory_space<vmem>>, vector<8x64xf32>
    %329 = arith.truncf %327 : vector<8x64xf32> to vector<8x64xbf16>
    %c0_111 = arith.constant 0 : index
    %c0_112 = arith.constant 0 : index
    %330 = vector.load %arg3[%c0_111, %c0_112] : memref<64x256xbf16, #tpu.memory_space<vmem>>, vector<64x256xbf16>
    %cst_113 = arith.constant dense<0.000000e+00> : vector<8x256xf32>
    %331 = tpu.matmul %329, %330, %cst_113 {dimension_numbers = #tpu.dot_dimension_numbers<[1], [0], [0], [1], [0, 0, 1, 1], [], []>} : vector<8x64xbf16>, vector<64x256xbf16>, vector<8x256xf32> -> vector<8x256xf32>
    %332 = arith.index_cast %c4_i32 : i32 to index
    %c0_114 = arith.constant 0 : index
    %c0_115 = arith.constant 0 : index
    %333 = vector.load %arg1[%332, %c0_114, %c0_115] : memref<16x8x128xf32, #tpu.memory_space<vmem>>, vector<1x8x128xf32>
    %334 = vector.shape_cast %333 : vector<1x8x128xf32> to vector<8x128xf32>
    %335 = vector.extract_strided_slice %331 {offsets = [0, 0], sizes = [8, 128], strides = [1, 1]} : vector<8x256xf32> to vector<8x128xf32>
    %336 = arith.addf %334, %335 : vector<8x128xf32>
    %c15_i32_116 = arith.constant 15 : i32
    %337 = arith.subi %c15_i32_116, %c4_i32 : i32
    %338 = arith.index_cast %337 : i32 to index
    %c0_117 = arith.constant 0 : index
    %c0_118 = arith.constant 0 : index
    %339 = vector.load %arg2[%338, %c0_117, %c0_118] : memref<16x8x128xf32, #tpu.memory_space<vmem>>, vector<1x8x128xf32>
    %340 = vector.shape_cast %339 : vector<1x8x128xf32> to vector<8x128xf32>
    %341 = vector.extract_strided_slice %331 {offsets = [0, 128], sizes = [8, 128], strides = [1, 1]} : vector<8x256xf32> to vector<8x128xf32>
    %342 = arith.addf %340, %341 : vector<8x128xf32>
    %343 = vector.extract_strided_slice %328 {offsets = [0, 0], sizes = [8, 32], strides = [1, 1]} : vector<8x64xf32> to vector<8x32xf32>
    %344 = vector.extract_strided_slice %336 {offsets = [0, 0], sizes = [8, 32], strides = [1, 1]} : vector<8x128xf32> to vector<8x32xf32>
    %345 = arith.negf %344 : vector<8x32xf32>
    %346 = math.exp %345 : vector<8x32xf32>
    %cst_119 = arith.constant 1.000000e+00 : f32
    %347 = vector.broadcast %cst_119 : f32 to vector<8x32xf32>
    %348 = arith.addf %347, %346 : vector<8x32xf32>
    %349 = arith.divf %347, %348 : vector<8x32xf32>
    %350 = vector.extract_strided_slice %336 {offsets = [0, 32], sizes = [8, 32], strides = [1, 1]} : vector<8x128xf32> to vector<8x32xf32>
    %351 = arith.negf %350 : vector<8x32xf32>
    %352 = math.exp %351 : vector<8x32xf32>
    %cst_120 = arith.constant 1.000000e+00 : f32
    %353 = vector.broadcast %cst_120 : f32 to vector<8x32xf32>
    %354 = arith.addf %353, %352 : vector<8x32xf32>
    %355 = arith.divf %353, %354 : vector<8x32xf32>
    %356 = vector.extract_strided_slice %336 {offsets = [0, 64], sizes = [8, 32], strides = [1, 1]} : vector<8x128xf32> to vector<8x32xf32>
    %357 = math.tanh %356 : vector<8x32xf32>
    %358 = vector.extract_strided_slice %336 {offsets = [0, 96], sizes = [8, 32], strides = [1, 1]} : vector<8x128xf32> to vector<8x32xf32>
    %359 = arith.negf %358 : vector<8x32xf32>
    %360 = math.exp %359 : vector<8x32xf32>
    %cst_121 = arith.constant 1.000000e+00 : f32
    %361 = vector.broadcast %cst_121 : f32 to vector<8x32xf32>
    %362 = arith.addf %361, %360 : vector<8x32xf32>
    %363 = arith.divf %361, %362 : vector<8x32xf32>
    %364 = arith.mulf %355, %343 : vector<8x32xf32>
    %365 = arith.mulf %349, %357 : vector<8x32xf32>
    %366 = arith.addf %364, %365 : vector<8x32xf32>
    %367 = math.tanh %366 : vector<8x32xf32>
    %368 = arith.mulf %363, %367 : vector<8x32xf32>
    %369 = vector.extract_strided_slice %328 {offsets = [0, 32], sizes = [8, 32], strides = [1, 1]} : vector<8x64xf32> to vector<8x32xf32>
    %370 = vector.extract_strided_slice %342 {offsets = [0, 0], sizes = [8, 32], strides = [1, 1]} : vector<8x128xf32> to vector<8x32xf32>
    %371 = arith.negf %370 : vector<8x32xf32>
    %372 = math.exp %371 : vector<8x32xf32>
    %cst_122 = arith.constant 1.000000e+00 : f32
    %373 = vector.broadcast %cst_122 : f32 to vector<8x32xf32>
    %374 = arith.addf %373, %372 : vector<8x32xf32>
    %375 = arith.divf %373, %374 : vector<8x32xf32>
    %376 = vector.extract_strided_slice %342 {offsets = [0, 32], sizes = [8, 32], strides = [1, 1]} : vector<8x128xf32> to vector<8x32xf32>
    %377 = arith.negf %376 : vector<8x32xf32>
    %378 = math.exp %377 : vector<8x32xf32>
    %cst_123 = arith.constant 1.000000e+00 : f32
    %379 = vector.broadcast %cst_123 : f32 to vector<8x32xf32>
    %380 = arith.addf %379, %378 : vector<8x32xf32>
    %381 = arith.divf %379, %380 : vector<8x32xf32>
    %382 = vector.extract_strided_slice %342 {offsets = [0, 64], sizes = [8, 32], strides = [1, 1]} : vector<8x128xf32> to vector<8x32xf32>
    %383 = math.tanh %382 : vector<8x32xf32>
    %384 = vector.extract_strided_slice %342 {offsets = [0, 96], sizes = [8, 32], strides = [1, 1]} : vector<8x128xf32> to vector<8x32xf32>
    %385 = arith.negf %384 : vector<8x32xf32>
    %386 = math.exp %385 : vector<8x32xf32>
    %cst_124 = arith.constant 1.000000e+00 : f32
    %387 = vector.broadcast %cst_124 : f32 to vector<8x32xf32>
    %388 = arith.addf %387, %386 : vector<8x32xf32>
    %389 = arith.divf %387, %388 : vector<8x32xf32>
    %390 = arith.mulf %381, %369 : vector<8x32xf32>
    %391 = arith.mulf %375, %383 : vector<8x32xf32>
    %392 = arith.addf %390, %391 : vector<8x32xf32>
    %393 = math.tanh %392 : vector<8x32xf32>
    %394 = arith.mulf %389, %393 : vector<8x32xf32>
    %395 = tpu.concatenate %368, %394 in 1 : vector<8x32xf32>, vector<8x32xf32> -> vector<8x64xf32>
    %c0_125 = arith.constant 0 : index
    %c0_126 = arith.constant 0 : index
    %396 = vector.load %arg6[%c0_125, %c0_126] : memref<8x64xf32, #tpu.memory_space<vmem>>, vector<8x64xf32>
    tpu.vector_store %arg6[%c0_125, %c0_126], %395 {strides = array<i32>} : memref<8x64xf32, #tpu.memory_space<vmem>>, vector<8x64xf32>,
    %397 = tpu.concatenate %366, %392 in 1 : vector<8x32xf32>, vector<8x32xf32> -> vector<8x64xf32>
    %c0_127 = arith.constant 0 : index
    %c0_128 = arith.constant 0 : index
    %398 = vector.load %arg7[%c0_127, %c0_128] : memref<8x64xf32, #tpu.memory_space<vmem>>, vector<8x64xf32>
    tpu.vector_store %arg7[%c0_127, %c0_128], %397 {strides = array<i32>} : memref<8x64xf32, #tpu.memory_space<vmem>>, vector<8x64xf32>,
    %399 = arith.index_cast %c4_i32 : i32 to index
    %c0_129 = arith.constant 0 : index
    %c0_130 = arith.constant 0 : index
    %400 = vector.load %arg4[%399, %c0_129, %c0_130] : memref<16x8x32xf32, #tpu.memory_space<vmem>>, vector<1x8x32xf32>
    %401 = vector.shape_cast %400 : vector<1x8x32xf32> to vector<8x32xf32>
    %402 = vector.shape_cast %368 : vector<8x32xf32> to vector<1x8x32xf32>
    tpu.vector_store %arg4[%399, %c0_129, %c0_130], %402 {strides = array<i32>} : memref<16x8x32xf32, #tpu.memory_space<vmem>>, vector<1x8x32xf32>,
    %c15_i32_131 = arith.constant 15 : i32
    %403 = arith.subi %c15_i32_131, %c4_i32 : i32
    %404 = arith.index_cast %403 : i32 to index
    %c0_132 = arith.constant 0 : index
    %c0_133 = arith.constant 0 : index
    %405 = vector.load %arg5[%404, %c0_132, %c0_133] : memref<16x8x32xf32, #tpu.memory_space<vmem>>, vector<1x8x32xf32>
    %406 = vector.shape_cast %405 : vector<1x8x32xf32> to vector<8x32xf32>
    %407 = vector.shape_cast %394 : vector<8x32xf32> to vector<1x8x32xf32>
    tpu.vector_store %arg5[%404, %c0_132, %c0_133], %407 {strides = array<i32>} : memref<16x8x32xf32, #tpu.memory_space<vmem>>, vector<1x8x32xf32>,
    %c5_i32 = arith.constant 5 : i32
    %c0_134 = arith.constant 0 : index
    %c0_135 = arith.constant 0 : index
    %408 = vector.load %arg6[%c0_134, %c0_135] : memref<8x64xf32, #tpu.memory_space<vmem>>, vector<8x64xf32>
    %c0_136 = arith.constant 0 : index
    %c0_137 = arith.constant 0 : index
    %409 = vector.load %arg7[%c0_136, %c0_137] : memref<8x64xf32, #tpu.memory_space<vmem>>, vector<8x64xf32>
    %410 = arith.truncf %408 : vector<8x64xf32> to vector<8x64xbf16>
    %c0_138 = arith.constant 0 : index
    %c0_139 = arith.constant 0 : index
    %411 = vector.load %arg3[%c0_138, %c0_139] : memref<64x256xbf16, #tpu.memory_space<vmem>>, vector<64x256xbf16>
    %cst_140 = arith.constant dense<0.000000e+00> : vector<8x256xf32>
    %412 = tpu.matmul %410, %411, %cst_140 {dimension_numbers = #tpu.dot_dimension_numbers<[1], [0], [0], [1], [0, 0, 1, 1], [], []>} : vector<8x64xbf16>, vector<64x256xbf16>, vector<8x256xf32> -> vector<8x256xf32>
    %413 = arith.index_cast %c5_i32 : i32 to index
    %c0_141 = arith.constant 0 : index
    %c0_142 = arith.constant 0 : index
    %414 = vector.load %arg1[%413, %c0_141, %c0_142] : memref<16x8x128xf32, #tpu.memory_space<vmem>>, vector<1x8x128xf32>
    %415 = vector.shape_cast %414 : vector<1x8x128xf32> to vector<8x128xf32>
    %416 = vector.extract_strided_slice %412 {offsets = [0, 0], sizes = [8, 128], strides = [1, 1]} : vector<8x256xf32> to vector<8x128xf32>
    %417 = arith.addf %415, %416 : vector<8x128xf32>
    %c15_i32_143 = arith.constant 15 : i32
    %418 = arith.subi %c15_i32_143, %c5_i32 : i32
    %419 = arith.index_cast %418 : i32 to index
    %c0_144 = arith.constant 0 : index
    %c0_145 = arith.constant 0 : index
    %420 = vector.load %arg2[%419, %c0_144, %c0_145] : memref<16x8x128xf32, #tpu.memory_space<vmem>>, vector<1x8x128xf32>
    %421 = vector.shape_cast %420 : vector<1x8x128xf32> to vector<8x128xf32>
    %422 = vector.extract_strided_slice %412 {offsets = [0, 128], sizes = [8, 128], strides = [1, 1]} : vector<8x256xf32> to vector<8x128xf32>
    %423 = arith.addf %421, %422 : vector<8x128xf32>
    %424 = vector.extract_strided_slice %409 {offsets = [0, 0], sizes = [8, 32], strides = [1, 1]} : vector<8x64xf32> to vector<8x32xf32>
    %425 = vector.extract_strided_slice %417 {offsets = [0, 0], sizes = [8, 32], strides = [1, 1]} : vector<8x128xf32> to vector<8x32xf32>
    %426 = arith.negf %425 : vector<8x32xf32>
    %427 = math.exp %426 : vector<8x32xf32>
    %cst_146 = arith.constant 1.000000e+00 : f32
    %428 = vector.broadcast %cst_146 : f32 to vector<8x32xf32>
    %429 = arith.addf %428, %427 : vector<8x32xf32>
    %430 = arith.divf %428, %429 : vector<8x32xf32>
    %431 = vector.extract_strided_slice %417 {offsets = [0, 32], sizes = [8, 32], strides = [1, 1]} : vector<8x128xf32> to vector<8x32xf32>
    %432 = arith.negf %431 : vector<8x32xf32>
    %433 = math.exp %432 : vector<8x32xf32>
    %cst_147 = arith.constant 1.000000e+00 : f32
    %434 = vector.broadcast %cst_147 : f32 to vector<8x32xf32>
    %435 = arith.addf %434, %433 : vector<8x32xf32>
    %436 = arith.divf %434, %435 : vector<8x32xf32>
    %437 = vector.extract_strided_slice %417 {offsets = [0, 64], sizes = [8, 32], strides = [1, 1]} : vector<8x128xf32> to vector<8x32xf32>
    %438 = math.tanh %437 : vector<8x32xf32>
    %439 = vector.extract_strided_slice %417 {offsets = [0, 96], sizes = [8, 32], strides = [1, 1]} : vector<8x128xf32> to vector<8x32xf32>
    %440 = arith.negf %439 : vector<8x32xf32>
    %441 = math.exp %440 : vector<8x32xf32>
    %cst_148 = arith.constant 1.000000e+00 : f32
    %442 = vector.broadcast %cst_148 : f32 to vector<8x32xf32>
    %443 = arith.addf %442, %441 : vector<8x32xf32>
    %444 = arith.divf %442, %443 : vector<8x32xf32>
    %445 = arith.mulf %436, %424 : vector<8x32xf32>
    %446 = arith.mulf %430, %438 : vector<8x32xf32>
    %447 = arith.addf %445, %446 : vector<8x32xf32>
    %448 = math.tanh %447 : vector<8x32xf32>
    %449 = arith.mulf %444, %448 : vector<8x32xf32>
    %450 = vector.extract_strided_slice %409 {offsets = [0, 32], sizes = [8, 32], strides = [1, 1]} : vector<8x64xf32> to vector<8x32xf32>
    %451 = vector.extract_strided_slice %423 {offsets = [0, 0], sizes = [8, 32], strides = [1, 1]} : vector<8x128xf32> to vector<8x32xf32>
    %452 = arith.negf %451 : vector<8x32xf32>
    %453 = math.exp %452 : vector<8x32xf32>
    %cst_149 = arith.constant 1.000000e+00 : f32
    %454 = vector.broadcast %cst_149 : f32 to vector<8x32xf32>
    %455 = arith.addf %454, %453 : vector<8x32xf32>
    %456 = arith.divf %454, %455 : vector<8x32xf32>
    %457 = vector.extract_strided_slice %423 {offsets = [0, 32], sizes = [8, 32], strides = [1, 1]} : vector<8x128xf32> to vector<8x32xf32>
    %458 = arith.negf %457 : vector<8x32xf32>
    %459 = math.exp %458 : vector<8x32xf32>
    %cst_150 = arith.constant 1.000000e+00 : f32
    %460 = vector.broadcast %cst_150 : f32 to vector<8x32xf32>
    %461 = arith.addf %460, %459 : vector<8x32xf32>
    %462 = arith.divf %460, %461 : vector<8x32xf32>
    %463 = vector.extract_strided_slice %423 {offsets = [0, 64], sizes = [8, 32], strides = [1, 1]} : vector<8x128xf32> to vector<8x32xf32>
    %464 = math.tanh %463 : vector<8x32xf32>
    %465 = vector.extract_strided_slice %423 {offsets = [0, 96], sizes = [8, 32], strides = [1, 1]} : vector<8x128xf32> to vector<8x32xf32>
    %466 = arith.negf %465 : vector<8x32xf32>
    %467 = math.exp %466 : vector<8x32xf32>
    %cst_151 = arith.constant 1.000000e+00 : f32
    %468 = vector.broadcast %cst_151 : f32 to vector<8x32xf32>
    %469 = arith.addf %468, %467 : vector<8x32xf32>
    %470 = arith.divf %468, %469 : vector<8x32xf32>
    %471 = arith.mulf %462, %450 : vector<8x32xf32>
    %472 = arith.mulf %456, %464 : vector<8x32xf32>
    %473 = arith.addf %471, %472 : vector<8x32xf32>
    %474 = math.tanh %473 : vector<8x32xf32>
    %475 = arith.mulf %470, %474 : vector<8x32xf32>
    %476 = tpu.concatenate %449, %475 in 1 : vector<8x32xf32>, vector<8x32xf32> -> vector<8x64xf32>
    %c0_152 = arith.constant 0 : index
    %c0_153 = arith.constant 0 : index
    %477 = vector.load %arg6[%c0_152, %c0_153] : memref<8x64xf32, #tpu.memory_space<vmem>>, vector<8x64xf32>
    tpu.vector_store %arg6[%c0_152, %c0_153], %476 {strides = array<i32>} : memref<8x64xf32, #tpu.memory_space<vmem>>, vector<8x64xf32>,
    %478 = tpu.concatenate %447, %473 in 1 : vector<8x32xf32>, vector<8x32xf32> -> vector<8x64xf32>
    %c0_154 = arith.constant 0 : index
    %c0_155 = arith.constant 0 : index
    %479 = vector.load %arg7[%c0_154, %c0_155] : memref<8x64xf32, #tpu.memory_space<vmem>>, vector<8x64xf32>
    tpu.vector_store %arg7[%c0_154, %c0_155], %478 {strides = array<i32>} : memref<8x64xf32, #tpu.memory_space<vmem>>, vector<8x64xf32>,
    %480 = arith.index_cast %c5_i32 : i32 to index
    %c0_156 = arith.constant 0 : index
    %c0_157 = arith.constant 0 : index
    %481 = vector.load %arg4[%480, %c0_156, %c0_157] : memref<16x8x32xf32, #tpu.memory_space<vmem>>, vector<1x8x32xf32>
    %482 = vector.shape_cast %481 : vector<1x8x32xf32> to vector<8x32xf32>
    %483 = vector.shape_cast %449 : vector<8x32xf32> to vector<1x8x32xf32>
    tpu.vector_store %arg4[%480, %c0_156, %c0_157], %483 {strides = array<i32>} : memref<16x8x32xf32, #tpu.memory_space<vmem>>, vector<1x8x32xf32>,
    %c15_i32_158 = arith.constant 15 : i32
    %484 = arith.subi %c15_i32_158, %c5_i32 : i32
    %485 = arith.index_cast %484 : i32 to index
    %c0_159 = arith.constant 0 : index
    %c0_160 = arith.constant 0 : index
    %486 = vector.load %arg5[%485, %c0_159, %c0_160] : memref<16x8x32xf32, #tpu.memory_space<vmem>>, vector<1x8x32xf32>
    %487 = vector.shape_cast %486 : vector<1x8x32xf32> to vector<8x32xf32>
    %488 = vector.shape_cast %475 : vector<8x32xf32> to vector<1x8x32xf32>
    tpu.vector_store %arg5[%485, %c0_159, %c0_160], %488 {strides = array<i32>} : memref<16x8x32xf32, #tpu.memory_space<vmem>>, vector<1x8x32xf32>,
    %c6_i32 = arith.constant 6 : i32
    %c0_161 = arith.constant 0 : index
    %c0_162 = arith.constant 0 : index
    %489 = vector.load %arg6[%c0_161, %c0_162] : memref<8x64xf32, #tpu.memory_space<vmem>>, vector<8x64xf32>
    %c0_163 = arith.constant 0 : index
    %c0_164 = arith.constant 0 : index
    %490 = vector.load %arg7[%c0_163, %c0_164] : memref<8x64xf32, #tpu.memory_space<vmem>>, vector<8x64xf32>
    %491 = arith.truncf %489 : vector<8x64xf32> to vector<8x64xbf16>
    %c0_165 = arith.constant 0 : index
    %c0_166 = arith.constant 0 : index
    %492 = vector.load %arg3[%c0_165, %c0_166] : memref<64x256xbf16, #tpu.memory_space<vmem>>, vector<64x256xbf16>
    %cst_167 = arith.constant dense<0.000000e+00> : vector<8x256xf32>
    %493 = tpu.matmul %491, %492, %cst_167 {dimension_numbers = #tpu.dot_dimension_numbers<[1], [0], [0], [1], [0, 0, 1, 1], [], []>} : vector<8x64xbf16>, vector<64x256xbf16>, vector<8x256xf32> -> vector<8x256xf32>
    %494 = arith.index_cast %c6_i32 : i32 to index
    %c0_168 = arith.constant 0 : index
    %c0_169 = arith.constant 0 : index
    %495 = vector.load %arg1[%494, %c0_168, %c0_169] : memref<16x8x128xf32, #tpu.memory_space<vmem>>, vector<1x8x128xf32>
    %496 = vector.shape_cast %495 : vector<1x8x128xf32> to vector<8x128xf32>
    %497 = vector.extract_strided_slice %493 {offsets = [0, 0], sizes = [8, 128], strides = [1, 1]} : vector<8x256xf32> to vector<8x128xf32>
    %498 = arith.addf %496, %497 : vector<8x128xf32>
    %c15_i32_170 = arith.constant 15 : i32
    %499 = arith.subi %c15_i32_170, %c6_i32 : i32
    %500 = arith.index_cast %499 : i32 to index
    %c0_171 = arith.constant 0 : index
    %c0_172 = arith.constant 0 : index
    %501 = vector.load %arg2[%500, %c0_171, %c0_172] : memref<16x8x128xf32, #tpu.memory_space<vmem>>, vector<1x8x128xf32>
    %502 = vector.shape_cast %501 : vector<1x8x128xf32> to vector<8x128xf32>
    %503 = vector.extract_strided_slice %493 {offsets = [0, 128], sizes = [8, 128], strides = [1, 1]} : vector<8x256xf32> to vector<8x128xf32>
    %504 = arith.addf %502, %503 : vector<8x128xf32>
    %505 = vector.extract_strided_slice %490 {offsets = [0, 0], sizes = [8, 32], strides = [1, 1]} : vector<8x64xf32> to vector<8x32xf32>
    %506 = vector.extract_strided_slice %498 {offsets = [0, 0], sizes = [8, 32], strides = [1, 1]} : vector<8x128xf32> to vector<8x32xf32>
    %507 = arith.negf %506 : vector<8x32xf32>
    %508 = math.exp %507 : vector<8x32xf32>
    %cst_173 = arith.constant 1.000000e+00 : f32
    %509 = vector.broadcast %cst_173 : f32 to vector<8x32xf32>
    %510 = arith.addf %509, %508 : vector<8x32xf32>
    %511 = arith.divf %509, %510 : vector<8x32xf32>
    %512 = vector.extract_strided_slice %498 {offsets = [0, 32], sizes = [8, 32], strides = [1, 1]} : vector<8x128xf32> to vector<8x32xf32>
    %513 = arith.negf %512 : vector<8x32xf32>
    %514 = math.exp %513 : vector<8x32xf32>
    %cst_174 = arith.constant 1.000000e+00 : f32
    %515 = vector.broadcast %cst_174 : f32 to vector<8x32xf32>
    %516 = arith.addf %515, %514 : vector<8x32xf32>
    %517 = arith.divf %515, %516 : vector<8x32xf32>
    %518 = vector.extract_strided_slice %498 {offsets = [0, 64], sizes = [8, 32], strides = [1, 1]} : vector<8x128xf32> to vector<8x32xf32>
    %519 = math.tanh %518 : vector<8x32xf32>
    %520 = vector.extract_strided_slice %498 {offsets = [0, 96], sizes = [8, 32], strides = [1, 1]} : vector<8x128xf32> to vector<8x32xf32>
    %521 = arith.negf %520 : vector<8x32xf32>
    %522 = math.exp %521 : vector<8x32xf32>
    %cst_175 = arith.constant 1.000000e+00 : f32
    %523 = vector.broadcast %cst_175 : f32 to vector<8x32xf32>
    %524 = arith.addf %523, %522 : vector<8x32xf32>
    %525 = arith.divf %523, %524 : vector<8x32xf32>
    %526 = arith.mulf %517, %505 : vector<8x32xf32>
    %527 = arith.mulf %511, %519 : vector<8x32xf32>
    %528 = arith.addf %526, %527 : vector<8x32xf32>
    %529 = math.tanh %528 : vector<8x32xf32>
    %530 = arith.mulf %525, %529 : vector<8x32xf32>
    %531 = vector.extract_strided_slice %490 {offsets = [0, 32], sizes = [8, 32], strides = [1, 1]} : vector<8x64xf32> to vector<8x32xf32>
    %532 = vector.extract_strided_slice %504 {offsets = [0, 0], sizes = [8, 32], strides = [1, 1]} : vector<8x128xf32> to vector<8x32xf32>
    %533 = arith.negf %532 : vector<8x32xf32>
    %534 = math.exp %533 : vector<8x32xf32>
    %cst_176 = arith.constant 1.000000e+00 : f32
    %535 = vector.broadcast %cst_176 : f32 to vector<8x32xf32>
    %536 = arith.addf %535, %534 : vector<8x32xf32>
    %537 = arith.divf %535, %536 : vector<8x32xf32>
    %538 = vector.extract_strided_slice %504 {offsets = [0, 32], sizes = [8, 32], strides = [1, 1]} : vector<8x128xf32> to vector<8x32xf32>
    %539 = arith.negf %538 : vector<8x32xf32>
    %540 = math.exp %539 : vector<8x32xf32>
    %cst_177 = arith.constant 1.000000e+00 : f32
    %541 = vector.broadcast %cst_177 : f32 to vector<8x32xf32>
    %542 = arith.addf %541, %540 : vector<8x32xf32>
    %543 = arith.divf %541, %542 : vector<8x32xf32>
    %544 = vector.extract_strided_slice %504 {offsets = [0, 64], sizes = [8, 32], strides = [1, 1]} : vector<8x128xf32> to vector<8x32xf32>
    %545 = math.tanh %544 : vector<8x32xf32>
    %546 = vector.extract_strided_slice %504 {offsets = [0, 96], sizes = [8, 32], strides = [1, 1]} : vector<8x128xf32> to vector<8x32xf32>
    %547 = arith.negf %546 : vector<8x32xf32>
    %548 = math.exp %547 : vector<8x32xf32>
    %cst_178 = arith.constant 1.000000e+00 : f32
    %549 = vector.broadcast %cst_178 : f32 to vector<8x32xf32>
    %550 = arith.addf %549, %548 : vector<8x32xf32>
    %551 = arith.divf %549, %550 : vector<8x32xf32>
    %552 = arith.mulf %543, %531 : vector<8x32xf32>
    %553 = arith.mulf %537, %545 : vector<8x32xf32>
    %554 = arith.addf %552, %553 : vector<8x32xf32>
    %555 = math.tanh %554 : vector<8x32xf32>
    %556 = arith.mulf %551, %555 : vector<8x32xf32>
    %557 = tpu.concatenate %530, %556 in 1 : vector<8x32xf32>, vector<8x32xf32> -> vector<8x64xf32>
    %c0_179 = arith.constant 0 : index
    %c0_180 = arith.constant 0 : index
    %558 = vector.load %arg6[%c0_179, %c0_180] : memref<8x64xf32, #tpu.memory_space<vmem>>, vector<8x64xf32>
    tpu.vector_store %arg6[%c0_179, %c0_180], %557 {strides = array<i32>} : memref<8x64xf32, #tpu.memory_space<vmem>>, vector<8x64xf32>,
    %559 = tpu.concatenate %528, %554 in 1 : vector<8x32xf32>, vector<8x32xf32> -> vector<8x64xf32>
    %c0_181 = arith.constant 0 : index
    %c0_182 = arith.constant 0 : index
    %560 = vector.load %arg7[%c0_181, %c0_182] : memref<8x64xf32, #tpu.memory_space<vmem>>, vector<8x64xf32>
    tpu.vector_store %arg7[%c0_181, %c0_182], %559 {strides = array<i32>} : memref<8x64xf32, #tpu.memory_space<vmem>>, vector<8x64xf32>,
    %561 = arith.index_cast %c6_i32 : i32 to index
    %c0_183 = arith.constant 0 : index
    %c0_184 = arith.constant 0 : index
    %562 = vector.load %arg4[%561, %c0_183, %c0_184] : memref<16x8x32xf32, #tpu.memory_space<vmem>>, vector<1x8x32xf32>
    %563 = vector.shape_cast %562 : vector<1x8x32xf32> to vector<8x32xf32>
    %564 = vector.shape_cast %530 : vector<8x32xf32> to vector<1x8x32xf32>
    tpu.vector_store %arg4[%561, %c0_183, %c0_184], %564 {strides = array<i32>} : memref<16x8x32xf32, #tpu.memory_space<vmem>>, vector<1x8x32xf32>,
    %c15_i32_185 = arith.constant 15 : i32
    %565 = arith.subi %c15_i32_185, %c6_i32 : i32
    %566 = arith.index_cast %565 : i32 to index
    %c0_186 = arith.constant 0 : index
    %c0_187 = arith.constant 0 : index
    %567 = vector.load %arg5[%566, %c0_186, %c0_187] : memref<16x8x32xf32, #tpu.memory_space<vmem>>, vector<1x8x32xf32>
    %568 = vector.shape_cast %567 : vector<1x8x32xf32> to vector<8x32xf32>
    %569 = vector.shape_cast %556 : vector<8x32xf32> to vector<1x8x32xf32>
    tpu.vector_store %arg5[%566, %c0_186, %c0_187], %569 {strides = array<i32>} : memref<16x8x32xf32, #tpu.memory_space<vmem>>, vector<1x8x32xf32>,
    %c7_i32 = arith.constant 7 : i32
    %c0_188 = arith.constant 0 : index
    %c0_189 = arith.constant 0 : index
    %570 = vector.load %arg6[%c0_188, %c0_189] : memref<8x64xf32, #tpu.memory_space<vmem>>, vector<8x64xf32>
    %c0_190 = arith.constant 0 : index
    %c0_191 = arith.constant 0 : index
    %571 = vector.load %arg7[%c0_190, %c0_191] : memref<8x64xf32, #tpu.memory_space<vmem>>, vector<8x64xf32>
    %572 = arith.truncf %570 : vector<8x64xf32> to vector<8x64xbf16>
    %c0_192 = arith.constant 0 : index
    %c0_193 = arith.constant 0 : index
    %573 = vector.load %arg3[%c0_192, %c0_193] : memref<64x256xbf16, #tpu.memory_space<vmem>>, vector<64x256xbf16>
    %cst_194 = arith.constant dense<0.000000e+00> : vector<8x256xf32>
    %574 = tpu.matmul %572, %573, %cst_194 {dimension_numbers = #tpu.dot_dimension_numbers<[1], [0], [0], [1], [0, 0, 1, 1], [], []>} : vector<8x64xbf16>, vector<64x256xbf16>, vector<8x256xf32> -> vector<8x256xf32>
    %575 = arith.index_cast %c7_i32 : i32 to index
    %c0_195 = arith.constant 0 : index
    %c0_196 = arith.constant 0 : index
    %576 = vector.load %arg1[%575, %c0_195, %c0_196] : memref<16x8x128xf32, #tpu.memory_space<vmem>>, vector<1x8x128xf32>
    %577 = vector.shape_cast %576 : vector<1x8x128xf32> to vector<8x128xf32>
    %578 = vector.extract_strided_slice %574 {offsets = [0, 0], sizes = [8, 128], strides = [1, 1]} : vector<8x256xf32> to vector<8x128xf32>
    %579 = arith.addf %577, %578 : vector<8x128xf32>
    %c15_i32_197 = arith.constant 15 : i32
    %580 = arith.subi %c15_i32_197, %c7_i32 : i32
    %581 = arith.index_cast %580 : i32 to index
    %c0_198 = arith.constant 0 : index
    %c0_199 = arith.constant 0 : index
    %582 = vector.load %arg2[%581, %c0_198, %c0_199] : memref<16x8x128xf32, #tpu.memory_space<vmem>>, vector<1x8x128xf32>
    %583 = vector.shape_cast %582 : vector<1x8x128xf32> to vector<8x128xf32>
    %584 = vector.extract_strided_slice %574 {offsets = [0, 128], sizes = [8, 128], strides = [1, 1]} : vector<8x256xf32> to vector<8x128xf32>
    %585 = arith.addf %583, %584 : vector<8x128xf32>
    %586 = vector.extract_strided_slice %571 {offsets = [0, 0], sizes = [8, 32], strides = [1, 1]} : vector<8x64xf32> to vector<8x32xf32>
    %587 = vector.extract_strided_slice %579 {offsets = [0, 0], sizes = [8, 32], strides = [1, 1]} : vector<8x128xf32> to vector<8x32xf32>
    %588 = arith.negf %587 : vector<8x32xf32>
    %589 = math.exp %588 : vector<8x32xf32>
    %cst_200 = arith.constant 1.000000e+00 : f32
    %590 = vector.broadcast %cst_200 : f32 to vector<8x32xf32>
    %591 = arith.addf %590, %589 : vector<8x32xf32>
    %592 = arith.divf %590, %591 : vector<8x32xf32>
    %593 = vector.extract_strided_slice %579 {offsets = [0, 32], sizes = [8, 32], strides = [1, 1]} : vector<8x128xf32> to vector<8x32xf32>
    %594 = arith.negf %593 : vector<8x32xf32>
    %595 = math.exp %594 : vector<8x32xf32>
    %cst_201 = arith.constant 1.000000e+00 : f32
    %596 = vector.broadcast %cst_201 : f32 to vector<8x32xf32>
    %597 = arith.addf %596, %595 : vector<8x32xf32>
    %598 = arith.divf %596, %597 : vector<8x32xf32>
    %599 = vector.extract_strided_slice %579 {offsets = [0, 64], sizes = [8, 32], strides = [1, 1]} : vector<8x128xf32> to vector<8x32xf32>
    %600 = math.tanh %599 : vector<8x32xf32>
    %601 = vector.extract_strided_slice %579 {offsets = [0, 96], sizes = [8, 32], strides = [1, 1]} : vector<8x128xf32> to vector<8x32xf32>
    %602 = arith.negf %601 : vector<8x32xf32>
    %603 = math.exp %602 : vector<8x32xf32>
    %cst_202 = arith.constant 1.000000e+00 : f32
    %604 = vector.broadcast %cst_202 : f32 to vector<8x32xf32>
    %605 = arith.addf %604, %603 : vector<8x32xf32>
    %606 = arith.divf %604, %605 : vector<8x32xf32>
    %607 = arith.mulf %598, %586 : vector<8x32xf32>
    %608 = arith.mulf %592, %600 : vector<8x32xf32>
    %609 = arith.addf %607, %608 : vector<8x32xf32>
    %610 = math.tanh %609 : vector<8x32xf32>
    %611 = arith.mulf %606, %610 : vector<8x32xf32>
    %612 = vector.extract_strided_slice %571 {offsets = [0, 32], sizes = [8, 32], strides = [1, 1]} : vector<8x64xf32> to vector<8x32xf32>
    %613 = vector.extract_strided_slice %585 {offsets = [0, 0], sizes = [8, 32], strides = [1, 1]} : vector<8x128xf32> to vector<8x32xf32>
    %614 = arith.negf %613 : vector<8x32xf32>
    %615 = math.exp %614 : vector<8x32xf32>
    %cst_203 = arith.constant 1.000000e+00 : f32
    %616 = vector.broadcast %cst_203 : f32 to vector<8x32xf32>
    %617 = arith.addf %616, %615 : vector<8x32xf32>
    %618 = arith.divf %616, %617 : vector<8x32xf32>
    %619 = vector.extract_strided_slice %585 {offsets = [0, 32], sizes = [8, 32], strides = [1, 1]} : vector<8x128xf32> to vector<8x32xf32>
    %620 = arith.negf %619 : vector<8x32xf32>
    %621 = math.exp %620 : vector<8x32xf32>
    %cst_204 = arith.constant 1.000000e+00 : f32
    %622 = vector.broadcast %cst_204 : f32 to vector<8x32xf32>
    %623 = arith.addf %622, %621 : vector<8x32xf32>
    %624 = arith.divf %622, %623 : vector<8x32xf32>
    %625 = vector.extract_strided_slice %585 {offsets = [0, 64], sizes = [8, 32], strides = [1, 1]} : vector<8x128xf32> to vector<8x32xf32>
    %626 = math.tanh %625 : vector<8x32xf32>
    %627 = vector.extract_strided_slice %585 {offsets = [0, 96], sizes = [8, 32], strides = [1, 1]} : vector<8x128xf32> to vector<8x32xf32>
    %628 = arith.negf %627 : vector<8x32xf32>
    %629 = math.exp %628 : vector<8x32xf32>
    %cst_205 = arith.constant 1.000000e+00 : f32
    %630 = vector.broadcast %cst_205 : f32 to vector<8x32xf32>
    %631 = arith.addf %630, %629 : vector<8x32xf32>
    %632 = arith.divf %630, %631 : vector<8x32xf32>
    %633 = arith.mulf %624, %612 : vector<8x32xf32>
    %634 = arith.mulf %618, %626 : vector<8x32xf32>
    %635 = arith.addf %633, %634 : vector<8x32xf32>
    %636 = math.tanh %635 : vector<8x32xf32>
    %637 = arith.mulf %632, %636 : vector<8x32xf32>
    %638 = tpu.concatenate %611, %637 in 1 : vector<8x32xf32>, vector<8x32xf32> -> vector<8x64xf32>
    %c0_206 = arith.constant 0 : index
    %c0_207 = arith.constant 0 : index
    %639 = vector.load %arg6[%c0_206, %c0_207] : memref<8x64xf32, #tpu.memory_space<vmem>>, vector<8x64xf32>
    tpu.vector_store %arg6[%c0_206, %c0_207], %638 {strides = array<i32>} : memref<8x64xf32, #tpu.memory_space<vmem>>, vector<8x64xf32>,
    %640 = tpu.concatenate %609, %635 in 1 : vector<8x32xf32>, vector<8x32xf32> -> vector<8x64xf32>
    %c0_208 = arith.constant 0 : index
    %c0_209 = arith.constant 0 : index
    %641 = vector.load %arg7[%c0_208, %c0_209] : memref<8x64xf32, #tpu.memory_space<vmem>>, vector<8x64xf32>
    tpu.vector_store %arg7[%c0_208, %c0_209], %640 {strides = array<i32>} : memref<8x64xf32, #tpu.memory_space<vmem>>, vector<8x64xf32>,
    %642 = arith.index_cast %c7_i32 : i32 to index
    %c0_210 = arith.constant 0 : index
    %c0_211 = arith.constant 0 : index
    %643 = vector.load %arg4[%642, %c0_210, %c0_211] : memref<16x8x32xf32, #tpu.memory_space<vmem>>, vector<1x8x32xf32>
    %644 = vector.shape_cast %643 : vector<1x8x32xf32> to vector<8x32xf32>
    %645 = vector.shape_cast %611 : vector<8x32xf32> to vector<1x8x32xf32>
    tpu.vector_store %arg4[%642, %c0_210, %c0_211], %645 {strides = array<i32>} : memref<16x8x32xf32, #tpu.memory_space<vmem>>, vector<1x8x32xf32>,
    %c15_i32_212 = arith.constant 15 : i32
    %646 = arith.subi %c15_i32_212, %c7_i32 : i32
    %647 = arith.index_cast %646 : i32 to index
    %c0_213 = arith.constant 0 : index
    %c0_214 = arith.constant 0 : index
    %648 = vector.load %arg5[%647, %c0_213, %c0_214] : memref<16x8x32xf32, #tpu.memory_space<vmem>>, vector<1x8x32xf32>
    %649 = vector.shape_cast %648 : vector<1x8x32xf32> to vector<8x32xf32>
    %650 = vector.shape_cast %637 : vector<8x32xf32> to vector<1x8x32xf32>
    tpu.vector_store %arg5[%647, %c0_213, %c0_214], %650 {strides = array<i32>} : memref<16x8x32xf32, #tpu.memory_space<vmem>>, vector<1x8x32xf32>,
    %c8_i32 = arith.constant 8 : i32
    %c0_215 = arith.constant 0 : index
    %c0_216 = arith.constant 0 : index
    %651 = vector.load %arg6[%c0_215, %c0_216] : memref<8x64xf32, #tpu.memory_space<vmem>>, vector<8x64xf32>
    %c0_217 = arith.constant 0 : index
    %c0_218 = arith.constant 0 : index
    %652 = vector.load %arg7[%c0_217, %c0_218] : memref<8x64xf32, #tpu.memory_space<vmem>>, vector<8x64xf32>
    %653 = arith.truncf %651 : vector<8x64xf32> to vector<8x64xbf16>
    %c0_219 = arith.constant 0 : index
    %c0_220 = arith.constant 0 : index
    %654 = vector.load %arg3[%c0_219, %c0_220] : memref<64x256xbf16, #tpu.memory_space<vmem>>, vector<64x256xbf16>
    %cst_221 = arith.constant dense<0.000000e+00> : vector<8x256xf32>
    %655 = tpu.matmul %653, %654, %cst_221 {dimension_numbers = #tpu.dot_dimension_numbers<[1], [0], [0], [1], [0, 0, 1, 1], [], []>} : vector<8x64xbf16>, vector<64x256xbf16>, vector<8x256xf32> -> vector<8x256xf32>
    %656 = arith.index_cast %c8_i32 : i32 to index
    %c0_222 = arith.constant 0 : index
    %c0_223 = arith.constant 0 : index
    %657 = vector.load %arg1[%656, %c0_222, %c0_223] : memref<16x8x128xf32, #tpu.memory_space<vmem>>, vector<1x8x128xf32>
    %658 = vector.shape_cast %657 : vector<1x8x128xf32> to vector<8x128xf32>
    %659 = vector.extract_strided_slice %655 {offsets = [0, 0], sizes = [8, 128], strides = [1, 1]} : vector<8x256xf32> to vector<8x128xf32>
    %660 = arith.addf %658, %659 : vector<8x128xf32>
    %c15_i32_224 = arith.constant 15 : i32
    %661 = arith.subi %c15_i32_224, %c8_i32 : i32
    %662 = arith.index_cast %661 : i32 to index
    %c0_225 = arith.constant 0 : index
    %c0_226 = arith.constant 0 : index
    %663 = vector.load %arg2[%662, %c0_225, %c0_226] : memref<16x8x128xf32, #tpu.memory_space<vmem>>, vector<1x8x128xf32>
    %664 = vector.shape_cast %663 : vector<1x8x128xf32> to vector<8x128xf32>
    %665 = vector.extract_strided_slice %655 {offsets = [0, 128], sizes = [8, 128], strides = [1, 1]} : vector<8x256xf32> to vector<8x128xf32>
    %666 = arith.addf %664, %665 : vector<8x128xf32>
    %667 = vector.extract_strided_slice %652 {offsets = [0, 0], sizes = [8, 32], strides = [1, 1]} : vector<8x64xf32> to vector<8x32xf32>
    %668 = vector.extract_strided_slice %660 {offsets = [0, 0], sizes = [8, 32], strides = [1, 1]} : vector<8x128xf32> to vector<8x32xf32>
    %669 = arith.negf %668 : vector<8x32xf32>
    %670 = math.exp %669 : vector<8x32xf32>
    %cst_227 = arith.constant 1.000000e+00 : f32
    %671 = vector.broadcast %cst_227 : f32 to vector<8x32xf32>
    %672 = arith.addf %671, %670 : vector<8x32xf32>
    %673 = arith.divf %671, %672 : vector<8x32xf32>
    %674 = vector.extract_strided_slice %660 {offsets = [0, 32], sizes = [8, 32], strides = [1, 1]} : vector<8x128xf32> to vector<8x32xf32>
    %675 = arith.negf %674 : vector<8x32xf32>
    %676 = math.exp %675 : vector<8x32xf32>
    %cst_228 = arith.constant 1.000000e+00 : f32
    %677 = vector.broadcast %cst_228 : f32 to vector<8x32xf32>
    %678 = arith.addf %677, %676 : vector<8x32xf32>
    %679 = arith.divf %677, %678 : vector<8x32xf32>
    %680 = vector.extract_strided_slice %660 {offsets = [0, 64], sizes = [8, 32], strides = [1, 1]} : vector<8x128xf32> to vector<8x32xf32>
    %681 = math.tanh %680 : vector<8x32xf32>
    %682 = vector.extract_strided_slice %660 {offsets = [0, 96], sizes = [8, 32], strides = [1, 1]} : vector<8x128xf32> to vector<8x32xf32>
    %683 = arith.negf %682 : vector<8x32xf32>
    %684 = math.exp %683 : vector<8x32xf32>
    %cst_229 = arith.constant 1.000000e+00 : f32
    %685 = vector.broadcast %cst_229 : f32 to vector<8x32xf32>
    %686 = arith.addf %685, %684 : vector<8x32xf32>
    %687 = arith.divf %685, %686 : vector<8x32xf32>
    %688 = arith.mulf %679, %667 : vector<8x32xf32>
    %689 = arith.mulf %673, %681 : vector<8x32xf32>
    %690 = arith.addf %688, %689 : vector<8x32xf32>
    %691 = math.tanh %690 : vector<8x32xf32>
    %692 = arith.mulf %687, %691 : vector<8x32xf32>
    %693 = vector.extract_strided_slice %652 {offsets = [0, 32], sizes = [8, 32], strides = [1, 1]} : vector<8x64xf32> to vector<8x32xf32>
    %694 = vector.extract_strided_slice %666 {offsets = [0, 0], sizes = [8, 32], strides = [1, 1]} : vector<8x128xf32> to vector<8x32xf32>
    %695 = arith.negf %694 : vector<8x32xf32>
    %696 = math.exp %695 : vector<8x32xf32>
    %cst_230 = arith.constant 1.000000e+00 : f32
    %697 = vector.broadcast %cst_230 : f32 to vector<8x32xf32>
    %698 = arith.addf %697, %696 : vector<8x32xf32>
    %699 = arith.divf %697, %698 : vector<8x32xf32>
    %700 = vector.extract_strided_slice %666 {offsets = [0, 32], sizes = [8, 32], strides = [1, 1]} : vector<8x128xf32> to vector<8x32xf32>
    %701 = arith.negf %700 : vector<8x32xf32>
    %702 = math.exp %701 : vector<8x32xf32>
    %cst_231 = arith.constant 1.000000e+00 : f32
    %703 = vector.broadcast %cst_231 : f32 to vector<8x32xf32>
    %704 = arith.addf %703, %702 : vector<8x32xf32>
    %705 = arith.divf %703, %704 : vector<8x32xf32>
    %706 = vector.extract_strided_slice %666 {offsets = [0, 64], sizes = [8, 32], strides = [1, 1]} : vector<8x128xf32> to vector<8x32xf32>
    %707 = math.tanh %706 : vector<8x32xf32>
    %708 = vector.extract_strided_slice %666 {offsets = [0, 96], sizes = [8, 32], strides = [1, 1]} : vector<8x128xf32> to vector<8x32xf32>
    %709 = arith.negf %708 : vector<8x32xf32>
    %710 = math.exp %709 : vector<8x32xf32>
    %cst_232 = arith.constant 1.000000e+00 : f32
    %711 = vector.broadcast %cst_232 : f32 to vector<8x32xf32>
    %712 = arith.addf %711, %710 : vector<8x32xf32>
    %713 = arith.divf %711, %712 : vector<8x32xf32>
    %714 = arith.mulf %705, %693 : vector<8x32xf32>
    %715 = arith.mulf %699, %707 : vector<8x32xf32>
    %716 = arith.addf %714, %715 : vector<8x32xf32>
    %717 = math.tanh %716 : vector<8x32xf32>
    %718 = arith.mulf %713, %717 : vector<8x32xf32>
    %719 = tpu.concatenate %692, %718 in 1 : vector<8x32xf32>, vector<8x32xf32> -> vector<8x64xf32>
    %c0_233 = arith.constant 0 : index
    %c0_234 = arith.constant 0 : index
    %720 = vector.load %arg6[%c0_233, %c0_234] : memref<8x64xf32, #tpu.memory_space<vmem>>, vector<8x64xf32>
    tpu.vector_store %arg6[%c0_233, %c0_234], %719 {strides = array<i32>} : memref<8x64xf32, #tpu.memory_space<vmem>>, vector<8x64xf32>,
    %721 = tpu.concatenate %690, %716 in 1 : vector<8x32xf32>, vector<8x32xf32> -> vector<8x64xf32>
    %c0_235 = arith.constant 0 : index
    %c0_236 = arith.constant 0 : index
    %722 = vector.load %arg7[%c0_235, %c0_236] : memref<8x64xf32, #tpu.memory_space<vmem>>, vector<8x64xf32>
    tpu.vector_store %arg7[%c0_235, %c0_236], %721 {strides = array<i32>} : memref<8x64xf32, #tpu.memory_space<vmem>>, vector<8x64xf32>,
    %723 = arith.index_cast %c8_i32 : i32 to index
    %c0_237 = arith.constant 0 : index
    %c0_238 = arith.constant 0 : index
    %724 = vector.load %arg4[%723, %c0_237, %c0_238] : memref<16x8x32xf32, #tpu.memory_space<vmem>>, vector<1x8x32xf32>
    %725 = vector.shape_cast %724 : vector<1x8x32xf32> to vector<8x32xf32>
    %726 = vector.shape_cast %692 : vector<8x32xf32> to vector<1x8x32xf32>
    tpu.vector_store %arg4[%723, %c0_237, %c0_238], %726 {strides = array<i32>} : memref<16x8x32xf32, #tpu.memory_space<vmem>>, vector<1x8x32xf32>,
    %c15_i32_239 = arith.constant 15 : i32
    %727 = arith.subi %c15_i32_239, %c8_i32 : i32
    %728 = arith.index_cast %727 : i32 to index
    %c0_240 = arith.constant 0 : index
    %c0_241 = arith.constant 0 : index
    %729 = vector.load %arg5[%728, %c0_240, %c0_241] : memref<16x8x32xf32, #tpu.memory_space<vmem>>, vector<1x8x32xf32>
    %730 = vector.shape_cast %729 : vector<1x8x32xf32> to vector<8x32xf32>
    %731 = vector.shape_cast %718 : vector<8x32xf32> to vector<1x8x32xf32>
    tpu.vector_store %arg5[%728, %c0_240, %c0_241], %731 {strides = array<i32>} : memref<16x8x32xf32, #tpu.memory_space<vmem>>, vector<1x8x32xf32>,
    %c9_i32 = arith.constant 9 : i32
    %c0_242 = arith.constant 0 : index
    %c0_243 = arith.constant 0 : index
    %732 = vector.load %arg6[%c0_242, %c0_243] : memref<8x64xf32, #tpu.memory_space<vmem>>, vector<8x64xf32>
    %c0_244 = arith.constant 0 : index
    %c0_245 = arith.constant 0 : index
    %733 = vector.load %arg7[%c0_244, %c0_245] : memref<8x64xf32, #tpu.memory_space<vmem>>, vector<8x64xf32>
    %734 = arith.truncf %732 : vector<8x64xf32> to vector<8x64xbf16>
    %c0_246 = arith.constant 0 : index
    %c0_247 = arith.constant 0 : index
    %735 = vector.load %arg3[%c0_246, %c0_247] : memref<64x256xbf16, #tpu.memory_space<vmem>>, vector<64x256xbf16>
    %cst_248 = arith.constant dense<0.000000e+00> : vector<8x256xf32>
    %736 = tpu.matmul %734, %735, %cst_248 {dimension_numbers = #tpu.dot_dimension_numbers<[1], [0], [0], [1], [0, 0, 1, 1], [], []>} : vector<8x64xbf16>, vector<64x256xbf16>, vector<8x256xf32> -> vector<8x256xf32>
    %737 = arith.index_cast %c9_i32 : i32 to index
    %c0_249 = arith.constant 0 : index
    %c0_250 = arith.constant 0 : index
    %738 = vector.load %arg1[%737, %c0_249, %c0_250] : memref<16x8x128xf32, #tpu.memory_space<vmem>>, vector<1x8x128xf32>
    %739 = vector.shape_cast %738 : vector<1x8x128xf32> to vector<8x128xf32>
    %740 = vector.extract_strided_slice %736 {offsets = [0, 0], sizes = [8, 128], strides = [1, 1]} : vector<8x256xf32> to vector<8x128xf32>
    %741 = arith.addf %739, %740 : vector<8x128xf32>
    %c15_i32_251 = arith.constant 15 : i32
    %742 = arith.subi %c15_i32_251, %c9_i32 : i32
    %743 = arith.index_cast %742 : i32 to index
    %c0_252 = arith.constant 0 : index
    %c0_253 = arith.constant 0 : index
    %744 = vector.load %arg2[%743, %c0_252, %c0_253] : memref<16x8x128xf32, #tpu.memory_space<vmem>>, vector<1x8x128xf32>
    %745 = vector.shape_cast %744 : vector<1x8x128xf32> to vector<8x128xf32>
    %746 = vector.extract_strided_slice %736 {offsets = [0, 128], sizes = [8, 128], strides = [1, 1]} : vector<8x256xf32> to vector<8x128xf32>
    %747 = arith.addf %745, %746 : vector<8x128xf32>
    %748 = vector.extract_strided_slice %733 {offsets = [0, 0], sizes = [8, 32], strides = [1, 1]} : vector<8x64xf32> to vector<8x32xf32>
    %749 = vector.extract_strided_slice %741 {offsets = [0, 0], sizes = [8, 32], strides = [1, 1]} : vector<8x128xf32> to vector<8x32xf32>
    %750 = arith.negf %749 : vector<8x32xf32>
    %751 = math.exp %750 : vector<8x32xf32>
    %cst_254 = arith.constant 1.000000e+00 : f32
    %752 = vector.broadcast %cst_254 : f32 to vector<8x32xf32>
    %753 = arith.addf %752, %751 : vector<8x32xf32>
    %754 = arith.divf %752, %753 : vector<8x32xf32>
    %755 = vector.extract_strided_slice %741 {offsets = [0, 32], sizes = [8, 32], strides = [1, 1]} : vector<8x128xf32> to vector<8x32xf32>
    %756 = arith.negf %755 : vector<8x32xf32>
    %757 = math.exp %756 : vector<8x32xf32>
    %cst_255 = arith.constant 1.000000e+00 : f32
    %758 = vector.broadcast %cst_255 : f32 to vector<8x32xf32>
    %759 = arith.addf %758, %757 : vector<8x32xf32>
    %760 = arith.divf %758, %759 : vector<8x32xf32>
    %761 = vector.extract_strided_slice %741 {offsets = [0, 64], sizes = [8, 32], strides = [1, 1]} : vector<8x128xf32> to vector<8x32xf32>
    %762 = math.tanh %761 : vector<8x32xf32>
    %763 = vector.extract_strided_slice %741 {offsets = [0, 96], sizes = [8, 32], strides = [1, 1]} : vector<8x128xf32> to vector<8x32xf32>
    %764 = arith.negf %763 : vector<8x32xf32>
    %765 = math.exp %764 : vector<8x32xf32>
    %cst_256 = arith.constant 1.000000e+00 : f32
    %766 = vector.broadcast %cst_256 : f32 to vector<8x32xf32>
    %767 = arith.addf %766, %765 : vector<8x32xf32>
    %768 = arith.divf %766, %767 : vector<8x32xf32>
    %769 = arith.mulf %760, %748 : vector<8x32xf32>
    %770 = arith.mulf %754, %762 : vector<8x32xf32>
    %771 = arith.addf %769, %770 : vector<8x32xf32>
    %772 = math.tanh %771 : vector<8x32xf32>
    %773 = arith.mulf %768, %772 : vector<8x32xf32>
    %774 = vector.extract_strided_slice %733 {offsets = [0, 32], sizes = [8, 32], strides = [1, 1]} : vector<8x64xf32> to vector<8x32xf32>
    %775 = vector.extract_strided_slice %747 {offsets = [0, 0], sizes = [8, 32], strides = [1, 1]} : vector<8x128xf32> to vector<8x32xf32>
    %776 = arith.negf %775 : vector<8x32xf32>
    %777 = math.exp %776 : vector<8x32xf32>
    %cst_257 = arith.constant 1.000000e+00 : f32
    %778 = vector.broadcast %cst_257 : f32 to vector<8x32xf32>
    %779 = arith.addf %778, %777 : vector<8x32xf32>
    %780 = arith.divf %778, %779 : vector<8x32xf32>
    %781 = vector.extract_strided_slice %747 {offsets = [0, 32], sizes = [8, 32], strides = [1, 1]} : vector<8x128xf32> to vector<8x32xf32>
    %782 = arith.negf %781 : vector<8x32xf32>
    %783 = math.exp %782 : vector<8x32xf32>
    %cst_258 = arith.constant 1.000000e+00 : f32
    %784 = vector.broadcast %cst_258 : f32 to vector<8x32xf32>
    %785 = arith.addf %784, %783 : vector<8x32xf32>
    %786 = arith.divf %784, %785 : vector<8x32xf32>
    %787 = vector.extract_strided_slice %747 {offsets = [0, 64], sizes = [8, 32], strides = [1, 1]} : vector<8x128xf32> to vector<8x32xf32>
    %788 = math.tanh %787 : vector<8x32xf32>
    %789 = vector.extract_strided_slice %747 {offsets = [0, 96], sizes = [8, 32], strides = [1, 1]} : vector<8x128xf32> to vector<8x32xf32>
    %790 = arith.negf %789 : vector<8x32xf32>
    %791 = math.exp %790 : vector<8x32xf32>
    %cst_259 = arith.constant 1.000000e+00 : f32
    %792 = vector.broadcast %cst_259 : f32 to vector<8x32xf32>
    %793 = arith.addf %792, %791 : vector<8x32xf32>
    %794 = arith.divf %792, %793 : vector<8x32xf32>
    %795 = arith.mulf %786, %774 : vector<8x32xf32>
    %796 = arith.mulf %780, %788 : vector<8x32xf32>
    %797 = arith.addf %795, %796 : vector<8x32xf32>
    %798 = math.tanh %797 : vector<8x32xf32>
    %799 = arith.mulf %794, %798 : vector<8x32xf32>
    %800 = tpu.concatenate %773, %799 in 1 : vector<8x32xf32>, vector<8x32xf32> -> vector<8x64xf32>
    %c0_260 = arith.constant 0 : index
    %c0_261 = arith.constant 0 : index
    %801 = vector.load %arg6[%c0_260, %c0_261] : memref<8x64xf32, #tpu.memory_space<vmem>>, vector<8x64xf32>
    tpu.vector_store %arg6[%c0_260, %c0_261], %800 {strides = array<i32>} : memref<8x64xf32, #tpu.memory_space<vmem>>, vector<8x64xf32>,
    %802 = tpu.concatenate %771, %797 in 1 : vector<8x32xf32>, vector<8x32xf32> -> vector<8x64xf32>
    %c0_262 = arith.constant 0 : index
    %c0_263 = arith.constant 0 : index
    %803 = vector.load %arg7[%c0_262, %c0_263] : memref<8x64xf32, #tpu.memory_space<vmem>>, vector<8x64xf32>
    tpu.vector_store %arg7[%c0_262, %c0_263], %802 {strides = array<i32>} : memref<8x64xf32, #tpu.memory_space<vmem>>, vector<8x64xf32>,
    %804 = arith.index_cast %c9_i32 : i32 to index
    %c0_264 = arith.constant 0 : index
    %c0_265 = arith.constant 0 : index
    %805 = vector.load %arg4[%804, %c0_264, %c0_265] : memref<16x8x32xf32, #tpu.memory_space<vmem>>, vector<1x8x32xf32>
    %806 = vector.shape_cast %805 : vector<1x8x32xf32> to vector<8x32xf32>
    %807 = vector.shape_cast %773 : vector<8x32xf32> to vector<1x8x32xf32>
    tpu.vector_store %arg4[%804, %c0_264, %c0_265], %807 {strides = array<i32>} : memref<16x8x32xf32, #tpu.memory_space<vmem>>, vector<1x8x32xf32>,
    %c15_i32_266 = arith.constant 15 : i32
    %808 = arith.subi %c15_i32_266, %c9_i32 : i32
    %809 = arith.index_cast %808 : i32 to index
    %c0_267 = arith.constant 0 : index
    %c0_268 = arith.constant 0 : index
    %810 = vector.load %arg5[%809, %c0_267, %c0_268] : memref<16x8x32xf32, #tpu.memory_space<vmem>>, vector<1x8x32xf32>
    %811 = vector.shape_cast %810 : vector<1x8x32xf32> to vector<8x32xf32>
    %812 = vector.shape_cast %799 : vector<8x32xf32> to vector<1x8x32xf32>
    tpu.vector_store %arg5[%809, %c0_267, %c0_268], %812 {strides = array<i32>} : memref<16x8x32xf32, #tpu.memory_space<vmem>>, vector<1x8x32xf32>,
    %c10_i32 = arith.constant 10 : i32
    %c0_269 = arith.constant 0 : index
    %c0_270 = arith.constant 0 : index
    %813 = vector.load %arg6[%c0_269, %c0_270] : memref<8x64xf32, #tpu.memory_space<vmem>>, vector<8x64xf32>
    %c0_271 = arith.constant 0 : index
    %c0_272 = arith.constant 0 : index
    %814 = vector.load %arg7[%c0_271, %c0_272] : memref<8x64xf32, #tpu.memory_space<vmem>>, vector<8x64xf32>
    %815 = arith.truncf %813 : vector<8x64xf32> to vector<8x64xbf16>
    %c0_273 = arith.constant 0 : index
    %c0_274 = arith.constant 0 : index
    %816 = vector.load %arg3[%c0_273, %c0_274] : memref<64x256xbf16, #tpu.memory_space<vmem>>, vector<64x256xbf16>
    %cst_275 = arith.constant dense<0.000000e+00> : vector<8x256xf32>
    %817 = tpu.matmul %815, %816, %cst_275 {dimension_numbers = #tpu.dot_dimension_numbers<[1], [0], [0], [1], [0, 0, 1, 1], [], []>} : vector<8x64xbf16>, vector<64x256xbf16>, vector<8x256xf32> -> vector<8x256xf32>
    %818 = arith.index_cast %c10_i32 : i32 to index
    %c0_276 = arith.constant 0 : index
    %c0_277 = arith.constant 0 : index
    %819 = vector.load %arg1[%818, %c0_276, %c0_277] : memref<16x8x128xf32, #tpu.memory_space<vmem>>, vector<1x8x128xf32>
    %820 = vector.shape_cast %819 : vector<1x8x128xf32> to vector<8x128xf32>
    %821 = vector.extract_strided_slice %817 {offsets = [0, 0], sizes = [8, 128], strides = [1, 1]} : vector<8x256xf32> to vector<8x128xf32>
    %822 = arith.addf %820, %821 : vector<8x128xf32>
    %c15_i32_278 = arith.constant 15 : i32
    %823 = arith.subi %c15_i32_278, %c10_i32 : i32
    %824 = arith.index_cast %823 : i32 to index
    %c0_279 = arith.constant 0 : index
    %c0_280 = arith.constant 0 : index
    %825 = vector.load %arg2[%824, %c0_279, %c0_280] : memref<16x8x128xf32, #tpu.memory_space<vmem>>, vector<1x8x128xf32>
    %826 = vector.shape_cast %825 : vector<1x8x128xf32> to vector<8x128xf32>
    %827 = vector.extract_strided_slice %817 {offsets = [0, 128], sizes = [8, 128], strides = [1, 1]} : vector<8x256xf32> to vector<8x128xf32>
    %828 = arith.addf %826, %827 : vector<8x128xf32>
    %829 = vector.extract_strided_slice %814 {offsets = [0, 0], sizes = [8, 32], strides = [1, 1]} : vector<8x64xf32> to vector<8x32xf32>
    %830 = vector.extract_strided_slice %822 {offsets = [0, 0], sizes = [8, 32], strides = [1, 1]} : vector<8x128xf32> to vector<8x32xf32>
    %831 = arith.negf %830 : vector<8x32xf32>
    %832 = math.exp %831 : vector<8x32xf32>
    %cst_281 = arith.constant 1.000000e+00 : f32
    %833 = vector.broadcast %cst_281 : f32 to vector<8x32xf32>
    %834 = arith.addf %833, %832 : vector<8x32xf32>
    %835 = arith.divf %833, %834 : vector<8x32xf32>
    %836 = vector.extract_strided_slice %822 {offsets = [0, 32], sizes = [8, 32], strides = [1, 1]} : vector<8x128xf32> to vector<8x32xf32>
    %837 = arith.negf %836 : vector<8x32xf32>
    %838 = math.exp %837 : vector<8x32xf32>
    %cst_282 = arith.constant 1.000000e+00 : f32
    %839 = vector.broadcast %cst_282 : f32 to vector<8x32xf32>
    %840 = arith.addf %839, %838 : vector<8x32xf32>
    %841 = arith.divf %839, %840 : vector<8x32xf32>
    %842 = vector.extract_strided_slice %822 {offsets = [0, 64], sizes = [8, 32], strides = [1, 1]} : vector<8x128xf32> to vector<8x32xf32>
    %843 = math.tanh %842 : vector<8x32xf32>
    %844 = vector.extract_strided_slice %822 {offsets = [0, 96], sizes = [8, 32], strides = [1, 1]} : vector<8x128xf32> to vector<8x32xf32>
    %845 = arith.negf %844 : vector<8x32xf32>
    %846 = math.exp %845 : vector<8x32xf32>
    %cst_283 = arith.constant 1.000000e+00 : f32
    %847 = vector.broadcast %cst_283 : f32 to vector<8x32xf32>
    %848 = arith.addf %847, %846 : vector<8x32xf32>
    %849 = arith.divf %847, %848 : vector<8x32xf32>
    %850 = arith.mulf %841, %829 : vector<8x32xf32>
    %851 = arith.mulf %835, %843 : vector<8x32xf32>
    %852 = arith.addf %850, %851 : vector<8x32xf32>
    %853 = math.tanh %852 : vector<8x32xf32>
    %854 = arith.mulf %849, %853 : vector<8x32xf32>
    %855 = vector.extract_strided_slice %814 {offsets = [0, 32], sizes = [8, 32], strides = [1, 1]} : vector<8x64xf32> to vector<8x32xf32>
    %856 = vector.extract_strided_slice %828 {offsets = [0, 0], sizes = [8, 32], strides = [1, 1]} : vector<8x128xf32> to vector<8x32xf32>
    %857 = arith.negf %856 : vector<8x32xf32>
    %858 = math.exp %857 : vector<8x32xf32>
    %cst_284 = arith.constant 1.000000e+00 : f32
    %859 = vector.broadcast %cst_284 : f32 to vector<8x32xf32>
    %860 = arith.addf %859, %858 : vector<8x32xf32>
    %861 = arith.divf %859, %860 : vector<8x32xf32>
    %862 = vector.extract_strided_slice %828 {offsets = [0, 32], sizes = [8, 32], strides = [1, 1]} : vector<8x128xf32> to vector<8x32xf32>
    %863 = arith.negf %862 : vector<8x32xf32>
    %864 = math.exp %863 : vector<8x32xf32>
    %cst_285 = arith.constant 1.000000e+00 : f32
    %865 = vector.broadcast %cst_285 : f32 to vector<8x32xf32>
    %866 = arith.addf %865, %864 : vector<8x32xf32>
    %867 = arith.divf %865, %866 : vector<8x32xf32>
    %868 = vector.extract_strided_slice %828 {offsets = [0, 64], sizes = [8, 32], strides = [1, 1]} : vector<8x128xf32> to vector<8x32xf32>
    %869 = math.tanh %868 : vector<8x32xf32>
    %870 = vector.extract_strided_slice %828 {offsets = [0, 96], sizes = [8, 32], strides = [1, 1]} : vector<8x128xf32> to vector<8x32xf32>
    %871 = arith.negf %870 : vector<8x32xf32>
    %872 = math.exp %871 : vector<8x32xf32>
    %cst_286 = arith.constant 1.000000e+00 : f32
    %873 = vector.broadcast %cst_286 : f32 to vector<8x32xf32>
    %874 = arith.addf %873, %872 : vector<8x32xf32>
    %875 = arith.divf %873, %874 : vector<8x32xf32>
    %876 = arith.mulf %867, %855 : vector<8x32xf32>
    %877 = arith.mulf %861, %869 : vector<8x32xf32>
    %878 = arith.addf %876, %877 : vector<8x32xf32>
    %879 = math.tanh %878 : vector<8x32xf32>
    %880 = arith.mulf %875, %879 : vector<8x32xf32>
    %881 = tpu.concatenate %854, %880 in 1 : vector<8x32xf32>, vector<8x32xf32> -> vector<8x64xf32>
    %c0_287 = arith.constant 0 : index
    %c0_288 = arith.constant 0 : index
    %882 = vector.load %arg6[%c0_287, %c0_288] : memref<8x64xf32, #tpu.memory_space<vmem>>, vector<8x64xf32>
    tpu.vector_store %arg6[%c0_287, %c0_288], %881 {strides = array<i32>} : memref<8x64xf32, #tpu.memory_space<vmem>>, vector<8x64xf32>,
    %883 = tpu.concatenate %852, %878 in 1 : vector<8x32xf32>, vector<8x32xf32> -> vector<8x64xf32>
    %c0_289 = arith.constant 0 : index
    %c0_290 = arith.constant 0 : index
    %884 = vector.load %arg7[%c0_289, %c0_290] : memref<8x64xf32, #tpu.memory_space<vmem>>, vector<8x64xf32>
    tpu.vector_store %arg7[%c0_289, %c0_290], %883 {strides = array<i32>} : memref<8x64xf32, #tpu.memory_space<vmem>>, vector<8x64xf32>,
    %885 = arith.index_cast %c10_i32 : i32 to index
    %c0_291 = arith.constant 0 : index
    %c0_292 = arith.constant 0 : index
    %886 = vector.load %arg4[%885, %c0_291, %c0_292] : memref<16x8x32xf32, #tpu.memory_space<vmem>>, vector<1x8x32xf32>
    %887 = vector.shape_cast %886 : vector<1x8x32xf32> to vector<8x32xf32>
    %888 = vector.shape_cast %854 : vector<8x32xf32> to vector<1x8x32xf32>
    tpu.vector_store %arg4[%885, %c0_291, %c0_292], %888 {strides = array<i32>} : memref<16x8x32xf32, #tpu.memory_space<vmem>>, vector<1x8x32xf32>,
    %c15_i32_293 = arith.constant 15 : i32
    %889 = arith.subi %c15_i32_293, %c10_i32 : i32
    %890 = arith.index_cast %889 : i32 to index
    %c0_294 = arith.constant 0 : index
    %c0_295 = arith.constant 0 : index
    %891 = vector.load %arg5[%890, %c0_294, %c0_295] : memref<16x8x32xf32, #tpu.memory_space<vmem>>, vector<1x8x32xf32>
    %892 = vector.shape_cast %891 : vector<1x8x32xf32> to vector<8x32xf32>
    %893 = vector.shape_cast %880 : vector<8x32xf32> to vector<1x8x32xf32>
    tpu.vector_store %arg5[%890, %c0_294, %c0_295], %893 {strides = array<i32>} : memref<16x8x32xf32, #tpu.memory_space<vmem>>, vector<1x8x32xf32>,
    %c11_i32 = arith.constant 11 : i32
    %c0_296 = arith.constant 0 : index
    %c0_297 = arith.constant 0 : index
    %894 = vector.load %arg6[%c0_296, %c0_297] : memref<8x64xf32, #tpu.memory_space<vmem>>, vector<8x64xf32>
    %c0_298 = arith.constant 0 : index
    %c0_299 = arith.constant 0 : index
    %895 = vector.load %arg7[%c0_298, %c0_299] : memref<8x64xf32, #tpu.memory_space<vmem>>, vector<8x64xf32>
    %896 = arith.truncf %894 : vector<8x64xf32> to vector<8x64xbf16>
    %c0_300 = arith.constant 0 : index
    %c0_301 = arith.constant 0 : index
    %897 = vector.load %arg3[%c0_300, %c0_301] : memref<64x256xbf16, #tpu.memory_space<vmem>>, vector<64x256xbf16>
    %cst_302 = arith.constant dense<0.000000e+00> : vector<8x256xf32>
    %898 = tpu.matmul %896, %897, %cst_302 {dimension_numbers = #tpu.dot_dimension_numbers<[1], [0], [0], [1], [0, 0, 1, 1], [], []>} : vector<8x64xbf16>, vector<64x256xbf16>, vector<8x256xf32> -> vector<8x256xf32>
    %899 = arith.index_cast %c11_i32 : i32 to index
    %c0_303 = arith.constant 0 : index
    %c0_304 = arith.constant 0 : index
    %900 = vector.load %arg1[%899, %c0_303, %c0_304] : memref<16x8x128xf32, #tpu.memory_space<vmem>>, vector<1x8x128xf32>
    %901 = vector.shape_cast %900 : vector<1x8x128xf32> to vector<8x128xf32>
    %902 = vector.extract_strided_slice %898 {offsets = [0, 0], sizes = [8, 128], strides = [1, 1]} : vector<8x256xf32> to vector<8x128xf32>
    %903 = arith.addf %901, %902 : vector<8x128xf32>
    %c15_i32_305 = arith.constant 15 : i32
    %904 = arith.subi %c15_i32_305, %c11_i32 : i32
    %905 = arith.index_cast %904 : i32 to index
    %c0_306 = arith.constant 0 : index
    %c0_307 = arith.constant 0 : index
    %906 = vector.load %arg2[%905, %c0_306, %c0_307] : memref<16x8x128xf32, #tpu.memory_space<vmem>>, vector<1x8x128xf32>
    %907 = vector.shape_cast %906 : vector<1x8x128xf32> to vector<8x128xf32>
    %908 = vector.extract_strided_slice %898 {offsets = [0, 128], sizes = [8, 128], strides = [1, 1]} : vector<8x256xf32> to vector<8x128xf32>
    %909 = arith.addf %907, %908 : vector<8x128xf32>
    %910 = vector.extract_strided_slice %895 {offsets = [0, 0], sizes = [8, 32], strides = [1, 1]} : vector<8x64xf32> to vector<8x32xf32>
    %911 = vector.extract_strided_slice %903 {offsets = [0, 0], sizes = [8, 32], strides = [1, 1]} : vector<8x128xf32> to vector<8x32xf32>
    %912 = arith.negf %911 : vector<8x32xf32>
    %913 = math.exp %912 : vector<8x32xf32>
    %cst_308 = arith.constant 1.000000e+00 : f32
    %914 = vector.broadcast %cst_308 : f32 to vector<8x32xf32>
    %915 = arith.addf %914, %913 : vector<8x32xf32>
    %916 = arith.divf %914, %915 : vector<8x32xf32>
    %917 = vector.extract_strided_slice %903 {offsets = [0, 32], sizes = [8, 32], strides = [1, 1]} : vector<8x128xf32> to vector<8x32xf32>
    %918 = arith.negf %917 : vector<8x32xf32>
    %919 = math.exp %918 : vector<8x32xf32>
    %cst_309 = arith.constant 1.000000e+00 : f32
    %920 = vector.broadcast %cst_309 : f32 to vector<8x32xf32>
    %921 = arith.addf %920, %919 : vector<8x32xf32>
    %922 = arith.divf %920, %921 : vector<8x32xf32>
    %923 = vector.extract_strided_slice %903 {offsets = [0, 64], sizes = [8, 32], strides = [1, 1]} : vector<8x128xf32> to vector<8x32xf32>
    %924 = math.tanh %923 : vector<8x32xf32>
    %925 = vector.extract_strided_slice %903 {offsets = [0, 96], sizes = [8, 32], strides = [1, 1]} : vector<8x128xf32> to vector<8x32xf32>
    %926 = arith.negf %925 : vector<8x32xf32>
    %927 = math.exp %926 : vector<8x32xf32>
    %cst_310 = arith.constant 1.000000e+00 : f32
    %928 = vector.broadcast %cst_310 : f32 to vector<8x32xf32>
    %929 = arith.addf %928, %927 : vector<8x32xf32>
    %930 = arith.divf %928, %929 : vector<8x32xf32>
    %931 = arith.mulf %922, %910 : vector<8x32xf32>
    %932 = arith.mulf %916, %924 : vector<8x32xf32>
    %933 = arith.addf %931, %932 : vector<8x32xf32>
    %934 = math.tanh %933 : vector<8x32xf32>
    %935 = arith.mulf %930, %934 : vector<8x32xf32>
    %936 = vector.extract_strided_slice %895 {offsets = [0, 32], sizes = [8, 32], strides = [1, 1]} : vector<8x64xf32> to vector<8x32xf32>
    %937 = vector.extract_strided_slice %909 {offsets = [0, 0], sizes = [8, 32], strides = [1, 1]} : vector<8x128xf32> to vector<8x32xf32>
    %938 = arith.negf %937 : vector<8x32xf32>
    %939 = math.exp %938 : vector<8x32xf32>
    %cst_311 = arith.constant 1.000000e+00 : f32
    %940 = vector.broadcast %cst_311 : f32 to vector<8x32xf32>
    %941 = arith.addf %940, %939 : vector<8x32xf32>
    %942 = arith.divf %940, %941 : vector<8x32xf32>
    %943 = vector.extract_strided_slice %909 {offsets = [0, 32], sizes = [8, 32], strides = [1, 1]} : vector<8x128xf32> to vector<8x32xf32>
    %944 = arith.negf %943 : vector<8x32xf32>
    %945 = math.exp %944 : vector<8x32xf32>
    %cst_312 = arith.constant 1.000000e+00 : f32
    %946 = vector.broadcast %cst_312 : f32 to vector<8x32xf32>
    %947 = arith.addf %946, %945 : vector<8x32xf32>
    %948 = arith.divf %946, %947 : vector<8x32xf32>
    %949 = vector.extract_strided_slice %909 {offsets = [0, 64], sizes = [8, 32], strides = [1, 1]} : vector<8x128xf32> to vector<8x32xf32>
    %950 = math.tanh %949 : vector<8x32xf32>
    %951 = vector.extract_strided_slice %909 {offsets = [0, 96], sizes = [8, 32], strides = [1, 1]} : vector<8x128xf32> to vector<8x32xf32>
    %952 = arith.negf %951 : vector<8x32xf32>
    %953 = math.exp %952 : vector<8x32xf32>
    %cst_313 = arith.constant 1.000000e+00 : f32
    %954 = vector.broadcast %cst_313 : f32 to vector<8x32xf32>
    %955 = arith.addf %954, %953 : vector<8x32xf32>
    %956 = arith.divf %954, %955 : vector<8x32xf32>
    %957 = arith.mulf %948, %936 : vector<8x32xf32>
    %958 = arith.mulf %942, %950 : vector<8x32xf32>
    %959 = arith.addf %957, %958 : vector<8x32xf32>
    %960 = math.tanh %959 : vector<8x32xf32>
    %961 = arith.mulf %956, %960 : vector<8x32xf32>
    %962 = tpu.concatenate %935, %961 in 1 : vector<8x32xf32>, vector<8x32xf32> -> vector<8x64xf32>
    %c0_314 = arith.constant 0 : index
    %c0_315 = arith.constant 0 : index
    %963 = vector.load %arg6[%c0_314, %c0_315] : memref<8x64xf32, #tpu.memory_space<vmem>>, vector<8x64xf32>
    tpu.vector_store %arg6[%c0_314, %c0_315], %962 {strides = array<i32>} : memref<8x64xf32, #tpu.memory_space<vmem>>, vector<8x64xf32>,
    %964 = tpu.concatenate %933, %959 in 1 : vector<8x32xf32>, vector<8x32xf32> -> vector<8x64xf32>
    %c0_316 = arith.constant 0 : index
    %c0_317 = arith.constant 0 : index
    %965 = vector.load %arg7[%c0_316, %c0_317] : memref<8x64xf32, #tpu.memory_space<vmem>>, vector<8x64xf32>
    tpu.vector_store %arg7[%c0_316, %c0_317], %964 {strides = array<i32>} : memref<8x64xf32, #tpu.memory_space<vmem>>, vector<8x64xf32>,
    %966 = arith.index_cast %c11_i32 : i32 to index
    %c0_318 = arith.constant 0 : index
    %c0_319 = arith.constant 0 : index
    %967 = vector.load %arg4[%966, %c0_318, %c0_319] : memref<16x8x32xf32, #tpu.memory_space<vmem>>, vector<1x8x32xf32>
    %968 = vector.shape_cast %967 : vector<1x8x32xf32> to vector<8x32xf32>
    %969 = vector.shape_cast %935 : vector<8x32xf32> to vector<1x8x32xf32>
    tpu.vector_store %arg4[%966, %c0_318, %c0_319], %969 {strides = array<i32>} : memref<16x8x32xf32, #tpu.memory_space<vmem>>, vector<1x8x32xf32>,
    %c15_i32_320 = arith.constant 15 : i32
    %970 = arith.subi %c15_i32_320, %c11_i32 : i32
    %971 = arith.index_cast %970 : i32 to index
    %c0_321 = arith.constant 0 : index
    %c0_322 = arith.constant 0 : index
    %972 = vector.load %arg5[%971, %c0_321, %c0_322] : memref<16x8x32xf32, #tpu.memory_space<vmem>>, vector<1x8x32xf32>
    %973 = vector.shape_cast %972 : vector<1x8x32xf32> to vector<8x32xf32>
    %974 = vector.shape_cast %961 : vector<8x32xf32> to vector<1x8x32xf32>
    tpu.vector_store %arg5[%971, %c0_321, %c0_322], %974 {strides = array<i32>} : memref<16x8x32xf32, #tpu.memory_space<vmem>>, vector<1x8x32xf32>,
    %c12_i32 = arith.constant 12 : i32
    %c0_323 = arith.constant 0 : index
    %c0_324 = arith.constant 0 : index
    %975 = vector.load %arg6[%c0_323, %c0_324] : memref<8x64xf32, #tpu.memory_space<vmem>>, vector<8x64xf32>
    %c0_325 = arith.constant 0 : index
    %c0_326 = arith.constant 0 : index
    %976 = vector.load %arg7[%c0_325, %c0_326] : memref<8x64xf32, #tpu.memory_space<vmem>>, vector<8x64xf32>
    %977 = arith.truncf %975 : vector<8x64xf32> to vector<8x64xbf16>
    %c0_327 = arith.constant 0 : index
    %c0_328 = arith.constant 0 : index
    %978 = vector.load %arg3[%c0_327, %c0_328] : memref<64x256xbf16, #tpu.memory_space<vmem>>, vector<64x256xbf16>
    %cst_329 = arith.constant dense<0.000000e+00> : vector<8x256xf32>
    %979 = tpu.matmul %977, %978, %cst_329 {dimension_numbers = #tpu.dot_dimension_numbers<[1], [0], [0], [1], [0, 0, 1, 1], [], []>} : vector<8x64xbf16>, vector<64x256xbf16>, vector<8x256xf32> -> vector<8x256xf32>
    %980 = arith.index_cast %c12_i32 : i32 to index
    %c0_330 = arith.constant 0 : index
    %c0_331 = arith.constant 0 : index
    %981 = vector.load %arg1[%980, %c0_330, %c0_331] : memref<16x8x128xf32, #tpu.memory_space<vmem>>, vector<1x8x128xf32>
    %982 = vector.shape_cast %981 : vector<1x8x128xf32> to vector<8x128xf32>
    %983 = vector.extract_strided_slice %979 {offsets = [0, 0], sizes = [8, 128], strides = [1, 1]} : vector<8x256xf32> to vector<8x128xf32>
    %984 = arith.addf %982, %983 : vector<8x128xf32>
    %c15_i32_332 = arith.constant 15 : i32
    %985 = arith.subi %c15_i32_332, %c12_i32 : i32
    %986 = arith.index_cast %985 : i32 to index
    %c0_333 = arith.constant 0 : index
    %c0_334 = arith.constant 0 : index
    %987 = vector.load %arg2[%986, %c0_333, %c0_334] : memref<16x8x128xf32, #tpu.memory_space<vmem>>, vector<1x8x128xf32>
    %988 = vector.shape_cast %987 : vector<1x8x128xf32> to vector<8x128xf32>
    %989 = vector.extract_strided_slice %979 {offsets = [0, 128], sizes = [8, 128], strides = [1, 1]} : vector<8x256xf32> to vector<8x128xf32>
    %990 = arith.addf %988, %989 : vector<8x128xf32>
    %991 = vector.extract_strided_slice %976 {offsets = [0, 0], sizes = [8, 32], strides = [1, 1]} : vector<8x64xf32> to vector<8x32xf32>
    %992 = vector.extract_strided_slice %984 {offsets = [0, 0], sizes = [8, 32], strides = [1, 1]} : vector<8x128xf32> to vector<8x32xf32>
    %993 = arith.negf %992 : vector<8x32xf32>
    %994 = math.exp %993 : vector<8x32xf32>
    %cst_335 = arith.constant 1.000000e+00 : f32
    %995 = vector.broadcast %cst_335 : f32 to vector<8x32xf32>
    %996 = arith.addf %995, %994 : vector<8x32xf32>
    %997 = arith.divf %995, %996 : vector<8x32xf32>
    %998 = vector.extract_strided_slice %984 {offsets = [0, 32], sizes = [8, 32], strides = [1, 1]} : vector<8x128xf32> to vector<8x32xf32>
    %999 = arith.negf %998 : vector<8x32xf32>
    %1000 = math.exp %999 : vector<8x32xf32>
    %cst_336 = arith.constant 1.000000e+00 : f32
    %1001 = vector.broadcast %cst_336 : f32 to vector<8x32xf32>
    %1002 = arith.addf %1001, %1000 : vector<8x32xf32>
    %1003 = arith.divf %1001, %1002 : vector<8x32xf32>
    %1004 = vector.extract_strided_slice %984 {offsets = [0, 64], sizes = [8, 32], strides = [1, 1]} : vector<8x128xf32> to vector<8x32xf32>
    %1005 = math.tanh %1004 : vector<8x32xf32>
    %1006 = vector.extract_strided_slice %984 {offsets = [0, 96], sizes = [8, 32], strides = [1, 1]} : vector<8x128xf32> to vector<8x32xf32>
    %1007 = arith.negf %1006 : vector<8x32xf32>
    %1008 = math.exp %1007 : vector<8x32xf32>
    %cst_337 = arith.constant 1.000000e+00 : f32
    %1009 = vector.broadcast %cst_337 : f32 to vector<8x32xf32>
    %1010 = arith.addf %1009, %1008 : vector<8x32xf32>
    %1011 = arith.divf %1009, %1010 : vector<8x32xf32>
    %1012 = arith.mulf %1003, %991 : vector<8x32xf32>
    %1013 = arith.mulf %997, %1005 : vector<8x32xf32>
    %1014 = arith.addf %1012, %1013 : vector<8x32xf32>
    %1015 = math.tanh %1014 : vector<8x32xf32>
    %1016 = arith.mulf %1011, %1015 : vector<8x32xf32>
    %1017 = vector.extract_strided_slice %976 {offsets = [0, 32], sizes = [8, 32], strides = [1, 1]} : vector<8x64xf32> to vector<8x32xf32>
    %1018 = vector.extract_strided_slice %990 {offsets = [0, 0], sizes = [8, 32], strides = [1, 1]} : vector<8x128xf32> to vector<8x32xf32>
    %1019 = arith.negf %1018 : vector<8x32xf32>
    %1020 = math.exp %1019 : vector<8x32xf32>
    %cst_338 = arith.constant 1.000000e+00 : f32
    %1021 = vector.broadcast %cst_338 : f32 to vector<8x32xf32>
    %1022 = arith.addf %1021, %1020 : vector<8x32xf32>
    %1023 = arith.divf %1021, %1022 : vector<8x32xf32>
    %1024 = vector.extract_strided_slice %990 {offsets = [0, 32], sizes = [8, 32], strides = [1, 1]} : vector<8x128xf32> to vector<8x32xf32>
    %1025 = arith.negf %1024 : vector<8x32xf32>
    %1026 = math.exp %1025 : vector<8x32xf32>
    %cst_339 = arith.constant 1.000000e+00 : f32
    %1027 = vector.broadcast %cst_339 : f32 to vector<8x32xf32>
    %1028 = arith.addf %1027, %1026 : vector<8x32xf32>
    %1029 = arith.divf %1027, %1028 : vector<8x32xf32>
    %1030 = vector.extract_strided_slice %990 {offsets = [0, 64], sizes = [8, 32], strides = [1, 1]} : vector<8x128xf32> to vector<8x32xf32>
    %1031 = math.tanh %1030 : vector<8x32xf32>
    %1032 = vector.extract_strided_slice %990 {offsets = [0, 96], sizes = [8, 32], strides = [1, 1]} : vector<8x128xf32> to vector<8x32xf32>
    %1033 = arith.negf %1032 : vector<8x32xf32>
    %1034 = math.exp %1033 : vector<8x32xf32>
    %cst_340 = arith.constant 1.000000e+00 : f32
    %1035 = vector.broadcast %cst_340 : f32 to vector<8x32xf32>
    %1036 = arith.addf %1035, %1034 : vector<8x32xf32>
    %1037 = arith.divf %1035, %1036 : vector<8x32xf32>
    %1038 = arith.mulf %1029, %1017 : vector<8x32xf32>
    %1039 = arith.mulf %1023, %1031 : vector<8x32xf32>
    %1040 = arith.addf %1038, %1039 : vector<8x32xf32>
    %1041 = math.tanh %1040 : vector<8x32xf32>
    %1042 = arith.mulf %1037, %1041 : vector<8x32xf32>
    %1043 = tpu.concatenate %1016, %1042 in 1 : vector<8x32xf32>, vector<8x32xf32> -> vector<8x64xf32>
    %c0_341 = arith.constant 0 : index
    %c0_342 = arith.constant 0 : index
    %1044 = vector.load %arg6[%c0_341, %c0_342] : memref<8x64xf32, #tpu.memory_space<vmem>>, vector<8x64xf32>
    tpu.vector_store %arg6[%c0_341, %c0_342], %1043 {strides = array<i32>} : memref<8x64xf32, #tpu.memory_space<vmem>>, vector<8x64xf32>,
    %1045 = tpu.concatenate %1014, %1040 in 1 : vector<8x32xf32>, vector<8x32xf32> -> vector<8x64xf32>
    %c0_343 = arith.constant 0 : index
    %c0_344 = arith.constant 0 : index
    %1046 = vector.load %arg7[%c0_343, %c0_344] : memref<8x64xf32, #tpu.memory_space<vmem>>, vector<8x64xf32>
    tpu.vector_store %arg7[%c0_343, %c0_344], %1045 {strides = array<i32>} : memref<8x64xf32, #tpu.memory_space<vmem>>, vector<8x64xf32>,
    %1047 = arith.index_cast %c12_i32 : i32 to index
    %c0_345 = arith.constant 0 : index
    %c0_346 = arith.constant 0 : index
    %1048 = vector.load %arg4[%1047, %c0_345, %c0_346] : memref<16x8x32xf32, #tpu.memory_space<vmem>>, vector<1x8x32xf32>
    %1049 = vector.shape_cast %1048 : vector<1x8x32xf32> to vector<8x32xf32>
    %1050 = vector.shape_cast %1016 : vector<8x32xf32> to vector<1x8x32xf32>
    tpu.vector_store %arg4[%1047, %c0_345, %c0_346], %1050 {strides = array<i32>} : memref<16x8x32xf32, #tpu.memory_space<vmem>>, vector<1x8x32xf32>,
    %c15_i32_347 = arith.constant 15 : i32
    %1051 = arith.subi %c15_i32_347, %c12_i32 : i32
    %1052 = arith.index_cast %1051 : i32 to index
    %c0_348 = arith.constant 0 : index
    %c0_349 = arith.constant 0 : index
    %1053 = vector.load %arg5[%1052, %c0_348, %c0_349] : memref<16x8x32xf32, #tpu.memory_space<vmem>>, vector<1x8x32xf32>
    %1054 = vector.shape_cast %1053 : vector<1x8x32xf32> to vector<8x32xf32>
    %1055 = vector.shape_cast %1042 : vector<8x32xf32> to vector<1x8x32xf32>
    tpu.vector_store %arg5[%1052, %c0_348, %c0_349], %1055 {strides = array<i32>} : memref<16x8x32xf32, #tpu.memory_space<vmem>>, vector<1x8x32xf32>,
    %c13_i32 = arith.constant 13 : i32
    %c0_350 = arith.constant 0 : index
    %c0_351 = arith.constant 0 : index
    %1056 = vector.load %arg6[%c0_350, %c0_351] : memref<8x64xf32, #tpu.memory_space<vmem>>, vector<8x64xf32>
    %c0_352 = arith.constant 0 : index
    %c0_353 = arith.constant 0 : index
    %1057 = vector.load %arg7[%c0_352, %c0_353] : memref<8x64xf32, #tpu.memory_space<vmem>>, vector<8x64xf32>
    %1058 = arith.truncf %1056 : vector<8x64xf32> to vector<8x64xbf16>
    %c0_354 = arith.constant 0 : index
    %c0_355 = arith.constant 0 : index
    %1059 = vector.load %arg3[%c0_354, %c0_355] : memref<64x256xbf16, #tpu.memory_space<vmem>>, vector<64x256xbf16>
    %cst_356 = arith.constant dense<0.000000e+00> : vector<8x256xf32>
    %1060 = tpu.matmul %1058, %1059, %cst_356 {dimension_numbers = #tpu.dot_dimension_numbers<[1], [0], [0], [1], [0, 0, 1, 1], [], []>} : vector<8x64xbf16>, vector<64x256xbf16>, vector<8x256xf32> -> vector<8x256xf32>
    %1061 = arith.index_cast %c13_i32 : i32 to index
    %c0_357 = arith.constant 0 : index
    %c0_358 = arith.constant 0 : index
    %1062 = vector.load %arg1[%1061, %c0_357, %c0_358] : memref<16x8x128xf32, #tpu.memory_space<vmem>>, vector<1x8x128xf32>
    %1063 = vector.shape_cast %1062 : vector<1x8x128xf32> to vector<8x128xf32>
    %1064 = vector.extract_strided_slice %1060 {offsets = [0, 0], sizes = [8, 128], strides = [1, 1]} : vector<8x256xf32> to vector<8x128xf32>
    %1065 = arith.addf %1063, %1064 : vector<8x128xf32>
    %c15_i32_359 = arith.constant 15 : i32
    %1066 = arith.subi %c15_i32_359, %c13_i32 : i32
    %1067 = arith.index_cast %1066 : i32 to index
    %c0_360 = arith.constant 0 : index
    %c0_361 = arith.constant 0 : index
    %1068 = vector.load %arg2[%1067, %c0_360, %c0_361] : memref<16x8x128xf32, #tpu.memory_space<vmem>>, vector<1x8x128xf32>
    %1069 = vector.shape_cast %1068 : vector<1x8x128xf32> to vector<8x128xf32>
    %1070 = vector.extract_strided_slice %1060 {offsets = [0, 128], sizes = [8, 128], strides = [1, 1]} : vector<8x256xf32> to vector<8x128xf32>
    %1071 = arith.addf %1069, %1070 : vector<8x128xf32>
    %1072 = vector.extract_strided_slice %1057 {offsets = [0, 0], sizes = [8, 32], strides = [1, 1]} : vector<8x64xf32> to vector<8x32xf32>
    %1073 = vector.extract_strided_slice %1065 {offsets = [0, 0], sizes = [8, 32], strides = [1, 1]} : vector<8x128xf32> to vector<8x32xf32>
    %1074 = arith.negf %1073 : vector<8x32xf32>
    %1075 = math.exp %1074 : vector<8x32xf32>
    %cst_362 = arith.constant 1.000000e+00 : f32
    %1076 = vector.broadcast %cst_362 : f32 to vector<8x32xf32>
    %1077 = arith.addf %1076, %1075 : vector<8x32xf32>
    %1078 = arith.divf %1076, %1077 : vector<8x32xf32>
    %1079 = vector.extract_strided_slice %1065 {offsets = [0, 32], sizes = [8, 32], strides = [1, 1]} : vector<8x128xf32> to vector<8x32xf32>
    %1080 = arith.negf %1079 : vector<8x32xf32>
    %1081 = math.exp %1080 : vector<8x32xf32>
    %cst_363 = arith.constant 1.000000e+00 : f32
    %1082 = vector.broadcast %cst_363 : f32 to vector<8x32xf32>
    %1083 = arith.addf %1082, %1081 : vector<8x32xf32>
    %1084 = arith.divf %1082, %1083 : vector<8x32xf32>
    %1085 = vector.extract_strided_slice %1065 {offsets = [0, 64], sizes = [8, 32], strides = [1, 1]} : vector<8x128xf32> to vector<8x32xf32>
    %1086 = math.tanh %1085 : vector<8x32xf32>
    %1087 = vector.extract_strided_slice %1065 {offsets = [0, 96], sizes = [8, 32], strides = [1, 1]} : vector<8x128xf32> to vector<8x32xf32>
    %1088 = arith.negf %1087 : vector<8x32xf32>
    %1089 = math.exp %1088 : vector<8x32xf32>
    %cst_364 = arith.constant 1.000000e+00 : f32
    %1090 = vector.broadcast %cst_364 : f32 to vector<8x32xf32>
    %1091 = arith.addf %1090, %1089 : vector<8x32xf32>
    %1092 = arith.divf %1090, %1091 : vector<8x32xf32>
    %1093 = arith.mulf %1084, %1072 : vector<8x32xf32>
    %1094 = arith.mulf %1078, %1086 : vector<8x32xf32>
    %1095 = arith.addf %1093, %1094 : vector<8x32xf32>
    %1096 = math.tanh %1095 : vector<8x32xf32>
    %1097 = arith.mulf %1092, %1096 : vector<8x32xf32>
    %1098 = vector.extract_strided_slice %1057 {offsets = [0, 32], sizes = [8, 32], strides = [1, 1]} : vector<8x64xf32> to vector<8x32xf32>
    %1099 = vector.extract_strided_slice %1071 {offsets = [0, 0], sizes = [8, 32], strides = [1, 1]} : vector<8x128xf32> to vector<8x32xf32>
    %1100 = arith.negf %1099 : vector<8x32xf32>
    %1101 = math.exp %1100 : vector<8x32xf32>
    %cst_365 = arith.constant 1.000000e+00 : f32
    %1102 = vector.broadcast %cst_365 : f32 to vector<8x32xf32>
    %1103 = arith.addf %1102, %1101 : vector<8x32xf32>
    %1104 = arith.divf %1102, %1103 : vector<8x32xf32>
    %1105 = vector.extract_strided_slice %1071 {offsets = [0, 32], sizes = [8, 32], strides = [1, 1]} : vector<8x128xf32> to vector<8x32xf32>
    %1106 = arith.negf %1105 : vector<8x32xf32>
    %1107 = math.exp %1106 : vector<8x32xf32>
    %cst_366 = arith.constant 1.000000e+00 : f32
    %1108 = vector.broadcast %cst_366 : f32 to vector<8x32xf32>
    %1109 = arith.addf %1108, %1107 : vector<8x32xf32>
    %1110 = arith.divf %1108, %1109 : vector<8x32xf32>
    %1111 = vector.extract_strided_slice %1071 {offsets = [0, 64], sizes = [8, 32], strides = [1, 1]} : vector<8x128xf32> to vector<8x32xf32>
    %1112 = math.tanh %1111 : vector<8x32xf32>
    %1113 = vector.extract_strided_slice %1071 {offsets = [0, 96], sizes = [8, 32], strides = [1, 1]} : vector<8x128xf32> to vector<8x32xf32>
    %1114 = arith.negf %1113 : vector<8x32xf32>
    %1115 = math.exp %1114 : vector<8x32xf32>
    %cst_367 = arith.constant 1.000000e+00 : f32
    %1116 = vector.broadcast %cst_367 : f32 to vector<8x32xf32>
    %1117 = arith.addf %1116, %1115 : vector<8x32xf32>
    %1118 = arith.divf %1116, %1117 : vector<8x32xf32>
    %1119 = arith.mulf %1110, %1098 : vector<8x32xf32>
    %1120 = arith.mulf %1104, %1112 : vector<8x32xf32>
    %1121 = arith.addf %1119, %1120 : vector<8x32xf32>
    %1122 = math.tanh %1121 : vector<8x32xf32>
    %1123 = arith.mulf %1118, %1122 : vector<8x32xf32>
    %1124 = tpu.concatenate %1097, %1123 in 1 : vector<8x32xf32>, vector<8x32xf32> -> vector<8x64xf32>
    %c0_368 = arith.constant 0 : index
    %c0_369 = arith.constant 0 : index
    %1125 = vector.load %arg6[%c0_368, %c0_369] : memref<8x64xf32, #tpu.memory_space<vmem>>, vector<8x64xf32>
    tpu.vector_store %arg6[%c0_368, %c0_369], %1124 {strides = array<i32>} : memref<8x64xf32, #tpu.memory_space<vmem>>, vector<8x64xf32>,
    %1126 = tpu.concatenate %1095, %1121 in 1 : vector<8x32xf32>, vector<8x32xf32> -> vector<8x64xf32>
    %c0_370 = arith.constant 0 : index
    %c0_371 = arith.constant 0 : index
    %1127 = vector.load %arg7[%c0_370, %c0_371] : memref<8x64xf32, #tpu.memory_space<vmem>>, vector<8x64xf32>
    tpu.vector_store %arg7[%c0_370, %c0_371], %1126 {strides = array<i32>} : memref<8x64xf32, #tpu.memory_space<vmem>>, vector<8x64xf32>,
    %1128 = arith.index_cast %c13_i32 : i32 to index
    %c0_372 = arith.constant 0 : index
    %c0_373 = arith.constant 0 : index
    %1129 = vector.load %arg4[%1128, %c0_372, %c0_373] : memref<16x8x32xf32, #tpu.memory_space<vmem>>, vector<1x8x32xf32>
    %1130 = vector.shape_cast %1129 : vector<1x8x32xf32> to vector<8x32xf32>
    %1131 = vector.shape_cast %1097 : vector<8x32xf32> to vector<1x8x32xf32>
    tpu.vector_store %arg4[%1128, %c0_372, %c0_373], %1131 {strides = array<i32>} : memref<16x8x32xf32, #tpu.memory_space<vmem>>, vector<1x8x32xf32>,
    %c15_i32_374 = arith.constant 15 : i32
    %1132 = arith.subi %c15_i32_374, %c13_i32 : i32
    %1133 = arith.index_cast %1132 : i32 to index
    %c0_375 = arith.constant 0 : index
    %c0_376 = arith.constant 0 : index
    %1134 = vector.load %arg5[%1133, %c0_375, %c0_376] : memref<16x8x32xf32, #tpu.memory_space<vmem>>, vector<1x8x32xf32>
    %1135 = vector.shape_cast %1134 : vector<1x8x32xf32> to vector<8x32xf32>
    %1136 = vector.shape_cast %1123 : vector<8x32xf32> to vector<1x8x32xf32>
    tpu.vector_store %arg5[%1133, %c0_375, %c0_376], %1136 {strides = array<i32>} : memref<16x8x32xf32, #tpu.memory_space<vmem>>, vector<1x8x32xf32>,
    %c14_i32 = arith.constant 14 : i32
    %c0_377 = arith.constant 0 : index
    %c0_378 = arith.constant 0 : index
    %1137 = vector.load %arg6[%c0_377, %c0_378] : memref<8x64xf32, #tpu.memory_space<vmem>>, vector<8x64xf32>
    %c0_379 = arith.constant 0 : index
    %c0_380 = arith.constant 0 : index
    %1138 = vector.load %arg7[%c0_379, %c0_380] : memref<8x64xf32, #tpu.memory_space<vmem>>, vector<8x64xf32>
    %1139 = arith.truncf %1137 : vector<8x64xf32> to vector<8x64xbf16>
    %c0_381 = arith.constant 0 : index
    %c0_382 = arith.constant 0 : index
    %1140 = vector.load %arg3[%c0_381, %c0_382] : memref<64x256xbf16, #tpu.memory_space<vmem>>, vector<64x256xbf16>
    %cst_383 = arith.constant dense<0.000000e+00> : vector<8x256xf32>
    %1141 = tpu.matmul %1139, %1140, %cst_383 {dimension_numbers = #tpu.dot_dimension_numbers<[1], [0], [0], [1], [0, 0, 1, 1], [], []>} : vector<8x64xbf16>, vector<64x256xbf16>, vector<8x256xf32> -> vector<8x256xf32>
    %1142 = arith.index_cast %c14_i32 : i32 to index
    %c0_384 = arith.constant 0 : index
    %c0_385 = arith.constant 0 : index
    %1143 = vector.load %arg1[%1142, %c0_384, %c0_385] : memref<16x8x128xf32, #tpu.memory_space<vmem>>, vector<1x8x128xf32>
    %1144 = vector.shape_cast %1143 : vector<1x8x128xf32> to vector<8x128xf32>
    %1145 = vector.extract_strided_slice %1141 {offsets = [0, 0], sizes = [8, 128], strides = [1, 1]} : vector<8x256xf32> to vector<8x128xf32>
    %1146 = arith.addf %1144, %1145 : vector<8x128xf32>
    %c15_i32_386 = arith.constant 15 : i32
    %1147 = arith.subi %c15_i32_386, %c14_i32 : i32
    %1148 = arith.index_cast %1147 : i32 to index
    %c0_387 = arith.constant 0 : index
    %c0_388 = arith.constant 0 : index
    %1149 = vector.load %arg2[%1148, %c0_387, %c0_388] : memref<16x8x128xf32, #tpu.memory_space<vmem>>, vector<1x8x128xf32>
    %1150 = vector.shape_cast %1149 : vector<1x8x128xf32> to vector<8x128xf32>
    %1151 = vector.extract_strided_slice %1141 {offsets = [0, 128], sizes = [8, 128], strides = [1, 1]} : vector<8x256xf32> to vector<8x128xf32>
    %1152 = arith.addf %1150, %1151 : vector<8x128xf32>
    %1153 = vector.extract_strided_slice %1138 {offsets = [0, 0], sizes = [8, 32], strides = [1, 1]} : vector<8x64xf32> to vector<8x32xf32>
    %1154 = vector.extract_strided_slice %1146 {offsets = [0, 0], sizes = [8, 32], strides = [1, 1]} : vector<8x128xf32> to vector<8x32xf32>
    %1155 = arith.negf %1154 : vector<8x32xf32>
    %1156 = math.exp %1155 : vector<8x32xf32>
    %cst_389 = arith.constant 1.000000e+00 : f32
    %1157 = vector.broadcast %cst_389 : f32 to vector<8x32xf32>
    %1158 = arith.addf %1157, %1156 : vector<8x32xf32>
    %1159 = arith.divf %1157, %1158 : vector<8x32xf32>
    %1160 = vector.extract_strided_slice %1146 {offsets = [0, 32], sizes = [8, 32], strides = [1, 1]} : vector<8x128xf32> to vector<8x32xf32>
    %1161 = arith.negf %1160 : vector<8x32xf32>
    %1162 = math.exp %1161 : vector<8x32xf32>
    %cst_390 = arith.constant 1.000000e+00 : f32
    %1163 = vector.broadcast %cst_390 : f32 to vector<8x32xf32>
    %1164 = arith.addf %1163, %1162 : vector<8x32xf32>
    %1165 = arith.divf %1163, %1164 : vector<8x32xf32>
    %1166 = vector.extract_strided_slice %1146 {offsets = [0, 64], sizes = [8, 32], strides = [1, 1]} : vector<8x128xf32> to vector<8x32xf32>
    %1167 = math.tanh %1166 : vector<8x32xf32>
    %1168 = vector.extract_strided_slice %1146 {offsets = [0, 96], sizes = [8, 32], strides = [1, 1]} : vector<8x128xf32> to vector<8x32xf32>
    %1169 = arith.negf %1168 : vector<8x32xf32>
    %1170 = math.exp %1169 : vector<8x32xf32>
    %cst_391 = arith.constant 1.000000e+00 : f32
    %1171 = vector.broadcast %cst_391 : f32 to vector<8x32xf32>
    %1172 = arith.addf %1171, %1170 : vector<8x32xf32>
    %1173 = arith.divf %1171, %1172 : vector<8x32xf32>
    %1174 = arith.mulf %1165, %1153 : vector<8x32xf32>
    %1175 = arith.mulf %1159, %1167 : vector<8x32xf32>
    %1176 = arith.addf %1174, %1175 : vector<8x32xf32>
    %1177 = math.tanh %1176 : vector<8x32xf32>
    %1178 = arith.mulf %1173, %1177 : vector<8x32xf32>
    %1179 = vector.extract_strided_slice %1138 {offsets = [0, 32], sizes = [8, 32], strides = [1, 1]} : vector<8x64xf32> to vector<8x32xf32>
    %1180 = vector.extract_strided_slice %1152 {offsets = [0, 0], sizes = [8, 32], strides = [1, 1]} : vector<8x128xf32> to vector<8x32xf32>
    %1181 = arith.negf %1180 : vector<8x32xf32>
    %1182 = math.exp %1181 : vector<8x32xf32>
    %cst_392 = arith.constant 1.000000e+00 : f32
    %1183 = vector.broadcast %cst_392 : f32 to vector<8x32xf32>
    %1184 = arith.addf %1183, %1182 : vector<8x32xf32>
    %1185 = arith.divf %1183, %1184 : vector<8x32xf32>
    %1186 = vector.extract_strided_slice %1152 {offsets = [0, 32], sizes = [8, 32], strides = [1, 1]} : vector<8x128xf32> to vector<8x32xf32>
    %1187 = arith.negf %1186 : vector<8x32xf32>
    %1188 = math.exp %1187 : vector<8x32xf32>
    %cst_393 = arith.constant 1.000000e+00 : f32
    %1189 = vector.broadcast %cst_393 : f32 to vector<8x32xf32>
    %1190 = arith.addf %1189, %1188 : vector<8x32xf32>
    %1191 = arith.divf %1189, %1190 : vector<8x32xf32>
    %1192 = vector.extract_strided_slice %1152 {offsets = [0, 64], sizes = [8, 32], strides = [1, 1]} : vector<8x128xf32> to vector<8x32xf32>
    %1193 = math.tanh %1192 : vector<8x32xf32>
    %1194 = vector.extract_strided_slice %1152 {offsets = [0, 96], sizes = [8, 32], strides = [1, 1]} : vector<8x128xf32> to vector<8x32xf32>
    %1195 = arith.negf %1194 : vector<8x32xf32>
    %1196 = math.exp %1195 : vector<8x32xf32>
    %cst_394 = arith.constant 1.000000e+00 : f32
    %1197 = vector.broadcast %cst_394 : f32 to vector<8x32xf32>
    %1198 = arith.addf %1197, %1196 : vector<8x32xf32>
    %1199 = arith.divf %1197, %1198 : vector<8x32xf32>
    %1200 = arith.mulf %1191, %1179 : vector<8x32xf32>
    %1201 = arith.mulf %1185, %1193 : vector<8x32xf32>
    %1202 = arith.addf %1200, %1201 : vector<8x32xf32>
    %1203 = math.tanh %1202 : vector<8x32xf32>
    %1204 = arith.mulf %1199, %1203 : vector<8x32xf32>
    %1205 = tpu.concatenate %1178, %1204 in 1 : vector<8x32xf32>, vector<8x32xf32> -> vector<8x64xf32>
    %c0_395 = arith.constant 0 : index
    %c0_396 = arith.constant 0 : index
    %1206 = vector.load %arg6[%c0_395, %c0_396] : memref<8x64xf32, #tpu.memory_space<vmem>>, vector<8x64xf32>
    tpu.vector_store %arg6[%c0_395, %c0_396], %1205 {strides = array<i32>} : memref<8x64xf32, #tpu.memory_space<vmem>>, vector<8x64xf32>,
    %1207 = tpu.concatenate %1176, %1202 in 1 : vector<8x32xf32>, vector<8x32xf32> -> vector<8x64xf32>
    %c0_397 = arith.constant 0 : index
    %c0_398 = arith.constant 0 : index
    %1208 = vector.load %arg7[%c0_397, %c0_398] : memref<8x64xf32, #tpu.memory_space<vmem>>, vector<8x64xf32>
    tpu.vector_store %arg7[%c0_397, %c0_398], %1207 {strides = array<i32>} : memref<8x64xf32, #tpu.memory_space<vmem>>, vector<8x64xf32>,
    %1209 = arith.index_cast %c14_i32 : i32 to index
    %c0_399 = arith.constant 0 : index
    %c0_400 = arith.constant 0 : index
    %1210 = vector.load %arg4[%1209, %c0_399, %c0_400] : memref<16x8x32xf32, #tpu.memory_space<vmem>>, vector<1x8x32xf32>
    %1211 = vector.shape_cast %1210 : vector<1x8x32xf32> to vector<8x32xf32>
    %1212 = vector.shape_cast %1178 : vector<8x32xf32> to vector<1x8x32xf32>
    tpu.vector_store %arg4[%1209, %c0_399, %c0_400], %1212 {strides = array<i32>} : memref<16x8x32xf32, #tpu.memory_space<vmem>>, vector<1x8x32xf32>,
    %c15_i32_401 = arith.constant 15 : i32
    %1213 = arith.subi %c15_i32_401, %c14_i32 : i32
    %1214 = arith.index_cast %1213 : i32 to index
    %c0_402 = arith.constant 0 : index
    %c0_403 = arith.constant 0 : index
    %1215 = vector.load %arg5[%1214, %c0_402, %c0_403] : memref<16x8x32xf32, #tpu.memory_space<vmem>>, vector<1x8x32xf32>
    %1216 = vector.shape_cast %1215 : vector<1x8x32xf32> to vector<8x32xf32>
    %1217 = vector.shape_cast %1204 : vector<8x32xf32> to vector<1x8x32xf32>
    tpu.vector_store %arg5[%1214, %c0_402, %c0_403], %1217 {strides = array<i32>} : memref<16x8x32xf32, #tpu.memory_space<vmem>>, vector<1x8x32xf32>,
    %c15_i32_404 = arith.constant 15 : i32
    %c0_405 = arith.constant 0 : index
    %c0_406 = arith.constant 0 : index
    %1218 = vector.load %arg6[%c0_405, %c0_406] : memref<8x64xf32, #tpu.memory_space<vmem>>, vector<8x64xf32>
    %c0_407 = arith.constant 0 : index
    %c0_408 = arith.constant 0 : index
    %1219 = vector.load %arg7[%c0_407, %c0_408] : memref<8x64xf32, #tpu.memory_space<vmem>>, vector<8x64xf32>
    %1220 = arith.truncf %1218 : vector<8x64xf32> to vector<8x64xbf16>
    %c0_409 = arith.constant 0 : index
    %c0_410 = arith.constant 0 : index
    %1221 = vector.load %arg3[%c0_409, %c0_410] : memref<64x256xbf16, #tpu.memory_space<vmem>>, vector<64x256xbf16>
    %cst_411 = arith.constant dense<0.000000e+00> : vector<8x256xf32>
    %1222 = tpu.matmul %1220, %1221, %cst_411 {dimension_numbers = #tpu.dot_dimension_numbers<[1], [0], [0], [1], [0, 0, 1, 1], [], []>} : vector<8x64xbf16>, vector<64x256xbf16>, vector<8x256xf32> -> vector<8x256xf32>
    %1223 = arith.index_cast %c15_i32_404 : i32 to index
    %c0_412 = arith.constant 0 : index
    %c0_413 = arith.constant 0 : index
    %1224 = vector.load %arg1[%1223, %c0_412, %c0_413] : memref<16x8x128xf32, #tpu.memory_space<vmem>>, vector<1x8x128xf32>
    %1225 = vector.shape_cast %1224 : vector<1x8x128xf32> to vector<8x128xf32>
    %1226 = vector.extract_strided_slice %1222 {offsets = [0, 0], sizes = [8, 128], strides = [1, 1]} : vector<8x256xf32> to vector<8x128xf32>
    %1227 = arith.addf %1225, %1226 : vector<8x128xf32>
    %c15_i32_414 = arith.constant 15 : i32
    %1228 = arith.subi %c15_i32_414, %c15_i32_404 : i32
    %1229 = arith.index_cast %1228 : i32 to index
    %c0_415 = arith.constant 0 : index
    %c0_416 = arith.constant 0 : index
    %1230 = vector.load %arg2[%1229, %c0_415, %c0_416] : memref<16x8x128xf32, #tpu.memory_space<vmem>>, vector<1x8x128xf32>
    %1231 = vector.shape_cast %1230 : vector<1x8x128xf32> to vector<8x128xf32>
    %1232 = vector.extract_strided_slice %1222 {offsets = [0, 128], sizes = [8, 128], strides = [1, 1]} : vector<8x256xf32> to vector<8x128xf32>
    %1233 = arith.addf %1231, %1232 : vector<8x128xf32>
    %1234 = vector.extract_strided_slice %1219 {offsets = [0, 0], sizes = [8, 32], strides = [1, 1]} : vector<8x64xf32> to vector<8x32xf32>
    %1235 = vector.extract_strided_slice %1227 {offsets = [0, 0], sizes = [8, 32], strides = [1, 1]} : vector<8x128xf32> to vector<8x32xf32>
    %1236 = arith.negf %1235 : vector<8x32xf32>
    %1237 = math.exp %1236 : vector<8x32xf32>
    %cst_417 = arith.constant 1.000000e+00 : f32
    %1238 = vector.broadcast %cst_417 : f32 to vector<8x32xf32>
    %1239 = arith.addf %1238, %1237 : vector<8x32xf32>
    %1240 = arith.divf %1238, %1239 : vector<8x32xf32>
    %1241 = vector.extract_strided_slice %1227 {offsets = [0, 32], sizes = [8, 32], strides = [1, 1]} : vector<8x128xf32> to vector<8x32xf32>
    %1242 = arith.negf %1241 : vector<8x32xf32>
    %1243 = math.exp %1242 : vector<8x32xf32>
    %cst_418 = arith.constant 1.000000e+00 : f32
    %1244 = vector.broadcast %cst_418 : f32 to vector<8x32xf32>
    %1245 = arith.addf %1244, %1243 : vector<8x32xf32>
    %1246 = arith.divf %1244, %1245 : vector<8x32xf32>
    %1247 = vector.extract_strided_slice %1227 {offsets = [0, 64], sizes = [8, 32], strides = [1, 1]} : vector<8x128xf32> to vector<8x32xf32>
    %1248 = math.tanh %1247 : vector<8x32xf32>
    %1249 = vector.extract_strided_slice %1227 {offsets = [0, 96], sizes = [8, 32], strides = [1, 1]} : vector<8x128xf32> to vector<8x32xf32>
    %1250 = arith.negf %1249 : vector<8x32xf32>
    %1251 = math.exp %1250 : vector<8x32xf32>
    %cst_419 = arith.constant 1.000000e+00 : f32
    %1252 = vector.broadcast %cst_419 : f32 to vector<8x32xf32>
    %1253 = arith.addf %1252, %1251 : vector<8x32xf32>
    %1254 = arith.divf %1252, %1253 : vector<8x32xf32>
    %1255 = arith.mulf %1246, %1234 : vector<8x32xf32>
    %1256 = arith.mulf %1240, %1248 : vector<8x32xf32>
    %1257 = arith.addf %1255, %1256 : vector<8x32xf32>
    %1258 = math.tanh %1257 : vector<8x32xf32>
    %1259 = arith.mulf %1254, %1258 : vector<8x32xf32>
    %1260 = vector.extract_strided_slice %1219 {offsets = [0, 32], sizes = [8, 32], strides = [1, 1]} : vector<8x64xf32> to vector<8x32xf32>
    %1261 = vector.extract_strided_slice %1233 {offsets = [0, 0], sizes = [8, 32], strides = [1, 1]} : vector<8x128xf32> to vector<8x32xf32>
    %1262 = arith.negf %1261 : vector<8x32xf32>
    %1263 = math.exp %1262 : vector<8x32xf32>
    %cst_420 = arith.constant 1.000000e+00 : f32
    %1264 = vector.broadcast %cst_420 : f32 to vector<8x32xf32>
    %1265 = arith.addf %1264, %1263 : vector<8x32xf32>
    %1266 = arith.divf %1264, %1265 : vector<8x32xf32>
    %1267 = vector.extract_strided_slice %1233 {offsets = [0, 32], sizes = [8, 32], strides = [1, 1]} : vector<8x128xf32> to vector<8x32xf32>
    %1268 = arith.negf %1267 : vector<8x32xf32>
    %1269 = math.exp %1268 : vector<8x32xf32>
    %cst_421 = arith.constant 1.000000e+00 : f32
    %1270 = vector.broadcast %cst_421 : f32 to vector<8x32xf32>
    %1271 = arith.addf %1270, %1269 : vector<8x32xf32>
    %1272 = arith.divf %1270, %1271 : vector<8x32xf32>
    %1273 = vector.extract_strided_slice %1233 {offsets = [0, 64], sizes = [8, 32], strides = [1, 1]} : vector<8x128xf32> to vector<8x32xf32>
    %1274 = math.tanh %1273 : vector<8x32xf32>
    %1275 = vector.extract_strided_slice %1233 {offsets = [0, 96], sizes = [8, 32], strides = [1, 1]} : vector<8x128xf32> to vector<8x32xf32>
    %1276 = arith.negf %1275 : vector<8x32xf32>
    %1277 = math.exp %1276 : vector<8x32xf32>
    %cst_422 = arith.constant 1.000000e+00 : f32
    %1278 = vector.broadcast %cst_422 : f32 to vector<8x32xf32>
    %1279 = arith.addf %1278, %1277 : vector<8x32xf32>
    %1280 = arith.divf %1278, %1279 : vector<8x32xf32>
    %1281 = arith.mulf %1272, %1260 : vector<8x32xf32>
    %1282 = arith.mulf %1266, %1274 : vector<8x32xf32>
    %1283 = arith.addf %1281, %1282 : vector<8x32xf32>
    %1284 = math.tanh %1283 : vector<8x32xf32>
    %1285 = arith.mulf %1280, %1284 : vector<8x32xf32>
    %1286 = tpu.concatenate %1259, %1285 in 1 : vector<8x32xf32>, vector<8x32xf32> -> vector<8x64xf32>
    %c0_423 = arith.constant 0 : index
    %c0_424 = arith.constant 0 : index
    %1287 = vector.load %arg6[%c0_423, %c0_424] : memref<8x64xf32, #tpu.memory_space<vmem>>, vector<8x64xf32>
    tpu.vector_store %arg6[%c0_423, %c0_424], %1286 {strides = array<i32>} : memref<8x64xf32, #tpu.memory_space<vmem>>, vector<8x64xf32>,
    %1288 = tpu.concatenate %1257, %1283 in 1 : vector<8x32xf32>, vector<8x32xf32> -> vector<8x64xf32>
    %c0_425 = arith.constant 0 : index
    %c0_426 = arith.constant 0 : index
    %1289 = vector.load %arg7[%c0_425, %c0_426] : memref<8x64xf32, #tpu.memory_space<vmem>>, vector<8x64xf32>
    tpu.vector_store %arg7[%c0_425, %c0_426], %1288 {strides = array<i32>} : memref<8x64xf32, #tpu.memory_space<vmem>>, vector<8x64xf32>,
    %1290 = arith.index_cast %c15_i32_404 : i32 to index
    %c0_427 = arith.constant 0 : index
    %c0_428 = arith.constant 0 : index
    %1291 = vector.load %arg4[%1290, %c0_427, %c0_428] : memref<16x8x32xf32, #tpu.memory_space<vmem>>, vector<1x8x32xf32>
    %1292 = vector.shape_cast %1291 : vector<1x8x32xf32> to vector<8x32xf32>
    %1293 = vector.shape_cast %1259 : vector<8x32xf32> to vector<1x8x32xf32>
    tpu.vector_store %arg4[%1290, %c0_427, %c0_428], %1293 {strides = array<i32>} : memref<16x8x32xf32, #tpu.memory_space<vmem>>, vector<1x8x32xf32>,
    %c15_i32_429 = arith.constant 15 : i32
    %1294 = arith.subi %c15_i32_429, %c15_i32_404 : i32
    %1295 = arith.index_cast %1294 : i32 to index
    %c0_430 = arith.constant 0 : index
    %c0_431 = arith.constant 0 : index
    %1296 = vector.load %arg5[%1295, %c0_430, %c0_431] : memref<16x8x32xf32, #tpu.memory_space<vmem>>, vector<1x8x32xf32>
    %1297 = vector.shape_cast %1296 : vector<1x8x32xf32> to vector<8x32xf32>
    %1298 = vector.shape_cast %1285 : vector<8x32xf32> to vector<1x8x32xf32>
    tpu.vector_store %arg5[%1295, %c0_430, %c0_431], %1298 {strides = array<i32>} : memref<16x8x32xf32, #tpu.memory_space<vmem>>, vector<1x8x32xf32>,
    %c16_i32 = arith.constant 16 : i32
    return
  }
  func.func @transform_0(%arg0: i32) -> (i32, i32, i32) {
    %c0_i32 = arith.constant 0 : i32
    %c0_i32_0 = arith.constant 0 : i32
    %c0_i32_1 = arith.constant 0 : i32
    return %arg0, %c0_i32, %c0_i32_0 : i32, i32, i32
  }
  func.func @transform_1(%arg0: i32) -> (i32, i32, i32) {
    %c0_i32 = arith.constant 0 : i32
    %0 = arith.subi %c0_i32, %arg0 : i32
    %c0_i32_0 = arith.constant 0 : i32
    %c1_i32 = arith.constant 1 : i32
    %c0_i32_1 = arith.constant 0 : i32
    return %0, %c0_i32_0, %c1_i32 : i32, i32, i32
  }
  func.func @transform_2(%arg0: i32) -> (i32, i32) {
    %c0_i32 = arith.constant 0 : i32
    %c0_i32_0 = arith.constant 0 : i32
    %c0_i32_1 = arith.constant 0 : i32
    return %c0_i32, %c0_i32_0 : i32, i32
  }
  func.func @transform_3(%arg0: i32) -> (i32, i32, i32) {
    %c0_i32 = arith.constant 0 : i32
    %c0_i32_0 = arith.constant 0 : i32
    %c0_i32_1 = arith.constant 0 : i32
    return %arg0, %c0_i32, %c0_i32_0 : i32, i32, i32
  }
  func.func @transform_4(%arg0: i32) -> (i32, i32, i32) {
    %c0_i32 = arith.constant 0 : i32
    %0 = arith.subi %c0_i32, %arg0 : i32
    %c0_i32_0 = arith.constant 0 : i32
    %c0_i32_1 = arith.constant 0 : i32
    %c0_i32_2 = arith.constant 0 : i32
    return %0, %c0_i32_0, %c0_i32_1 : i32, i32, i32
  }
}

module attributes {stable_mosaic.version = 11 : i64} {
  func.func @_linear2_kernel(%arg0: i32, %arg1: memref<128x32xbf16, #tpu.memory_space<vmem>>, %arg2: memref<128x32xbf16, #tpu.memory_space<vmem>>, %arg3: memref<32x256xbf16, #tpu.memory_space<vmem>>, %arg4: memref<32x256xbf16, #tpu.memory_space<vmem>>, %arg5: memref<1x256xf32, #tpu.memory_space<vmem>>, %arg6: memref<128x256xf32, #tpu.memory_space<vmem>>) attributes {dimension_semantics = [#tpu.dimension_semantics<parallel>], iteration_bounds = array<i64: 1>, scalar_prefetch = 0 : i64, scratch_operands = 0 : i64, tpu.core_type = #tpu.core_type<tc>, window_params = [{transform_indices = @transform_0, window_bounds = array<i64: 128, 32>}, {transform_indices = @transform_1, window_bounds = array<i64: 128, 32>}, {pipeline_mode = #tpu.pipeline_mode<synchronous>, transform_indices = @transform_2, window_bounds = array<i64: 32, 256>}, {pipeline_mode = #tpu.pipeline_mode<synchronous>, transform_indices = @transform_3, window_bounds = array<i64: 32, 256>}, {pipeline_mode = #tpu.pipeline_mode<synchronous>, transform_indices = @transform_4, window_bounds = array<i64: 1, 256>}, {transform_indices = @transform_5, window_bounds = array<i64: 128, 256>}]} {
    %c0 = arith.constant 0 : index
    %c0_0 = arith.constant 0 : index
    %0 = vector.load %arg1[%c0, %c0_0] : memref<128x32xbf16, #tpu.memory_space<vmem>>, vector<128x32xbf16>
    %c0_1 = arith.constant 0 : index
    %c0_2 = arith.constant 0 : index
    %1 = vector.load %arg3[%c0_1, %c0_2] : memref<32x256xbf16, #tpu.memory_space<vmem>>, vector<32x256xbf16>
    %cst = arith.constant dense<0.000000e+00> : vector<128x256xf32>
    %2 = tpu.matmul %0, %1, %cst {dimension_numbers = #tpu.dot_dimension_numbers<[1], [0], [0], [1], [0, 0, 1, 1], [], []>} : vector<128x32xbf16>, vector<32x256xbf16>, vector<128x256xf32> -> vector<128x256xf32>
    %c0_3 = arith.constant 0 : index
    %c0_4 = arith.constant 0 : index
    %3 = vector.load %arg2[%c0_3, %c0_4] : memref<128x32xbf16, #tpu.memory_space<vmem>>, vector<128x32xbf16>
    %c0_5 = arith.constant 0 : index
    %c0_6 = arith.constant 0 : index
    %4 = vector.load %arg4[%c0_5, %c0_6] : memref<32x256xbf16, #tpu.memory_space<vmem>>, vector<32x256xbf16>
    %cst_7 = arith.constant dense<0.000000e+00> : vector<128x256xf32>
    %5 = tpu.matmul %3, %4, %cst_7 {dimension_numbers = #tpu.dot_dimension_numbers<[1], [0], [0], [1], [0, 0, 1, 1], [], []>} : vector<128x32xbf16>, vector<32x256xbf16>, vector<128x256xf32> -> vector<128x256xf32>
    %6 = arith.addf %2, %5 : vector<128x256xf32>
    %c0_8 = arith.constant 0 : index
    %c0_9 = arith.constant 0 : index
    %7 = vector.load %arg5[%c0_8, %c0_9] : memref<1x256xf32, #tpu.memory_space<vmem>>, vector<1x256xf32>
    %8 = vector.broadcast %7 : vector<1x256xf32> to vector<128x256xf32>
    %9 = arith.addf %6, %8 : vector<128x256xf32>
    %c0_10 = arith.constant 0 : index
    %c0_11 = arith.constant 0 : index
    %10 = vector.load %arg6[%c0_10, %c0_11] : memref<128x256xf32, #tpu.memory_space<vmem>>, vector<128x256xf32>
    tpu.vector_store %arg6[%c0_10, %c0_11], %9 {strides = array<i32>} : memref<128x256xf32, #tpu.memory_space<vmem>>, vector<128x256xf32>,
    return
  }
  func.func @transform_0(%arg0: i32) -> (i32, i32) {
    %c0_i32 = arith.constant 0 : i32
    %c0_i32_0 = arith.constant 0 : i32
    return %arg0, %c0_i32 : i32, i32
  }
  func.func @transform_1(%arg0: i32) -> (i32, i32) {
    %c0_i32 = arith.constant 0 : i32
    %c0_i32_0 = arith.constant 0 : i32
    return %arg0, %c0_i32 : i32, i32
  }
  func.func @transform_2(%arg0: i32) -> (i32, i32) {
    %c0_i32 = arith.constant 0 : i32
    %c0_i32_0 = arith.constant 0 : i32
    %c0_i32_1 = arith.constant 0 : i32
    return %c0_i32, %c0_i32_0 : i32, i32
  }
  func.func @transform_3(%arg0: i32) -> (i32, i32) {
    %c0_i32 = arith.constant 0 : i32
    %c0_i32_0 = arith.constant 0 : i32
    %c0_i32_1 = arith.constant 0 : i32
    return %c0_i32, %c0_i32_0 : i32, i32
  }
  func.func @transform_4(%arg0: i32) -> (i32, i32) {
    %c0_i32 = arith.constant 0 : i32
    %c0_i32_0 = arith.constant 0 : i32
    %c0_i32_1 = arith.constant 0 : i32
    return %c0_i32, %c0_i32_0 : i32, i32
  }
  func.func @transform_5(%arg0: i32) -> (i32, i32) {
    %c0_i32 = arith.constant 0 : i32
    %c0_i32_0 = arith.constant 0 : i32
    return %arg0, %c0_i32 : i32, i32
  }
}

module attributes {stable_mosaic.version = 11 : i64} {
  func.func @_decoder_kernel(%arg0: i32, %arg1: memref<128x32xbf16, #tpu.memory_space<vmem>>, %arg2: memref<128x32xbf16, #tpu.memory_space<vmem>>, %arg3: memref<32x128xbf16, #tpu.memory_space<vmem>>, %arg4: memref<32x128xbf16, #tpu.memory_space<vmem>>, %arg5: memref<1x128xf32, #tpu.memory_space<vmem>>, %arg6: memref<128x128xf32, #tpu.memory_space<vmem>>, %arg7: memref<128x128xf32, #tpu.memory_space<vmem>>, %arg8: memref<128x128xf32, #tpu.memory_space<vmem>>, %arg9: memref<1x1xf32, #tpu.memory_space<vmem>>, %arg10: memref<2xf32, #tpu.memory_space<smem>>) attributes {dimension_semantics = [#tpu.dimension_semantics<arbitrary>], iteration_bounds = array<i64: 1>, scalar_prefetch = 0 : i64, scratch_operands = 1 : i64, tpu.core_type = #tpu.core_type<tc>, window_params = [{transform_indices = @transform_0, window_bounds = array<i64: 128, 32>}, {transform_indices = @transform_1, window_bounds = array<i64: 128, 32>}, {pipeline_mode = #tpu.pipeline_mode<synchronous>, transform_indices = @transform_2, window_bounds = array<i64: 32, 128>}, {pipeline_mode = #tpu.pipeline_mode<synchronous>, transform_indices = @transform_3, window_bounds = array<i64: 32, 128>}, {pipeline_mode = #tpu.pipeline_mode<synchronous>, transform_indices = @transform_4, window_bounds = array<i64: 1, 128>}, {transform_indices = @transform_5, window_bounds = array<i64: 128, 128>}, {transform_indices = @transform_6, window_bounds = array<i64: 128, 128>}, {transform_indices = @transform_7, window_bounds = array<i64: 128, 128>}, {pipeline_mode = #tpu.pipeline_mode<synchronous>, transform_indices = @transform_8, window_bounds = array<i64: 1, 1>}]} {
    %c0_i32 = arith.constant 0 : i32
    %0 = arith.cmpi eq, %arg0, %c0_i32 : i32
    %1 = arith.extui %0 : i1 to i32
    %c0_i32_0 = arith.constant 0 : i32
    %2 = arith.cmpi ne, %1, %c0_i32_0 : i32
    scf.if %2 {
      %cst_25 = arith.constant 0.000000e+00 : f32
      %c0_26 = arith.constant 0 : index
      %39 = memref.load %arg10[%c0_26] : memref<2xf32, #tpu.memory_space<smem>>
      memref.store %cst_25, %arg10[%c0_26] : memref<2xf32, #tpu.memory_space<smem>>
      %cst_27 = arith.constant 0.000000e+00 : f32
      %c1_28 = arith.constant 1 : index
      %40 = memref.load %arg10[%c1_28] : memref<2xf32, #tpu.memory_space<smem>>
      memref.store %cst_27, %arg10[%c1_28] : memref<2xf32, #tpu.memory_space<smem>>
    } else {
    }
    %c0 = arith.constant 0 : index
    %c0_1 = arith.constant 0 : index
    %3 = vector.load %arg1[%c0, %c0_1] : memref<128x32xbf16, #tpu.memory_space<vmem>>, vector<128x32xbf16>
    %c0_2 = arith.constant 0 : index
    %c0_3 = arith.constant 0 : index
    %4 = vector.load %arg3[%c0_2, %c0_3] : memref<32x128xbf16, #tpu.memory_space<vmem>>, vector<32x128xbf16>
    %cst = arith.constant dense<0.000000e+00> : vector<128x128xf32>
    %5 = tpu.matmul %3, %4, %cst {dimension_numbers = #tpu.dot_dimension_numbers<[1], [0], [0], [1], [0, 0, 1, 1], [], []>} : vector<128x32xbf16>, vector<32x128xbf16>, vector<128x128xf32> -> vector<128x128xf32>
    %c0_4 = arith.constant 0 : index
    %c0_5 = arith.constant 0 : index
    %6 = vector.load %arg2[%c0_4, %c0_5] : memref<128x32xbf16, #tpu.memory_space<vmem>>, vector<128x32xbf16>
    %c0_6 = arith.constant 0 : index
    %c0_7 = arith.constant 0 : index
    %7 = vector.load %arg4[%c0_6, %c0_7] : memref<32x128xbf16, #tpu.memory_space<vmem>>, vector<32x128xbf16>
    %cst_8 = arith.constant dense<0.000000e+00> : vector<128x128xf32>
    %8 = tpu.matmul %6, %7, %cst_8 {dimension_numbers = #tpu.dot_dimension_numbers<[1], [0], [0], [1], [0, 0, 1, 1], [], []>} : vector<128x32xbf16>, vector<32x128xbf16>, vector<128x128xf32> -> vector<128x128xf32>
    %9 = arith.addf %5, %8 : vector<128x128xf32>
    %c0_9 = arith.constant 0 : index
    %c0_10 = arith.constant 0 : index
    %10 = vector.load %arg5[%c0_9, %c0_10] : memref<1x128xf32, #tpu.memory_space<vmem>>, vector<1x128xf32>
    %11 = vector.broadcast %10 : vector<1x128xf32> to vector<128x128xf32>
    %12 = arith.addf %9, %11 : vector<128x128xf32>
    %c0_11 = arith.constant 0 : index
    %c0_12 = arith.constant 0 : index
    %13 = vector.load %arg6[%c0_11, %c0_12] : memref<128x128xf32, #tpu.memory_space<vmem>>, vector<128x128xf32>
    %c0_13 = arith.constant 0 : index
    %c0_14 = arith.constant 0 : index
    %14 = vector.load %arg7[%c0_13, %c0_14] : memref<128x128xf32, #tpu.memory_space<vmem>>, vector<128x128xf32>
    %15 = arith.subf %12, %13 : vector<128x128xf32>
    %c0_15 = arith.constant 0 : index
    %16 = memref.load %arg10[%c0_15] : memref<2xf32, #tpu.memory_space<smem>>
    %17 = arith.mulf %14, %15 : vector<128x128xf32>
    %18 = arith.mulf %17, %15 : vector<128x128xf32>
    %19 = vector.shape_cast %18 : vector<128x128xf32> to vector<1x128x128xf32>
    %cst_16 = arith.constant dense<0.000000e+00> : vector<1xf32>
    %20 = vector.multi_reduction <add>, %19, %cst_16 [1, 2] : vector<1x128x128xf32> to vector<1xf32>
    %21 = vector.shape_cast %20 : vector<1xf32> to vector<1x1x1xf32>
    %22 = vector.extract %21[0, 0, 0] : f32 from vector<1x1x1xf32>
    %23 = arith.addf %16, %22 : f32
    %c0_17 = arith.constant 0 : index
    %24 = memref.load %arg10[%c0_17] : memref<2xf32, #tpu.memory_space<smem>>
    memref.store %23, %arg10[%c0_17] : memref<2xf32, #tpu.memory_space<smem>>
    %c1 = arith.constant 1 : index
    %25 = memref.load %arg10[%c1] : memref<2xf32, #tpu.memory_space<smem>>
    %26 = vector.shape_cast %14 : vector<128x128xf32> to vector<1x128x128xf32>
    %cst_18 = arith.constant dense<0.000000e+00> : vector<1xf32>
    %27 = vector.multi_reduction <add>, %26, %cst_18 [1, 2] : vector<1x128x128xf32> to vector<1xf32>
    %28 = vector.shape_cast %27 : vector<1xf32> to vector<1x1x1xf32>
    %29 = vector.extract %28[0, 0, 0] : f32 from vector<1x1x1xf32>
    %30 = arith.addf %25, %29 : f32
    %c1_19 = arith.constant 1 : index
    %31 = memref.load %arg10[%c1_19] : memref<2xf32, #tpu.memory_space<smem>>
    memref.store %30, %arg10[%c1_19] : memref<2xf32, #tpu.memory_space<smem>>
    %cst_20 = arith.constant 0.000000e+00 : f32
    %32 = vector.broadcast %cst_20 : f32 to vector<128x128xf32>
    %33 = arith.cmpf one, %14, %32 : vector<128x128xf32>
    %34 = arith.select %33, %13, %12 : vector<128x128xi1>, vector<128x128xf32>
    %c0_21 = arith.constant 0 : index
    %c0_22 = arith.constant 0 : index
    %35 = vector.load %arg8[%c0_21, %c0_22] : memref<128x128xf32, #tpu.memory_space<vmem>>, vector<128x128xf32>
    tpu.vector_store %arg8[%c0_21, %c0_22], %34 {strides = array<i32>} : memref<128x128xf32, #tpu.memory_space<vmem>>, vector<128x128xf32>,
    %c0_i32_23 = arith.constant 0 : i32
    %36 = arith.cmpi eq, %arg0, %c0_i32_23 : i32
    %37 = arith.extui %36 : i1 to i32
    %c0_i32_24 = arith.constant 0 : i32
    %38 = arith.cmpi ne, %37, %c0_i32_24 : i32
    scf.if %38 {
      %c0_25 = arith.constant 0 : index
      %39 = memref.load %arg10[%c0_25] : memref<2xf32, #tpu.memory_space<smem>>
      %c1_26 = arith.constant 1 : index
      %40 = memref.load %arg10[%c1_26] : memref<2xf32, #tpu.memory_space<smem>>
      %cst_27 = arith.constant 9.99999993E-9 : f32
      %41 = arith.addf %40, %cst_27 : f32
      %42 = arith.divf %39, %41 : f32
      %43 = vector.broadcast %42 : f32 to vector<1x1xf32>
      %c0_28 = arith.constant 0 : index
      %c0_29 = arith.constant 0 : index
      %44 = vector.load %arg9[%c0_28, %c0_29] : memref<1x1xf32, #tpu.memory_space<vmem>>, vector<1x1xf32>
      tpu.vector_store %arg9[%c0_28, %c0_29], %43 {strides = array<i32>} : memref<1x1xf32, #tpu.memory_space<vmem>>, vector<1x1xf32>,
    } else {
    }
    return
  }
  func.func @transform_0(%arg0: i32) -> (i32, i32) {
    %c0_i32 = arith.constant 0 : i32
    %c0_i32_0 = arith.constant 0 : i32
    return %arg0, %c0_i32 : i32, i32
  }
  func.func @transform_1(%arg0: i32) -> (i32, i32) {
    %c0_i32 = arith.constant 0 : i32
    %c0_i32_0 = arith.constant 0 : i32
    return %arg0, %c0_i32 : i32, i32
  }
  func.func @transform_2(%arg0: i32) -> (i32, i32) {
    %c0_i32 = arith.constant 0 : i32
    %c0_i32_0 = arith.constant 0 : i32
    %c0_i32_1 = arith.constant 0 : i32
    return %c0_i32, %c0_i32_0 : i32, i32
  }
  func.func @transform_3(%arg0: i32) -> (i32, i32) {
    %c0_i32 = arith.constant 0 : i32
    %c0_i32_0 = arith.constant 0 : i32
    %c0_i32_1 = arith.constant 0 : i32
    return %c0_i32, %c0_i32_0 : i32, i32
  }
  func.func @transform_4(%arg0: i32) -> (i32, i32) {
    %c0_i32 = arith.constant 0 : i32
    %c0_i32_0 = arith.constant 0 : i32
    %c0_i32_1 = arith.constant 0 : i32
    return %c0_i32, %c0_i32_0 : i32, i32
  }
  func.func @transform_5(%arg0: i32) -> (i32, i32) {
    %c0_i32 = arith.constant 0 : i32
    %c0_i32_0 = arith.constant 0 : i32
    return %arg0, %c0_i32 : i32, i32
  }
  func.func @transform_6(%arg0: i32) -> (i32, i32) {
    %c0_i32 = arith.constant 0 : i32
    %c0_i32_0 = arith.constant 0 : i32
    return %arg0, %c0_i32 : i32, i32
  }
  func.func @transform_7(%arg0: i32) -> (i32, i32) {
    %c0_i32 = arith.constant 0 : i32
    %c0_i32_0 = arith.constant 0 : i32
    return %arg0, %c0_i32 : i32, i32
  }
  func.func @transform_8(%arg0: i32) -> (i32, i32) {
    %c0_i32 = arith.constant 0 : i32
    %c0_i32_0 = arith.constant 0 : i32
    %c0_i32_1 = arith.constant 0 : i32
    return %c0_i32, %c0_i32_0 : i32, i32
  }
}

</mosaic_0001>

<bundles_post_ra>
// kernel: stgi_forward.9
= control target key start
LH: loop header
LB: loop body
LE: loop exit
PB: predicated region body
PF: predicated region fallthrough
CT: control target
= control target key end

     0   :  { %vm104_vm0 = vcmask 1041408   ;;  %vm79_vm1 = vcmask 31744   ;;  %s387_s1 = inlined_call_operand.vmem [shape: bf16[4,128], index: 1, kind: input, shape index: {}]   ;;  %s388_s0 = inlined_call_operand.vmem [shape: bf16[128,4], index: 0, kind: input, shape index: {}]   ;;  %s389_s2 = inlined_call_operand.vmem [shape: f32[1,128], index: 2, kind: input, shape index: {}]   ;;  %s390_s3 = inlined_call_operand.vmem [shape: f32[128,128], index: 3, kind: output, shape index: {}]  }
   0x1   :  { %v31_v0 = vld [vmem:[%s387_s1] sm:$0x3]  ;;  %v275_v4 = vld [vmem:[%s388_s0 + $0x8] sm:$0xff]   ;;  %v277_v6 = vld [vmem:[%s388_s0 + $0x10] sm:$0xff]  }
   0x2   :  { %271 = vmatprep.subr.msk.bf16.mxu0 %vm104_vm0, %v31_v0  ;;  %272 = vmatprep.subr.msk.bf16.mxu1 %vm104_vm0, %v31_v0  ;;  %v106_v1 = vsel %vm104_vm0, %v31_v0, 0  ;;  %v273_v2 = vld [vmem:[%s388_s0] sm:$0xff]   ;;  %v276_v5 = vld [vmem:[%s388_s0 + $0x28] sm:$0xff]   ;;  %v278_v7 = vld [vmem:[%s388_s0 + $0x30] sm:$0xff]  }
   0x3   :  { %252 = vmatpush3.bf16.msra.mxu0 %v106_v1  ;;  %270 = vmatpush3.bf16.msra.mxu1 %v106_v1  ;;  %v274_v3 = vld [vmem:[%s388_s0 + $0x20] sm:$0xff]   ;;  %v279_v8 = vld [vmem:[%s388_s0 + $0x18] sm:$0xff]  }
   0x4   :  { %253 = vmatprep.mubr.msk.bf16.mxu0 %vm79_vm1, %v273_v2  ;;  %261 = vmatprep.mubr.msk.bf16.mxu1 %vm79_vm1, %v274_v3  ;;  %v280_v9 = vld [vmem:[%s388_s0 + $0x38] sm:$0xff]   ;;  %v225_v10 = vld [vmem:[%s389_s2] ss:$0 sm:$0xff] }
   0x6   :  { %254 = vmatmul.mubr.msk.bf16.vlgmr.msra.gmra.mxu0 %vm79_vm1, %v275_v4  ;;  %262 = vmatmul.mubr.msk.bf16.vlgmr.msra.gmra.mxu1 %vm79_vm1, %v276_v5 }
   0x7   :  { %257 = vmatprep.mubr.msk.bf16.mxu0 %vm79_vm1, %v277_v6  ;;  %265 = vmatprep.mubr.msk.bf16.mxu1 %vm79_vm1, %v278_v7 }
   0xe   :  { %258 = vmatmul.mubr.msk.bf16.gmra.mxu0 %vm79_vm1, %v279_v8  ;;  %266 = vmatmul.mubr.msk.bf16.gmra.mxu1 %vm79_vm1, %v280_v9 }
  0xc6   :  { %v255_v11 = vpop.f32.mrf.mxu0  ;;  %v263_v13 = vpop.f32.mrf.mxu1 }
  0xc7   :  { %v151_v12 = vadd.f32 %v255_v11, %v225_v10  ;;  %v183_v14 = vadd.f32 %v263_v13, %v225_v10 }
  0xc8   :  { %v142_v15 = vpop.f32.mrf.mxu0  ;;  %v174_v17 = vpop.f32.mrf.mxu1 }
  0xc9   :  { %207 = vst [vmem:[%s390_s3 + $0x10] sm:$0xff] %v151_v12  ;;  %v143_v16 = vadd.f32 %v225_v10, %v142_v15  ;;  %215 = vst [vmem:[%s390_s3 + $0x50] sm:$0xff] %v183_v14  ;;  %v175_v18 = vadd.f32 %v225_v10, %v174_v17 }
  0xca   :  { %v256_v19 = vpop.f32.mrf.mxu0  ;;  %v264_v21 = vpop.f32.mrf.mxu1 }
  0xcb   :  { %205 = vst [vmem:[%s390_s3] sm:$0xff] %v143_v16  ;;  %v154_v20 = vadd.f32 %v256_v19, %v225_v10  ;;  %213 = vst [vmem:[%s390_s3 + $0x40] sm:$0xff] %v175_v18  ;;  %v186_v22 = vadd.f32 %v264_v21, %v225_v10 }
  0xcc   :  { %v145_v23 = vpop.f32.mrf.mxu0  ;;  %v177_v25 = vpop.f32.mrf.mxu1 }
  0xcd   :  { %208 = vst [vmem:[%s390_s3 + $0x18] sm:$0xff] %v154_v20  ;;  %v146_v24 = vadd.f32 %v225_v10, %v145_v23  ;;  %216 = vst [vmem:[%s390_s3 + $0x58] sm:$0xff] %v186_v22  ;;  %v178_v26 = vadd.f32 %v225_v10, %v177_v25 }
  0xce   :  { %v259_v27 = vpop.f32.mrf.mxu0  ;;  %v267_v29 = vpop.f32.mrf.mxu1 }
  0xcf   :  { %206 = vst [vmem:[%s390_s3 + $0x8] sm:$0xff] %v146_v24  ;;  %v167_v28 = vadd.f32 %v259_v27, %v225_v10  ;;  %214 = vst [vmem:[%s390_s3 + $0x48] sm:$0xff] %v178_v26  ;;  %v199_v30 = vadd.f32 %v267_v29, %v225_v10 }
  0xd0   :  { %v158_v31 = vpop.f32.mrf.mxu0  ;;  %v190_v33 = vpop.f32.mrf.mxu1 }
  0xd1   :  { %211 = vst [vmem:[%s390_s3 + $0x30] sm:$0xff] %v167_v28  ;;  %v159_v32 = vadd.f32 %v225_v10, %v158_v31  ;;  %219 = vst [vmem:[%s390_s3 + $0x70] sm:$0xff] %v199_v30  ;;  %v191_v34 = vadd.f32 %v225_v10, %v190_v33 }
  0xd2   :  { %v260_v35 = vpop.f32.mrf.mxu0  ;;  %v268_v37 = vpop.f32.mrf.mxu1 }
  0xd3   :  { %209 = vst [vmem:[%s390_s3 + $0x20] sm:$0xff] %v159_v32  ;;  %v170_v36 = vadd.f32 %v260_v35, %v225_v10  ;;  %217 = vst [vmem:[%s390_s3 + $0x60] sm:$0xff] %v191_v34  ;;  %v202_v38 = vadd.f32 %v268_v37, %v225_v10 }
  0xd4   :  { %v161_v39 = vpop.f32.mrf.mxu0  ;;  %v193_v41 = vpop.f32.mrf.mxu1 }
  0xd5   :  { %212 = vst [vmem:[%s390_s3 + $0x38] sm:$0xff] %v170_v36  ;;  %v162_v40 = vadd.f32 %v225_v10, %v161_v39  ;;  %220 = vst [vmem:[%s390_s3 + $0x78] sm:$0xff] %v202_v38  ;;  %v194_v42 = vadd.f32 %v225_v10, %v193_v41 }
  0xd7   :  { %210 = vst [vmem:[%s390_s3 + $0x28] sm:$0xff] %v162_v40  ;;  %218 = vst [vmem:[%s390_s3 + $0x68] sm:$0xff] %v194_v42 }

// kernel: stgi_forward.11
= control target key start
LH: loop header
LB: loop body
LE: loop exit
PB: predicated region body
PF: predicated region fallthrough
CT: control target
= control target key end

     0   :  { %s483_s1 = inlined_call_operand.vmem [shape: bf16[128,128], index: 1, kind: input, shape index: {}]   ;;  %s484_s0 = inlined_call_operand.vmem [shape: bf16[128,128], index: 0, kind: input, shape index: {}]   ;;  %s485_s2 = inlined_call_operand.vmem [shape: f32[1,128], index: 2, kind: input, shape index: {}]   ;;  %s486_s3 = inlined_call_operand.vmem [shape: f32[128,128], index: 3, kind: output, shape index: {}]  }
   0x1   :  { %v348_v0 = vld [vmem:[%s483_s1 + $0x38] sm:$0xff]   ;;  %v349_v1 = vld [vmem:[%s483_s1 + $0x30] sm:$0xff]   ;;  %v350_v2 = vld [vmem:[%s483_s1 + $0x28] sm:$0xff]  }
   0x2   :  { %300 = vmatprep.subr.bf16.mxu0 %v348_v0  ;;  %332 = vmatprep.subr.bf16.mxu1 %v348_v0  ;;  %v351_v3 = vld [vmem:[%s483_s1 + $0x20] sm:$0xff]   ;;  %v352_v6 = vld [vmem:[%s483_s1 + $0x18] sm:$0xff]   ;;  %v353_v7 = vld [vmem:[%s483_s1 + $0x10] sm:$0xff]  }
   0x3   :  { %301 = vmatpush3.bf16.msra.mxu0 %v348_v0  ;;  %340 = vmatpush3.bf16.msra.mxu1 %v348_v0  ;;  %v356_v4 = vld [vmem:[%s484_s0] sm:$0xff]   ;;  %v354_v8 = vld [vmem:[%s483_s1 + $0x8] sm:$0xff]   ;;  %v360_v12 = vld [vmem:[%s484_s0 + $0x10] sm:$0xff]  }
   0x4   :  { %302 = vmatprep.subr.bf16.mxu0 %v349_v1  ;;  %333 = vmatprep.subr.bf16.mxu1 %v349_v1  ;;  %v357_v5 = vld [vmem:[%s484_s0 + $0x20] sm:$0xff]   ;;  %v358_v10 = vld [vmem:[%s484_s0 + $0x8] sm:$0xff]   ;;  %v361_v13 = vld [vmem:[%s484_s0 + $0x30] sm:$0xff]  }
   0x5   :  { %316 = vmatprep.mubr.bf16.mxu0 %v356_v4  ;;  %324 = vmatprep.mubr.bf16.mxu1 %v357_v5  ;;  %v355_v9 = vld [vmem:[%s483_s1] sm:$0xff]   ;;  %v359_v11 = vld [vmem:[%s484_s0 + $0x28] sm:$0xff]   ;;  %v362_v14 = vld [vmem:[%s484_s0 + $0x18] sm:$0xff]  }
   0x6   :  { %v363_v15 = vld [vmem:[%s484_s0 + $0x38] sm:$0xff]   ;;  %v267_v16 = vld [vmem:[%s485_s2] ss:$0 sm:$0xff] }
   0x7   :  { %303 = vmatpush3.bf16.msra.mxu0 %v349_v1  ;;  %341 = vmatpush3.bf16.msra.mxu1 %v349_v1 }
   0x8   :  { %304 = vmatprep.subr.bf16.mxu0 %v350_v2  ;;  %334 = vmatprep.subr.bf16.mxu1 %v350_v2 }
   0xb   :  { %305 = vmatpush3.bf16.msra.mxu0 %v350_v2  ;;  %342 = vmatpush3.bf16.msra.mxu1 %v350_v2 }
   0xc   :  { %306 = vmatprep.subr.bf16.mxu0 %v351_v3  ;;  %335 = vmatprep.subr.bf16.mxu1 %v351_v3 }
   0xf   :  { %307 = vmatpush3.bf16.msra.mxu0 %v351_v3  ;;  %343 = vmatpush3.bf16.msra.mxu1 %v351_v3 }
  0x10   :  { %308 = vmatprep.subr.bf16.mxu0 %v352_v6  ;;  %336 = vmatprep.subr.bf16.mxu1 %v352_v6 }
  0x13   :  { %309 = vmatpush3.bf16.msra.mxu0 %v352_v6  ;;  %344 = vmatpush3.bf16.msra.mxu1 %v352_v6 }
  0x14   :  { %310 = vmatprep.subr.bf16.mxu0 %v353_v7  ;;  %337 = vmatprep.subr.bf16.mxu1 %v353_v7 }
  0x17   :  { %311 = vmatpush3.bf16.msra.mxu0 %v353_v7  ;;  %345 = vmatpush3.bf16.msra.mxu1 %v353_v7 }
  0x18   :  { %312 = vmatprep.subr.bf16.mxu0 %v354_v8  ;;  %338 = vmatprep.subr.bf16.mxu1 %v354_v8 }
  0x1b   :  { %313 = vmatpush3.bf16.msra.mxu0 %v354_v8  ;;  %346 = vmatpush3.bf16.msra.mxu1 %v354_v8 }
  0x1c   :  { %314 = vmatprep.subr.bf16.mxu0 %v355_v9  ;;  %339 = vmatprep.subr.bf16.mxu1 %v355_v9 }
  0x1f   :  { %315 = vmatpush3.bf16.msra.mxu0 %v355_v9  ;;  %347 = vmatpush3.bf16.msra.mxu1 %v355_v9 }
  0x22   :  { %317 = vmatmul.mubr.bf16.vlgmr.msra.gmra.mxu0 %v358_v10  ;;  %325 = vmatmul.mubr.bf16.vlgmr.msra.gmra.mxu1 %v359_v11 }
  0x23   :  { %320 = vmatprep.mubr.bf16.mxu0 %v360_v12  ;;  %328 = vmatprep.mubr.bf16.mxu1 %v361_v13 }
  0x2a   :  { %321 = vmatmul.mubr.bf16.gmra.mxu0 %v362_v14  ;;  %329 = vmatmul.mubr.bf16.gmra.mxu1 %v363_v15 }
  0xe2   :  { %v318_v17 = vpop.f32.mrf.mxu0  ;;  %v326_v18 = vpop.f32.mrf.mxu1 }
  0xe3   :  { %v193_v19 = vadd.f32 %v318_v17, %v267_v16  ;;  %v225_v20 = vadd.f32 %v326_v18, %v267_v16 }
  0xe4   :  { %v184_v21 = vpop.f32.mrf.mxu0  ;;  %v216_v22 = vpop.f32.mrf.mxu1 }
  0xe5   :  { %249 = vst [vmem:[%s486_s3 + $0x10] sm:$0xff] %v193_v19  ;;  %257 = vst [vmem:[%s486_s3 + $0x50] sm:$0xff] %v225_v20  ;;  %v185_v23 = vadd.f32 %v267_v16, %v184_v21  ;;  %v217_v24 = vadd.f32 %v267_v16, %v216_v22 }
  0xe6   :  { %v319_v25 = vpop.f32.mrf.mxu0  ;;  %v327_v26 = vpop.f32.mrf.mxu1 }
  0xe7   :  { %247 = vst [vmem:[%s486_s3] sm:$0xff] %v185_v23  ;;  %255 = vst [vmem:[%s486_s3 + $0x40] sm:$0xff] %v217_v24  ;;  %v196_v27 = vadd.f32 %v319_v25, %v267_v16  ;;  %v228_v28 = vadd.f32 %v327_v26, %v267_v16 }
  0xe8   :  { %v187_v29 = vpop.f32.mrf.mxu0  ;;  %v219_v30 = vpop.f32.mrf.mxu1 }
  0xe9   :  { %250 = vst [vmem:[%s486_s3 + $0x18] sm:$0xff] %v196_v27  ;;  %258 = vst [vmem:[%s486_s3 + $0x58] sm:$0xff] %v228_v28  ;;  %v188_v31 = vadd.f32 %v267_v16, %v187_v29  ;;  %v220_v32 = vadd.f32 %v267_v16, %v219_v30 }
  0xea   :  { %v322_v33 = vpop.f32.mrf.mxu0  ;;  %v330_v34 = vpop.f32.mrf.mxu1 }
  0xeb   :  { %248 = vst [vmem:[%s486_s3 + $0x8] sm:$0xff] %v188_v31  ;;  %256 = vst [vmem:[%s486_s3 + $0x48] sm:$0xff] %v220_v32  ;;  %v209_v35 = vadd.f32 %v322_v33, %v267_v16  ;;  %v241_v36 = vadd.f32 %v330_v34, %v267_v16 }
  0xec   :  { %v200_v37 = vpop.f32.mrf.mxu0  ;;  %v232_v38 = vpop.f32.mrf.mxu1 }
  0xed   :  { %253 = vst [vmem:[%s486_s3 + $0x30] sm:$0xff] %v209_v35  ;;  %261 = vst [vmem:[%s486_s3 + $0x70] sm:$0xff] %v241_v36  ;;  %v201_v39 = vadd.f32 %v267_v16, %v200_v37  ;;  %v233_v40 = vadd.f32 %v267_v16, %v232_v38 }
  0xee   :  { %v323_v41 = vpop.f32.mrf.mxu0  ;;  %v331_v42 = vpop.f32.mrf.mxu1 }
  0xef   :  { %251 = vst [vmem:[%s486_s3 + $0x20] sm:$0xff] %v201_v39  ;;  %259 = vst [vmem:[%s486_s3 + $0x60] sm:$0xff] %v233_v40  ;;  %v212_v43 = vadd.f32 %v323_v41, %v267_v16  ;;  %v244_v44 = vadd.f32 %v331_v42, %v267_v16 }
  0xf0   :  { %v203_v45 = vpop.f32.mrf.mxu0  ;;  %v235_v46 = vpop.f32.mrf.mxu1 }
  0xf1   :  { %254 = vst [vmem:[%s486_s3 + $0x38] sm:$0xff] %v212_v43  ;;  %262 = vst [vmem:[%s486_s3 + $0x78] sm:$0xff] %v244_v44  ;;  %v204_v47 = vadd.f32 %v267_v16, %v203_v45  ;;  %v236_v48 = vadd.f32 %v267_v16, %v235_v46 }
  0xf3   :  { %252 = vst [vmem:[%s486_s3 + $0x28] sm:$0xff] %v204_v47  ;;  %260 = vst [vmem:[%s486_s3 + $0x68] sm:$0xff] %v236_v48 }

// kernel: stgi_forward.10
= control target key start
LH: loop header
LB: loop body
LE: loop exit
PB: predicated region body
PF: predicated region fallthrough
CT: control target
= control target key end

     0   :  { %s602_s1 = inlined_call_operand.vmem [shape: bf16[128,128], index: 1, kind: input, shape index: {}]   ;;  %s603_s0 = inlined_call_operand.vmem [shape: bf16[128,128], index: 0, kind: input, shape index: {}]   ;;  %s604_s2 = inlined_call_operand.vmem [shape: f32[1,128], index: 2, kind: input, shape index: {}]   ;;  %s605_s3 = inlined_call_operand.vmem [shape: f32[128,128], index: 3, kind: output, shape index: {}]  }
   0x1   :  { %v467_v0 = vld [vmem:[%s602_s1 + $0x38] sm:$0xff]   ;;  %v468_v1 = vld [vmem:[%s602_s1 + $0x30] sm:$0xff]   ;;  %v469_v2 = vld [vmem:[%s602_s1 + $0x28] sm:$0xff]  }
   0x2   :  { %419 = vmatprep.subr.bf16.mxu0 %v467_v0  ;;  %451 = vmatprep.subr.bf16.mxu1 %v467_v0  ;;  %v470_v3 = vld [vmem:[%s602_s1 + $0x20] sm:$0xff]   ;;  %v471_v6 = vld [vmem:[%s602_s1 + $0x18] sm:$0xff]   ;;  %v472_v7 = vld [vmem:[%s602_s1 + $0x10] sm:$0xff]  }
   0x3   :  { %420 = vmatpush3.bf16.msra.mxu0 %v467_v0  ;;  %459 = vmatpush3.bf16.msra.mxu1 %v467_v0  ;;  %v475_v4 = vld [vmem:[%s603_s0] sm:$0xff]   ;;  %v473_v8 = vld [vmem:[%s602_s1 + $0x8] sm:$0xff]   ;;  %v479_v12 = vld [vmem:[%s603_s0 + $0x10] sm:$0xff]  }
   0x4   :  { %421 = vmatprep.subr.bf16.mxu0 %v468_v1  ;;  %452 = vmatprep.subr.bf16.mxu1 %v468_v1  ;;  %v476_v5 = vld [vmem:[%s603_s0 + $0x20] sm:$0xff]   ;;  %v477_v10 = vld [vmem:[%s603_s0 + $0x8] sm:$0xff]   ;;  %v480_v13 = vld [vmem:[%s603_s0 + $0x30] sm:$0xff]  }
   0x5   :  { %435 = vmatprep.mubr.bf16.mxu0 %v475_v4  ;;  %443 = vmatprep.mubr.bf16.mxu1 %v476_v5  ;;  %v474_v9 = vld [vmem:[%s602_s1] sm:$0xff]   ;;  %v478_v11 = vld [vmem:[%s603_s0 + $0x28] sm:$0xff]   ;;  %v481_v14 = vld [vmem:[%s603_s0 + $0x18] sm:$0xff]  }
   0x6   :  { %v482_v15 = vld [vmem:[%s603_s0 + $0x38] sm:$0xff]   ;;  %v402_v16 = vld [vmem:[%s604_s2] ss:$0 sm:$0xff] }
   0x7   :  { %422 = vmatpush3.bf16.msra.mxu0 %v468_v1  ;;  %460 = vmatpush3.bf16.msra.mxu1 %v468_v1 }
   0x8   :  { %423 = vmatprep.subr.bf16.mxu0 %v469_v2  ;;  %453 = vmatprep.subr.bf16.mxu1 %v469_v2 }
   0xb   :  { %424 = vmatpush3.bf16.msra.mxu0 %v469_v2  ;;  %461 = vmatpush3.bf16.msra.mxu1 %v469_v2 }
   0xc   :  { %425 = vmatprep.subr.bf16.mxu0 %v470_v3  ;;  %454 = vmatprep.subr.bf16.mxu1 %v470_v3 }
   0xf   :  { %426 = vmatpush3.bf16.msra.mxu0 %v470_v3  ;;  %462 = vmatpush3.bf16.msra.mxu1 %v470_v3 }
  0x10   :  { %427 = vmatprep.subr.bf16.mxu0 %v471_v6  ;;  %455 = vmatprep.subr.bf16.mxu1 %v471_v6 }
  0x13   :  { %428 = vmatpush3.bf16.msra.mxu0 %v471_v6  ;;  %463 = vmatpush3.bf16.msra.mxu1 %v471_v6 }
  0x14   :  { %429 = vmatprep.subr.bf16.mxu0 %v472_v7  ;;  %456 = vmatprep.subr.bf16.mxu1 %v472_v7 }
  0x17   :  { %430 = vmatpush3.bf16.msra.mxu0 %v472_v7  ;;  %464 = vmatpush3.bf16.msra.mxu1 %v472_v7 }
  0x18   :  { %431 = vmatprep.subr.bf16.mxu0 %v473_v8  ;;  %457 = vmatprep.subr.bf16.mxu1 %v473_v8 }
  0x1b   :  { %432 = vmatpush3.bf16.msra.mxu0 %v473_v8  ;;  %465 = vmatpush3.bf16.msra.mxu1 %v473_v8 }
  0x1c   :  { %433 = vmatprep.subr.bf16.mxu0 %v474_v9  ;;  %458 = vmatprep.subr.bf16.mxu1 %v474_v9 }
  0x1f   :  { %434 = vmatpush3.bf16.msra.mxu0 %v474_v9  ;;  %466 = vmatpush3.bf16.msra.mxu1 %v474_v9 }
  0x22   :  { %436 = vmatmul.mubr.bf16.vlgmr.msra.gmra.mxu0 %v477_v10  ;;  %444 = vmatmul.mubr.bf16.vlgmr.msra.gmra.mxu1 %v478_v11 }
  0x23   :  { %439 = vmatprep.mubr.bf16.mxu0 %v479_v12  ;;  %447 = vmatprep.mubr.bf16.mxu1 %v480_v13 }
  0x2a   :  { %440 = vmatmul.mubr.bf16.gmra.mxu0 %v481_v14  ;;  %448 = vmatmul.mubr.bf16.gmra.mxu1 %v482_v15 }
  0xe2   :  { %v437_v17 = vpop.f32.mrf.mxu0  ;;  %v445_v18 = vpop.f32.mrf.mxu1 }
  0xe3   :  { %v336_v19 = vadd.f32 %v437_v17, %v402_v16  ;;  %v344_v20 = vadd.f32 %v445_v18, %v402_v16 }
  0xe4   :  { %v213_v21 = vpop.f32.mrf.mxu0  ;;  %v245_v22 = vpop.f32.mrf.mxu1 }
  0xe5   :  { %v352_v23 = vmax.f32 %v336_v19, 0.0  ;;  %v360_v24 = vmax.f32 %v344_v20, 0.0  ;;  %v334_v25 = vadd.f32 %v402_v16, %v213_v21  ;;  %v342_v26 = vadd.f32 %v402_v16, %v245_v22 }
  0xe6   :  { %v438_v27 = vpop.f32.mrf.mxu0  ;;  %v446_v28 = vpop.f32.mrf.mxu1 }
  0xe7   :  { %368 = vst [vmem:[%s605_s3 + $0x10] sm:$0xff] %v352_v23  ;;  %376 = vst [vmem:[%s605_s3 + $0x50] sm:$0xff] %v360_v24  ;;  %v350_v29 = vmax.f32 %v334_v25, 0.0  ;;  %v358_v30 = vmax.f32 %v342_v26, 0.0  ;;  %v337_v31 = vadd.f32 %v438_v27, %v402_v16  ;;  %v345_v32 = vadd.f32 %v446_v28, %v402_v16 }
  0xe8   :  { %v216_v33 = vpop.f32.mrf.mxu0  ;;  %v248_v34 = vpop.f32.mrf.mxu1 }
  0xe9   :  { %366 = vst [vmem:[%s605_s3] sm:$0xff] %v350_v29  ;;  %374 = vst [vmem:[%s605_s3 + $0x40] sm:$0xff] %v358_v30  ;;  %v353_v35 = vmax.f32 %v337_v31, 0.0  ;;  %v361_v36 = vmax.f32 %v345_v32, 0.0  ;;  %v335_v37 = vadd.f32 %v402_v16, %v216_v33  ;;  %v343_v38 = vadd.f32 %v402_v16, %v248_v34 }
  0xea   :  { %v441_v39 = vpop.f32.mrf.mxu0  ;;  %v449_v40 = vpop.f32.mrf.mxu1 }
  0xeb   :  { %369 = vst [vmem:[%s605_s3 + $0x18] sm:$0xff] %v353_v35  ;;  %377 = vst [vmem:[%s605_s3 + $0x58] sm:$0xff] %v361_v36  ;;  %v351_v41 = vmax.f32 %v335_v37, 0.0  ;;  %v359_v42 = vmax.f32 %v343_v38, 0.0  ;;  %v340_v43 = vadd.f32 %v441_v39, %v402_v16  ;;  %v348_v44 = vadd.f32 %v449_v40, %v402_v16 }
  0xec   :  { %v229_v45 = vpop.f32.mrf.mxu0  ;;  %v261_v46 = vpop.f32.mrf.mxu1 }
  0xed   :  { %367 = vst [vmem:[%s605_s3 + $0x8] sm:$0xff] %v351_v41  ;;  %375 = vst [vmem:[%s605_s3 + $0x48] sm:$0xff] %v359_v42  ;;  %v356_v47 = vmax.f32 %v340_v43, 0.0  ;;  %v364_v48 = vmax.f32 %v348_v44, 0.0  ;;  %v338_v49 = vadd.f32 %v402_v16, %v229_v45  ;;  %v346_v50 = vadd.f32 %v402_v16, %v261_v46 }
  0xee   :  { %v442_v51 = vpop.f32.mrf.mxu0  ;;  %v450_v52 = vpop.f32.mrf.mxu1 }
  0xef   :  { %372 = vst [vmem:[%s605_s3 + $0x30] sm:$0xff] %v356_v47  ;;  %380 = vst [vmem:[%s605_s3 + $0x70] sm:$0xff] %v364_v48  ;;  %v354_v53 = vmax.f32 %v338_v49, 0.0  ;;  %v362_v54 = vmax.f32 %v346_v50, 0.0  ;;  %v341_v55 = vadd.f32 %v442_v51, %v402_v16  ;;  %v349_v56 = vadd.f32 %v450_v52, %v402_v16 }
  0xf0   :  { %v232_v57 = vpop.f32.mrf.mxu0  ;;  %v264_v58 = vpop.f32.mrf.mxu1 }
  0xf1   :  { %370 = vst [vmem:[%s605_s3 + $0x20] sm:$0xff] %v354_v53  ;;  %378 = vst [vmem:[%s605_s3 + $0x60] sm:$0xff] %v362_v54  ;;  %v357_v59 = vmax.f32 %v341_v55, 0.0  ;;  %v365_v60 = vmax.f32 %v349_v56, 0.0  ;;  %v339_v61 = vadd.f32 %v402_v16, %v232_v57  ;;  %v347_v62 = vadd.f32 %v402_v16, %v264_v58 }
  0xf3   :  { %373 = vst [vmem:[%s605_s3 + $0x38] sm:$0xff] %v357_v59  ;;  %381 = vst [vmem:[%s605_s3 + $0x78] sm:$0xff] %v365_v60  ;;  %v355_v63 = vmax.f32 %v339_v61, 0.0  ;;  %v363_v0 = vmax.f32 %v347_v62, 0.0 }
  0xf5   :  { %371 = vst [vmem:[%s605_s3 + $0x28] sm:$0xff] %v355_v63  ;;  %379 = vst [vmem:[%s605_s3 + $0x68] sm:$0xff] %v363_v0 }

// kernel: stgi_forward.13
= control target key start
LH: loop header
LB: loop body
LE: loop exit
PB: predicated region body
PF: predicated region fallthrough
CT: control target
= control target key end

     0   :  { %v409_v1 = vmov 0   ;;  %v49_v25 = vlaneseq  ;;  %s645_s1 = inlined_call_operand.vmem [shape: bf16[128,256], index: 1, kind: input, shape index: {}]   ;;  %s646_s0 = inlined_call_operand.vmem [shape: bf16[128,128], index: 0, kind: input, shape index: {}]   ;;  %s647_s2 = inlined_call_operand.vmem [shape: f32[1,256], index: 2, kind: input, shape index: {}]   ;;  %s648_s3 = inlined_call_operand.vmem [shape: f32[128,256], index: 3, kind: output, shape index: {}]  }
   0x1   :  { %v377_v0 = vld [vmem:[%s645_s1 + $0x74] ss:$8 sps:$4 sm:$0xff]   ;;  %219 = vmatprep.mubr.bf16.mxu0 %v409_v1  ;;  %259 = vmatprep.mubr.bf16.mxu1 %v409_v1  ;;  %v379_v2 = vld [vmem:[%s645_s1 + $0x70] ss:$8 sps:$4 sm:$0xff]   ;;  %v380_v3 = vld [vmem:[%s645_s1 + $0x64] ss:$8 sps:$4 sm:$0xff]  }
   0x2   :  { %187 = vmatprep.subr.bf16.mxu0 %v377_v0  ;;  %360 = vmatprep.subr.bf16.mxu1 %v377_v0  ;;  %v382_v4 = vld [vmem:[%s645_s1 + $0x60] ss:$8 sps:$4 sm:$0xff]   ;;  %v383_v5 = vld [vmem:[%s645_s1 + $0x54] ss:$8 sps:$4 sm:$0xff]   ;;  %v385_v6 = vld [vmem:[%s645_s1 + $0x50] ss:$8 sps:$4 sm:$0xff]  }
   0x3   :  { %188 = vmatpush1.bf16.msra.mxu0 %v379_v2  ;;  %368 = vmatpush1.bf16.msra.mxu1 %v379_v2  ;;  %v386_v7 = vld [vmem:[%s645_s1 + $0x44] ss:$8 sps:$4 sm:$0xff]   ;;  %v388_v8 = vld [vmem:[%s645_s1 + $0x40] ss:$8 sps:$4 sm:$0xff]   ;;  %v389_v9 = vld [vmem:[%s645_s1 + $0x34] ss:$8 sps:$4 sm:$0xff]  }
   0x4   :  { %189 = vmatprep.subr.bf16.mxu0 %v380_v3  ;;  %361 = vmatprep.subr.bf16.mxu1 %v380_v3  ;;  %v391_v10 = vld [vmem:[%s645_s1 + $0x30] ss:$8 sps:$4 sm:$0xff]   ;;  %v392_v11 = vld [vmem:[%s645_s1 + $0x24] ss:$8 sps:$4 sm:$0xff]   ;;  %v394_v12 = vld [vmem:[%s645_s1 + $0x20] ss:$8 sps:$4 sm:$0xff]  }
   0x5   :  { %v395_v13 = vld [vmem:[%s645_s1 + $0x14] ss:$8 sps:$4 sm:$0xff]   ;;  %v397_v14 = vld [vmem:[%s645_s1 + $0x10] ss:$8 sps:$4 sm:$0xff]   ;;  %v398_v15 = vld [vmem:[%s645_s1 + $0x4] ss:$8 sps:$4 sm:$0xff]  }
   0x6   :  { %v400_v16 = vld [vmem:[%s645_s1] ss:$8 sps:$4 sm:$0xff]   ;;  %v405_v21 = vld [vmem:[%s646_s0 + $0x10] sm:$0xff]   ;;  %v407_v23 = vld [vmem:[%s646_s0 + $0x18] sm:$0xff]   ;;  %v50_v26 = vshrl.u32 %v49_v25, 7 }
   0x7   :  { %190 = vmatpush1.bf16.msra.mxu0 %v382_v4  ;;  %369 = vmatpush1.bf16.msra.mxu1 %v382_v4  ;;  %v401_v17 = vld [vmem:[%s646_s0] sm:$0xff]   ;;  %v403_v19 = vld [vmem:[%s646_s0 + $0x8] sm:$0xff]   ;;  %v406_v22 = vld [vmem:[%s646_s0 + $0x30] sm:$0xff]  }
   0x8   :  { %191 = vmatprep.subr.bf16.mxu0 %v383_v5  ;;  %362 = vmatprep.subr.bf16.mxu1 %v383_v5  ;;  %v402_v18 = vld [vmem:[%s646_s0 + $0x20] sm:$0xff]   ;;  %v404_v20 = vld [vmem:[%s646_s0 + $0x28] sm:$0xff]   ;;  %v408_v24 = vld [vmem:[%s646_s0 + $0x38] sm:$0xff]   ;;  %v51_v27 = vsub.s32 0, %v50_v26  ;;  %v55_v29 = vsub.s32 1, %v50_v26 }
   0x9   :  { %v47_v28 = vld [vmem:[%s647_s2] sm:$0x3] }
   0xa   :  { %v513_v30 = vrot.slane %v47_v28, %v51_v27  ;;  %v515_v31 = vrot.slane %v47_v28, %v55_v29 }
   0xb   :  { %192 = vmatpush1.bf16.msra.mxu0 %v385_v6  ;;  %370 = vmatpush1.bf16.msra.mxu1 %v385_v6 }
   0xc   :  { %193 = vmatprep.subr.bf16.mxu0 %v386_v7  ;;  %363 = vmatprep.subr.bf16.mxu1 %v386_v7 }
   0xf   :  { %194 = vmatpush1.bf16.msra.mxu0 %v388_v8  ;;  %371 = vmatpush1.bf16.msra.mxu1 %v388_v8 }
  0x10   :  { %195 = vmatprep.subr.bf16.mxu0 %v389_v9  ;;  %364 = vmatprep.subr.bf16.mxu1 %v389_v9 }
  0x13   :  { %196 = vmatpush1.bf16.msra.mxu0 %v391_v10  ;;  %372 = vmatpush1.bf16.msra.mxu1 %v391_v10 }
  0x14   :  { %197 = vmatprep.subr.bf16.mxu0 %v392_v11  ;;  %365 = vmatprep.subr.bf16.mxu1 %v392_v11 }
  0x17   :  { %198 = vmatpush1.bf16.msra.mxu0 %v394_v12  ;;  %373 = vmatpush1.bf16.msra.mxu1 %v394_v12 }
  0x18   :  { %199 = vmatprep.subr.bf16.mxu0 %v395_v13  ;;  %366 = vmatprep.subr.bf16.mxu1 %v395_v13 }
  0x1b   :  { %200 = vmatpush1.bf16.msra.mxu0 %v397_v14  ;;  %374 = vmatpush1.bf16.msra.mxu1 %v397_v14 }
  0x1c   :  { %201 = vmatprep.subr.bf16.mxu0 %v398_v15  ;;  %367 = vmatprep.subr.bf16.mxu1 %v398_v15 }
  0x1f   :  { %202 = vmatpush1.bf16.msra.mxu0 %v400_v16  ;;  %375 = vmatpush1.bf16.msra.mxu1 %v400_v16 }
  0x22   :  { %220 = vmatmul.mubr.bf16.vlgmr.msra.gmra.mxu0 %v401_v17  ;;  %260 = vmatmul.mubr.bf16.vlgmr.msra.gmra.mxu1 %v402_v18 }
  0x23   :  { %229 = vmatprep.mubr.bf16.mxu0 %v409_v1  ;;  %269 = vmatprep.mubr.bf16.mxu1 %v409_v1 }
  0x2a   :  { %230 = vmatmul.mubr.bf16.gmra.mxu0 %v403_v19  ;;  %270 = vmatmul.mubr.bf16.gmra.mxu1 %v404_v20 }
  0x2b   :  { %239 = vmatprep.mubr.bf16.mxu0 %v409_v1  ;;  %279 = vmatprep.mubr.bf16.mxu1 %v409_v1 }
  0x32   :  { %240 = vmatmul.mubr.bf16.gmra.mxu0 %v405_v21  ;;  %280 = vmatmul.mubr.bf16.gmra.mxu1 %v406_v22 }
  0x33   :  { %249 = vmatprep.mubr.bf16.mxu0 %v409_v1  ;;  %289 = vmatprep.mubr.bf16.mxu1 %v409_v1 }
  0x3a   :  { %250 = vmatmul.mubr.bf16.gmra.mxu0 %v407_v23  ;;  %290 = vmatmul.mubr.bf16.gmra.mxu1 %v408_v24 }
  0xe2   :  { %v221_v32 = vpop.f32.mrf.mxu0  ;;  %v261_v33 = vpop.f32.mrf.mxu1 }
  0xe3   :  { %v222_v34 = vadd.f32 %v221_v32, %v513_v30  ;;  %v262_v35 = vadd.f32 %v261_v33, %v513_v30 }
  0xe4   :  { %v223_v36 = vpop.f32.mrf.mxu0  ;;  %v263_v37 = vpop.f32.mrf.mxu1 }
  0xe5   :  { %300 = vst [vmem:[%s648_s3] sm:$0xff] %v222_v34  ;;  %316 = vst [vmem:[%s648_s3 + $0x80] sm:$0xff] %v262_v35  ;;  %v224_v38 = vadd.f32 %v223_v36, %v515_v31  ;;  %v264_v39 = vadd.f32 %v263_v37, %v515_v31 }
  0xe6   :  { %v225_v40 = vpop.f32.mrf.mxu0  ;;  %v265_v41 = vpop.f32.mrf.mxu1 }
  0xe7   :  { %301 = vst [vmem:[%s648_s3 + $0x8] sm:$0xff] %v224_v38  ;;  %317 = vst [vmem:[%s648_s3 + $0x88] sm:$0xff] %v264_v39  ;;  %v226_v42 = vadd.f32 %v225_v40, %v513_v30  ;;  %v266_v43 = vadd.f32 %v265_v41, %v513_v30 }
  0xe8   :  { %v227_v44 = vpop.f32.mrf.mxu0  ;;  %v267_v45 = vpop.f32.mrf.mxu1 }
  0xe9   :  { %302 = vst [vmem:[%s648_s3 + $0x10] sm:$0xff] %v226_v42  ;;  %318 = vst [vmem:[%s648_s3 + $0x90] sm:$0xff] %v266_v43  ;;  %v228_v46 = vadd.f32 %v227_v44, %v515_v31  ;;  %v268_v47 = vadd.f32 %v267_v45, %v515_v31 }
  0xea   :  { %v231_v48 = vpop.f32.mrf.mxu0  ;;  %v271_v49 = vpop.f32.mrf.mxu1 }
  0xeb   :  { %303 = vst [vmem:[%s648_s3 + $0x18] sm:$0xff] %v228_v46  ;;  %319 = vst [vmem:[%s648_s3 + $0x98] sm:$0xff] %v268_v47  ;;  %v232_v50 = vadd.f32 %v231_v48, %v513_v30  ;;  %v272_v51 = vadd.f32 %v271_v49, %v513_v30 }
  0xec   :  { %v233_v52 = vpop.f32.mrf.mxu0  ;;  %v273_v53 = vpop.f32.mrf.mxu1 }
  0xed   :  { %304 = vst [vmem:[%s648_s3 + $0x20] sm:$0xff] %v232_v50  ;;  %320 = vst [vmem:[%s648_s3 + $0xa0] sm:$0xff] %v272_v51  ;;  %v234_v54 = vadd.f32 %v233_v52, %v515_v31  ;;  %v274_v55 = vadd.f32 %v273_v53, %v515_v31 }
  0xee   :  { %v235_v56 = vpop.f32.mrf.mxu0  ;;  %v275_v57 = vpop.f32.mrf.mxu1 }
  0xef   :  { %305 = vst [vmem:[%s648_s3 + $0x28] sm:$0xff] %v234_v54  ;;  %321 = vst [vmem:[%s648_s3 + $0xa8] sm:$0xff] %v274_v55  ;;  %v236_v58 = vadd.f32 %v235_v56, %v513_v30  ;;  %v276_v59 = vadd.f32 %v275_v57, %v513_v30 }
  0xf0   :  { %v237_v60 = vpop.f32.mrf.mxu0  ;;  %v277_v61 = vpop.f32.mrf.mxu1 }
  0xf1   :  { %306 = vst [vmem:[%s648_s3 + $0x30] sm:$0xff] %v236_v58  ;;  %322 = vst [vmem:[%s648_s3 + $0xb0] sm:$0xff] %v276_v59  ;;  %v238_v62 = vadd.f32 %v237_v60, %v515_v31  ;;  %v278_v63 = vadd.f32 %v277_v61, %v515_v31 }
  0xf2   :  { %v241_v0 = vpop.f32.mrf.mxu0  ;;  %v281_v1 = vpop.f32.mrf.mxu1 }
  0xf3   :  { %307 = vst [vmem:[%s648_s3 + $0x38] sm:$0xff] %v238_v62  ;;  %323 = vst [vmem:[%s648_s3 + $0xb8] sm:$0xff] %v278_v63  ;;  %v242_v2 = vadd.f32 %v241_v0, %v513_v30  ;;  %v282_v3 = vadd.f32 %v281_v1, %v513_v30 }
  0xf4   :  { %v243_v4 = vpop.f32.mrf.mxu0  ;;  %v283_v5 = vpop.f32.mrf.mxu1 }
  0xf5   :  { %308 = vst [vmem:[%s648_s3 + $0x40] sm:$0xff] %v242_v2  ;;  %324 = vst [vmem:[%s648_s3 + $0xc0] sm:$0xff] %v282_v3  ;;  %v244_v6 = vadd.f32 %v243_v4, %v515_v31  ;;  %v284_v7 = vadd.f32 %v283_v5, %v515_v31 }
  0xf6   :  { %v245_v8 = vpop.f32.mrf.mxu0  ;;  %v285_v9 = vpop.f32.mrf.mxu1 }
  0xf7   :  { %309 = vst [vmem:[%s648_s3 + $0x48] sm:$0xff] %v244_v6  ;;  %325 = vst [vmem:[%s648_s3 + $0xc8] sm:$0xff] %v284_v7  ;;  %v246_v10 = vadd.f32 %v245_v8, %v513_v30  ;;  %v286_v11 = vadd.f32 %v285_v9, %v513_v30 }
  0xf8   :  { %v247_v12 = vpop.f32.mrf.mxu0  ;;  %v287_v13 = vpop.f32.mrf.mxu1 }
  0xf9   :  { %310 = vst [vmem:[%s648_s3 + $0x50] sm:$0xff] %v246_v10  ;;  %326 = vst [vmem:[%s648_s3 + $0xd0] sm:$0xff] %v286_v11  ;;  %v248_v14 = vadd.f32 %v247_v12, %v515_v31  ;;  %v288_v15 = vadd.f32 %v287_v13, %v515_v31 }
  0xfa   :  { %v251_v16 = vpop.f32.mrf.mxu0  ;;  %v291_v17 = vpop.f32.mrf.mxu1 }
  0xfb   :  { %311 = vst [vmem:[%s648_s3 + $0x58] sm:$0xff] %v248_v14  ;;  %327 = vst [vmem:[%s648_s3 + $0xd8] sm:$0xff] %v288_v15  ;;  %v252_v18 = vadd.f32 %v251_v16, %v513_v30  ;;  %v292_v19 = vadd.f32 %v291_v17, %v513_v30 }
  0xfc   :  { %v253_v20 = vpop.f32.mrf.mxu0  ;;  %v293_v21 = vpop.f32.mrf.mxu1 }
  0xfd   :  { %312 = vst [vmem:[%s648_s3 + $0x60] sm:$0xff] %v252_v18  ;;  %328 = vst [vmem:[%s648_s3 + $0xe0] sm:$0xff] %v292_v19  ;;  %v254_v22 = vadd.f32 %v253_v20, %v515_v31  ;;  %v294_v23 = vadd.f32 %v293_v21, %v515_v31 }
  0xfe   :  { %v255_v24 = vpop.f32.mrf.mxu0  ;;  %v295_v25 = vpop.f32.mrf.mxu1 }
  0xff   :  { %313 = vst [vmem:[%s648_s3 + $0x68] sm:$0xff] %v254_v22  ;;  %329 = vst [vmem:[%s648_s3 + $0xe8] sm:$0xff] %v294_v23  ;;  %v256_v26 = vadd.f32 %v255_v24, %v513_v30  ;;  %v296_v27 = vadd.f32 %v295_v25, %v513_v30 }
 0x100   :  { %v257_v28 = vpop.f32.mrf.mxu0  ;;  %v297_v29 = vpop.f32.mrf.mxu1 }
 0x101   :  { %314 = vst [vmem:[%s648_s3 + $0x70] sm:$0xff] %v256_v26  ;;  %330 = vst [vmem:[%s648_s3 + $0xf0] sm:$0xff] %v296_v27  ;;  %v258_v32 = vadd.f32 %v257_v28, %v515_v31  ;;  %v298_v33 = vadd.f32 %v297_v29, %v515_v31 }
 0x103   :  { %315 = vst [vmem:[%s648_s3 + $0x78] sm:$0xff] %v258_v32  ;;  %331 = vst [vmem:[%s648_s3 + $0xf8] sm:$0xff] %v298_v33 }

// kernel: stgi_forward.15
= control target key start
LH: loop header
LB: loop body
LE: loop exit
PB: predicated region body
PF: predicated region fallthrough
CT: control target
= control target key end

     0   :  { %v605_v1 = vmov 0   ;;  %vm121_vm0 = vcmask 261120   ;;  %v458_v25 = vlaneseq  ;;  %s859_s3 = inlined_call_operand.vmem [shape: bf16[32,256], index: 3, kind: input, shape index: {}]   ;;  %s860_s2 = inlined_call_operand.vmem [shape: bf16[32,256], index: 2, kind: input, shape index: {}]   ;;  %s861_s1 = inlined_call_operand.vmem [shape: bf16[128,32], index: 1, kind: input, shape index: {}]   ;;  %s862_s0 = inlined_call_operand.vmem [shape: bf16[128,32], index: 0, kind: input, shape index: {}]   ;;  %s863_s4 = inlined_call_operand.vmem [shape: f32[1,256], index: 4, kind: input, shape index: {}]   ;;  %s864_s5 = inlined_call_operand.vmem [shape: f32[128,256], index: 5, kind: output, shape index: {}]  }
   0x1   :  { %v577_v0 = vld [vmem:[%s859_s3 + $0x14] ss:$8 sps:$4 sm:$0xff]   ;;  %178 = vmatprep.mubr.bf16.mxu0 %v605_v1  ;;  %375 = vmatprep.mubr.bf16.mxu1 %v605_v1  ;;  %v581_v3 = vld [vmem:[%s859_s3 + $0x10] ss:$8 sps:$4 sm:$0xff]   ;;  %v583_v5 = vld [vmem:[%s859_s3 + $0x4] ss:$8 sps:$4 sm:$0xff]  }
   0x2   :  { %v579_v2 = vld [vmem:[%s860_s2 + $0x14] ss:$8 sps:$4 sm:$0xff]   ;;  %158 = vmatprep.subr.bf16.mxu0 %v577_v0  ;;  %v582_v4 = vld [vmem:[%s860_s2 + $0x10] ss:$8 sps:$4 sm:$0xff]   ;;  %v585_v6 = vld [vmem:[%s860_s2 + $0x4] ss:$8 sps:$4 sm:$0xff]  }
   0x3   :  { %355 = vmatprep.subr.bf16.mxu1 %v579_v2  ;;  %159 = vmatpush1.bf16.msra.mxu0 %v581_v3  ;;  %v587_v7 = vld [vmem:[%s859_s3] ss:$8 sps:$4 sm:$0xff]   ;;  %v593_v13 = vld [vmem:[%s861_s1 + $0x10] sm:$0xff]   ;;  %v595_v15 = vld [vmem:[%s861_s1 + $0x18] sm:$0xff]   ;;  %v459_v26 = vshrl.u32 %v458_v25, 7 }
   0x4   :  { %356 = vmatpush1.bf16.msra.mxu1 %v582_v4  ;;  %160 = vmatprep.subr.bf16.mxu0 %v583_v5  ;;  %v588_v8 = vld [vmem:[%s860_s2] ss:$8 sps:$4 sm:$0xff]   ;;  %v594_v14 = vld [vmem:[%s862_s0 + $0x10] sm:$0xff]   ;;  %v596_v16 = vld [vmem:[%s862_s0 + $0x18] sm:$0xff]  }
   0x5   :  { %357 = vmatprep.subr.bf16.mxu1 %v585_v6  ;;  %v589_v9 = vld [vmem:[%s861_s1] sm:$0xff]   ;;  %v591_v11 = vld [vmem:[%s861_s1 + $0x8] sm:$0xff]   ;;  %v601_v21 = vld [vmem:[%s861_s1 + $0x30] sm:$0xff]   ;;  %v460_v27 = vsub.s32 0, %v459_v26  ;;  %v464_v29 = vsub.s32 1, %v459_v26 }
   0x6   :  { %v590_v10 = vld [vmem:[%s862_s0] sm:$0xff]   ;;  %v592_v12 = vld [vmem:[%s862_s0 + $0x8] sm:$0xff]   ;;  %v602_v22 = vld [vmem:[%s862_s0 + $0x30] sm:$0xff]  }
   0x7   :  { %161 = vmatpush1.bf16.msra.mxu0 %v587_v7  ;;  %v597_v17 = vld [vmem:[%s861_s1 + $0x20] sm:$0xff]   ;;  %v599_v19 = vld [vmem:[%s861_s1 + $0x28] sm:$0xff]   ;;  %v603_v23 = vld [vmem:[%s861_s1 + $0x38] sm:$0xff]  }
   0x8   :  { %358 = vmatpush1.bf16.msra.mxu1 %v588_v8  ;;  %v598_v18 = vld [vmem:[%s862_s0 + $0x20] sm:$0xff]   ;;  %v600_v20 = vld [vmem:[%s862_s0 + $0x28] sm:$0xff]   ;;  %v604_v24 = vld [vmem:[%s862_s0 + $0x38] sm:$0xff]  }
   0x9   :  { %v456_v28 = vld [vmem:[%s863_s4] sm:$0x3] }
   0xa   :  { %548 = vmatmul.mubr.msk.bf16.vlgmr.msra.gmra.mxu0 %vm121_vm0, %v589_v9  ;;  %v727_v30 = vrot.slane %v456_v28, %v460_v27  ;;  %v729_v34 = vrot.slane %v456_v28, %v464_v29 }
   0xb   :  { %568 = vmatmul.mubr.msk.bf16.vlgmr.msra.gmra.mxu1 %vm121_vm0, %v590_v10  ;;  %188 = vmatprep.mubr.bf16.mxu0 %v605_v1 }
   0xc   :  { %385 = vmatprep.mubr.bf16.mxu1 %v605_v1 }
  0x12   :  { %549 = vmatmul.mubr.msk.bf16.gmra.mxu0 %vm121_vm0, %v591_v11 }
  0x13   :  { %569 = vmatmul.mubr.msk.bf16.gmra.mxu1 %vm121_vm0, %v592_v12  ;;  %198 = vmatprep.mubr.bf16.mxu0 %v605_v1 }
  0x14   :  { %395 = vmatprep.mubr.bf16.mxu1 %v605_v1 }
  0x1a   :  { %550 = vmatmul.mubr.msk.bf16.gmra.mxu0 %vm121_vm0, %v593_v13 }
  0x1b   :  { %570 = vmatmul.mubr.msk.bf16.gmra.mxu1 %vm121_vm0, %v594_v14  ;;  %208 = vmatprep.mubr.bf16.mxu0 %v605_v1 }
  0x1c   :  { %405 = vmatprep.mubr.bf16.mxu1 %v605_v1 }
  0x22   :  { %551 = vmatmul.mubr.msk.bf16.gmra.mxu0 %vm121_vm0, %v595_v15 }
  0x23   :  { %571 = vmatmul.mubr.msk.bf16.gmra.mxu1 %vm121_vm0, %v596_v16  ;;  %218 = vmatprep.mubr.bf16.mxu0 %v605_v1 }
  0x24   :  { %415 = vmatprep.mubr.bf16.mxu1 %v605_v1 }
  0x2a   :  { %552 = vmatmul.mubr.msk.bf16.gmra.mxu0 %vm121_vm0, %v597_v17 }
  0x2b   :  { %572 = vmatmul.mubr.msk.bf16.gmra.mxu1 %vm121_vm0, %v598_v18  ;;  %228 = vmatprep.mubr.bf16.mxu0 %v605_v1 }
  0x2c   :  { %425 = vmatprep.mubr.bf16.mxu1 %v605_v1 }
  0x32   :  { %553 = vmatmul.mubr.msk.bf16.gmra.mxu0 %vm121_vm0, %v599_v19 }
  0x33   :  { %573 = vmatmul.mubr.msk.bf16.gmra.mxu1 %vm121_vm0, %v600_v20  ;;  %238 = vmatprep.mubr.bf16.mxu0 %v605_v1 }
  0x34   :  { %435 = vmatprep.mubr.bf16.mxu1 %v605_v1 }
  0x3a   :  { %554 = vmatmul.mubr.msk.bf16.gmra.mxu0 %vm121_vm0, %v601_v21 }
  0x3b   :  { %574 = vmatmul.mubr.msk.bf16.gmra.mxu1 %vm121_vm0, %v602_v22  ;;  %248 = vmatprep.mubr.bf16.mxu0 %v605_v1 }
  0x3c   :  { %445 = vmatprep.mubr.bf16.mxu1 %v605_v1 }
  0x42   :  { %555 = vmatmul.mubr.msk.bf16.gmra.mxu0 %vm121_vm0, %v603_v23 }
  0x43   :  { %575 = vmatmul.mubr.msk.bf16.gmra.mxu1 %vm121_vm0, %v604_v24 }
  0xca   :  { %v180_v31 = vpop.f32.mrf.mxu0 }
  0xcb   :  { %v377_v32 = vpop.f32.mrf.mxu1 }
  0xcc   :  { %v378_v33 = vadd.f32 %v377_v32, %v180_v31  ;;  %v182_v35 = vpop.f32.mrf.mxu0 }
  0xcd   :  { %v379_v36 = vpop.f32.mrf.mxu1 }
  0xce   :  { %v468_v37 = vadd.f32 %v727_v30, %v378_v33  ;;  %v380_v38 = vadd.f32 %v379_v36, %v182_v35  ;;  %v184_v39 = vpop.f32.mrf.mxu0 }
  0xcf   :  { %v381_v40 = vpop.f32.mrf.mxu1 }
  0xd0   :  { %500 = vst [vmem:[%s864_s5] sm:$0xff] %v468_v37  ;;  %v469_v41 = vadd.f32 %v729_v34, %v380_v38  ;;  %v382_v42 = vadd.f32 %v381_v40, %v184_v39  ;;  %v186_v43 = vpop.f32.mrf.mxu0 }
  0xd1   :  { %v383_v44 = vpop.f32.mrf.mxu1 }
  0xd2   :  { %501 = vst [vmem:[%s864_s5 + $0x8] sm:$0xff] %v469_v41  ;;  %v470_v45 = vadd.f32 %v727_v30, %v382_v42  ;;  %v384_v46 = vadd.f32 %v383_v44, %v186_v43  ;;  %v190_v47 = vpop.f32.mrf.mxu0 }
  0xd3   :  { %v387_v48 = vpop.f32.mrf.mxu1 }
  0xd4   :  { %502 = vst [vmem:[%s864_s5 + $0x10] sm:$0xff] %v470_v45  ;;  %v471_v49 = vadd.f32 %v729_v34, %v384_v46  ;;  %v388_v50 = vadd.f32 %v387_v48, %v190_v47  ;;  %v192_v51 = vpop.f32.mrf.mxu0 }
  0xd5   :  { %v389_v52 = vpop.f32.mrf.mxu1 }
  0xd6   :  { %503 = vst [vmem:[%s864_s5 + $0x18] sm:$0xff] %v471_v49  ;;  %v472_v53 = vadd.f32 %v727_v30, %v388_v50  ;;  %v390_v54 = vadd.f32 %v389_v52, %v192_v51  ;;  %v194_v55 = vpop.f32.mrf.mxu0 }
  0xd7   :  { %v391_v56 = vpop.f32.mrf.mxu1 }
  0xd8   :  { %504 = vst [vmem:[%s864_s5 + $0x20] sm:$0xff] %v472_v53  ;;  %v473_v57 = vadd.f32 %v729_v34, %v390_v54  ;;  %v392_v58 = vadd.f32 %v391_v56, %v194_v55  ;;  %v196_v59 = vpop.f32.mrf.mxu0 }
  0xd9   :  { %v393_v60 = vpop.f32.mrf.mxu1 }
  0xda   :  { %505 = vst [vmem:[%s864_s5 + $0x28] sm:$0xff] %v473_v57  ;;  %v474_v61 = vadd.f32 %v727_v30, %v392_v58  ;;  %v394_v62 = vadd.f32 %v393_v60, %v196_v59  ;;  %v200_v63 = vpop.f32.mrf.mxu0 }
  0xdb   :  { %v397_v0 = vpop.f32.mrf.mxu1 }
  0xdc   :  { %506 = vst [vmem:[%s864_s5 + $0x30] sm:$0xff] %v474_v61  ;;  %v475_v1 = vadd.f32 %v729_v34, %v394_v62  ;;  %v398_v2 = vadd.f32 %v397_v0, %v200_v63  ;;  %v202_v3 = vpop.f32.mrf.mxu0 }
  0xdd   :  { %v399_v4 = vpop.f32.mrf.mxu1 }
  0xde   :  { %507 = vst [vmem:[%s864_s5 + $0x38] sm:$0xff] %v475_v1  ;;  %v476_v5 = vadd.f32 %v727_v30, %v398_v2  ;;  %v400_v6 = vadd.f32 %v399_v4, %v202_v3  ;;  %v204_v7 = vpop.f32.mrf.mxu0 }
  0xdf   :  { %v401_v8 = vpop.f32.mrf.mxu1 }
  0xe0   :  { %508 = vst [vmem:[%s864_s5 + $0x40] sm:$0xff] %v476_v5  ;;  %v477_v9 = vadd.f32 %v729_v34, %v400_v6  ;;  %v402_v10 = vadd.f32 %v401_v8, %v204_v7  ;;  %v206_v11 = vpop.f32.mrf.mxu0 }
  0xe1   :  { %v403_v12 = vpop.f32.mrf.mxu1 }
  0xe2   :  { %509 = vst [vmem:[%s864_s5 + $0x48] sm:$0xff] %v477_v9  ;;  %v478_v13 = vadd.f32 %v727_v30, %v402_v10  ;;  %v404_v14 = vadd.f32 %v403_v12, %v206_v11  ;;  %v210_v15 = vpop.f32.mrf.mxu0 }
  0xe3   :  { %v407_v16 = vpop.f32.mrf.mxu1 }
  0xe4   :  { %510 = vst [vmem:[%s864_s5 + $0x50] sm:$0xff] %v478_v13  ;;  %v479_v17 = vadd.f32 %v729_v34, %v404_v14  ;;  %v408_v18 = vadd.f32 %v407_v16, %v210_v15  ;;  %v212_v19 = vpop.f32.mrf.mxu0 }
  0xe5   :  { %v409_v20 = vpop.f32.mrf.mxu1 }
  0xe6   :  { %511 = vst [vmem:[%s864_s5 + $0x58] sm:$0xff] %v479_v17  ;;  %v480_v21 = vadd.f32 %v727_v30, %v408_v18  ;;  %v410_v22 = vadd.f32 %v409_v20, %v212_v19  ;;  %v214_v23 = vpop.f32.mrf.mxu0 }
  0xe7   :  { %v411_v24 = vpop.f32.mrf.mxu1 }
  0xe8   :  { %512 = vst [vmem:[%s864_s5 + $0x60] sm:$0xff] %v480_v21  ;;  %v481_v25 = vadd.f32 %v729_v34, %v410_v22  ;;  %v412_v26 = vadd.f32 %v411_v24, %v214_v23  ;;  %v216_v27 = vpop.f32.mrf.mxu0 }
  0xe9   :  { %v413_v28 = vpop.f32.mrf.mxu1 }
  0xea   :  { %513 = vst [vmem:[%s864_s5 + $0x68] sm:$0xff] %v481_v25  ;;  %v482_v29 = vadd.f32 %v727_v30, %v412_v26  ;;  %v414_v31 = vadd.f32 %v413_v28, %v216_v27  ;;  %v220_v32 = vpop.f32.mrf.mxu0 }
  0xeb   :  { %v417_v33 = vpop.f32.mrf.mxu1 }
  0xec   :  { %514 = vst [vmem:[%s864_s5 + $0x70] sm:$0xff] %v482_v29  ;;  %v483_v35 = vadd.f32 %v729_v34, %v414_v31  ;;  %v418_v36 = vadd.f32 %v417_v33, %v220_v32  ;;  %v222_v37 = vpop.f32.mrf.mxu0 }
  0xed   :  { %v419_v38 = vpop.f32.mrf.mxu1 }
  0xee   :  { %515 = vst [vmem:[%s864_s5 + $0x78] sm:$0xff] %v483_v35  ;;  %v484_v39 = vadd.f32 %v727_v30, %v418_v36  ;;  %v420_v40 = vadd.f32 %v419_v38, %v222_v37  ;;  %v224_v41 = vpop.f32.mrf.mxu0 }
  0xef   :  { %v421_v42 = vpop.f32.mrf.mxu1 }
  0xf0   :  { %516 = vst [vmem:[%s864_s5 + $0x80] sm:$0xff] %v484_v39  ;;  %v485_v43 = vadd.f32 %v729_v34, %v420_v40  ;;  %v422_v44 = vadd.f32 %v421_v42, %v224_v41  ;;  %v226_v45 = vpop.f32.mrf.mxu0 }
  0xf1   :  { %v423_v46 = vpop.f32.mrf.mxu1 }
  0xf2   :  { %517 = vst [vmem:[%s864_s5 + $0x88] sm:$0xff] %v485_v43  ;;  %v486_v47 = vadd.f32 %v727_v30, %v422_v44  ;;  %v424_v48 = vadd.f32 %v423_v46, %v226_v45  ;;  %v230_v49 = vpop.f32.mrf.mxu0 }
  0xf3   :  { %v427_v50 = vpop.f32.mrf.mxu1 }
  0xf4   :  { %518 = vst [vmem:[%s864_s5 + $0x90] sm:$0xff] %v486_v47  ;;  %v487_v51 = vadd.f32 %v729_v34, %v424_v48  ;;  %v428_v52 = vadd.f32 %v427_v50, %v230_v49  ;;  %v232_v53 = vpop.f32.mrf.mxu0 }
  0xf5   :  { %v429_v54 = vpop.f32.mrf.mxu1 }
  0xf6   :  { %519 = vst [vmem:[%s864_s5 + $0x98] sm:$0xff] %v487_v51  ;;  %v488_v55 = vadd.f32 %v727_v30, %v428_v52  ;;  %v430_v56 = vadd.f32 %v429_v54, %v232_v53  ;;  %v234_v57 = vpop.f32.mrf.mxu0 }
  0xf7   :  { %v431_v58 = vpop.f32.mrf.mxu1 }
  0xf8   :  { %520 = vst [vmem:[%s864_s5 + $0xa0] sm:$0xff] %v488_v55  ;;  %v489_v59 = vadd.f32 %v729_v34, %v430_v56  ;;  %v432_v60 = vadd.f32 %v431_v58, %v234_v57  ;;  %v236_v61 = vpop.f32.mrf.mxu0 }
  0xf9   :  { %v433_v62 = vpop.f32.mrf.mxu1 }
  0xfa   :  { %521 = vst [vmem:[%s864_s5 + $0xa8] sm:$0xff] %v489_v59  ;;  %v490_v63 = vadd.f32 %v727_v30, %v432_v60  ;;  %v434_v0 = vadd.f32 %v433_v62, %v236_v61  ;;  %v240_v1 = vpop.f32.mrf.mxu0 }
  0xfb   :  { %v437_v2 = vpop.f32.mrf.mxu1 }
  0xfc   :  { %522 = vst [vmem:[%s864_s5 + $0xb0] sm:$0xff] %v490_v63  ;;  %v491_v3 = vadd.f32 %v729_v34, %v434_v0  ;;  %v438_v4 = vadd.f32 %v437_v2, %v240_v1  ;;  %v242_v5 = vpop.f32.mrf.mxu0 }
  0xfd   :  { %v439_v6 = vpop.f32.mrf.mxu1 }
  0xfe   :  { %523 = vst [vmem:[%s864_s5 + $0xb8] sm:$0xff] %v491_v3  ;;  %v492_v7 = vadd.f32 %v727_v30, %v438_v4  ;;  %v440_v8 = vadd.f32 %v439_v6, %v242_v5  ;;  %v244_v9 = vpop.f32.mrf.mxu0 }
  0xff   :  { %v441_v10 = vpop.f32.mrf.mxu1 }
 0x100   :  { %524 = vst [vmem:[%s864_s5 + $0xc0] sm:$0xff] %v492_v7  ;;  %v493_v11 = vadd.f32 %v729_v34, %v440_v8  ;;  %v442_v12 = vadd.f32 %v441_v10, %v244_v9  ;;  %v246_v13 = vpop.f32.mrf.mxu0 }
 0x101   :  { %v443_v14 = vpop.f32.mrf.mxu1 }
 0x102   :  { %525 = vst [vmem:[%s864_s5 + $0xc8] sm:$0xff] %v493_v11  ;;  %v494_v15 = vadd.f32 %v727_v30, %v442_v12  ;;  %v444_v16 = vadd.f32 %v443_v14, %v246_v13  ;;  %v250_v17 = vpop.f32.mrf.mxu0 }
 0x103   :  { %v447_v18 = vpop.f32.mrf.mxu1 }
 0x104   :  { %526 = vst [vmem:[%s864_s5 + $0xd0] sm:$0xff] %v494_v15  ;;  %v495_v19 = vadd.f32 %v729_v34, %v444_v16  ;;  %v448_v20 = vadd.f32 %v447_v18, %v250_v17  ;;  %v252_v21 = vpop.f32.mrf.mxu0 }
 0x105   :  { %v449_v22 = vpop.f32.mrf.mxu1 }
 0x106   :  { %527 = vst [vmem:[%s864_s5 + $0xd8] sm:$0xff] %v495_v19  ;;  %v496_v23 = vadd.f32 %v727_v30, %v448_v20  ;;  %v450_v24 = vadd.f32 %v449_v22, %v252_v21  ;;  %v254_v25 = vpop.f32.mrf.mxu0 }
 0x107   :  { %v451_v26 = vpop.f32.mrf.mxu1 }
 0x108   :  { %528 = vst [vmem:[%s864_s5 + $0xe0] sm:$0xff] %v496_v23  ;;  %v497_v27 = vadd.f32 %v729_v34, %v450_v24  ;;  %v452_v28 = vadd.f32 %v451_v26, %v254_v25  ;;  %v256_v29 = vpop.f32.mrf.mxu0 }
 0x109   :  { %v453_v31 = vpop.f32.mrf.mxu1 }
 0x10a   :  { %529 = vst [vmem:[%s864_s5 + $0xe8] sm:$0xff] %v497_v27  ;;  %v498_v32 = vadd.f32 %v727_v30, %v452_v28  ;;  %v454_v33 = vadd.f32 %v453_v31, %v256_v29 }
 0x10c   :  { %530 = vst [vmem:[%s864_s5 + $0xf0] sm:$0xff] %v498_v32  ;;  %v499_v35 = vadd.f32 %v729_v34, %v454_v33 }
 0x10e   :  { %531 = vst [vmem:[%s864_s5 + $0xf8] sm:$0xff] %v499_v35 }

// kernel: stgi_forward.17
= control target key start
LH: loop header
LB: loop body
LE: loop exit
PB: predicated region body
PF: predicated region fallthrough
CT: control target
= control target key end

     0   :  { %vm130_vm0 = vcmask 261120   ;;  %s1203_s0 = inlined_call_operand.vmem [shape: bf16[128,32], index: 0, kind: input, shape index: {}]   ;;  %s1204_s1 = inlined_call_operand.vmem [shape: bf16[128,32], index: 1, kind: input, shape index: {}]   ;;  %s1205_s2 = inlined_call_operand.vmem [shape: bf16[32,128], index: 2, kind: input, shape index: {}]   ;;  %s1206_s3 = inlined_call_operand.vmem [shape: bf16[32,128], index: 3, kind: input, shape index: {}]   ;;  %s1207_s4 = inlined_call_operand.vmem [shape: f32[1,128], index: 4, kind: input, shape index: {}]   ;;  %s1208_s5 = inlined_call_operand.vmem [shape: f32[128,128], index: 5, kind: input, shape index: {}]   ;;  %s1209_s6 = inlined_call_operand.vmem [shape: f32[128,128], index: 6, kind: input, shape index: {}]   ;;  %s1210_s7 = inlined_call_operand.vmem [shape: f32[128,128], index: 7, kind: output, shape index: {0}]   ;;  %s1211_s8 = inlined_call_operand.hbm [shape: f32[1,1], index: 8, kind: output, shape index: {1}]  }
   0x1   :  { %v769_v0 = vld [vmem:[%s1206_s3 + $0x8] sm:$0xff]   ;;  %v771_v2 = vld [vmem:[%s1206_s3] sm:$0xff]   ;;  %v777_v8 = vld [vmem:[%s1204_s1 + $0x10] sm:$0xff]  }
   0x2   :  { %v770_v1 = vld [vmem:[%s1205_s2 + $0x8] sm:$0xff]   ;;  %722 = vmatprep.subr.bf16.mxu0 %v769_v0  ;;  %v772_v3 = vld [vmem:[%s1205_s2] sm:$0xff]   ;;  %v778_v9 = vld [vmem:[%s1203_s0 + $0x10] sm:$0xff]  }
   0x3   :  { %742 = vmatprep.subr.bf16.mxu1 %v770_v1  ;;  %723 = vmatpush3.bf16.msra.mxu0 %v769_v0  ;;  %v773_v4 = vld [vmem:[%s1204_s1] sm:$0xff]   ;;  %v775_v6 = vld [vmem:[%s1204_s1 + $0x8] sm:$0xff]   ;;  %v779_v10 = vld [vmem:[%s1204_s1 + $0x18] sm:$0xff]  }
   0x4   :  { %743 = vmatpush3.bf16.msra.mxu1 %v770_v1  ;;  %724 = vmatprep.subr.bf16.mxu0 %v771_v2  ;;  %v774_v5 = vld [vmem:[%s1203_s0] sm:$0xff]   ;;  %v776_v7 = vld [vmem:[%s1203_s0 + $0x8] sm:$0xff]   ;;  %v780_v11 = vld [vmem:[%s1203_s0 + $0x18] sm:$0xff]  }
   0x5   :  { %744 = vmatprep.subr.bf16.mxu1 %v772_v3  ;;  %726 = vmatprep.mubr.msk.bf16.mxu0 %vm130_vm0, %v773_v4  ;;  %v781_v12 = vld [vmem:[%s1204_s1 + $0x20] sm:$0xff]  }
   0x6   :  { %746 = vmatprep.mubr.msk.bf16.mxu1 %vm130_vm0, %v774_v5  ;;  %v782_v13 = vld [vmem:[%s1203_s0 + $0x20] sm:$0xff]  }
   0x7   :  { %725 = vmatpush3.bf16.msra.mxu0 %v771_v2 }
   0x8   :  { %745 = vmatpush3.bf16.msra.mxu1 %v772_v3 }
   0xa   :  { %727 = vmatmul.mubr.msk.bf16.vlgmr.msra.gmra.mxu0 %vm130_vm0, %v775_v6 }
   0xb   :  { %747 = vmatmul.mubr.msk.bf16.vlgmr.msra.gmra.mxu1 %vm130_vm0, %v776_v7  ;;  %730 = vmatprep.mubr.msk.bf16.mxu0 %vm130_vm0, %v777_v8 }
   0xc   :  { %750 = vmatprep.mubr.msk.bf16.mxu1 %vm130_vm0, %v778_v9 }
  0x12   :  { %731 = vmatmul.mubr.msk.bf16.gmra.mxu0 %vm130_vm0, %v779_v10 }
  0x13   :  { %751 = vmatmul.mubr.msk.bf16.gmra.mxu1 %vm130_vm0, %v780_v11  ;;  %734 = vmatprep.mubr.msk.bf16.mxu0 %vm130_vm0, %v781_v12 }
  0x14   :  { %754 = vmatprep.mubr.msk.bf16.mxu1 %vm130_vm0, %v782_v13 }
  0x15   :  { %14 = vsyncpa [#allocation4], 0  ;;  %v783_v14 = vld [vmem:[%s1204_s1 + $0x28] sm:$0xff]   ;;  %v785_v16 = vld [vmem:[%s1204_s1 + $0x30] sm:$0xff]   ;;  %s813_s11 = smov [#allocation3]  }
  0x16   :  { %v784_v15 = vld [vmem:[%s1203_s0 + $0x28] sm:$0xff]   ;;  %v786_v17 = vld [vmem:[%s1203_s0 + $0x30] sm:$0xff]   ;;  %v787_v18 = vld [vmem:[%s1204_s1 + $0x38] sm:$0xff]   ;;  %s653_s12 = sshll.u32 %s813_s11, 4  ;;  %s654_s12 = int_to_ptr.vmem [resolvable:$true] %s653_s12 }
  0x17   :  { %v788_v19 = vld [vmem:[%s1203_s0 + $0x38] sm:$0xff]   ;;  %v938_v20 = vld [vmem:[%s1209_s6] sm:$0xff]  ;;  %v943_v21 = vld [vmem:[%s1209_s6 + $0x8] sm:$0xff]  ;;  %s791_s15 = scalar_lea.vmem %s654_s12, 16  ;;  %s795_s16 = scalar_lea.vmem %s654_s12, 32 }
  0x18   :  { %v557_v22 = vadd.f32 %v943_v21, %v938_v20  ;;  %v950_v23 = vld [vmem:[%s1209_s6 + $0x10] sm:$0xff]  ;;  %v956_v25 = vld [vmem:[%s1209_s6 + $0x18] sm:$0xff]  ;;  %v962_v29 = vld [vmem:[%s1207_s4] ss:$0 sm:$0xff]  ;;  %vm584_vm2 = vcmp.ne.f32.partialorder %v938_v20, 0.0  ;;  %vm585_vm4 = vcmp.ne.f32.partialorder %v943_v21, 0.0  ;;  %p792_p0 = scmp.ne.s32.totalorder %s654_s12, %s791_s15  ;;  %p796_p1 = scmp.lt.s32.totalorder %s654_s12, %s654_s12 }
  0x19   :  { %v967_v30 = vld [vmem:[%s1209_s6 + $0x20] sm:$0xff]  ;;  %v450_v34 = vld [vmem:[%s1208_s5 + $0x10] sm:$0xff]  ;;  %vm586_vm1 = vcmp.ne.f32.partialorder %v950_v23, 0.0  ;;  %v982_v41 = vld [vmem:[%s1209_s6 + $0x28] sm:$0xff]  ;;  %vm587_vm3 = vcmp.ne.f32.partialorder %v956_v25, 0.0  ;;  %p797_p2 = scmp.lt.s32.totalorder %s795_s16, %s791_s15 }
  0x1a   :  { %735 = vmatmul.mubr.msk.bf16.gmra.mxu0 %vm130_vm0, %v783_v14  ;;  %v558_v24 = vadd.f32 %v557_v22, %v950_v23  ;;  %v448_v39 = vld [vmem:[%s1208_s5] sm:$0xff]  ;;  %v451_v47 = vld [vmem:[%s1208_s5 + $0x18] sm:$0xff]  ;;  %v996_v49 = vld [vmem:[%s1209_s6 + $0x30] sm:$0xff]  ;;  %vm588_vm6 = vcmp.ne.f32.partialorder %v967_v30, 0.0  ;;  %vm589_vm8 = vcmp.ne.f32.partialorder %v982_v41, 0.0 }
  0x1b   :  { %755 = vmatmul.mubr.msk.bf16.gmra.mxu1 %vm130_vm0, %v784_v15  ;;  %738 = vmatprep.mubr.msk.bf16.mxu0 %vm130_vm0, %v785_v16  ;;  %v1006_v56 = vld [vmem:[%s1209_s6 + $0x38] sm:$0xff]  ;;  %v1011_v57 = vld [vmem:[%s1209_s6 + $0x50] sm:$0xff]  ;;  %v449_v59 = vld [vmem:[%s1208_s5 + $0x8] sm:$0xff]  ;;  %vm590_vm5 = vcmp.ne.f32.partialorder %v996_v49, 0.0  ;;  %p798_p3 = por %p797_p2, %p796_p1 }
  0x1c   :  { %758 = vmatprep.mubr.msk.bf16.mxu1 %vm130_vm0, %v786_v17  ;;  %v559_v26 = vadd.f32 %v558_v24, %v956_v25  ;;  %v1026_v3 = vld [vmem:[%s1209_s6 + $0x40] sm:$0xff]  ;;  %v454_v4 = vld [vmem:[%s1208_s5 + $0x30] sm:$0xff]  ;;  %vm591_vm7 = vcmp.ne.f32.partialorder %v1006_v56, 0.0  ;;  %vm594_vm9 = vcmp.ne.f32.partialorder %v1011_v57, 0.0  ;;  %v1050_v17 = vld [vmem:[%s1209_s6 + $0x58] sm:$0xff] }
  0x1d   :  { %v452_v11 = vld [vmem:[%s1208_s5 + $0x20] sm:$0xff]  ;;  %vm592_vm10 = vcmp.ne.f32.partialorder %v1026_v3, 0.0  ;;  %vm595_vm11 = vcmp.ne.f32.partialorder %v1050_v17, 0.0  ;;  %p799_p4 = pnand %p798_p3, %p792_p0 }
  0x1e   :  { %v560_v33 = vadd.f32 %v559_v26, %v967_v30  ;;  %v455_v26 = vld [vmem:[%s1208_s5 + $0x38] sm:$0xff] }
  0x20   :  { %v561_v46 = vadd.f32 %v560_v33, %v982_v41 }
  0x22   :  { %739 = vmatmul.mubr.msk.bf16.gmra.mxu0 %vm130_vm0, %v787_v18  ;;  %v562_v61 = vadd.f32 %v561_v46, %v996_v49  ;;  %v1055_v18 = vld [vmem:[%s1209_s6 + $0x48] sm:$0xff] }
  0x23   :  { %759 = vmatmul.mubr.msk.bf16.gmra.mxu1 %vm130_vm0, %v788_v19  ;;  %vm593_vm12 = vcmp.ne.f32.partialorder %v1055_v18, 0.0 }
  0x24   :  { %v563_v16 = vadd.f32 %v562_v61, %v1006_v56 }
  0xca   :  { %v728_v27 = vpop.f32.mrf.mxu0 }
  0xcb   :  { %v748_v28 = vpop.f32.mrf.mxu1 }
  0xcc   :  { %v371_v31 = vadd.f32 %v748_v28, %v728_v27  ;;  %v189_v32 = vpop.f32.mrf.mxu0 }
  0xcd   :  { %v362_v35 = vpop.f32.mrf.mxu1 }
  0xce   :  { %v434_v36 = vadd.f32 %v962_v29, %v371_v31  ;;  %v363_v37 = vadd.f32 %v362_v35, %v189_v32  ;;  %v729_v38 = vpop.f32.mrf.mxu0 }
  0xcf   :  { %v749_v40 = vpop.f32.mrf.mxu1 }
  0xd0   :  { %v602_v42 = vsel %vm586_vm1, %v450_v34, %v434_v36  ;;  %v432_v43 = vadd.f32 %v962_v29, %v363_v37  ;;  %v374_v44 = vadd.f32 %v749_v40, %v729_v38  ;;  %v192_v45 = vpop.f32.mrf.mxu0  ;;  %v482_v62 = vsub.f32 %v434_v36, %v450_v34  ;;  %v453_v34 = vld [vmem:[%s1208_s5 + $0x28] sm:$0xff]  ;;  %v1082_v36 = vld [vmem:[%s1209_s6 + $0x70] sm:$0xff] }
  0xd1   :  { %618 = vst [vmem:[%s1210_s7 + $0x10] sm:$0xff] %v602_v42  ;;  %v365_v48 = vpop.f32.mrf.mxu1  ;;  %v564_v42 = vadd.f32 %v563_v16, %v1026_v3  ;;  %vm598_vm13 = vcmp.ne.f32.partialorder %v1082_v36, 0.0  ;;  %v457_v16 = vld [vmem:[%s1208_s5 + $0x48] sm:$0xff]  ;;  %vm643_vm1 = vcmask 0  }
  0xd2   :  { %v600_v50 = vsel %vm584_vm2, %v448_v39, %v432_v43  ;;  %v435_v51 = vadd.f32 %v962_v29, %v374_v44  ;;  %v732_v52 = vpop.f32.mrf.mxu0  ;;  %v480_v53 = vsub.f32 %v432_v43, %v448_v39  ;;  %v366_v54 = vadd.f32 %v365_v48, %v192_v45 }
  0xd3   :  { %616 = vst [vmem:[%s1210_s7] sm:$0xff] %v600_v50  ;;  %v752_v55 = vpop.f32.mrf.mxu1  ;;  %v499_v19 = vmul.f32 %v482_v62, %v950_v23 }
  0xd4   :  { %v603_v58 = vsel %vm587_vm3, %v451_v47, %v435_v51  ;;  %v205_v60 = vpop.f32.mrf.mxu0  ;;  %v483_v63 = vsub.f32 %v435_v51, %v451_v47  ;;  %v433_v0 = vadd.f32 %v962_v29, %v366_v54  ;;  %v387_v1 = vadd.f32 %v752_v55, %v732_v52  ;;  %v458_v52 = vld [vmem:[%s1208_s5 + $0x50] sm:$0xff] }
  0xd5   :  { %619 = vst [vmem:[%s1210_s7 + $0x18] sm:$0xff] %v603_v58  ;;  %v378_v2 = vpop.f32.mrf.mxu1  ;;  %v497_v7 = vmul.f32 %v480_v53, %v938_v20  ;;  %v515_v43 = vmul.f32 %v499_v19, %v482_v62 }
  0xd6   :  { %v379_v5 = vadd.f32 %v378_v2, %v205_v60  ;;  %v733_v6 = vpop.f32.mrf.mxu0  ;;  %v481_v8 = vsub.f32 %v433_v0, %v449_v59  ;;  %v601_v9 = vsel %vm585_vm4, %v449_v59, %v433_v0  ;;  %v438_v10 = vadd.f32 %v962_v29, %v387_v1  ;;  %v1105_v60 = vld [vmem:[%s1209_s6 + $0x60] sm:$0xff] }
  0xd7   :  { %v753_v12 = vpop.f32.mrf.mxu1  ;;  %617 = vst [vmem:[%s1210_s7 + $0x8] sm:$0xff] %v601_v9  ;;  %v500_v20 = vmul.f32 %v483_v63, %v956_v25  ;;  %v513_v32 = vmul.f32 %v497_v7, %v480_v53  ;;  %v565_v2 = vadd.f32 %v564_v42, %v1055_v18  ;;  %vm596_vm14 = vcmp.ne.f32.partialorder %v1105_v60, 0.0 }
  0xd8   :  { %v436_v13 = vadd.f32 %v962_v29, %v379_v5  ;;  %v390_v14 = vadd.f32 %v753_v12, %v733_v6  ;;  %v208_v15 = vpop.f32.mrf.mxu0  ;;  %v498_v22 = vmul.f32 %v481_v8, %v943_v21  ;;  %v606_v24 = vsel %vm590_vm5, %v454_v4, %v438_v10 }
  0xd9   :  { %v381_v27 = vpop.f32.mrf.mxu1  ;;  %622 = vst [vmem:[%s1210_s7 + $0x30] sm:$0xff] %v606_v24  ;;  %v486_v37 = vsub.f32 %v438_v10, %v454_v4  ;;  %v516_v48 = vmul.f32 %v500_v20, %v483_v63  ;;  %v456_v63 = vld [vmem:[%s1208_s5 + $0x40] sm:$0xff] }
  0xda   :  { %v484_v28 = vsub.f32 %v436_v13, %v452_v11  ;;  %v604_v23 = vsel %vm588_vm6, %v452_v11, %v436_v13  ;;  %v439_v25 = vadd.f32 %v962_v29, %v390_v14  ;;  %v382_v31 = vadd.f32 %v381_v27, %v208_v15  ;;  %v736_v21 = vpop.f32.mrf.mxu0  ;;  %v1139_v27 = vld [vmem:[%s1209_s6 + $0x78] sm:$0xff] }
  0xdb   :  { %v514_v33 = vmul.f32 %v498_v22, %v481_v8  ;;  %620 = vst [vmem:[%s1210_s7 + $0x20] sm:$0xff] %v604_v23  ;;  %v756_v35 = vpop.f32.mrf.mxu1  ;;  %v503_v61 = vmul.f32 %v486_v37, %v996_v49  ;;  %v459_v49 = vld [vmem:[%s1208_s5 + $0x58] sm:$0xff]  ;;  %vm599_vm15 = vcmp.ne.f32.partialorder %v1139_v27, 0.0 }
  0xdc   :  { %v607_v38 = vsel %vm591_vm7, %v455_v26, %v439_v25  ;;  %v437_v39 = vadd.f32 %v962_v29, %v382_v31  ;;  %v221_v40 = vpop.f32.mrf.mxu0  ;;  %v501_v45 = vmul.f32 %v484_v28, %v967_v30  ;;  %v403_v46 = vadd.f32 %v756_v35, %v736_v21  ;;  %v462_v31 = vld [vmem:[%s1208_s5 + $0x70] sm:$0xff] }
  0xdd   :  { %v529_v44 = vadd.f32 %v514_v33, %v513_v32  ;;  %623 = vst [vmem:[%s1210_s7 + $0x38] sm:$0xff] %v607_v38  ;;  %v394_v47 = vpop.f32.mrf.mxu1  ;;  %v487_v30 = vsub.f32 %v439_v25, %v455_v26  ;;  %v477_v32 = vld [vmem:[%s1209_s6 + $0x68] sm:$0xff]  ;;  %v566_v33 = vadd.f32 %v565_v2, %v1011_v57 }
  0xde   :  { %v485_v50 = vsub.f32 %v437_v39, %v453_v34  ;;  %v605_v51 = vsel %vm589_vm8, %v453_v34, %v437_v39  ;;  %v737_v53 = vpop.f32.mrf.mxu0  ;;  %v442_v55 = vadd.f32 %v962_v29, %v403_v46  ;;  %v395_v58 = vadd.f32 %v394_v47, %v221_v40  ;;  %v460_v47 = vld [vmem:[%s1208_s5 + $0x60] sm:$0xff] }
  0xdf   :  { %v530_v54 = vadd.f32 %v529_v44, %v515_v43  ;;  %621 = vst [vmem:[%s1210_s7 + $0x28] sm:$0xff] %v605_v51  ;;  %v757_v59 = vpop.f32.mrf.mxu1  ;;  %v517_v4 = vmul.f32 %v501_v45, %v484_v28  ;;  %v504_v13 = vmul.f32 %v487_v30, %v1006_v56  ;;  %v519_v28 = vmul.f32 %v503_v61, %v486_v37 }
  0xe0   :  { %v502_v62 = vmul.f32 %v485_v50, %v982_v41  ;;  %v406_v0 = vadd.f32 %v757_v59, %v737_v53  ;;  %v224_v1 = vpop.f32.mrf.mxu0  ;;  %v610_v6 = vsel %vm594_vm9, %v458_v52, %v442_v55  ;;  %v440_v7 = vadd.f32 %v962_v29, %v395_v58 }
  0xe1   :  { %v531_v5 = vadd.f32 %v530_v54, %v516_v48  ;;  %v397_v41 = vpop.f32.mrf.mxu1  ;;  %626 = vst [vmem:[%s1210_s7 + $0x50] sm:$0xff] %v610_v6  ;;  %v490_v20 = vsub.f32 %v442_v55, %v458_v52  ;;  %v520_v39 = vmul.f32 %v504_v13, %v487_v30  ;;  %vm597_vm0 = vcmp.ne.f32.partialorder %v477_v32, 0.0  ;;  %v463_v55 = vld [vmem:[%s1208_s5 + $0x78] sm:$0xff] }
  0xe2   :  { %v518_v8 = vmul.f32 %v502_v62, %v485_v50  ;;  %v443_v9 = vadd.f32 %v962_v29, %v406_v0  ;;  %v398_v10 = vadd.f32 %v397_v41, %v224_v1  ;;  %v740_v11 = vpop.f32.mrf.mxu0  ;;  %v488_v14 = vsub.f32 %v440_v7, %v456_v63  ;;  %v461_v0 = vld [vmem:[%s1208_s5 + $0x68] sm:$0xff] }
  0xe3   :  { %v532_v12 = vadd.f32 %v531_v5, %v517_v4  ;;  %v608_v15 = vsel %vm592_vm10, %v456_v63, %v440_v7  ;;  %v760_v19 = vpop.f32.mrf.mxu1  ;;  %v507_v44 = vmul.f32 %v490_v20, %v1011_v57  ;;  %v567_v58 = vadd.f32 %v566_v33, %v1050_v17 }
  0xe4   :  { %624 = vst [vmem:[%s1210_s7 + $0x40] sm:$0xff] %v608_v15  ;;  %v611_v22 = vsel %vm595_vm11, %v459_v49, %v443_v9  ;;  %v441_v24 = vadd.f32 %v962_v29, %v398_v10  ;;  %v419_v56 = vadd.f32 %v760_v19, %v740_v11  ;;  %v237_v26 = vpop.f32.mrf.mxu0  ;;  %v505_v25 = vmul.f32 %v488_v14, %v1026_v3 }
  0xe5   :  { %v533_v23 = vadd.f32 %v532_v12, %v518_v8  ;;  %627 = vst [vmem:[%s1210_s7 + $0x58] sm:$0xff] %v611_v22  ;;  %v410_v21 = vpop.f32.mrf.mxu1  ;;  %v491_v34 = vsub.f32 %v443_v9, %v459_v49  ;;  %v523_v1 = vmul.f32 %v507_v44, %v490_v20  ;;  %v568_v9 = vadd.f32 %v567_v58, %v1105_v60 }
  0xe6   :  { %v489_v35 = vsub.f32 %v441_v24, %v457_v16  ;;  %v609_v3 = vsel %vm593_vm12, %v457_v16, %v441_v24  ;;  %v446_v37 = vadd.f32 %v962_v29, %v419_v56  ;;  %v741_v38 = vpop.f32.mrf.mxu0  ;;  %v411_v42 = vadd.f32 %v410_v21, %v237_v26 }
  0xe7   :  { %v534_v40 = vadd.f32 %v533_v23, %v519_v28  ;;  %625 = vst [vmem:[%s1210_s7 + $0x48] sm:$0xff] %v609_v3  ;;  %v761_v43 = vpop.f32.mrf.mxu1  ;;  %v521_v50 = vmul.f32 %v505_v25, %v488_v14  ;;  %v569_v19 = vadd.f32 %v568_v9, %v477_v32 }
  0xe8   :  { %v506_v45 = vmul.f32 %v489_v35, %v1055_v18  ;;  %v614_v46 = vsel %vm598_vm13, %v462_v31, %v446_v37  ;;  %v240_v48 = vpop.f32.mrf.mxu0  ;;  %v444_v52 = vadd.f32 %v962_v29, %v411_v42  ;;  %v422_v57 = vadd.f32 %v761_v43, %v741_v38 }
  0xe9   :  { %v535_v51 = vadd.f32 %v534_v40, %v520_v39  ;;  %630 = vst [vmem:[%s1210_s7 + $0x70] sm:$0xff] %v614_v46  ;;  %v413_v53 = vpop.f32.mrf.mxu1  ;;  %v508_v18 = vmul.f32 %v491_v34, %v1050_v17  ;;  %v494_v17 = vsub.f32 %v446_v37, %v462_v31  ;;  %v570_v26 = vadd.f32 %v569_v19, %v1082_v36 }
  0xea   :  { %v522_v54 = vmul.f32 %v506_v45, %v489_v35  ;;  %v414_v30 = vadd.f32 %v413_v53, %v240_v48  ;;  %v492_v61 = vsub.f32 %v444_v52, %v460_v47  ;;  %v612_v62 = vsel %vm596_vm14, %v460_v47, %v444_v52 }
  0xeb   :  { %v536_v59 = vadd.f32 %v535_v51, %v521_v50  ;;  %v447_v63 = vadd.f32 %v962_v29, %v422_v57  ;;  %628 = vst [vmem:[%s1210_s7 + $0x60] sm:$0xff] %v612_v62  ;;  %v524_v41 = vmul.f32 %v508_v18, %v491_v34  ;;  %v511_v12 = vmul.f32 %v494_v17, %v1082_v36 }
  0xec   :  { %v445_v2 = vadd.f32 %v962_v29, %v414_v30  ;;  %v509_v5 = vmul.f32 %v492_v61, %v1105_v60  ;;  %v571_v60 = vadd.f32 %v570_v26, %v1139_v27 }
  0xed   :  { %v537_v4 = vadd.f32 %v536_v59, %v522_v54  ;;  %v615_v6 = vsel %vm599_vm15, %v463_v55, %v447_v63  ;;  %v495_v29 = vsub.f32 %v447_v63, %v463_v55  ;;  %v527_v20 = vmul.f32 %v511_v12, %v494_v17 }
  0xee   :  { %v493_v7 = vsub.f32 %v445_v2, %v461_v0  ;;  %v613_v49 = vsel %vm597_vm0, %v461_v0, %v445_v2  ;;  %631 = vst [vmem:[%s1210_s7 + $0x78] sm:$0xff] %v615_v6  ;;  %v525_v11 = vmul.f32 %v509_v5, %v492_v61 }
  0xef   :  { %629 = vst [vmem:[%s1210_s7 + $0x68] sm:$0xff] %v613_v49  ;;  %v538_v8 = vadd.f32 %v537_v4, %v523_v1  ;;  %v512_v15 = vmul.f32 %v495_v29, %v1139_v27 }
  0xf0   :  { %v510_v10 = vmul.f32 %v493_v7, %v477_v32 }
  0xf1   :  { %v539_v13 = vadd.f32 %v538_v8, %v524_v41  ;;  %v528_v24 = vmul.f32 %v512_v15, %v495_v29 }
  0xf2   :  { %v526_v14 = vmul.f32 %v510_v10, %v493_v7 }
  0xf3   :  { %v540_v16 = vadd.f32 %v539_v13, %v525_v11 }
  0xf5   :  { %v541_v22 = vadd.f32 %v540_v16, %v526_v14 }
  0xf7   :  { %v542_v56 = vadd.f32 %v541_v22, %v527_v20 }
  0xf9   :  { %v543_v28 = vadd.f32 %v542_v56, %v528_v24 }
  0xfb   :  { %544 = vadd.xlane.f32.xlu0 %v543_v28 }
  0xff   :  { %572 = vadd.xlane.f32.xlu0 %v571_v60 }
 0x184   :  { %v545_v23 = vpop.xlane.xlu0 %544 }
 0x185   :  { %v546_v25 = vrot.slane %v545_v23, 4 }
 0x187   :  { %v547_v31 = vadd.f32 %v546_v25, %v545_v23 }
 0x188   :  { %v573_v21 = vpop.xlane.xlu0 %572 }
 0x189   :  { %v548_v33 = vrot.slane %v547_v31, 2  ;;  %v574_v34 = vrot.slane %v573_v21, 4 }
 0x18b   :  { %v575_v35 = vadd.f32 %v574_v34, %v573_v21  ;;  %v549_v3 = vadd.f32 %v548_v33, %v547_v31 }
 0x18d   :  { %v576_v32 = vrot.slane %v575_v35, 2  ;;  %v550_v37 = vrot.slane %v549_v3, 1 }
 0x18f   :  { %v577_v38 = vadd.f32 %v576_v32, %v575_v35  ;;  %v551_v39 = vadd.f32 %v550_v37, %v549_v3 }
 0x191   :  { %762 = vpush %v551_v39  ;;  %v578_v40 = vrot.slane %v577_v38, 1 }
 0x193   :  { %v579_v36 = vadd.f32 %v578_v40, %v577_v38 }
 0x195   :  { %764 = vpush %v579_v36 }
 0x1c2   :  { %s763_s7 = spop %762 }
 0x1c6   :  { %s765_s9 = spop %764 }
 0x1c7   :  { %s637_s10 = sadd.f32 1e-08, %s765_s9 }
 0x1c9   :  { %v638_v27 = vstv %s637_s10 }
 0x1ca   :  { %789 = vrcp.f32 %v638_v27 }
 0x1d7   :  { %v790_v42 = vpop.eup %789 }
 0x1d8   :  { %766 = vpush %v790_v42 }
 0x209   :  { %s767_s13 = spop %766 }
 0x20a   :  { %s641_s14 = smul.f32 %s767_s13, %s763_s7 }
 0x20c   :  { %v642_v43 = vstv %s641_s14 }
 0x20d   :  { %644 = vst.msk [vmem:[#allocation3] sm:$0x1] %vm643_vm1, %v642_v43 }
 0x20e   :  { %802 = shalt.err (!%p799_p4)
}
 0x20f   :  { %656 = dma.vmem_to_hbm [thread:$0]  %s654_s12, 16, %s1211_s8, [#allocation4]  }
 0x210   :  { %811 = dma.done.wait [#allocation4], 16  }
 0x211   :  { %812 = vsyncadd [#allocation4], 4294967280 }
 0x212   :  { %662 = vsyncpa [#allocation4], 1 }

// kernel: stgi_forward.14
= control target key start
LH: loop header
LB: loop body
LE: loop exit
PB: predicated region body
PF: predicated region fallthrough
CT: control target
= control target key end

     0   :  { %vm233_vm0 = vcmask 523264   ;;  %v3611_v2 = vmov 0   ;;  %v3612_v4 = vmov 0.0   ;;  %s3613_s5 = smov 32   ;;  %s3614_s10 = smov 64   ;;  %vm397_vm1 = vcmask 261120   ;;  %s4415_s0 = inlined_call_operand.vmem [shape: f32[16,8,256], index: 0, kind: input, shape index: {}, may-alias: {0,1}]   ;;  %s4416_s1 = inlined_call_operand.vmem [shape: f32[16,8,256], index: 1, kind: input, shape index: {}, may-alias: {0,1}]   ;;  %s4417_s2 = inlined_call_operand.vmem [shape: bf16[64,256], index: 2, kind: input, shape index: {}]   ;;  %s4418_s3 = inlined_call_operand.vmem [shape: f32[16,8,32], index: 3, kind: output, shape index: {0}]   ;;  %s4419_s4 = inlined_call_operand.vmem [shape: f32[16,8,32], index: 4, kind: output, shape index: {1}]  }
   0x1   :  { %v3644_v0 = vld [vmem:[%s4417_s2 + $0x34] ss:$8 sps:$4 sm:$0xff]   ;;  %v3649_v1 = vld [vmem:[%s4417_s2 + $0x30] ss:$8 sps:$4 sm:$0xff]   ;;  %323 = vmatprep.mubr.bf16.mxu0 %v3611_v2  ;;  %498 = vmatprep.mubr.bf16.mxu1 %v3611_v2  ;;  %v3657_v3 = vld [vmem:[%s4417_s2 + $0x24] ss:$8 sps:$4 sm:$0xff]  }
   0x2   :  { %299 = vmatprep.subr.bf16.mxu0 %v3644_v0  ;;  %234 = vst.msk [vmem:[#allocation2] sm:$0xff] %vm233_vm0, %v3612_v4  ;;  %235 = vst.msk [vmem:[#allocation3] sm:$0xff] %vm233_vm0, %v3612_v4  ;;  %474 = vmatprep.subr.bf16.mxu1 %v3644_v0  ;;  %v3666_v5 = vld [vmem:[%s4417_s2 + $0x20] ss:$8 sps:$4 sm:$0xff]   ;;  %v3673_v6 = vld [vmem:[%s4417_s2 + $0x14] ss:$8 sps:$4 sm:$0xff]  }
   0x3   :  { %300 = vmatpush1.bf16.msra.mxu0 %v3649_v1  ;;  %475 = vmatpush1.bf16.msra.mxu1 %v3649_v1  ;;  %v3679_v7 = vld [vmem:[%s4417_s2 + $0x10] ss:$8 sps:$4 sm:$0xff]   ;;  %v3684_v8 = vld [vmem:[%s4417_s2 + $0x4] ss:$8 sps:$4 sm:$0xff]   ;;  %v3693_v9 = vld [vmem:[%s4417_s2] ss:$8 sps:$4 sm:$0xff]  }
   0x4   :  { %301 = vmatprep.subr.bf16.mxu0 %v3657_v3  ;;  %476 = vmatprep.subr.bf16.mxu1 %v3657_v3  ;;  %v70_v13 = vld [vmem:[%s4415_s0] sm:$0xff]  ;;  %v3107_v15 = vld [vmem:[%s4416_s1 + $0xf8] sm:$0xff]  ;;  %s3615_s11 = smov 96   ;;  %v72_v55 = vld [vmem:[%s4415_s0 + $0x10] sm:$0xff] }
   0x5   :  { %v3106_v57 = vld [vmem:[%s4416_s1 + $0xe8] sm:$0xff] }
   0x7   :  { %302 = vmatpush1.bf16.msra.mxu0 %v3666_v5  ;;  %477 = vmatpush1.bf16.msra.mxu1 %v3666_v5 }
   0x8   :  { %303 = vmatprep.subr.bf16.mxu0 %v3673_v6  ;;  %478 = vmatprep.subr.bf16.mxu1 %v3673_v6 }
   0x9   :  { %v237_v10 = vld [vmem:[#allocation3] sm:$0xff]  ;;  %v236_v11 = vld [vmem:[#allocation2] sm:$0xff] }
   0xa   :  { %345 = vrot.lane.b32.xlu1 %v237_v10, %s3613_s5  ;;  %v238_v12 = vpack.c.bf16 %v236_v11, %v236_v11 }
   0xb   :  { %304 = vmatpush1.bf16.msra.mxu0 %v3679_v7  ;;  %479 = vmatpush1.bf16.msra.mxu1 %v3679_v7 }
   0xc   :  { %305 = vmatprep.subr.bf16.mxu0 %v3684_v8  ;;  %480 = vmatprep.subr.bf16.mxu1 %v3684_v8 }
   0xf   :  { %306 = vmatpush1.bf16.msra.mxu0 %v3693_v9  ;;  %481 = vmatpush1.bf16.msra.mxu1 %v3693_v9 }
  0x10   :  { %650 = vmatprep.subr.bf16.mxu0 %v3644_v0  ;;  %826 = vmatprep.subr.bf16.mxu1 %v3644_v0 }
  0x12   :  { %3116 = vmatmul.mubr.msk.bf16.vlgmr.msra.gmra.mxu0 %vm233_vm0, %v238_v12 }
  0x13   :  { %651 = vmatpush1.bf16.msra.mxu0 %v3649_v1  ;;  %674 = vmatprep.mubr.bf16.mxu0 %v3611_v2 }
  0x14   :  { %652 = vmatprep.subr.bf16.mxu0 %v3657_v3 }
  0x17   :  { %653 = vmatpush1.bf16.msra.mxu0 %v3666_v5 }
  0x18   :  { %654 = vmatprep.subr.bf16.mxu0 %v3673_v6 }
  0x1b   :  { %655 = vmatpush1.bf16.msra.mxu0 %v3679_v7 }
  0x1c   :  { %656 = vmatprep.subr.bf16.mxu0 %v3684_v8 }
  0x1f   :  { %657 = vmatpush1.bf16.msra.mxu0 %v3693_v9 }
  0x20   :  { %1002 = vmatprep.subr.bf16.mxu0 %v3644_v0 }
  0x7c   :  { %v346_v35 = vpop.permute.xlu1 %345 }
  0xd2   :  { %v325_v14 = vpop.f32.mrf.mxu0 }
  0xd3   :  { %v333_v16 = vadd.f32 %v325_v14, %v70_v13 }
  0xd4   :  { %v327_v17 = vpop.f32.mrf.mxu0 }
  0xd5   :  { %3355 = vtanh.f32 %v333_v16  ;;  %v336_v18 = vadd.f32 %v3107_v15, %v327_v17  ;;  %v3117_v23 = vmul.f32 -1.442695, %v333_v16 }
  0xd6   :  { %v329_v19 = vpop.f32.mrf.mxu0 }
  0xd7   :  { %3357 = vtanh.f32 %v336_v18  ;;  %v3118_v24 = vmul.f32 -1.442695, %v336_v18 }
  0xd8   :  { %v330_v20 = vpop.f32.mrf.mxu0  ;;  %3359 = vpow2.f32 %v3117_v23 }
  0xd9   :  { %3361 = vpow2.f32 %v3118_v24 }
  0xe2   :  { %v3356_v21 = vpop.eup %3355 }
  0xe3   :  { %350 = vrot.lane.b32.xlu0 %v3356_v21, %s3614_s10 }
  0xe4   :  { %v3358_v22 = vpop.eup %3357 }
  0xe5   :  { %v3360_v25 = vpop.eup %3359 }
  0xe6   :  { %v340_v26 = vadd.f32 1.0, %v3360_v25  ;;  %v3362_v27 = vpop.eup %3361 }
  0xe7   :  { %374 = vrot.lane.b32.xlu0 %v3358_v22, %s3614_s10  ;;  %v368_v28 = vadd.f32 1.0, %v3362_v27 }
  0xe8   :  { %3363 = vrcp.f32 %v340_v26 }
  0xe9   :  { %3365 = vrcp.f32 %v368_v28 }
  0xf5   :  { %v3364_v29 = vpop.eup %3363 }
  0xf6   :  { %v3366_v32 = vpop.eup %3365  ;;  %v348_v36 = vmul.f32 %v3364_v29, %v346_v35 }
  0xf7   :  { %v372_v39 = vmul.f32 %v3366_v32, %v237_v10 }
 0x155   :  { %v351_v30 = vpop.permute.xlu0 %350 }
 0x156   :  { %v353_v31 = vmul.f32 %v3364_v29, %v351_v30 }
 0x158   :  { %355 = vrot.lane.b32.xlu1 %v353_v31, %s3613_s5 }
 0x159   :  { %v375_v33 = vpop.permute.xlu0 %374 }
 0x15a   :  { %v377_v34 = vmul.f32 %v3366_v32, %v375_v33 }
 0x15c   :  { %379 = vrot.lane.b32.xlu0 %v377_v34, %s3613_s5 }
 0x1ca   :  { %v356_v37 = vpop.permute.xlu1 %355 }
 0x1cb   :  { %v358_v38 = vadd.f32 %v356_v37, %v348_v36 }
 0x1cd   :  { %3367 = vtanh.f32 %v358_v38 }
 0x1ce   :  { %v380_v40 = vpop.permute.xlu0 %379 }
 0x1cf   :  { %v382_v41 = vadd.f32 %v380_v40, %v372_v39 }
 0x1d1   :  { %3369 = vtanh.f32 %v382_v41 }
 0x1da   :  { %v3368_v42 = vpop.eup %3367 }
 0x1db   :  { %361 = vrot.lane.b32.xlu1 %v3368_v42, %s3614_s10 }
 0x1de   :  { %v3370_v43 = vpop.eup %3369 }
 0x1df   :  { %385 = vrot.lane.b32.xlu0 %v3370_v43, %s3614_s10  ;;  %v74_v43 = vld [vmem:[%s4415_s0 + $0x20] sm:$0xff] }
 0x24d   :  { %v362_v44 = vpop.permute.xlu1 %361 }
 0x24e   :  { %v364_v45 = vmul.f32 %v3364_v29, %v362_v44 }
 0x250   :  { %390 = vrot.lane.b32.xlu1 %v364_v45, %s3613_s5  ;;  %v3105_v45 = vld [vmem:[%s4416_s1 + $0xd8] sm:$0xff] }
 0x251   :  { %v386_v46 = vpop.permute.xlu0 %385 }
 0x252   :  { %v3727_v47 = vmul.f32 %v3366_v32, %v386_v46 }
 0x254   :  { %394 = vrot.lane.b32.xlu0 %v3727_v47, %s3614_s10  ;;  %401 = vrot.lane.b32.xlu1 %v358_v38, %s3615_s11 }
 0x2c2   :  { %v391_v48 = vpop.permute.xlu1 %390 }
 0x2c3   :  { %406 = vst.msk [vmem:[%s4418_s3] sm:$0xff] %vm397_vm1, %v391_v48 }
 0x2c6   :  { %v395_v49 = vpop.permute.xlu0 %394  ;;  %v402_v50 = vpop.permute.xlu1 %401 }
 0x2c7   :  { %v398_v51 = vsel %vm397_vm1, %v391_v48, %v395_v49  ;;  %v404_v52 = vsel %vm397_vm1, %v402_v50, %v382_v41 }
 0x2c8   :  { %399 = vst.msk [vmem:[#allocation2] sm:$0xff] %vm233_vm0, %v398_v51  ;;  %405 = vst.msk [vmem:[#allocation3] sm:$0xff] %vm233_vm0, %v404_v52 }
 0x2cf   :  { %v412_v53 = vld [vmem:[#allocation2] sm:$0xff]  ;;  %v413_v10 = vld [vmem:[#allocation3] sm:$0xff] }
 0x2d0   :  { %v414_v54 = vpack.c.bf16 %v412_v53, %v412_v53 }
 0x2d2   :  { %3128 = vmatmul.mubr.msk.bf16.vlgmr.msra.gmra.mxu1 %vm233_vm0, %v414_v54 }
 0x2d3   :  { %827 = vmatpush1.bf16.msra.mxu1 %v3649_v1  ;;  %850 = vmatprep.mubr.bf16.mxu1 %v3611_v2 }
 0x2d4   :  { %828 = vmatprep.subr.bf16.mxu1 %v3657_v3 }
 0x2d7   :  { %829 = vmatpush1.bf16.msra.mxu1 %v3666_v5 }
 0x2d8   :  { %830 = vmatprep.subr.bf16.mxu1 %v3673_v6 }
 0x2db   :  { %831 = vmatpush1.bf16.msra.mxu1 %v3679_v7 }
 0x2dc   :  { %832 = vmatprep.subr.bf16.mxu1 %v3684_v8 }
 0x2df   :  { %833 = vmatpush1.bf16.msra.mxu1 %v3693_v9 }
 0x2e0   :  { %1178 = vmatprep.subr.bf16.mxu1 %v3644_v0 }
 0x392   :  { %v500_v56 = vpop.f32.mrf.mxu1 }
 0x393   :  { %v509_v58 = vadd.f32 %v500_v56, %v72_v55 }
 0x394   :  { %v502_v59 = vpop.f32.mrf.mxu1 }
 0x395   :  { %3371 = vtanh.f32 %v509_v58  ;;  %v512_v60 = vadd.f32 %v3106_v57, %v502_v59  ;;  %v3129_v11 = vmul.f32 -1.442695, %v509_v58 }
 0x396   :  { %v504_v61 = vpop.f32.mrf.mxu1 }
 0x397   :  { %3373 = vtanh.f32 %v512_v60  ;;  %v3130_v12 = vmul.f32 -1.442695, %v512_v60 }
 0x398   :  { %v505_v62 = vpop.f32.mrf.mxu1  ;;  %3375 = vpow2.f32 %v3129_v11 }
 0x399   :  { %3377 = vpow2.f32 %v3130_v12 }
 0x3a2   :  { %v3372_v63 = vpop.eup %3371 }
 0x3a3   :  { %526 = vrot.lane.b32.xlu0 %v3372_v63, %s3614_s10 }
 0x3a4   :  { %v3374_v4 = vpop.eup %3373 }
 0x3a5   :  { %550 = vrot.lane.b32.xlu1 %v3374_v4, %s3614_s10  ;;  %v3376_v13 = vpop.eup %3375 }
 0x3a6   :  { %v3378_v14 = vpop.eup %3377  ;;  %v516_v15 = vadd.f32 1.0, %v3376_v13 }
 0x3a7   :  { %521 = vrot.lane.b32.xlu0 %v413_v10, %s3613_s5  ;;  %v544_v16 = vadd.f32 1.0, %v3378_v14 }
 0x3a8   :  { %3379 = vrcp.f32 %v516_v15 }
 0x3a9   :  { %3381 = vrcp.f32 %v544_v16 }
 0x3b5   :  { %v3380_v17 = vpop.eup %3379 }
 0x3b6   :  { %v3382_v20 = vpop.eup %3381 }
 0x3b7   :  { %v548_v27 = vmul.f32 %v3382_v20, %v413_v10 }
 0x415   :  { %v527_v18 = vpop.permute.xlu0 %526 }
 0x416   :  { %v529_v19 = vmul.f32 %v3380_v17, %v527_v18 }
 0x417   :  { %v551_v21 = vpop.permute.xlu1 %550 }
 0x418   :  { %531 = vrot.lane.b32.xlu1 %v529_v19, %s3613_s5  ;;  %v553_v22 = vmul.f32 %v3382_v20, %v551_v21 }
 0x419   :  { %v522_v23 = vpop.permute.xlu0 %521 }
 0x41a   :  { %555 = vrot.lane.b32.xlu0 %v553_v22, %s3613_s5  ;;  %v524_v24 = vmul.f32 %v3380_v17, %v522_v23 }
 0x48a   :  { %v532_v25 = vpop.permute.xlu1 %531 }
 0x48b   :  { %v534_v26 = vadd.f32 %v532_v25, %v524_v24 }
 0x48c   :  { %v556_v28 = vpop.permute.xlu0 %555 }
 0x48d   :  { %3383 = vtanh.f32 %v534_v26  ;;  %v558_v29 = vadd.f32 %v556_v28, %v548_v27 }
 0x48f   :  { %3385 = vtanh.f32 %v558_v29 }
 0x49a   :  { %v3384_v30 = vpop.eup %3383 }
 0x49b   :  { %537 = vrot.lane.b32.xlu1 %v3384_v30, %s3614_s10 }
 0x49c   :  { %v3386_v31 = vpop.eup %3385 }
 0x49d   :  { %561 = vrot.lane.b32.xlu0 %v3386_v31, %s3614_s10  ;;  %v76_v31 = vld [vmem:[%s4415_s0 + $0x30] sm:$0xff] }
 0x50d   :  { %v538_v32 = vpop.permute.xlu1 %537 }
 0x50e   :  { %v540_v33 = vmul.f32 %v3380_v17, %v538_v32 }
 0x50f   :  { %v562_v34 = vpop.permute.xlu0 %561 }
 0x510   :  { %566 = vrot.lane.b32.xlu1 %v540_v33, %s3613_s5  ;;  %v3764_v35 = vmul.f32 %v3382_v20, %v562_v34  ;;  %v3104_v33 = vld [vmem:[%s4416_s1 + $0xc8] sm:$0xff] }
 0x512   :  { %570 = vrot.lane.b32.xlu0 %v3764_v35, %s3614_s10 }
 0x514   :  { %576 = vrot.lane.b32.xlu1 %v534_v26, %s3615_s11 }
 0x582   :  { %v567_v36 = vpop.permute.xlu1 %566 }
 0x583   :  { %3131 = vst.msk [vmem:[%s4418_s3 + $0x8] sm:$0xff] %vm397_vm1, %v567_v36 }
 0x584   :  { %v571_v37 = vpop.permute.xlu0 %570 }
 0x585   :  { %v573_v38 = vsel %vm397_vm1, %v567_v36, %v571_v37 }
 0x586   :  { %v577_v39 = vpop.permute.xlu1 %576  ;;  %574 = vst.msk [vmem:[#allocation2] sm:$0xff] %vm233_vm0, %v573_v38 }
 0x587   :  { %v579_v40 = vsel %vm397_vm1, %v577_v39, %v558_v29 }
 0x588   :  { %580 = vst.msk [vmem:[#allocation3] sm:$0xff] %vm233_vm0, %v579_v40 }
 0x58d   :  { %v588_v41 = vld [vmem:[#allocation2] sm:$0xff] }
 0x58e   :  { %v590_v42 = vpack.c.bf16 %v588_v41, %v588_v41 }
 0x58f   :  { %v589_v53 = vld [vmem:[#allocation3] sm:$0xff] }
 0x590   :  { %3141 = vmatmul.mubr.msk.bf16.vlgmr.msra.gmra.mxu0 %vm233_vm0, %v590_v42 }
 0x591   :  { %1003 = vmatpush1.bf16.msra.mxu0 %v3649_v1  ;;  %1026 = vmatprep.mubr.bf16.mxu0 %v3611_v2 }
 0x592   :  { %1004 = vmatprep.subr.bf16.mxu0 %v3657_v3 }
 0x595   :  { %1005 = vmatpush1.bf16.msra.mxu0 %v3666_v5 }
 0x596   :  { %1006 = vmatprep.subr.bf16.mxu0 %v3673_v6 }
 0x599   :  { %1007 = vmatpush1.bf16.msra.mxu0 %v3679_v7 }
 0x59a   :  { %1008 = vmatprep.subr.bf16.mxu0 %v3684_v8 }
 0x59d   :  { %1009 = vmatpush1.bf16.msra.mxu0 %v3693_v9 }
 0x59e   :  { %1354 = vmatprep.subr.bf16.mxu0 %v3644_v0 }
 0x650   :  { %v676_v44 = vpop.f32.mrf.mxu0 }
 0x651   :  { %v685_v46 = vadd.f32 %v676_v44, %v74_v43 }
 0x652   :  { %v678_v48 = vpop.f32.mrf.mxu0 }
 0x653   :  { %3387 = vtanh.f32 %v685_v46  ;;  %v688_v49 = vadd.f32 %v3105_v45, %v678_v48  ;;  %v3142_v54 = vmul.f32 -1.442695, %v685_v46 }
 0x654   :  { %v680_v50 = vpop.f32.mrf.mxu0 }
 0x655   :  { %3389 = vtanh.f32 %v688_v49  ;;  %v3143_v55 = vmul.f32 -1.442695, %v688_v49 }
 0x656   :  { %v681_v51 = vpop.f32.mrf.mxu0  ;;  %3391 = vpow2.f32 %v3142_v54 }
 0x657   :  { %3393 = vpow2.f32 %v3143_v55 }
 0x660   :  { %v3388_v52 = vpop.eup %3387 }
 0x661   :  { %702 = vrot.lane.b32.xlu0 %v3388_v52, %s3614_s10 }
 0x662   :  { %v3390_v0 = vpop.eup %3389 }
 0x663   :  { %726 = vrot.lane.b32.xlu1 %v3390_v0, %s3614_s10  ;;  %v3392_v56 = vpop.eup %3391 }
 0x664   :  { %v3394_v57 = vpop.eup %3393  ;;  %v692_v58 = vadd.f32 1.0, %v3392_v56 }
 0x665   :  { %697 = vrot.lane.b32.xlu0 %v589_v53, %s3613_s5  ;;  %v720_v59 = vadd.f32 1.0, %v3394_v57 }
 0x666   :  { %3395 = vrcp.f32 %v692_v58 }
 0x667   :  { %3397 = vrcp.f32 %v720_v59 }
 0x673   :  { %v3396_v60 = vpop.eup %3395 }
 0x674   :  { %v3398_v63 = vpop.eup %3397 }
 0x675   :  { %v724_v15 = vmul.f32 %v3398_v63, %v589_v53 }
 0x6d3   :  { %v703_v61 = vpop.permute.xlu0 %702 }
 0x6d4   :  { %v705_v62 = vmul.f32 %v3396_v60, %v703_v61 }
 0x6d5   :  { %v727_v4 = vpop.permute.xlu1 %726 }
 0x6d6   :  { %707 = vrot.lane.b32.xlu1 %v705_v62, %s3613_s5  ;;  %v729_v10 = vmul.f32 %v3398_v63, %v727_v4 }
 0x6d7   :  { %v698_v11 = vpop.permute.xlu0 %697 }
 0x6d8   :  { %731 = vrot.lane.b32.xlu0 %v729_v10, %s3613_s5  ;;  %v700_v12 = vmul.f32 %v3396_v60, %v698_v11 }
 0x748   :  { %v708_v13 = vpop.permute.xlu1 %707 }
 0x749   :  { %v710_v14 = vadd.f32 %v708_v13, %v700_v12 }
 0x74a   :  { %v732_v16 = vpop.permute.xlu0 %731 }
 0x74b   :  { %3399 = vtanh.f32 %v710_v14  ;;  %v734_v17 = vadd.f32 %v732_v16, %v724_v15 }
 0x74d   :  { %3401 = vtanh.f32 %v734_v17 }
 0x758   :  { %v3400_v18 = vpop.eup %3399 }
 0x759   :  { %713 = vrot.lane.b32.xlu1 %v3400_v18, %s3614_s10 }
 0x75a   :  { %v3402_v19 = vpop.eup %3401 }
 0x75b   :  { %737 = vrot.lane.b32.xlu0 %v3402_v19, %s3614_s10 }
 0x7cb   :  { %v714_v20 = vpop.permute.xlu1 %713 }
 0x7cc   :  { %v716_v21 = vmul.f32 %v3396_v60, %v714_v20  ;;  %v78_v20 = vld [vmem:[%s4415_s0 + $0x40] sm:$0xff] }
 0x7cd   :  { %v738_v22 = vpop.permute.xlu0 %737 }
 0x7ce   :  { %742 = vrot.lane.b32.xlu1 %v716_v21, %s3613_s5  ;;  %v3801_v23 = vmul.f32 %v3398_v63, %v738_v22 }
 0x7d0   :  { %746 = vrot.lane.b32.xlu0 %v3801_v23, %s3614_s10 }
 0x7d2   :  { %752 = vrot.lane.b32.xlu1 %v710_v14, %s3615_s11 }
 0x840   :  { %v743_v24 = vpop.permute.xlu1 %742 }
 0x841   :  { %3144 = vst.msk [vmem:[%s4418_s3 + $0x10] sm:$0xff] %vm397_vm1, %v743_v24 }
 0x842   :  { %v747_v25 = vpop.permute.xlu0 %746 }
 0x843   :  { %v749_v26 = vsel %vm397_vm1, %v743_v24, %v747_v25 }
 0x844   :  { %v753_v27 = vpop.permute.xlu1 %752  ;;  %750 = vst.msk [vmem:[#allocation2] sm:$0xff] %vm233_vm0, %v749_v26 }
 0x845   :  { %v755_v28 = vsel %vm397_vm1, %v753_v27, %v734_v17 }
 0x846   :  { %756 = vst.msk [vmem:[#allocation3] sm:$0xff] %vm233_vm0, %v755_v28 }
 0x84b   :  { %v764_v29 = vld [vmem:[#allocation2] sm:$0xff] }
 0x84c   :  { %v766_v30 = vpack.c.bf16 %v764_v29, %v764_v29 }
 0x84d   :  { %v765_v42 = vld [vmem:[#allocation3] sm:$0xff] }
 0x84e   :  { %3154 = vmatmul.mubr.msk.bf16.vlgmr.msra.gmra.mxu1 %vm233_vm0, %v766_v30 }
 0x84f   :  { %1179 = vmatpush1.bf16.msra.mxu1 %v3649_v1  ;;  %1202 = vmatprep.mubr.bf16.mxu1 %v3611_v2 }
 0x850   :  { %1180 = vmatprep.subr.bf16.mxu1 %v3657_v3 }
 0x853   :  { %1181 = vmatpush1.bf16.msra.mxu1 %v3666_v5 }
 0x854   :  { %1182 = vmatprep.subr.bf16.mxu1 %v3673_v6 }
 0x857   :  { %1183 = vmatpush1.bf16.msra.mxu1 %v3679_v7 }
 0x858   :  { %1184 = vmatprep.subr.bf16.mxu1 %v3684_v8 }
 0x85b   :  { %1185 = vmatpush1.bf16.msra.mxu1 %v3693_v9 }
 0x90e   :  { %v852_v32 = vpop.f32.mrf.mxu1 }
 0x90f   :  { %v861_v34 = vadd.f32 %v852_v32, %v76_v31 }
 0x910   :  { %v854_v36 = vpop.f32.mrf.mxu1 }
 0x911   :  { %3403 = vtanh.f32 %v861_v34  ;;  %v864_v37 = vadd.f32 %v3104_v33, %v854_v36  ;;  %v3155_v43 = vmul.f32 -1.442695, %v861_v34 }
 0x912   :  { %v856_v38 = vpop.f32.mrf.mxu1 }
 0x913   :  { %3405 = vtanh.f32 %v864_v37  ;;  %v3156_v44 = vmul.f32 -1.442695, %v864_v37 }
 0x914   :  { %v857_v39 = vpop.f32.mrf.mxu1  ;;  %3407 = vpow2.f32 %v3155_v43 }
 0x915   :  { %3409 = vpow2.f32 %v3156_v44 }
 0x91e   :  { %v3404_v40 = vpop.eup %3403 }
 0x91f   :  { %878 = vrot.lane.b32.xlu0 %v3404_v40, %s3614_s10 }
 0x920   :  { %v3406_v41 = vpop.eup %3405 }
 0x921   :  { %902 = vrot.lane.b32.xlu1 %v3406_v41, %s3614_s10  ;;  %v3408_v45 = vpop.eup %3407 }
 0x922   :  { %v3410_v46 = vpop.eup %3409  ;;  %v868_v48 = vadd.f32 1.0, %v3408_v45 }
 0x923   :  { %873 = vrot.lane.b32.xlu0 %v765_v42, %s3613_s5  ;;  %v896_v49 = vadd.f32 1.0, %v3410_v46 }
 0x924   :  { %3411 = vrcp.f32 %v868_v48 }
 0x925   :  { %3413 = vrcp.f32 %v896_v49 }
 0x931   :  { %v3412_v50 = vpop.eup %3411 }
 0x932   :  { %v3414_v0 = vpop.eup %3413 }
 0x933   :  { %v900_v59 = vmul.f32 %v3414_v0, %v765_v42 }
 0x991   :  { %v879_v51 = vpop.permute.xlu0 %878 }
 0x992   :  { %v881_v52 = vmul.f32 %v3412_v50, %v879_v51 }
 0x993   :  { %v903_v53 = vpop.permute.xlu1 %902 }
 0x994   :  { %883 = vrot.lane.b32.xlu1 %v881_v52, %s3613_s5  ;;  %v905_v54 = vmul.f32 %v3414_v0, %v903_v53 }
 0x995   :  { %v874_v55 = vpop.permute.xlu0 %873 }
 0x996   :  { %907 = vrot.lane.b32.xlu0 %v905_v54, %s3613_s5  ;;  %v876_v56 = vmul.f32 %v3412_v50, %v874_v55 }
 0xa06   :  { %v884_v57 = vpop.permute.xlu1 %883 }
 0xa07   :  { %v886_v58 = vadd.f32 %v884_v57, %v876_v56 }
 0xa08   :  { %v908_v60 = vpop.permute.xlu0 %907 }
 0xa09   :  { %3415 = vtanh.f32 %v886_v58  ;;  %v910_v61 = vadd.f32 %v908_v60, %v900_v59  ;;  %v3102_v60 = vld [vmem:[%s4416_s1 + $0xa8] sm:$0xff] }
 0xa0b   :  { %3417 = vtanh.f32 %v910_v61 }
 0xa16   :  { %v3416_v62 = vpop.eup %3415 }
 0xa17   :  { %889 = vrot.lane.b32.xlu1 %v3416_v62, %s3614_s10 }
 0xa18   :  { %v3418_v63 = vpop.eup %3417 }
 0xa19   :  { %913 = vrot.lane.b32.xlu0 %v3418_v63, %s3614_s10 }
 0xa89   :  { %v890_v4 = vpop.permute.xlu1 %889 }
 0xa8a   :  { %v892_v10 = vmul.f32 %v3412_v50, %v890_v4 }
 0xa8b   :  { %v914_v11 = vpop.permute.xlu0 %913 }
 0xa8c   :  { %918 = vrot.lane.b32.xlu1 %v892_v10, %s3613_s5  ;;  %v3837_v12 = vmul.f32 %v3414_v0, %v914_v11 }
 0xa8e   :  { %922 = vrot.lane.b32.xlu0 %v3837_v12, %s3614_s10 }
 0xa90   :  { %928 = vrot.lane.b32.xlu1 %v886_v58, %s3615_s11  ;;  %v80_v58 = vld [vmem:[%s4415_s0 + $0x50] sm:$0xff] }
 0xafe   :  { %v919_v13 = vpop.permute.xlu1 %918 }
 0xaff   :  { %3157 = vst.msk [vmem:[%s4418_s3 + $0x18] sm:$0xff] %vm397_vm1, %v919_v13 }
 0xb00   :  { %v923_v14 = vpop.permute.xlu0 %922 }
 0xb01   :  { %v925_v15 = vsel %vm397_vm1, %v919_v13, %v923_v14 }
 0xb02   :  { %v929_v16 = vpop.permute.xlu1 %928  ;;  %926 = vst.msk [vmem:[#allocation2] sm:$0xff] %vm233_vm0, %v925_v15 }
 0xb03   :  { %v931_v17 = vsel %vm397_vm1, %v929_v16, %v910_v61 }
 0xb04   :  { %932 = vst.msk [vmem:[#allocation3] sm:$0xff] %vm233_vm0, %v931_v17 }
 0xb09   :  { %v940_v18 = vld [vmem:[#allocation2] sm:$0xff] }
 0xb0a   :  { %v942_v19 = vpack.c.bf16 %v940_v18, %v940_v18 }
 0xb0c   :  { %3167 = vmatmul.mubr.msk.bf16.vlgmr.msra.gmra.mxu0 %vm233_vm0, %v942_v19 }
 0xb0d   :  { %1355 = vmatpush1.bf16.msra.mxu0 %v3649_v1  ;;  %1378 = vmatprep.mubr.bf16.mxu0 %v3611_v2  ;;  %v3103_v1 = vld [vmem:[%s4416_s1 + $0xb8] sm:$0xff] }
 0xb0e   :  { %1356 = vmatprep.subr.bf16.mxu0 %v3657_v3 }
 0xb11   :  { %1357 = vmatpush1.bf16.msra.mxu0 %v3666_v5 }
 0xb12   :  { %1358 = vmatprep.subr.bf16.mxu0 %v3673_v6 }
 0xb15   :  { %1359 = vmatpush1.bf16.msra.mxu0 %v3679_v7 }
 0xb16   :  { %1360 = vmatprep.subr.bf16.mxu0 %v3684_v8 }
 0xb19   :  { %1361 = vmatpush1.bf16.msra.mxu0 %v3693_v9  ;;  %v941_v9 = vld [vmem:[#allocation3] sm:$0xff] }
 0xbcc   :  { %v1028_v21 = vpop.f32.mrf.mxu0 }
 0xbcd   :  { %v1037_v3 = vadd.f32 %v1028_v21, %v78_v20 }
 0xbce   :  { %v1030_v22 = vpop.f32.mrf.mxu0 }
 0xbcf   :  { %3419 = vtanh.f32 %v1037_v3  ;;  %v1040_v5 = vadd.f32 %v3103_v1, %v1030_v22  ;;  %v3168_v25 = vmul.f32 -1.442695, %v1037_v3 }
 0xbd0   :  { %v1032_v6 = vpop.f32.mrf.mxu0 }
 0xbd1   :  { %3421 = vtanh.f32 %v1040_v5  ;;  %v3169_v26 = vmul.f32 -1.442695, %v1040_v5 }
 0xbd2   :  { %v1033_v7 = vpop.f32.mrf.mxu0  ;;  %3423 = vpow2.f32 %v3168_v25 }
 0xbd3   :  { %3425 = vpow2.f32 %v3169_v26 }
 0xbdc   :  { %v3420_v24 = vpop.eup %3419 }
 0xbdd   :  { %1054 = vrot.lane.b32.xlu0 %v3420_v24, %s3614_s10 }
 0xbde   :  { %v3422_v8 = vpop.eup %3421 }
 0xbdf   :  { %1078 = vrot.lane.b32.xlu1 %v3422_v8, %s3614_s10  ;;  %v3424_v27 = vpop.eup %3423 }
 0xbe0   :  { %v3426_v28 = vpop.eup %3425  ;;  %v1044_v29 = vadd.f32 1.0, %v3424_v27 }
 0xbe1   :  { %1049 = vrot.lane.b32.xlu0 %v941_v9, %s3613_s5  ;;  %v1072_v30 = vadd.f32 1.0, %v3426_v28 }
 0xbe2   :  { %3427 = vrcp.f32 %v1044_v29 }
 0xbe3   :  { %3429 = vrcp.f32 %v1072_v30 }
 0xbef   :  { %v3428_v31 = vpop.eup %3427 }
 0xbf0   :  { %v3430_v34 = vpop.eup %3429 }
 0xbf1   :  { %v1076_v42 = vmul.f32 %v3430_v34, %v941_v9 }
 0xc4f   :  { %v1055_v32 = vpop.permute.xlu0 %1054 }
 0xc50   :  { %v1057_v33 = vmul.f32 %v3428_v31, %v1055_v32 }
 0xc51   :  { %v1079_v36 = vpop.permute.xlu1 %1078 }
 0xc52   :  { %1059 = vrot.lane.b32.xlu1 %v1057_v33, %s3613_s5  ;;  %v1081_v37 = vmul.f32 %v3430_v34, %v1079_v36 }
 0xc53   :  { %v1050_v38 = vpop.permute.xlu0 %1049 }
 0xc54   :  { %1083 = vrot.lane.b32.xlu0 %v1081_v37, %s3613_s5  ;;  %v1052_v39 = vmul.f32 %v3428_v31, %v1050_v38 }
 0xcc4   :  { %v1060_v40 = vpop.permute.xlu1 %1059 }
 0xcc5   :  { %v1062_v41 = vadd.f32 %v1060_v40, %v1052_v39 }
 0xcc6   :  { %v1084_v43 = vpop.permute.xlu0 %1083 }
 0xcc7   :  { %3431 = vtanh.f32 %v1062_v41  ;;  %v1086_v44 = vadd.f32 %v1084_v43, %v1076_v42  ;;  %v82_v42 = vld [vmem:[%s4415_s0 + $0x60] sm:$0xff] }
 0xcc9   :  { %3433 = vtanh.f32 %v1086_v44 }
 0xcd4   :  { %v3432_v45 = vpop.eup %3431 }
 0xcd5   :  { %1065 = vrot.lane.b32.xlu1 %v3432_v45, %s3614_s10 }
 0xcd6   :  { %v3434_v46 = vpop.eup %3433 }
 0xcd7   :  { %1089 = vrot.lane.b32.xlu0 %v3434_v46, %s3614_s10 }
 0xd47   :  { %v1066_v48 = vpop.permute.xlu1 %1065 }
 0xd48   :  { %v1068_v49 = vmul.f32 %v3428_v31, %v1066_v48 }
 0xd49   :  { %v1090_v50 = vpop.permute.xlu0 %1089 }
 0xd4a   :  { %1094 = vrot.lane.b32.xlu1 %v1068_v49, %s3613_s5  ;;  %v3873_v51 = vmul.f32 %v3430_v34, %v1090_v50 }
 0xd4c   :  { %1098 = vrot.lane.b32.xlu0 %v3873_v51, %s3614_s10 }
 0xd4e   :  { %1104 = vrot.lane.b32.xlu1 %v1062_v41, %s3615_s11 }
 0xdbc   :  { %v1095_v52 = vpop.permute.xlu1 %1094 }
 0xdbd   :  { %3170 = vst.msk [vmem:[%s4418_s3 + $0x20] sm:$0xff] %vm397_vm1, %v1095_v52 }
 0xdbe   :  { %v1099_v0 = vpop.permute.xlu0 %1098 }
 0xdbf   :  { %v1101_v53 = vsel %vm397_vm1, %v1095_v52, %v1099_v0 }
 0xdc0   :  { %v1105_v54 = vpop.permute.xlu1 %1104  ;;  %1102 = vst.msk [vmem:[#allocation2] sm:$0xff] %vm233_vm0, %v1101_v53 }
 0xdc1   :  { %v1107_v55 = vsel %vm397_vm1, %v1105_v54, %v1086_v44  ;;  %v3101_v44 = vld [vmem:[%s4416_s1 + $0x98] sm:$0xff] }
 0xdc2   :  { %1108 = vst.msk [vmem:[#allocation3] sm:$0xff] %vm233_vm0, %v1107_v55 }
 0xdc7   :  { %v1116_v56 = vld [vmem:[#allocation2] sm:$0xff] }
 0xdc8   :  { %v1118_v57 = vpack.c.bf16 %v1116_v56, %v1116_v56 }
 0xdc9   :  { %v1117_v14 = vld [vmem:[#allocation3] sm:$0xff] }
 0xdca   :  { %3180 = vmatmul.mubr.msk.bf16.vlgmr.msra.gmra.mxu1 %vm233_vm0, %v1118_v57 }
 0xdcb   :  { %1554 = vmatprep.mubr.bf16.mxu1 %v3611_v2 }
 0xe8a   :  { %v1204_v59 = vpop.f32.mrf.mxu1 }
 0xe8b   :  { %v1213_v61 = vadd.f32 %v1204_v59, %v80_v58 }
 0xe8c   :  { %v1206_v62 = vpop.f32.mrf.mxu1 }
 0xe8d   :  { %3435 = vtanh.f32 %v1213_v61  ;;  %v1216_v63 = vadd.f32 %v3102_v60, %v1206_v62  ;;  %v3181_v15 = vmul.f32 -1.442695, %v1213_v61 }
 0xe8e   :  { %v1208_v4 = vpop.f32.mrf.mxu1 }
 0xe8f   :  { %3437 = vtanh.f32 %v1216_v63  ;;  %v3182_v16 = vmul.f32 -1.442695, %v1216_v63 }
 0xe90   :  { %v1209_v10 = vpop.f32.mrf.mxu1  ;;  %3439 = vpow2.f32 %v3181_v15 }
 0xe91   :  { %3441 = vpow2.f32 %v3182_v16 }
 0xe9a   :  { %v3436_v11 = vpop.eup %3435 }
 0xe9b   :  { %1230 = vrot.lane.b32.xlu0 %v3436_v11, %s3614_s10 }
 0xe9c   :  { %v3438_v13 = vpop.eup %3437 }
 0xe9d   :  { %1254 = vrot.lane.b32.xlu1 %v3438_v13, %s3614_s10  ;;  %v3440_v17 = vpop.eup %3439 }
 0xe9e   :  { %v3442_v18 = vpop.eup %3441  ;;  %v1220_v19 = vadd.f32 1.0, %v3440_v17 }
 0xe9f   :  { %1225 = vrot.lane.b32.xlu0 %v1117_v14, %s3613_s5  ;;  %v1248_v20 = vadd.f32 1.0, %v3442_v18 }
 0xea0   :  { %3443 = vrcp.f32 %v1220_v19  ;;  %v3931_v19 = vld [vmem:[%s4417_s2 + $0x30] ss:$8 sps:$4 sm:$0xff]  }
 0xea1   :  { %3445 = vrcp.f32 %v1248_v20  ;;  %v3936_v20 = vld [vmem:[%s4417_s2 + $0x34] ss:$8 sps:$4 sm:$0xff]  }
 0xea2   :  { %1530 = vmatprep.subr.bf16.mxu1 %v3936_v20  ;;  %1706 = vmatprep.subr.bf16.mxu0 %v3936_v20 }
 0xea3   :  { %1531 = vmatpush1.bf16.msra.mxu1 %v3931_v19 }
 0xead   :  { %v3444_v21 = vpop.eup %3443 }
 0xeae   :  { %v3446_v22 = vpop.eup %3445 }
 0xeaf   :  { %v1252_v25 = vmul.f32 %v3446_v22, %v1117_v14 }
 0xf0d   :  { %v1231_v1 = vpop.permute.xlu0 %1230 }
 0xf0e   :  { %v1233_v3 = vmul.f32 %v3444_v21, %v1231_v1 }
 0xf0f   :  { %v1255_v5 = vpop.permute.xlu1 %1254 }
 0xf10   :  { %1235 = vrot.lane.b32.xlu1 %v1233_v3, %s3613_s5  ;;  %v1257_v6 = vmul.f32 %v3446_v22, %v1255_v5  ;;  %v3947_v3 = vld [vmem:[%s4417_s2 + $0x20] ss:$8 sps:$4 sm:$0xff]   ;;  %v3961_v5 = vld [vmem:[%s4417_s2 + $0x14] ss:$8 sps:$4 sm:$0xff]  }
 0xf11   :  { %v1226_v7 = vpop.permute.xlu0 %1225 }
 0xf12   :  { %1259 = vrot.lane.b32.xlu0 %v1257_v6, %s3613_s5  ;;  %v1228_v24 = vmul.f32 %v3444_v21, %v1226_v7  ;;  %v3966_v6 = vld [vmem:[%s4417_s2 + $0x10] ss:$8 sps:$4 sm:$0xff]   ;;  %v3971_v7 = vld [vmem:[%s4417_s2 + $0x4] ss:$8 sps:$4 sm:$0xff]  }
 0xf82   :  { %v1236_v8 = vpop.permute.xlu1 %1235 }
 0xf83   :  { %v1238_v9 = vadd.f32 %v1236_v8, %v1228_v24  ;;  %v3979_v24 = vld [vmem:[%s4417_s2] ss:$8 sps:$4 sm:$0xff]  }
 0xf84   :  { %v1260_v26 = vpop.permute.xlu0 %1259 }
 0xf85   :  { %3447 = vtanh.f32 %v1238_v9  ;;  %v1262_v27 = vadd.f32 %v1260_v26, %v1252_v25 }
 0xf87   :  { %3449 = vtanh.f32 %v1262_v27 }
 0xf92   :  { %v3448_v28 = vpop.eup %3447 }
 0xf93   :  { %1241 = vrot.lane.b32.xlu1 %v3448_v28, %s3614_s10 }
 0xf94   :  { %v3450_v29 = vpop.eup %3449 }
 0xf95   :  { %1265 = vrot.lane.b32.xlu0 %v3450_v29, %s3614_s10 }
0x1005   :  { %v1242_v30 = vpop.permute.xlu1 %1241 }
0x1006   :  { %v1244_v31 = vmul.f32 %v3444_v21, %v1242_v30 }
0x1007   :  { %v1266_v32 = vpop.permute.xlu0 %1265 }
0x1008   :  { %1270 = vrot.lane.b32.xlu1 %v1244_v31, %s3613_s5  ;;  %v3902_v33 = vmul.f32 %v3446_v22, %v1266_v32  ;;  %v3952_v22 = vld [vmem:[%s4417_s2 + $0x24] ss:$8 sps:$4 sm:$0xff]  }
0x1009   :  { %1532 = vmatprep.subr.bf16.mxu1 %v3952_v22 }
0x100a   :  { %1274 = vrot.lane.b32.xlu0 %v3902_v33, %s3614_s10  ;;  %1533 = vmatpush1.bf16.msra.mxu1 %v3947_v3 }
0x100b   :  { %1534 = vmatprep.subr.bf16.mxu1 %v3961_v5 }
0x100c   :  { %1280 = vrot.lane.b32.xlu1 %v1238_v9, %s3615_s11 }
0x100e   :  { %1535 = vmatpush1.bf16.msra.mxu1 %v3966_v6 }
0x100f   :  { %1536 = vmatprep.subr.bf16.mxu1 %v3971_v7 }
0x1012   :  { %1537 = vmatpush1.bf16.msra.mxu1 %v3979_v24 }
0x1013   :  { %1882 = vmatprep.subr.bf16.mxu1 %v3936_v20 }
0x107a   :  { %v1271_v34 = vpop.permute.xlu1 %1270 }
0x107b   :  { %3183 = vst.msk [vmem:[%s4418_s3 + $0x28] sm:$0xff] %vm397_vm1, %v1271_v34 }
0x107c   :  { %v1275_v36 = vpop.permute.xlu0 %1274 }
0x107d   :  { %v1277_v37 = vsel %vm397_vm1, %v1271_v34, %v1275_v36  ;;  %v84_v36 = vld [vmem:[%s4415_s0 + $0x70] sm:$0xff] }
0x107e   :  { %v1281_v38 = vpop.permute.xlu1 %1280  ;;  %1278 = vst.msk [vmem:[#allocation2] sm:$0xff] %vm233_vm0, %v1277_v37 }
0x107f   :  { %v1283_v39 = vsel %vm397_vm1, %v1281_v38, %v1262_v27  ;;  %v3100_v38 = vld [vmem:[%s4416_s1 + $0x88] sm:$0xff] }
0x1080   :  { %1284 = vst.msk [vmem:[#allocation3] sm:$0xff] %vm233_vm0, %v1283_v39 }
0x1085   :  { %v1292_v40 = vld [vmem:[#allocation2] sm:$0xff] }
0x1086   :  { %v1294_v41 = vpack.c.bf16 %v1292_v40, %v1292_v40 }
0x1087   :  { %v1293_v53 = vld [vmem:[#allocation3] sm:$0xff] }
0x1088   :  { %3193 = vmatmul.mubr.msk.bf16.vlgmr.msra.gmra.mxu0 %vm233_vm0, %v1294_v41 }
0x1089   :  { %1730 = vmatprep.mubr.bf16.mxu0 %v3611_v2  ;;  %1707 = vmatpush1.bf16.msra.mxu0 %v3931_v19 }
0x108a   :  { %1708 = vmatprep.subr.bf16.mxu0 %v3952_v22 }
0x108d   :  { %1709 = vmatpush1.bf16.msra.mxu0 %v3947_v3 }
0x108e   :  { %1710 = vmatprep.subr.bf16.mxu0 %v3961_v5 }
0x1091   :  { %1711 = vmatpush1.bf16.msra.mxu0 %v3966_v6 }
0x1092   :  { %1712 = vmatprep.subr.bf16.mxu0 %v3971_v7 }
0x1095   :  { %1713 = vmatpush1.bf16.msra.mxu0 %v3979_v24 }
0x1096   :  { %2058 = vmatprep.subr.bf16.mxu0 %v3936_v20 }
0x1148   :  { %v1380_v43 = vpop.f32.mrf.mxu0 }
0x1149   :  { %v1389_v45 = vadd.f32 %v1380_v43, %v82_v42 }
0x114a   :  { %v1382_v46 = vpop.f32.mrf.mxu0 }
0x114b   :  { %3451 = vtanh.f32 %v1389_v45  ;;  %v1392_v48 = vadd.f32 %v3101_v44, %v1382_v46  ;;  %v3194_v54 = vmul.f32 -1.442695, %v1389_v45 }
0x114c   :  { %v1384_v49 = vpop.f32.mrf.mxu0 }
0x114d   :  { %3453 = vtanh.f32 %v1392_v48  ;;  %v3195_v55 = vmul.f32 -1.442695, %v1392_v48 }
0x114e   :  { %v1385_v50 = vpop.f32.mrf.mxu0  ;;  %3455 = vpow2.f32 %v3194_v54 }
0x114f   :  { %3457 = vpow2.f32 %v3195_v55 }
0x1158   :  { %v3452_v52 = vpop.eup %3451 }
0x1159   :  { %1406 = vrot.lane.b32.xlu0 %v3452_v52, %s3614_s10 }
0x115a   :  { %v3454_v0 = vpop.eup %3453 }
0x115b   :  { %1430 = vrot.lane.b32.xlu1 %v3454_v0, %s3614_s10  ;;  %v3456_v56 = vpop.eup %3455 }
0x115c   :  { %v3458_v57 = vpop.eup %3457  ;;  %v1396_v58 = vadd.f32 1.0, %v3456_v56 }
0x115d   :  { %1401 = vrot.lane.b32.xlu0 %v1293_v53, %s3613_s5  ;;  %v1424_v59 = vadd.f32 1.0, %v3458_v57 }
0x115e   :  { %3459 = vrcp.f32 %v1396_v58 }
0x115f   :  { %3461 = vrcp.f32 %v1424_v59 }
0x116b   :  { %v3460_v60 = vpop.eup %3459 }
0x116c   :  { %v3462_v63 = vpop.eup %3461 }
0x116d   :  { %v1428_v16 = vmul.f32 %v3462_v63, %v1293_v53 }
0x11cb   :  { %v1407_v61 = vpop.permute.xlu0 %1406 }
0x11cc   :  { %v1409_v62 = vmul.f32 %v3460_v60, %v1407_v61 }
0x11cd   :  { %v1431_v4 = vpop.permute.xlu1 %1430 }
0x11ce   :  { %1411 = vrot.lane.b32.xlu1 %v1409_v62, %s3613_s5  ;;  %v1433_v10 = vmul.f32 %v3462_v63, %v1431_v4 }
0x11cf   :  { %v1402_v11 = vpop.permute.xlu0 %1401 }
0x11d0   :  { %1435 = vrot.lane.b32.xlu0 %v1433_v10, %s3613_s5  ;;  %v1404_v13 = vmul.f32 %v3460_v60, %v1402_v11 }
0x1240   :  { %v1412_v14 = vpop.permute.xlu1 %1411 }
0x1241   :  { %v1414_v15 = vadd.f32 %v1412_v14, %v1404_v13 }
0x1242   :  { %v1436_v17 = vpop.permute.xlu0 %1435 }
0x1243   :  { %3463 = vtanh.f32 %v1414_v15  ;;  %v1438_v18 = vadd.f32 %v1436_v17, %v1428_v16 }
0x1245   :  { %3465 = vtanh.f32 %v1438_v18 }
0x1250   :  { %v3464_v21 = vpop.eup %3463 }
0x1251   :  { %1417 = vrot.lane.b32.xlu1 %v3464_v21, %s3614_s10 }
0x1252   :  { %v3466_v1 = vpop.eup %3465 }
0x1253   :  { %1441 = vrot.lane.b32.xlu0 %v3466_v1, %s3614_s10 }
0x12c3   :  { %v1418_v8 = vpop.permute.xlu1 %1417 }
0x12c4   :  { %v1420_v9 = vmul.f32 %v3460_v60, %v1418_v8 }
0x12c5   :  { %v1442_v25 = vpop.permute.xlu0 %1441 }
0x12c6   :  { %1446 = vrot.lane.b32.xlu1 %v1420_v9, %s3613_s5  ;;  %v3989_v26 = vmul.f32 %v3462_v63, %v1442_v25 }
0x12c8   :  { %1450 = vrot.lane.b32.xlu0 %v3989_v26, %s3614_s10 }
0x12ca   :  { %1456 = vrot.lane.b32.xlu1 %v1414_v15, %s3615_s11 }
0x1338   :  { %v1447_v27 = vpop.permute.xlu1 %1446 }
0x1339   :  { %3196 = vst.msk [vmem:[%s4418_s3 + $0x30] sm:$0xff] %vm397_vm1, %v1447_v27 }
0x133a   :  { %v1451_v28 = vpop.permute.xlu0 %1450 }
0x133b   :  { %v1453_v29 = vsel %vm397_vm1, %v1447_v27, %v1451_v28 }
0x133c   :  { %v1457_v30 = vpop.permute.xlu1 %1456  ;;  %1454 = vst.msk [vmem:[#allocation2] sm:$0xff] %vm233_vm0, %v1453_v29  ;;  %v86_v29 = vld [vmem:[%s4415_s0 + $0x80] sm:$0xff] }
0x133d   :  { %v1459_v31 = vsel %vm397_vm1, %v1457_v30, %v1438_v18 }
0x133e   :  { %1460 = vst.msk [vmem:[#allocation3] sm:$0xff] %vm233_vm0, %v1459_v31  ;;  %v3099_v31 = vld [vmem:[%s4416_s1 + $0x78] sm:$0xff] }
0x1343   :  { %v1468_v32 = vld [vmem:[#allocation2] sm:$0xff] }
0x1344   :  { %v1470_v34 = vpack.c.bf16 %v1468_v32, %v1468_v32 }
0x1345   :  { %v1469_v46 = vld [vmem:[#allocation3] sm:$0xff] }
0x1346   :  { %3206 = vmatmul.mubr.msk.bf16.vlgmr.msra.gmra.mxu1 %vm233_vm0, %v1470_v34 }
0x1347   :  { %1883 = vmatpush1.bf16.msra.mxu1 %v3931_v19  ;;  %1906 = vmatprep.mubr.bf16.mxu1 %v3611_v2 }
0x1348   :  { %1884 = vmatprep.subr.bf16.mxu1 %v3952_v22 }
0x134b   :  { %1885 = vmatpush1.bf16.msra.mxu1 %v3947_v3 }
0x134c   :  { %1886 = vmatprep.subr.bf16.mxu1 %v3961_v5 }
0x134f   :  { %1887 = vmatpush1.bf16.msra.mxu1 %v3966_v6 }
0x1350   :  { %1888 = vmatprep.subr.bf16.mxu1 %v3971_v7 }
0x1353   :  { %1889 = vmatpush1.bf16.msra.mxu1 %v3979_v24 }
0x1354   :  { %2234 = vmatprep.subr.bf16.mxu1 %v3936_v20 }
0x1406   :  { %v1556_v37 = vpop.f32.mrf.mxu1 }
0x1407   :  { %v1565_v39 = vadd.f32 %v1556_v37, %v84_v36 }
0x1408   :  { %v1558_v40 = vpop.f32.mrf.mxu1 }
0x1409   :  { %3467 = vtanh.f32 %v1565_v39  ;;  %v1568_v41 = vadd.f32 %v3100_v38, %v1558_v40  ;;  %v3207_v48 = vmul.f32 -1.442695, %v1565_v39 }
0x140a   :  { %v1560_v42 = vpop.f32.mrf.mxu1 }
0x140b   :  { %3469 = vtanh.f32 %v1568_v41  ;;  %v3208_v49 = vmul.f32 -1.442695, %v1568_v41 }
0x140c   :  { %v1561_v43 = vpop.f32.mrf.mxu1  ;;  %3471 = vpow2.f32 %v3207_v48 }
0x140d   :  { %3473 = vpow2.f32 %v3208_v49 }
0x1416   :  { %v3468_v44 = vpop.eup %3467 }
0x1417   :  { %1582 = vrot.lane.b32.xlu0 %v3468_v44, %s3614_s10 }
0x1418   :  { %v3470_v45 = vpop.eup %3469 }
0x1419   :  { %1606 = vrot.lane.b32.xlu1 %v3470_v45, %s3614_s10  ;;  %v3472_v50 = vpop.eup %3471 }
0x141a   :  { %v3474_v52 = vpop.eup %3473  ;;  %v1572_v0 = vadd.f32 1.0, %v3472_v50 }
0x141b   :  { %1577 = vrot.lane.b32.xlu0 %v1469_v46, %s3613_s5  ;;  %v1600_v53 = vadd.f32 1.0, %v3474_v52 }
0x141c   :  { %3475 = vrcp.f32 %v1572_v0 }
0x141d   :  { %3477 = vrcp.f32 %v1600_v53 }
0x1429   :  { %v3476_v54 = vpop.eup %3475 }
0x142a   :  { %v3478_v57 = vpop.eup %3477 }
0x142b   :  { %v1604_v4 = vmul.f32 %v3478_v57, %v1469_v46 }
0x1489   :  { %v1583_v55 = vpop.permute.xlu0 %1582 }
0x148a   :  { %v1585_v56 = vmul.f32 %v3476_v54, %v1583_v55 }
0x148b   :  { %v1607_v58 = vpop.permute.xlu1 %1606 }
0x148c   :  { %1587 = vrot.lane.b32.xlu1 %v1585_v56, %s3613_s5  ;;  %v1609_v59 = vmul.f32 %v3478_v57, %v1607_v58 }
0x148d   :  { %v1578_v60 = vpop.permute.xlu0 %1577 }
0x148e   :  { %1611 = vrot.lane.b32.xlu0 %v1609_v59, %s3613_s5  ;;  %v1580_v61 = vmul.f32 %v3476_v54, %v1578_v60 }
0x14fe   :  { %v1588_v62 = vpop.permute.xlu1 %1587 }
0x14ff   :  { %v1590_v63 = vadd.f32 %v1588_v62, %v1580_v61 }
0x1500   :  { %v1612_v10 = vpop.permute.xlu0 %1611 }
0x1501   :  { %3479 = vtanh.f32 %v1590_v63  ;;  %v1614_v11 = vadd.f32 %v1612_v10, %v1604_v4 }
0x1503   :  { %3481 = vtanh.f32 %v1614_v11 }
0x150e   :  { %v3480_v13 = vpop.eup %3479 }
0x150f   :  { %1593 = vrot.lane.b32.xlu1 %v3480_v13, %s3614_s10 }
0x1510   :  { %v3482_v14 = vpop.eup %3481 }
0x1511   :  { %1617 = vrot.lane.b32.xlu0 %v3482_v14, %s3614_s10 }
0x1581   :  { %v1594_v15 = vpop.permute.xlu1 %1593 }
0x1582   :  { %v1596_v16 = vmul.f32 %v3476_v54, %v1594_v15 }
0x1583   :  { %v1618_v17 = vpop.permute.xlu0 %1617 }
0x1584   :  { %1622 = vrot.lane.b32.xlu1 %v1596_v16, %s3613_s5  ;;  %v4026_v18 = vmul.f32 %v3478_v57, %v1618_v17 }
0x1586   :  { %1626 = vrot.lane.b32.xlu0 %v4026_v18, %s3614_s10 }
0x1588   :  { %1632 = vrot.lane.b32.xlu1 %v1590_v63, %s3615_s11 }
0x15f6   :  { %v1623_v21 = vpop.permute.xlu1 %1622 }
0x15f7   :  { %3209 = vst.msk [vmem:[%s4418_s3 + $0x38] sm:$0xff] %vm397_vm1, %v1623_v21 }
0x15f8   :  { %v1627_v1 = vpop.permute.xlu0 %1626 }
0x15f9   :  { %v1629_v8 = vsel %vm397_vm1, %v1623_v21, %v1627_v1 }
0x15fa   :  { %v1633_v9 = vpop.permute.xlu1 %1632  ;;  %1630 = vst.msk [vmem:[#allocation2] sm:$0xff] %vm233_vm0, %v1629_v8 }
0x15fb   :  { %v1635_v25 = vsel %vm397_vm1, %v1633_v9, %v1614_v11  ;;  %v88_v9 = vld [vmem:[%s4415_s0 + $0x90] sm:$0xff] }
0x15fc   :  { %1636 = vst.msk [vmem:[#allocation3] sm:$0xff] %vm233_vm0, %v1635_v25 }
0x1601   :  { %v1644_v27 = vld [vmem:[#allocation2] sm:$0xff] }
0x1602   :  { %v1646_v28 = vpack.c.bf16 %v1644_v27, %v1644_v27  ;;  %v3098_v27 = vld [vmem:[%s4416_s1 + $0x68] sm:$0xff] }
0x1603   :  { %v1645_v41 = vld [vmem:[#allocation3] sm:$0xff] }
0x1604   :  { %3219 = vmatmul.mubr.msk.bf16.vlgmr.msra.gmra.mxu0 %vm233_vm0, %v1646_v28 }
0x1605   :  { %2059 = vmatpush1.bf16.msra.mxu0 %v3931_v19  ;;  %2082 = vmatprep.mubr.bf16.mxu0 %v3611_v2 }
0x1606   :  { %2060 = vmatprep.subr.bf16.mxu0 %v3952_v22 }
0x1609   :  { %2061 = vmatpush1.bf16.msra.mxu0 %v3947_v3 }
0x160a   :  { %2062 = vmatprep.subr.bf16.mxu0 %v3961_v5 }
0x160d   :  { %2063 = vmatpush1.bf16.msra.mxu0 %v3966_v6 }
0x160e   :  { %2064 = vmatprep.subr.bf16.mxu0 %v3971_v7 }
0x1611   :  { %2065 = vmatpush1.bf16.msra.mxu0 %v3979_v24 }
0x1612   :  { %2410 = vmatprep.subr.bf16.mxu0 %v3936_v20 }
0x16c4   :  { %v1732_v30 = vpop.f32.mrf.mxu0 }
0x16c5   :  { %v1741_v32 = vadd.f32 %v1732_v30, %v86_v29 }
0x16c6   :  { %v1734_v34 = vpop.f32.mrf.mxu0 }
0x16c7   :  { %3483 = vtanh.f32 %v1741_v32  ;;  %v1744_v36 = vadd.f32 %v3099_v31, %v1734_v34  ;;  %v3220_v42 = vmul.f32 -1.442695, %v1741_v32 }
0x16c8   :  { %v1736_v37 = vpop.f32.mrf.mxu0 }
0x16c9   :  { %3485 = vtanh.f32 %v1744_v36  ;;  %v3221_v43 = vmul.f32 -1.442695, %v1744_v36 }
0x16ca   :  { %v1737_v38 = vpop.f32.mrf.mxu0  ;;  %3487 = vpow2.f32 %v3220_v42 }
0x16cb   :  { %3489 = vpow2.f32 %v3221_v43 }
0x16d4   :  { %v3484_v39 = vpop.eup %3483 }
0x16d5   :  { %1758 = vrot.lane.b32.xlu0 %v3484_v39, %s3614_s10 }
0x16d6   :  { %v3486_v40 = vpop.eup %3485 }
0x16d7   :  { %1782 = vrot.lane.b32.xlu1 %v3486_v40, %s3614_s10  ;;  %v3488_v44 = vpop.eup %3487 }
0x16d8   :  { %v3490_v45 = vpop.eup %3489  ;;  %v1748_v46 = vadd.f32 1.0, %v3488_v44 }
0x16d9   :  { %1753 = vrot.lane.b32.xlu0 %v1645_v41, %s3613_s5  ;;  %v1776_v48 = vadd.f32 1.0, %v3490_v45 }
0x16da   :  { %3491 = vrcp.f32 %v1748_v46 }
0x16db   :  { %3493 = vrcp.f32 %v1776_v48 }
0x16e7   :  { %v3492_v49 = vpop.eup %3491 }
0x16e8   :  { %v3494_v0 = vpop.eup %3493 }
0x16e9   :  { %v1780_v59 = vmul.f32 %v3494_v0, %v1645_v41 }
0x1747   :  { %v1759_v50 = vpop.permute.xlu0 %1758 }
0x1748   :  { %v1761_v52 = vmul.f32 %v3492_v49, %v1759_v50 }
0x1749   :  { %v1783_v53 = vpop.permute.xlu1 %1782 }
0x174a   :  { %1763 = vrot.lane.b32.xlu1 %v1761_v52, %s3613_s5  ;;  %v1785_v54 = vmul.f32 %v3494_v0, %v1783_v53 }
0x174b   :  { %v1754_v55 = vpop.permute.xlu0 %1753 }
0x174c   :  { %1787 = vrot.lane.b32.xlu0 %v1785_v54, %s3613_s5  ;;  %v1756_v56 = vmul.f32 %v3492_v49, %v1754_v55 }
0x17bc   :  { %v1764_v57 = vpop.permute.xlu1 %1763 }
0x17bd   :  { %v1766_v58 = vadd.f32 %v1764_v57, %v1756_v56 }
0x17be   :  { %v1788_v60 = vpop.permute.xlu0 %1787 }
0x17bf   :  { %3495 = vtanh.f32 %v1766_v58  ;;  %v1790_v61 = vadd.f32 %v1788_v60, %v1780_v59 }
0x17c1   :  { %3497 = vtanh.f32 %v1790_v61 }
0x17cc   :  { %v3496_v62 = vpop.eup %3495 }
0x17cd   :  { %1769 = vrot.lane.b32.xlu1 %v3496_v62, %s3614_s10 }
0x17ce   :  { %v3498_v63 = vpop.eup %3497 }
0x17cf   :  { %1793 = vrot.lane.b32.xlu0 %v3498_v63, %s3614_s10 }
0x183f   :  { %v1770_v4 = vpop.permute.xlu1 %1769 }
0x1840   :  { %v1772_v10 = vmul.f32 %v3492_v49, %v1770_v4 }
0x1841   :  { %v1794_v11 = vpop.permute.xlu0 %1793 }
0x1842   :  { %1798 = vrot.lane.b32.xlu1 %v1772_v10, %s3613_s5  ;;  %v4063_v13 = vmul.f32 %v3494_v0, %v1794_v11 }
0x1844   :  { %1802 = vrot.lane.b32.xlu0 %v4063_v13, %s3614_s10 }
0x1846   :  { %1808 = vrot.lane.b32.xlu1 %v1766_v58, %s3615_s11 }
0x18b4   :  { %v1799_v14 = vpop.permute.xlu1 %1798 }
0x18b5   :  { %3222 = vst.msk [vmem:[%s4418_s3 + $0x40] sm:$0xff] %vm397_vm1, %v1799_v14 }
0x18b6   :  { %v1803_v15 = vpop.permute.xlu0 %1802 }
0x18b7   :  { %v1805_v16 = vsel %vm397_vm1, %v1799_v14, %v1803_v15 }
0x18b8   :  { %v1809_v17 = vpop.permute.xlu1 %1808  ;;  %1806 = vst.msk [vmem:[#allocation2] sm:$0xff] %vm233_vm0, %v1805_v16 }
0x18b9   :  { %v1811_v21 = vsel %vm397_vm1, %v1809_v17, %v1790_v61  ;;  %v90_v17 = vld [vmem:[%s4415_s0 + $0xa0] sm:$0xff] }
0x18ba   :  { %1812 = vst.msk [vmem:[#allocation3] sm:$0xff] %vm233_vm0, %v1811_v21 }
0x18bf   :  { %v1820_v1 = vld [vmem:[#allocation2] sm:$0xff] }
0x18c0   :  { %v1822_v8 = vpack.c.bf16 %v1820_v1, %v1820_v1  ;;  %v3097_v1 = vld [vmem:[%s4416_s1 + $0x58] sm:$0xff] }
0x18c1   :  { %v1821_v36 = vld [vmem:[#allocation3] sm:$0xff] }
0x18c2   :  { %3232 = vmatmul.mubr.msk.bf16.vlgmr.msra.gmra.mxu1 %vm233_vm0, %v1822_v8 }
0x18c3   :  { %2235 = vmatpush1.bf16.msra.mxu1 %v3931_v19  ;;  %2258 = vmatprep.mubr.bf16.mxu1 %v3611_v2 }
0x18c4   :  { %2236 = vmatprep.subr.bf16.mxu1 %v3952_v22 }
0x18c7   :  { %2237 = vmatpush1.bf16.msra.mxu1 %v3947_v3 }
0x18c8   :  { %2238 = vmatprep.subr.bf16.mxu1 %v3961_v5 }
0x18cb   :  { %2239 = vmatpush1.bf16.msra.mxu1 %v3966_v6 }
0x18cc   :  { %2240 = vmatprep.subr.bf16.mxu1 %v3971_v7 }
0x18cf   :  { %2241 = vmatpush1.bf16.msra.mxu1 %v3979_v24 }
0x18d0   :  { %2586 = vmatprep.subr.bf16.mxu1 %v3936_v20 }
0x1982   :  { %v1908_v25 = vpop.f32.mrf.mxu1 }
0x1983   :  { %v1917_v28 = vadd.f32 %v1908_v25, %v88_v9 }
0x1984   :  { %v1910_v29 = vpop.f32.mrf.mxu1 }
0x1985   :  { %3499 = vtanh.f32 %v1917_v28  ;;  %v1920_v30 = vadd.f32 %v3098_v27, %v1910_v29  ;;  %v3233_v37 = vmul.f32 -1.442695, %v1917_v28 }
0x1986   :  { %v1912_v31 = vpop.f32.mrf.mxu1 }
0x1987   :  { %3501 = vtanh.f32 %v1920_v30  ;;  %v3234_v38 = vmul.f32 -1.442695, %v1920_v30 }
0x1988   :  { %v1913_v32 = vpop.f32.mrf.mxu1  ;;  %3503 = vpow2.f32 %v3233_v37 }
0x1989   :  { %3505 = vpow2.f32 %v3234_v38 }
0x1992   :  { %v3500_v34 = vpop.eup %3499 }
0x1993   :  { %1934 = vrot.lane.b32.xlu0 %v3500_v34, %s3614_s10 }
0x1994   :  { %v3502_v20 = vpop.eup %3501 }
0x1995   :  { %1958 = vrot.lane.b32.xlu1 %v3502_v20, %s3614_s10  ;;  %v3504_v39 = vpop.eup %3503 }
0x1996   :  { %v3506_v40 = vpop.eup %3505  ;;  %v1924_v41 = vadd.f32 1.0, %v3504_v39 }
0x1997   :  { %1929 = vrot.lane.b32.xlu0 %v1821_v36, %s3613_s5  ;;  %v1952_v42 = vadd.f32 1.0, %v3506_v40 }
0x1998   :  { %3507 = vrcp.f32 %v1924_v41 }
0x1999   :  { %3509 = vrcp.f32 %v1952_v42 }
0x19a5   :  { %v3508_v43 = vpop.eup %3507 }
0x19a6   :  { %v3510_v46 = vpop.eup %3509 }
0x19a7   :  { %v1956_v54 = vmul.f32 %v3510_v46, %v1821_v36 }
0x1a05   :  { %v1935_v44 = vpop.permute.xlu0 %1934 }
0x1a06   :  { %v1937_v45 = vmul.f32 %v3508_v43, %v1935_v44 }
0x1a07   :  { %v1959_v48 = vpop.permute.xlu1 %1958 }
0x1a08   :  { %1939 = vrot.lane.b32.xlu1 %v1937_v45, %s3613_s5  ;;  %v1961_v49 = vmul.f32 %v3510_v46, %v1959_v48 }
0x1a09   :  { %v1930_v50 = vpop.permute.xlu0 %1929 }
0x1a0a   :  { %1963 = vrot.lane.b32.xlu0 %v1961_v49, %s3613_s5  ;;  %v1932_v52 = vmul.f32 %v3508_v43, %v1930_v50 }
0x1a7a   :  { %v1940_v0 = vpop.permute.xlu1 %1939 }
0x1a7b   :  { %v1942_v53 = vadd.f32 %v1940_v0, %v1932_v52 }
0x1a7c   :  { %v1964_v55 = vpop.permute.xlu0 %1963 }
0x1a7d   :  { %3511 = vtanh.f32 %v1942_v53  ;;  %v1966_v56 = vadd.f32 %v1964_v55, %v1956_v54 }
0x1a7f   :  { %3513 = vtanh.f32 %v1966_v56 }
0x1a8a   :  { %v3512_v57 = vpop.eup %3511 }
0x1a8b   :  { %1945 = vrot.lane.b32.xlu1 %v3512_v57, %s3614_s10 }
0x1a8c   :  { %v3514_v58 = vpop.eup %3513 }
0x1a8d   :  { %1969 = vrot.lane.b32.xlu0 %v3514_v58, %s3614_s10 }
0x1afd   :  { %v1946_v59 = vpop.permute.xlu1 %1945 }
0x1afe   :  { %v1948_v60 = vmul.f32 %v3508_v43, %v1946_v59 }
0x1aff   :  { %v1970_v61 = vpop.permute.xlu0 %1969 }
0x1b00   :  { %1974 = vrot.lane.b32.xlu1 %v1948_v60, %s3613_s5  ;;  %v4100_v62 = vmul.f32 %v3510_v46, %v1970_v61 }
0x1b02   :  { %1978 = vrot.lane.b32.xlu0 %v4100_v62, %s3614_s10 }
0x1b04   :  { %1984 = vrot.lane.b32.xlu1 %v1942_v53, %s3615_s11 }
0x1b72   :  { %v1975_v63 = vpop.permute.xlu1 %1974 }
0x1b73   :  { %3235 = vst.msk [vmem:[%s4418_s3 + $0x48] sm:$0xff] %vm397_vm1, %v1975_v63 }
0x1b74   :  { %v1979_v4 = vpop.permute.xlu0 %1978 }
0x1b75   :  { %v1981_v10 = vsel %vm397_vm1, %v1975_v63, %v1979_v4 }
0x1b76   :  { %v1985_v11 = vpop.permute.xlu1 %1984  ;;  %1982 = vst.msk [vmem:[#allocation2] sm:$0xff] %vm233_vm0, %v1981_v10 }
0x1b77   :  { %v1987_v14 = vsel %vm397_vm1, %v1985_v11, %v1966_v56 }
0x1b78   :  { %1988 = vst.msk [vmem:[#allocation3] sm:$0xff] %vm233_vm0, %v1987_v14  ;;  %v92_v14 = vld [vmem:[%s4415_s0 + $0xb0] sm:$0xff] }
0x1b7d   :  { %v1996_v15 = vld [vmem:[#allocation2] sm:$0xff] }
0x1b7e   :  { %v1998_v16 = vpack.c.bf16 %v1996_v15, %v1996_v15 }
0x1b7f   :  { %v1997_v31 = vld [vmem:[#allocation3] sm:$0xff] }
0x1b80   :  { %3245 = vmatmul.mubr.msk.bf16.vlgmr.msra.gmra.mxu0 %vm233_vm0, %v1998_v16 }
0x1b81   :  { %2411 = vmatpush1.bf16.msra.mxu0 %v3931_v19  ;;  %2434 = vmatprep.mubr.bf16.mxu0 %v3611_v2 }
0x1b82   :  { %2412 = vmatprep.subr.bf16.mxu0 %v3952_v22 }
0x1b85   :  { %2413 = vmatpush1.bf16.msra.mxu0 %v3947_v3 }
0x1b86   :  { %2414 = vmatprep.subr.bf16.mxu0 %v3961_v5 }
0x1b89   :  { %2415 = vmatpush1.bf16.msra.mxu0 %v3966_v6 }
0x1b8a   :  { %2416 = vmatprep.subr.bf16.mxu0 %v3971_v7 }
0x1b8d   :  { %2417 = vmatpush1.bf16.msra.mxu0 %v3979_v24 }
0x1c40   :  { %v2084_v21 = vpop.f32.mrf.mxu0 }
0x1c41   :  { %v2093_v8 = vadd.f32 %v2084_v21, %v90_v17 }
0x1c42   :  { %v2086_v9 = vpop.f32.mrf.mxu0 }
0x1c43   :  { %3515 = vtanh.f32 %v2093_v8  ;;  %v2096_v25 = vadd.f32 %v3097_v1, %v2086_v9  ;;  %v3246_v32 = vmul.f32 -1.442695, %v2093_v8 }
0x1c44   :  { %v2088_v27 = vpop.f32.mrf.mxu0 }
0x1c45   :  { %3517 = vtanh.f32 %v2096_v25  ;;  %v3247_v34 = vmul.f32 -1.442695, %v2096_v25 }
0x1c46   :  { %v2089_v28 = vpop.f32.mrf.mxu0  ;;  %3519 = vpow2.f32 %v3246_v32 }
0x1c47   :  { %3521 = vpow2.f32 %v3247_v34 }
0x1c50   :  { %v3516_v29 = vpop.eup %3515 }
0x1c51   :  { %2110 = vrot.lane.b32.xlu0 %v3516_v29, %s3614_s10 }
0x1c52   :  { %v3518_v30 = vpop.eup %3517 }
0x1c53   :  { %2134 = vrot.lane.b32.xlu1 %v3518_v30, %s3614_s10  ;;  %v3520_v20 = vpop.eup %3519 }
0x1c54   :  { %v3522_v36 = vpop.eup %3521  ;;  %v2100_v37 = vadd.f32 1.0, %v3520_v20 }
0x1c55   :  { %2105 = vrot.lane.b32.xlu0 %v1997_v31, %s3613_s5  ;;  %v2128_v38 = vadd.f32 1.0, %v3522_v36 }
0x1c56   :  { %3523 = vrcp.f32 %v2100_v37 }
0x1c57   :  { %3525 = vrcp.f32 %v2128_v38 }
0x1c63   :  { %v3524_v39 = vpop.eup %3523 }
0x1c64   :  { %v3526_v42 = vpop.eup %3525 }
0x1c65   :  { %v2132_v50 = vmul.f32 %v3526_v42, %v1997_v31 }
0x1cc3   :  { %v2111_v40 = vpop.permute.xlu0 %2110 }
0x1cc4   :  { %v2113_v41 = vmul.f32 %v3524_v39, %v2111_v40 }
0x1cc5   :  { %v2135_v43 = vpop.permute.xlu1 %2134 }
0x1cc6   :  { %2115 = vrot.lane.b32.xlu1 %v2113_v41, %s3613_s5  ;;  %v2137_v44 = vmul.f32 %v3526_v42, %v2135_v43 }
0x1cc7   :  { %v2106_v45 = vpop.permute.xlu0 %2105 }
0x1cc8   :  { %2139 = vrot.lane.b32.xlu0 %v2137_v44, %s3613_s5  ;;  %v2108_v46 = vmul.f32 %v3524_v39, %v2106_v45 }
0x1d38   :  { %v2116_v48 = vpop.permute.xlu1 %2115 }
0x1d39   :  { %v2118_v49 = vadd.f32 %v2116_v48, %v2108_v46 }
0x1d3a   :  { %v2140_v52 = vpop.permute.xlu0 %2139 }
0x1d3b   :  { %3527 = vtanh.f32 %v2118_v49  ;;  %v2142_v0 = vadd.f32 %v2140_v52, %v2132_v50 }
0x1d3d   :  { %3529 = vtanh.f32 %v2142_v0 }
0x1d48   :  { %v3528_v53 = vpop.eup %3527 }
0x1d49   :  { %2121 = vrot.lane.b32.xlu1 %v3528_v53, %s3614_s10 }
0x1d4a   :  { %v3530_v54 = vpop.eup %3529 }
0x1d4b   :  { %2145 = vrot.lane.b32.xlu0 %v3530_v54, %s3614_s10 }
0x1dbb   :  { %v2122_v55 = vpop.permute.xlu1 %2121 }
0x1dbc   :  { %v2124_v56 = vmul.f32 %v3524_v39, %v2122_v55 }
0x1dbd   :  { %v2146_v57 = vpop.permute.xlu0 %2145 }
0x1dbe   :  { %2150 = vrot.lane.b32.xlu1 %v2124_v56, %s3613_s5  ;;  %v4136_v58 = vmul.f32 %v3526_v42, %v2146_v57  ;;  %v94_v56 = vld [vmem:[%s4415_s0 + $0xc0] sm:$0xff] }
0x1dc0   :  { %2154 = vrot.lane.b32.xlu0 %v4136_v58, %s3614_s10 }
0x1dc2   :  { %2160 = vrot.lane.b32.xlu1 %v2118_v49, %s3615_s11 }
0x1e30   :  { %v2151_v59 = vpop.permute.xlu1 %2150 }
0x1e31   :  { %3248 = vst.msk [vmem:[%s4418_s3 + $0x50] sm:$0xff] %vm397_vm1, %v2151_v59 }
0x1e32   :  { %v2155_v60 = vpop.permute.xlu0 %2154 }
0x1e33   :  { %v2157_v61 = vsel %vm397_vm1, %v2151_v59, %v2155_v60  ;;  %v3095_v59 = vld [vmem:[%s4416_s1 + $0x38] sm:$0xff] }
0x1e34   :  { %v2161_v63 = vpop.permute.xlu1 %2160  ;;  %2158 = vst.msk [vmem:[#allocation2] sm:$0xff] %vm233_vm0, %v2157_v61 }
0x1e35   :  { %v2163_v4 = vsel %vm397_vm1, %v2161_v63, %v2142_v0 }
0x1e36   :  { %2164 = vst.msk [vmem:[#allocation3] sm:$0xff] %vm233_vm0, %v2163_v4 }
0x1e3b   :  { %v2172_v10 = vld [vmem:[#allocation2] sm:$0xff] }
0x1e3c   :  { %v2174_v11 = vpack.c.bf16 %v2172_v10, %v2172_v10 }
0x1e3e   :  { %3258 = vmatmul.mubr.msk.bf16.vlgmr.msra.gmra.mxu1 %vm233_vm0, %v2174_v11 }
0x1e3f   :  { %2587 = vmatpush1.bf16.msra.mxu1 %v3931_v19  ;;  %2610 = vmatprep.mubr.bf16.mxu1 %v3611_v2  ;;  %v3096_v19 = vld [vmem:[%s4416_s1 + $0x48] sm:$0xff] }
0x1e40   :  { %2588 = vmatprep.subr.bf16.mxu1 %v3952_v22 }
0x1e43   :  { %2589 = vmatpush1.bf16.msra.mxu1 %v3947_v3 }
0x1e44   :  { %2590 = vmatprep.subr.bf16.mxu1 %v3961_v5 }
0x1e47   :  { %2591 = vmatpush1.bf16.msra.mxu1 %v3966_v6 }
0x1e48   :  { %2592 = vmatprep.subr.bf16.mxu1 %v3971_v7 }
0x1e4b   :  { %2593 = vmatpush1.bf16.msra.mxu1 %v3979_v24  ;;  %v2173_v24 = vld [vmem:[#allocation3] sm:$0xff] }
0x1efe   :  { %v2260_v15 = vpop.f32.mrf.mxu1 }
0x1eff   :  { %v2269_v22 = vadd.f32 %v2260_v15, %v92_v14 }
0x1f00   :  { %v2262_v16 = vpop.f32.mrf.mxu1 }
0x1f01   :  { %3531 = vtanh.f32 %v2269_v22  ;;  %v2272_v3 = vadd.f32 %v3096_v19, %v2262_v16  ;;  %v3259_v21 = vmul.f32 -1.442695, %v2269_v22 }
0x1f02   :  { %v2264_v5 = vpop.f32.mrf.mxu1 }
0x1f03   :  { %3533 = vtanh.f32 %v2272_v3  ;;  %v3260_v1 = vmul.f32 -1.442695, %v2272_v3 }
0x1f04   :  { %v2265_v6 = vpop.f32.mrf.mxu1  ;;  %3535 = vpow2.f32 %v3259_v21 }
0x1f05   :  { %3537 = vpow2.f32 %v3260_v1 }
0x1f0e   :  { %v3532_v17 = vpop.eup %3531 }
0x1f0f   :  { %2286 = vrot.lane.b32.xlu0 %v3532_v17, %s3614_s10 }
0x1f10   :  { %v3534_v7 = vpop.eup %3533 }
0x1f11   :  { %2310 = vrot.lane.b32.xlu1 %v3534_v7, %s3614_s10  ;;  %v3536_v8 = vpop.eup %3535 }
0x1f12   :  { %v3538_v9 = vpop.eup %3537  ;;  %v2276_v25 = vadd.f32 1.0, %v3536_v8 }
0x1f13   :  { %2281 = vrot.lane.b32.xlu0 %v2173_v24, %s3613_s5  ;;  %v2304_v27 = vadd.f32 1.0, %v3538_v9 }
0x1f14   :  { %3539 = vrcp.f32 %v2276_v25 }
0x1f15   :  { %3541 = vrcp.f32 %v2304_v27 }
0x1f21   :  { %v3540_v28 = vpop.eup %3539 }
0x1f22   :  { %v3542_v31 = vpop.eup %3541 }
0x1f23   :  { %v2308_v39 = vmul.f32 %v3542_v31, %v2173_v24 }
0x1f81   :  { %v2287_v29 = vpop.permute.xlu0 %2286 }
0x1f82   :  { %v2289_v30 = vmul.f32 %v3540_v28, %v2287_v29 }
0x1f83   :  { %v2311_v32 = vpop.permute.xlu1 %2310 }
0x1f84   :  { %2291 = vrot.lane.b32.xlu1 %v2289_v30, %s3613_s5  ;;  %v2313_v34 = vmul.f32 %v3542_v31, %v2311_v32 }
0x1f85   :  { %v2282_v20 = vpop.permute.xlu0 %2281 }
0x1f86   :  { %2315 = vrot.lane.b32.xlu0 %v2313_v34, %s3613_s5  ;;  %v2284_v36 = vmul.f32 %v3540_v28, %v2282_v20 }
0x1ff6   :  { %v2292_v37 = vpop.permute.xlu1 %2291 }
0x1ff7   :  { %v2294_v38 = vadd.f32 %v2292_v37, %v2284_v36 }
0x1ff8   :  { %v2316_v40 = vpop.permute.xlu0 %2315 }
0x1ff9   :  { %3543 = vtanh.f32 %v2294_v38  ;;  %v2318_v41 = vadd.f32 %v2316_v40, %v2308_v39 }
0x1ffb   :  { %3545 = vtanh.f32 %v2318_v41 }
0x2006   :  { %v3544_v42 = vpop.eup %3543 }
0x2007   :  { %2297 = vrot.lane.b32.xlu1 %v3544_v42, %s3614_s10 }
0x2008   :  { %v3546_v43 = vpop.eup %3545 }
0x2009   :  { %2321 = vrot.lane.b32.xlu0 %v3546_v43, %s3614_s10 }
0x2079   :  { %v2298_v44 = vpop.permute.xlu1 %2297 }
0x207a   :  { %v2300_v45 = vmul.f32 %v3540_v28, %v2298_v44 }
0x207b   :  { %v2322_v46 = vpop.permute.xlu0 %2321 }
0x207c   :  { %2326 = vrot.lane.b32.xlu1 %v2300_v45, %s3613_s5  ;;  %v4172_v48 = vmul.f32 %v3542_v31, %v2322_v46  ;;  %v96_v46 = vld [vmem:[%s4415_s0 + $0xd0] sm:$0xff] }
0x207e   :  { %2330 = vrot.lane.b32.xlu0 %v4172_v48, %s3614_s10 }
0x2080   :  { %2336 = vrot.lane.b32.xlu1 %v2294_v38, %s3615_s11 }
0x20ee   :  { %v2327_v49 = vpop.permute.xlu1 %2326 }
0x20ef   :  { %3261 = vst.msk [vmem:[%s4418_s3 + $0x58] sm:$0xff] %vm397_vm1, %v2327_v49 }
0x20f0   :  { %v2331_v50 = vpop.permute.xlu0 %2330 }
0x20f1   :  { %v2333_v52 = vsel %vm397_vm1, %v2327_v49, %v2331_v50  ;;  %v3094_v50 = vld [vmem:[%s4416_s1 + $0x28] sm:$0xff] }
0x20f2   :  { %v2337_v0 = vpop.permute.xlu1 %2336  ;;  %2334 = vst.msk [vmem:[#allocation2] sm:$0xff] %vm233_vm0, %v2333_v52 }
0x20f3   :  { %v2339_v53 = vsel %vm397_vm1, %v2337_v0, %v2318_v41 }
0x20f4   :  { %2340 = vst.msk [vmem:[#allocation3] sm:$0xff] %vm233_vm0, %v2339_v53 }
0x20f9   :  { %v2348_v54 = vld [vmem:[#allocation2] sm:$0xff] }
0x20fa   :  { %v2350_v55 = vpack.c.bf16 %v2348_v54, %v2348_v54 }
0x20fb   :  { %v2349_v15 = vld [vmem:[#allocation3] sm:$0xff] }
0x20fc   :  { %3271 = vmatmul.mubr.msk.bf16.vlgmr.msra.gmra.mxu0 %vm233_vm0, %v2350_v55 }
0x20fd   :  { %2786 = vmatprep.mubr.bf16.mxu0 %v3611_v2 }
0x21bc   :  { %v2436_v57 = vpop.f32.mrf.mxu0 }
0x21bd   :  { %v2445_v60 = vadd.f32 %v2436_v57, %v94_v56 }
0x21be   :  { %v2438_v61 = vpop.f32.mrf.mxu0 }
0x21bf   :  { %3547 = vtanh.f32 %v2445_v60  ;;  %v2448_v63 = vadd.f32 %v3095_v59, %v2438_v61  ;;  %v3272_v19 = vmul.f32 -1.442695, %v2445_v60 }
0x21c0   :  { %v2440_v4 = vpop.f32.mrf.mxu0 }
0x21c1   :  { %3549 = vtanh.f32 %v2448_v63  ;;  %v3273_v22 = vmul.f32 -1.442695, %v2448_v63 }
0x21c2   :  { %v2441_v10 = vpop.f32.mrf.mxu0  ;;  %3551 = vpow2.f32 %v3272_v19 }
0x21c3   :  { %3553 = vpow2.f32 %v3273_v22 }
0x21cc   :  { %v3548_v11 = vpop.eup %3547 }
0x21cd   :  { %2462 = vrot.lane.b32.xlu0 %v3548_v11, %s3614_s10 }
0x21ce   :  { %v3550_v14 = vpop.eup %3549 }
0x21cf   :  { %2486 = vrot.lane.b32.xlu1 %v3550_v14, %s3614_s10  ;;  %v3552_v16 = vpop.eup %3551 }
0x21d0   :  { %v3554_v3 = vpop.eup %3553  ;;  %v2452_v5 = vadd.f32 1.0, %v3552_v16 }
0x21d1   :  { %2457 = vrot.lane.b32.xlu0 %v2349_v15, %s3613_s5  ;;  %v2480_v6 = vadd.f32 1.0, %v3554_v3 }
0x21d2   :  { %3555 = vrcp.f32 %v2452_v5 }
0x21d3   :  { %3557 = vrcp.f32 %v2480_v6 }
0x21df   :  { %v3556_v17 = vpop.eup %3555 }
0x21e0   :  { %v3558_v21 = vpop.eup %3557 }
0x21e1   :  { %v2484_v29 = vmul.f32 %v3558_v21, %v2349_v15 }
0x223f   :  { %v2463_v7 = vpop.permute.xlu0 %2462 }
0x2240   :  { %v2465_v24 = vmul.f32 %v3556_v17, %v2463_v7 }
0x2241   :  { %v2487_v1 = vpop.permute.xlu1 %2486 }
0x2242   :  { %2467 = vrot.lane.b32.xlu1 %v2465_v24, %s3613_s5  ;;  %v2489_v8 = vmul.f32 %v3558_v21, %v2487_v1  ;;  %v3343_v1 = vld [vmem:[%s4417_s2 + $0x30] ss:$8 sps:$4 sm:$0xff]  }
0x2243   :  { %v2458_v9 = vpop.permute.xlu0 %2457 }
0x2244   :  { %2491 = vrot.lane.b32.xlu0 %v2489_v8, %s3613_s5  ;;  %v2460_v25 = vmul.f32 %v3556_v17, %v2458_v9  ;;  %v3345_v8 = vld [vmem:[%s4417_s2 + $0x34] ss:$8 sps:$4 sm:$0xff]  }
0x2245   :  { %2762 = vmatprep.subr.bf16.mxu0 %v3345_v8  ;;  %2938 = vmatprep.subr.bf16.mxu1 %v3345_v8 }
0x2246   :  { %2763 = vmatpush1.bf16.msra.mxu0 %v3343_v1 }
0x22b4   :  { %v2468_v27 = vpop.permute.xlu1 %2467 }
0x22b5   :  { %v2470_v28 = vadd.f32 %v2468_v27, %v2460_v25  ;;  %v3346_v27 = vld [vmem:[%s4417_s2 + $0x20] ss:$8 sps:$4 sm:$0xff]  }
0x22b6   :  { %v2492_v30 = vpop.permute.xlu0 %2491 }
0x22b7   :  { %3559 = vtanh.f32 %v2470_v28  ;;  %v2494_v31 = vadd.f32 %v2492_v30, %v2484_v29  ;;  %v3351_v29 = vld [vmem:[%s4417_s2 + $0x14] ss:$8 sps:$4 sm:$0xff]   ;;  %v3349_v30 = vld [vmem:[%s4417_s2 + $0x10] ss:$8 sps:$4 sm:$0xff]  }
0x22b9   :  { %3561 = vtanh.f32 %v2494_v31 }
0x22c4   :  { %v3560_v32 = vpop.eup %3559 }
0x22c5   :  { %2473 = vrot.lane.b32.xlu1 %v3560_v32, %s3614_s10  ;;  %v3352_v32 = vld [vmem:[%s4417_s2] ss:$8 sps:$4 sm:$0xff]  }
0x22c6   :  { %v3562_v34 = vpop.eup %3561 }
0x22c7   :  { %2497 = vrot.lane.b32.xlu0 %v3562_v34, %s3614_s10 }
0x2337   :  { %v2474_v20 = vpop.permute.xlu1 %2473 }
0x2338   :  { %v2476_v36 = vmul.f32 %v3556_v17, %v2474_v20 }
0x2339   :  { %v2498_v37 = vpop.permute.xlu0 %2497 }
0x233a   :  { %2502 = vrot.lane.b32.xlu1 %v2476_v36, %s3613_s5  ;;  %v4201_v38 = vmul.f32 %v3558_v21, %v2498_v37 }
0x233c   :  { %2506 = vrot.lane.b32.xlu0 %v4201_v38, %s3614_s10 }
0x233e   :  { %2512 = vrot.lane.b32.xlu1 %v2470_v28, %s3615_s11  ;;  %v3348_v28 = vld [vmem:[%s4417_s2 + $0x24] ss:$8 sps:$4 sm:$0xff]  }
0x233f   :  { %2764 = vmatprep.subr.bf16.mxu0 %v3348_v28 }
0x2340   :  { %2765 = vmatpush1.bf16.msra.mxu0 %v3346_v27 }
0x2341   :  { %2766 = vmatprep.subr.bf16.mxu0 %v3351_v29 }
0x2344   :  { %2767 = vmatpush1.bf16.msra.mxu0 %v3349_v30 }
0x23ac   :  { %v2503_v39 = vpop.permute.xlu1 %2502 }
0x23ad   :  { %3274 = vst.msk [vmem:[%s4418_s3 + $0x60] sm:$0xff] %vm397_vm1, %v2503_v39 }
0x23ae   :  { %v2507_v40 = vpop.permute.xlu0 %2506 }
0x23af   :  { %v2509_v41 = vsel %vm397_vm1, %v2503_v39, %v2507_v40 }
0x23b0   :  { %v2513_v42 = vpop.permute.xlu1 %2512  ;;  %2510 = vst.msk [vmem:[#allocation2] sm:$0xff] %vm233_vm0, %v2509_v41 }
0x23b1   :  { %v2515_v43 = vsel %vm397_vm1, %v2513_v42, %v2494_v31  ;;  %v3354_v31 = vld [vmem:[%s4417_s2 + $0x4] ss:$8 sps:$4 sm:$0xff]  }
0x23b2   :  { %2516 = vst.msk [vmem:[#allocation3] sm:$0xff] %vm233_vm0, %v2515_v43  ;;  %2768 = vmatprep.subr.bf16.mxu0 %v3354_v31 }
0x23b3   :  { %2769 = vmatpush1.bf16.msra.mxu0 %v3352_v32 }
0x23b7   :  { %v2524_v44 = vld [vmem:[#allocation2] sm:$0xff] }
0x23b8   :  { %v2526_v45 = vpack.c.bf16 %v2524_v44, %v2524_v44 }
0x23b9   :  { %v2525_v57 = vld [vmem:[#allocation3] sm:$0xff] }
0x23ba   :  { %3284 = vmatmul.mubr.msk.bf16.vlgmr.msra.gmra.mxu1 %vm233_vm0, %v2526_v45 }
0x23bb   :  { %2962 = vmatprep.mubr.bf16.mxu1 %v3611_v2  ;;  %2939 = vmatpush1.bf16.msra.mxu1 %v3343_v1 }
0x23bc   :  { %2940 = vmatprep.subr.bf16.mxu1 %v3348_v28 }
0x23bf   :  { %2941 = vmatpush1.bf16.msra.mxu1 %v3346_v27 }
0x23c0   :  { %2942 = vmatprep.subr.bf16.mxu1 %v3351_v29 }
0x23c3   :  { %2943 = vmatpush1.bf16.msra.mxu1 %v3349_v30 }
0x23c4   :  { %2944 = vmatprep.subr.bf16.mxu1 %v3354_v31 }
0x23c7   :  { %2945 = vmatpush1.bf16.msra.mxu1 %v3352_v32 }
0x247a   :  { %v2612_v49 = vpop.f32.mrf.mxu1 }
0x247b   :  { %v2621_v52 = vadd.f32 %v2612_v49, %v96_v46  ;;  %v98_v46 = vld [vmem:[%s4415_s0 + $0xe0] sm:$0xff] }
0x247c   :  { %v2614_v0 = vpop.f32.mrf.mxu1 }
0x247d   :  { %3563 = vtanh.f32 %v2621_v52  ;;  %v2624_v53 = vadd.f32 %v3094_v50, %v2614_v0  ;;  %v3285_v59 = vmul.f32 -1.442695, %v2621_v52  ;;  %v3093_v50 = vld [vmem:[%s4416_s1 + $0x18] sm:$0xff] }
0x247e   :  { %v2616_v54 = vpop.f32.mrf.mxu1 }
0x247f   :  { %3565 = vtanh.f32 %v2624_v53  ;;  %v3286_v60 = vmul.f32 -1.442695, %v2624_v53 }
0x2480   :  { %v2617_v55 = vpop.f32.mrf.mxu1  ;;  %3567 = vpow2.f32 %v3285_v59 }
0x2481   :  { %3569 = vpow2.f32 %v3286_v60 }
0x248a   :  { %v3564_v56 = vpop.eup %3563 }
0x248b   :  { %2638 = vrot.lane.b32.xlu0 %v3564_v56, %s3614_s10 }
0x248c   :  { %v3566_v2 = vpop.eup %3565 }
0x248d   :  { %2662 = vrot.lane.b32.xlu1 %v3566_v2, %s3614_s10  ;;  %v3568_v61 = vpop.eup %3567 }
0x248e   :  { %v3570_v63 = vpop.eup %3569  ;;  %v2628_v4 = vadd.f32 1.0, %v3568_v61 }
0x248f   :  { %2633 = vrot.lane.b32.xlu0 %v2525_v57, %s3613_s5  ;;  %v2656_v10 = vadd.f32 1.0, %v3570_v63 }
0x2490   :  { %3571 = vrcp.f32 %v2628_v4 }
0x2491   :  { %3573 = vrcp.f32 %v2656_v10 }
0x249d   :  { %v3572_v11 = vpop.eup %3571 }
0x249e   :  { %v3574_v19 = vpop.eup %3573 }
0x249f   :  { %v2660_v7 = vmul.f32 %v3574_v19, %v2525_v57 }
0x24fd   :  { %v2639_v14 = vpop.permute.xlu0 %2638 }
0x24fe   :  { %v2641_v15 = vmul.f32 %v3572_v11, %v2639_v14 }
0x24ff   :  { %v2663_v22 = vpop.permute.xlu1 %2662 }
0x2500   :  { %2643 = vrot.lane.b32.xlu1 %v2641_v15, %s3613_s5  ;;  %v2665_v16 = vmul.f32 %v3574_v19, %v2663_v22 }
0x2501   :  { %v2634_v3 = vpop.permute.xlu0 %2633 }
0x2502   :  { %2667 = vrot.lane.b32.xlu0 %v2665_v16, %s3613_s5  ;;  %v2636_v5 = vmul.f32 %v3572_v11, %v2634_v3 }
0x2572   :  { %v2644_v6 = vpop.permute.xlu1 %2643 }
0x2573   :  { %v2646_v17 = vadd.f32 %v2644_v6, %v2636_v5 }
0x2574   :  { %v2668_v24 = vpop.permute.xlu0 %2667 }
0x2575   :  { %3575 = vtanh.f32 %v2646_v17  ;;  %v2670_v21 = vadd.f32 %v2668_v24, %v2660_v7 }
0x2577   :  { %3577 = vtanh.f32 %v2670_v21 }
0x2582   :  { %v3576_v9 = vpop.eup %3575 }
0x2583   :  { %2649 = vrot.lane.b32.xlu1 %v3576_v9, %s3614_s10 }
0x2584   :  { %v3578_v25 = vpop.eup %3577 }
0x2585   :  { %2673 = vrot.lane.b32.xlu0 %v3578_v25, %s3614_s10 }
0x25f5   :  { %v2650_v34 = vpop.permute.xlu1 %2649 }
0x25f6   :  { %v2652_v20 = vmul.f32 %v3572_v11, %v2650_v34 }
0x25f7   :  { %v2674_v36 = vpop.permute.xlu0 %2673 }
0x25f8   :  { %2678 = vrot.lane.b32.xlu1 %v2652_v20, %s3613_s5  ;;  %v4254_v37 = vmul.f32 %v3574_v19, %v2674_v36 }
0x25fa   :  { %2682 = vrot.lane.b32.xlu0 %v4254_v37, %s3614_s10 }
0x25fc   :  { %2688 = vrot.lane.b32.xlu1 %v2646_v17, %s3615_s11 }
0x266a   :  { %v2679_v39 = vpop.permute.xlu1 %2678 }
0x266b   :  { %3287 = vst.msk [vmem:[%s4418_s3 + $0x68] sm:$0xff] %vm397_vm1, %v2679_v39 }
0x266c   :  { %v2683_v40 = vpop.permute.xlu0 %2682 }
0x266d   :  { %v2685_v41 = vsel %vm397_vm1, %v2679_v39, %v2683_v40  ;;  %v100_v39 = vld [vmem:[%s4415_s0 + $0xf0] sm:$0xff] }
0x266e   :  { %v2689_v42 = vpop.permute.xlu1 %2688  ;;  %2686 = vst.msk [vmem:[#allocation2] sm:$0xff] %vm233_vm0, %v2685_v41  ;;  %v3092_v41 = vld [vmem:[%s4416_s1 + $0x8] sm:$0xff] }
0x266f   :  { %v2691_v43 = vsel %vm397_vm1, %v2689_v42, %v2670_v21 }
0x2670   :  { %2692 = vst.msk [vmem:[#allocation3] sm:$0xff] %vm233_vm0, %v2691_v43 }
0x2675   :  { %v2700_v44 = vld [vmem:[#allocation2] sm:$0xff] }
0x2676   :  { %v2702_v45 = vpack.c.bf16 %v2700_v44, %v2700_v44 }
0x2677   :  { %v2701_v57 = vld [vmem:[#allocation3] sm:$0xff] }
0x2678   :  { %3297 = vmatmul.mubr.msk.bf16.vlgmr.msra.gmra.mxu0 %vm233_vm0, %v2702_v45 }
0x2738   :  { %v2788_v49 = vpop.f32.mrf.mxu0 }
0x2739   :  { %v2797_v52 = vadd.f32 %v2788_v49, %v98_v46 }
0x273a   :  { %v2790_v0 = vpop.f32.mrf.mxu0 }
0x273b   :  { %3579 = vtanh.f32 %v2797_v52  ;;  %v2800_v53 = vadd.f32 %v3093_v50, %v2790_v0  ;;  %v3298_v59 = vmul.f32 -1.442695, %v2797_v52 }
0x273c   :  { %v2792_v54 = vpop.f32.mrf.mxu0 }
0x273d   :  { %3581 = vtanh.f32 %v2800_v53  ;;  %v3299_v60 = vmul.f32 -1.442695, %v2800_v53 }
0x273e   :  { %v2793_v55 = vpop.f32.mrf.mxu0  ;;  %3583 = vpow2.f32 %v3298_v59 }
0x273f   :  { %3585 = vpow2.f32 %v3299_v60 }
0x2748   :  { %v3580_v56 = vpop.eup %3579 }
0x2749   :  { %2814 = vrot.lane.b32.xlu0 %v3580_v56, %s3614_s10 }
0x274a   :  { %v3582_v2 = vpop.eup %3581 }
0x274b   :  { %2838 = vrot.lane.b32.xlu1 %v3582_v2, %s3614_s10  ;;  %v3584_v61 = vpop.eup %3583 }
0x274c   :  { %v3586_v63 = vpop.eup %3585  ;;  %v2804_v4 = vadd.f32 1.0, %v3584_v61 }
0x274d   :  { %2809 = vrot.lane.b32.xlu0 %v2701_v57, %s3613_s5  ;;  %v2832_v10 = vadd.f32 1.0, %v3586_v63 }
0x274e   :  { %3587 = vrcp.f32 %v2804_v4 }
0x274f   :  { %3589 = vrcp.f32 %v2832_v10 }
0x275b   :  { %v3588_v11 = vpop.eup %3587 }
0x275c   :  { %v3590_v19 = vpop.eup %3589 }
0x275d   :  { %v2836_v7 = vmul.f32 %v3590_v19, %v2701_v57 }
0x27bb   :  { %v2815_v14 = vpop.permute.xlu0 %2814 }
0x27bc   :  { %v2817_v15 = vmul.f32 %v3588_v11, %v2815_v14 }
0x27bd   :  { %v2839_v22 = vpop.permute.xlu1 %2838 }
0x27be   :  { %2819 = vrot.lane.b32.xlu1 %v2817_v15, %s3613_s5  ;;  %v2841_v16 = vmul.f32 %v3590_v19, %v2839_v22 }
0x27bf   :  { %v2810_v3 = vpop.permute.xlu0 %2809 }
0x27c0   :  { %2843 = vrot.lane.b32.xlu0 %v2841_v16, %s3613_s5  ;;  %v2812_v5 = vmul.f32 %v3588_v11, %v2810_v3 }
0x2830   :  { %v2820_v6 = vpop.permute.xlu1 %2819 }
0x2831   :  { %v2822_v17 = vadd.f32 %v2820_v6, %v2812_v5 }
0x2832   :  { %v2844_v24 = vpop.permute.xlu0 %2843 }
0x2833   :  { %3591 = vtanh.f32 %v2822_v17  ;;  %v2846_v21 = vadd.f32 %v2844_v24, %v2836_v7 }
0x2835   :  { %3593 = vtanh.f32 %v2846_v21 }
0x2840   :  { %v3592_v1 = vpop.eup %3591 }
0x2841   :  { %2825 = vrot.lane.b32.xlu1 %v3592_v1, %s3614_s10 }
0x2842   :  { %v3594_v8 = vpop.eup %3593 }
0x2843   :  { %2849 = vrot.lane.b32.xlu0 %v3594_v8, %s3614_s10 }
0x28b3   :  { %v2826_v9 = vpop.permute.xlu1 %2825 }
0x28b4   :  { %v2828_v25 = vmul.f32 %v3588_v11, %v2826_v9 }
0x28b5   :  { %v2850_v27 = vpop.permute.xlu0 %2849 }
0x28b6   :  { %2854 = vrot.lane.b32.xlu1 %v2828_v25, %s3613_s5  ;;  %v4282_v28 = vmul.f32 %v3590_v19, %v2850_v27 }
0x28b8   :  { %2858 = vrot.lane.b32.xlu0 %v4282_v28, %s3614_s10 }
0x28ba   :  { %2864 = vrot.lane.b32.xlu1 %v2822_v17, %s3615_s11 }
0x2928   :  { %v2855_v29 = vpop.permute.xlu1 %2854 }
0x2929   :  { %3300 = vst.msk [vmem:[%s4418_s3 + $0x70] sm:$0xff] %vm397_vm1, %v2855_v29 }
0x292a   :  { %v2859_v30 = vpop.permute.xlu0 %2858 }
0x292b   :  { %v2861_v31 = vsel %vm397_vm1, %v2855_v29, %v2859_v30 }
0x292c   :  { %v2865_v32 = vpop.permute.xlu1 %2864  ;;  %2862 = vst.msk [vmem:[#allocation2] sm:$0xff] %vm233_vm0, %v2861_v31 }
0x292d   :  { %v2867_v34 = vsel %vm397_vm1, %v2865_v32, %v2846_v21 }
0x292e   :  { %2868 = vst.msk [vmem:[#allocation3] sm:$0xff] %vm233_vm0, %v2867_v34 }
0x2933   :  { %v2876_v20 = vld [vmem:[#allocation2] sm:$0xff] }
0x2934   :  { %v2878_v36 = vpack.c.bf16 %v2876_v20, %v2876_v20 }
0x2935   :  { %v2877_v52 = vld [vmem:[#allocation3] sm:$0xff] }
0x2936   :  { %3310 = vmatmul.mubr.msk.bf16.vlgmr.msra.gmra.mxu1 %vm233_vm0, %v2878_v36 }
0x29f6   :  { %v2964_v40 = vpop.f32.mrf.mxu1 }
0x29f7   :  { %v2973_v42 = vadd.f32 %v2964_v40, %v100_v39 }
0x29f8   :  { %v2966_v43 = vpop.f32.mrf.mxu1 }
0x29f9   :  { %3595 = vtanh.f32 %v2973_v42  ;;  %v2975_v44 = vadd.f32 %v3092_v41, %v2966_v43  ;;  %v3311_v0 = vmul.f32 -1.442695, %v2973_v42 }
0x29fa   :  { %v2968_v45 = vpop.f32.mrf.mxu1 }
0x29fb   :  { %3597 = vtanh.f32 %v2975_v44  ;;  %v3312_v53 = vmul.f32 -1.442695, %v2975_v44 }
0x29fc   :  { %v2969_v46 = vpop.f32.mrf.mxu1  ;;  %3599 = vpow2.f32 %v3311_v0 }
0x29fd   :  { %3601 = vpow2.f32 %v3312_v53 }
0x2a06   :  { %v3596_v49 = vpop.eup %3595 }
0x2a07   :  { %2989 = vrot.lane.b32.xlu0 %v3596_v49, %s3614_s10 }
0x2a08   :  { %v3598_v50 = vpop.eup %3597 }
0x2a09   :  { %3013 = vrot.lane.b32.xlu1 %v3598_v50, %s3614_s10  ;;  %v3600_v54 = vpop.eup %3599 }
0x2a0a   :  { %v3602_v55 = vpop.eup %3601  ;;  %v2979_v56 = vadd.f32 1.0, %v3600_v54 }
0x2a0b   :  { %2984 = vrot.lane.b32.xlu0 %v2877_v52, %s3613_s5  ;;  %v3007_v2 = vadd.f32 1.0, %v3602_v55 }
0x2a0c   :  { %3603 = vrcp.f32 %v2979_v56 }
0x2a0d   :  { %3605 = vrcp.f32 %v3007_v2 }
0x2a19   :  { %v3604_v57 = vpop.eup %3603 }
0x2a1a   :  { %v3606_v61 = vpop.eup %3605 }
0x2a1b   :  { %v3011_v19 = vmul.f32 %v3606_v61, %v2877_v52 }
0x2a79   :  { %v2990_v59 = vpop.permute.xlu0 %2989 }
0x2a7a   :  { %v2992_v60 = vmul.f32 %v3604_v57, %v2990_v59 }
0x2a7b   :  { %v3014_v63 = vpop.permute.xlu1 %3013 }
0x2a7c   :  { %2994 = vrot.lane.b32.xlu1 %v2992_v60, %s3613_s5  ;;  %v3016_v4 = vmul.f32 %v3606_v61, %v3014_v63 }
0x2a7d   :  { %v2985_v10 = vpop.permute.xlu0 %2984 }
0x2a7e   :  { %3018 = vrot.lane.b32.xlu0 %v3016_v4, %s3613_s5  ;;  %v2987_v11 = vmul.f32 %v3604_v57, %v2985_v10 }
0x2aee   :  { %v2995_v14 = vpop.permute.xlu1 %2994 }
0x2aef   :  { %v2997_v15 = vadd.f32 %v2995_v14, %v2987_v11 }
0x2af0   :  { %v3019_v22 = vpop.permute.xlu0 %3018 }
0x2af1   :  { %3607 = vtanh.f32 %v2997_v15  ;;  %v3021_v16 = vadd.f32 %v3019_v22, %v3011_v19 }
0x2af3   :  { %3609 = vtanh.f32 %v3021_v16 }
0x2afe   :  { %v3608_v3 = vpop.eup %3607 }
0x2aff   :  { %3000 = vrot.lane.b32.xlu1 %v3608_v3, %s3614_s10 }
0x2b00   :  { %v3610_v5 = vpop.eup %3609 }
0x2b01   :  { %3024 = vrot.lane.b32.xlu0 %v3610_v5, %s3614_s10 }
0x2b03   :  { %3039 = vrot.lane.b32.xlu1 %v2997_v15, %s3615_s11 }
0x2b05   :  { %407 = vrot.lane.b32.xlu0 %v3727_v47, %s3613_s5 }
0x2b07   :  { %583 = vrot.lane.b32.xlu1 %v3764_v35, %s3613_s5 }
0x2b09   :  { %759 = vrot.lane.b32.xlu0 %v3801_v23, %s3613_s5 }
0x2b0b   :  { %935 = vrot.lane.b32.xlu1 %v3837_v12, %s3613_s5 }
0x2b0d   :  { %1111 = vrot.lane.b32.xlu0 %v3873_v51, %s3613_s5 }
0x2b0f   :  { %1287 = vrot.lane.b32.xlu1 %v3902_v33, %s3613_s5 }
0x2b11   :  { %1463 = vrot.lane.b32.xlu0 %v3989_v26, %s3613_s5 }
0x2b13   :  { %1639 = vrot.lane.b32.xlu1 %v4026_v18, %s3613_s5 }
0x2b15   :  { %1815 = vrot.lane.b32.xlu0 %v4063_v13, %s3613_s5 }
0x2b17   :  { %1991 = vrot.lane.b32.xlu1 %v4100_v62, %s3613_s5 }
0x2b19   :  { %2167 = vrot.lane.b32.xlu0 %v4136_v58, %s3613_s5 }
0x2b1b   :  { %2343 = vrot.lane.b32.xlu1 %v4172_v48, %s3613_s5 }
0x2b1d   :  { %2519 = vrot.lane.b32.xlu0 %v4201_v38, %s3613_s5 }
0x2b1f   :  { %2695 = vrot.lane.b32.xlu1 %v4254_v37, %s3613_s5 }
0x2b71   :  { %v3001_v47 = vpop.permute.xlu1 %3000 }
0x2b72   :  { %v3003_v35 = vmul.f32 %v3604_v57, %v3001_v47 }
0x2b73   :  { %v3025_v23 = vpop.permute.xlu0 %3024 }
0x2b74   :  { %3029 = vrot.lane.b32.xlu1 %v3003_v35, %s3613_s5  ;;  %v3027_v12 = vmul.f32 %v3606_v61, %v3025_v23 }
0x2b75   :  { %v3040_v51 = vpop.permute.xlu1 %3039 }
0x2b76   :  { %v3042_v33 = vsel %vm397_vm1, %v3040_v51, %v3021_v16  ;;  %3033 = vrot.lane.b32.xlu0 %v3027_v12, %s3614_s10 }
0x2b77   :  { %3043 = vst.msk [vmem:[#allocation3] sm:$0xff] %vm233_vm0, %v3042_v33  ;;  %v408_v26 = vpop.permute.xlu0 %407 }
0x2b78   :  { %3046 = vrot.lane.b32.xlu1 %v3027_v12, %s3613_s5  ;;  %3119 = vst.msk [vmem:[%s4419_s4 + $0x78] sm:$0xff] %vm397_vm1, %v408_v26 }
0x2b79   :  { %v584_v18 = vpop.permute.xlu1 %583 }
0x2b7a   :  { %3132 = vst.msk [vmem:[%s4419_s4 + $0x70] sm:$0xff] %vm397_vm1, %v584_v18  ;;  %2871 = vrot.lane.b32.xlu0 %v4282_v28, %s3613_s5 }
0x2b7b   :  { %v760_v13 = vpop.permute.xlu0 %759 }
0x2b7c   :  { %3145 = vst.msk [vmem:[%s4419_s4 + $0x68] sm:$0xff] %vm397_vm1, %v760_v13 }
0x2b7d   :  { %v936_v62 = vpop.permute.xlu1 %935 }
0x2b7e   :  { %3158 = vst.msk [vmem:[%s4419_s4 + $0x60] sm:$0xff] %vm397_vm1, %v936_v62 }
0x2b7f   :  { %v1112_v58 = vpop.permute.xlu0 %1111 }
0x2b80   :  { %3171 = vst.msk [vmem:[%s4419_s4 + $0x58] sm:$0xff] %vm397_vm1, %v1112_v58 }
0x2b81   :  { %v1288_v48 = vpop.permute.xlu1 %1287 }
0x2b82   :  { %3184 = vst.msk [vmem:[%s4419_s4 + $0x50] sm:$0xff] %vm397_vm1, %v1288_v48 }
0x2b83   :  { %v1464_v38 = vpop.permute.xlu0 %1463 }
0x2b84   :  { %3197 = vst.msk [vmem:[%s4419_s4 + $0x48] sm:$0xff] %vm397_vm1, %v1464_v38 }
0x2b85   :  { %v1640_v37 = vpop.permute.xlu1 %1639 }
0x2b86   :  { %3210 = vst.msk [vmem:[%s4419_s4 + $0x40] sm:$0xff] %vm397_vm1, %v1640_v37 }
0x2b87   :  { %v1816_v6 = vpop.permute.xlu0 %1815 }
0x2b88   :  { %3223 = vst.msk [vmem:[%s4419_s4 + $0x38] sm:$0xff] %vm397_vm1, %v1816_v6 }
0x2b89   :  { %v1992_v17 = vpop.permute.xlu1 %1991 }
0x2b8a   :  { %3236 = vst.msk [vmem:[%s4419_s4 + $0x30] sm:$0xff] %vm397_vm1, %v1992_v17 }
0x2b8b   :  { %v2168_v7 = vpop.permute.xlu0 %2167 }
0x2b8c   :  { %3249 = vst.msk [vmem:[%s4419_s4 + $0x28] sm:$0xff] %vm397_vm1, %v2168_v7 }
0x2b8d   :  { %v2344_v24 = vpop.permute.xlu1 %2343 }
0x2b8e   :  { %3262 = vst.msk [vmem:[%s4419_s4 + $0x20] sm:$0xff] %vm397_vm1, %v2344_v24 }
0x2b8f   :  { %v2520_v21 = vpop.permute.xlu0 %2519 }
0x2b90   :  { %3275 = vst.msk [vmem:[%s4419_s4 + $0x18] sm:$0xff] %vm397_vm1, %v2520_v21 }
0x2b91   :  { %v2696_v1 = vpop.permute.xlu1 %2695 }
0x2b92   :  { %3288 = vst.msk [vmem:[%s4419_s4 + $0x10] sm:$0xff] %vm397_vm1, %v2696_v1 }
0x2be6   :  { %v3030_v8 = vpop.permute.xlu1 %3029 }
0x2be7   :  { %3313 = vst.msk [vmem:[%s4418_s3 + $0x78] sm:$0xff] %vm397_vm1, %v3030_v8 }
0x2be8   :  { %v3034_v9 = vpop.permute.xlu0 %3033 }
0x2be9   :  { %v3036_v25 = vsel %vm397_vm1, %v3030_v8, %v3034_v9 }
0x2bea   :  { %v3047_v27 = vpop.permute.xlu1 %3046  ;;  %3037 = vst.msk [vmem:[#allocation2] sm:$0xff] %vm233_vm0, %v3036_v25 }
0x2beb   :  { %3049 = vst.msk [vmem:[%s4419_s4] sm:$0xff] %vm397_vm1, %v3047_v27 }
0x2bec   :  { %v2872_v28 = vpop.permute.xlu0 %2871 }
0x2bed   :  { %3301 = vst.msk [vmem:[%s4419_s4 + $0x8] sm:$0xff] %vm397_vm1, %v2872_v28 }

</bundles_post_ra>
